<compile_context>
chip_gen: v7x
topology: tpu7x:2x2x1
jax: 0.10.0
libtpu: 0.0.40
codegen_flags: <defaults>
</compile_context>

<pallas_src>
import functools

import jax
import jax.numpy as jnp
from jax.experimental import pallas as pl
from jax.experimental.pallas import tpu as pltpu


def _gating_kernel(x_ref, emb2_ref, wexp_ref, out_ref, *, k, bin_f, chunk):
    # x_ref:    (TB, BIN_F)
    # emb2_ref: (TB, NUM_F*EMB_D)    -- x_emb flattened; last dim is a multiple of 128 here
    # wexp_ref: (NUM_F*EMB_D, BIN_F) -- repeat(W.T, EMB_D, axis=0) / EMB_D
    # out_ref:  (TB, BIN_F)

    # mean-over-embedding fused into a single MXU matmul (K = NUM_F*EMB_D).
    agg = jnp.dot(emb2_ref[...], wexp_ref[...], preferred_element_type=jnp.float32)

    # k-th largest per row without sorting:
    #   cnt_greater[b, i] = #{ j : agg[b, j] > agg[b, i] }
    #   thr[b] = min { agg[b, i] : cnt_greater[b, i] < k }  == k-th largest value.
    # Inner compare axis is chunked into <=128-lane slabs to bound the 3-D intermediate.
    cnt = jnp.zeros(agg.shape, jnp.float32)
    for c0 in range(0, bin_f, chunk):  # static trip count (bin_f, chunk are trace-time)
        a_c = agg[:, c0:c0 + chunk]                                    # (TB, chunk)
        gt = (a_c[:, None, :] > agg[:, :, None]).astype(jnp.float32)   # (TB, BIN_F, chunk)
        cnt = cnt + jnp.sum(gt, axis=-1)
    thr = jnp.min(jnp.where(cnt < jnp.float32(k), agg, jnp.inf), axis=-1, keepdims=True)

    # Ties at the threshold may select more than k features -- matches the torch reference.
    # Forward value of the straight-through mask equals the hard mask, so no sigmoid here.
    mask_hard = (agg >= thr).astype(jnp.float32)
    out_ref[...] = (mask_hard * x_ref[...]).astype(out_ref.dtype)
    # TODO(synk): a lane-dense packed (B//8, 8*BIN_F) output layout would avoid masked vst
    # for small BIN_F, but needs an in-kernel cross-sublane mask relayout; out/x traffic is
    # <1/8 of the emb traffic here, so the natural layout is kept.


def _vmem_estimate_bytes(tb, kdim, bin_f, chunk):
    # double-buffered blocks (emb, x, out) + resident weight + in-kernel intermediates, f32.
    blocks = 2 * (tb * kdim + 2 * tb * bin_f) + 2 * kdim * bin_f
    interm = tb * bin_f * (chunk + 4)
    return 4 * (blocks + interm)


def adaptive_topk_gating(x, x_emb, w, *, k, tau=0.1, tb=None, vmem_budget_bytes=20 << 20):
    """Forward pass of AdaptiveTopKGating.

    x:     (B, BIN_F) float32
    x_emb: (B, NUM_F, EMB_D) float32
    w:     (BIN_F, NUM_F) float32 -- torch nn.Linear(num_features, bin_features).weight layout
    tau is unused in the forward value (straight-through mask == hard mask).
    """
    del tau  # TODO(synk): only needed for the STE backward (custom_vjp), not the forward.
    B, bin_f = x.shape
    _, num_f, emb_d = x_emb.shape
    assert w.shape == (bin_f, num_f)
    kdim = num_f * emb_d

    # Fuse the mean into the matmul: (B, NUM_F*EMB_D) @ (NUM_F*EMB_D, BIN_F).
    emb2 = x_emb.reshape(B, kdim)                                          # free row-major view
    w_exp = jnp.repeat(jnp.transpose(w), emb_d, axis=0) * (1.0 / emb_d)    # (KDIM, BIN_F)

    chunk = min(bin_f, 128)

    # Pick a large batch tile, capped by the VMEM budget (keeps v7x's 64 MiB VMEM happy too).
    if tb is None:
        tb = 512
    tb = min(tb, B)
    if B >= 8:
        tb = max(8, (tb // 8) * 8)
        while tb > 8 and _vmem_estimate_bytes(tb, kdim, bin_f, chunk) > vmem_budget_bytes:
            tb -= 8
    else:
        tb = B  # block == full array dim, allowed even if < 8

    grid = (pl.cdiv(B, tb),)
    # When B % tb != 0 the padded tail rows compute a garbage threshold; harmless because
    # every op in this kernel is strictly per-row.

    params = {"dimension_semantics": ("parallel",)}
    est = _vmem_estimate_bytes(tb, kdim, bin_f, chunk)
    if est > (16 << 20):  # above the most conservative (v5e) default scoped-VMEM limit
        params["vmem_limit_bytes"] = int(min(2 * est, 48 << 20))  # headroom vs v7x 64 MiB phys

    kernel = functools.partial(_gating_kernel, k=k, bin_f=bin_f, chunk=chunk)
    return pl.pallas_call(
        kernel,
        out_shape=jax.ShapeDtypeStruct((B, bin_f), x.dtype),
        grid=grid,
        in_specs=[
            pl.BlockSpec((tb, bin_f), lambda b: (b, 0)),   # x
            pl.BlockSpec((tb, kdim), lambda b: (b, 0)),    # flattened x_emb (lane-dense)
            pl.BlockSpec((kdim, bin_f), lambda b: (0, 0)),  # expanded weight (resident)
        ],
        out_specs=pl.BlockSpec((tb, bin_f), lambda b: (b, 0)),
        compiler_params=pltpu.CompilerParams(**params),
    )(x, emb2, w_exp)


if __name__ == "__main__":
    # Small, deterministic example shapes consistent with the module's forward.
    B, num_features, bin_features, emb_dim = 256, 8, 16, 32
    k = 4

    key = jax.random.PRNGKey(0)
    kx, ke, kw = jax.random.split(key, 3)
    x = jax.random.normal(kx, (B, bin_features), jnp.float32)
    x_emb = jax.random.normal(ke, (B, num_features, emb_dim), jnp.float32)
    # Stand-in for nn.Linear(num_features, bin_features, bias=False).weight (torch layout).
    w = jax.random.normal(kw, (bin_features, num_features), jnp.float32) / jnp.sqrt(
        jnp.float32(num_features)
    )

    # tb=128 -> 2 grid steps, exercising the pipelined grid while staying tiny.
    out = adaptive_topk_gating(x, x_emb, w, k=k, tb=128)
    out = jax.block_until_ready(out)

    # Pure-JAX reference (forward value of the straight-through mask == hard mask).
    scores_ref = x_emb.mean(axis=-1)
    agg_ref = scores_ref @ w.T
    thr_ref = jnp.sort(agg_ref, axis=-1)[:, -k][:, None]
    mask_hard_ref = (agg_ref >= thr_ref).astype(jnp.float32)
    ref = mask_hard_ref * x
    assert jnp.allclose(out, ref, atol=1e-5, rtol=1e-5), "mismatch vs reference"

    print("KERNEL_OK")
</pallas_src>

<mosaic_0001>
module attributes {stable_mosaic.version = 11 : i64} {
  func.func @_gating_kernel(%arg0: i32, %arg1: memref<128x16xf32, #tpu.memory_space<vmem>>, %arg2: memref<128x256xf32, #tpu.memory_space<vmem>>, %arg3: memref<256x16xf32, #tpu.memory_space<vmem>>, %arg4: memref<128x16xf32, #tpu.memory_space<vmem>>) attributes {dimension_semantics = [#tpu.dimension_semantics<parallel>], iteration_bounds = array<i64: 2>, scalar_prefetch = 0 : i64, scratch_operands = 0 : i64, tpu.core_type = #tpu.core_type<tc>, window_params = [{transform_indices = @transform_0, window_bounds = array<i64: 128, 16>}, {transform_indices = @transform_1, window_bounds = array<i64: 128, 256>}, {pipeline_mode = #tpu.pipeline_mode<synchronous>, transform_indices = @transform_2, window_bounds = array<i64: 256, 16>}, {transform_indices = @transform_3, window_bounds = array<i64: 128, 16>}]} {
    %c0 = arith.constant 0 : index
    %c0_0 = arith.constant 0 : index
    %0 = vector.load %arg2[%c0, %c0_0] : memref<128x256xf32, #tpu.memory_space<vmem>>, vector<128x256xf32>
    %c0_1 = arith.constant 0 : index
    %c0_2 = arith.constant 0 : index
    %1 = vector.load %arg3[%c0_1, %c0_2] : memref<256x16xf32, #tpu.memory_space<vmem>>, vector<256x16xf32>
    %cst = arith.constant dense<0.000000e+00> : vector<128x16xf32>
    %2 = tpu.matmul %0, %1, %cst {dimension_numbers = #tpu.dot_dimension_numbers<[1], [0], [0], [1], [0, 0, 1, 1], [], []>} : vector<128x256xf32>, vector<256x16xf32>, vector<128x16xf32> -> vector<128x16xf32>
    %cst_3 = arith.constant 0.000000e+00 : f32
    %3 = vector.broadcast %cst_3 : f32 to vector<128x16xf32>
    %4 = vector.shape_cast %2 : vector<128x16xf32> to vector<128x1x16xf32>
    %5 = vector.shape_cast %2 : vector<128x16xf32> to vector<128x16x1xf32>
    %6 = vector.broadcast %4 : vector<128x1x16xf32> to vector<128x16x16xf32>
    %7 = vector.broadcast %5 : vector<128x16x1xf32> to vector<128x16x16xf32>
    %8 = arith.cmpf ogt, %6, %7 : vector<128x16x16xf32>
    %9 = arith.extui %8 : vector<128x16x16xi1> to vector<128x16x16xi32>
    %10 = arith.sitofp %9 : vector<128x16x16xi32> to vector<128x16x16xf32>
    %cst_4 = arith.constant dense<0.000000e+00> : vector<128x16xf32>
    %11 = vector.multi_reduction <add>, %10, %cst_4 [2] : vector<128x16x16xf32> to vector<128x16xf32>
    %12 = arith.addf %3, %11 : vector<128x16xf32>
    %cst_5 = arith.constant 4.000000e+00 : f32
    %13 = vector.broadcast %cst_5 : f32 to vector<128x16xf32>
    %14 = arith.cmpf olt, %12, %13 : vector<128x16xf32>
    %cst_6 = arith.constant 0x7F800000 : f32
    %15 = vector.broadcast %cst_6 : f32 to vector<128x16xf32>
    %16 = arith.select %14, %2, %15 : vector<128x16xi1>, vector<128x16xf32>
    %cst_7 = arith.constant dense<0x7F800000> : vector<128xf32>
    %17 = vector.multi_reduction <minimumf>, %16, %cst_7 [1] : vector<128x16xf32> to vector<128xf32>
    %18 = vector.shape_cast %17 : vector<128xf32> to vector<128x1xf32>
    %19 = vector.broadcast %18 : vector<128x1xf32> to vector<128x16xf32>
    %20 = arith.cmpf oge, %2, %19 : vector<128x16xf32>
    %21 = arith.extui %20 : vector<128x16xi1> to vector<128x16xi32>
    %22 = arith.sitofp %21 : vector<128x16xi32> to vector<128x16xf32>
    %c0_8 = arith.constant 0 : index
    %c0_9 = arith.constant 0 : index
    %23 = vector.load %arg1[%c0_8, %c0_9] : memref<128x16xf32, #tpu.memory_space<vmem>>, vector<128x16xf32>
    %24 = arith.mulf %22, %23 : vector<128x16xf32>
    %c0_10 = arith.constant 0 : index
    %c0_11 = arith.constant 0 : index
    %25 = vector.load %arg4[%c0_10, %c0_11] : memref<128x16xf32, #tpu.memory_space<vmem>>, vector<128x16xf32>
    tpu.vector_store %arg4[%c0_10, %c0_11], %24 {strides = array<i32>} : memref<128x16xf32, #tpu.memory_space<vmem>>, vector<128x16xf32>,
    return
  }
  func.func @transform_0(%arg0: i32) -> (i32, i32) {
    %c0_i32 = arith.constant 0 : i32
    %c0_i32_0 = arith.constant 0 : i32
    return %arg0, %c0_i32 : i32, i32
  }
  func.func @transform_1(%arg0: i32) -> (i32, i32) {
    %c0_i32 = arith.constant 0 : i32
    %c0_i32_0 = arith.constant 0 : i32
    return %arg0, %c0_i32 : i32, i32
  }
  func.func @transform_2(%arg0: i32) -> (i32, i32) {
    %c0_i32 = arith.constant 0 : i32
    %c0_i32_0 = arith.constant 0 : i32
    %c0_i32_1 = arith.constant 0 : i32
    return %c0_i32, %c0_i32_0 : i32, i32
  }
  func.func @transform_3(%arg0: i32) -> (i32, i32) {
    %c0_i32 = arith.constant 0 : i32
    %c0_i32_0 = arith.constant 0 : i32
    return %arg0, %c0_i32 : i32, i32
  }
}

</mosaic_0001>

<bundles_post_ra>
// kernel: tpu_custom_call.1
= control target key start
LH: loop header
LB: loop body
LE: loop exit
PB: predicated region body
PF: predicated region fallthrough
CT: control target
= control target key end

     0   :  { %s10211_s12 = smov 0   ;;  %s15921_s0 = inlined_call_operand.vmem [shape: f32[256,16], index: 0, kind: input, shape index: {}]   ;;  %s15922_s1 = inlined_call_operand.vmem [shape: f32[256,256], index: 1, kind: input, shape index: {}]   ;;  %s15923_s2 = inlined_call_operand.vmem [shape: f32[256,16], index: 2, kind: input, shape index: {}]   ;;  %s15924_s3 = inlined_call_operand.vmem [shape: f32[256,16], index: 3, kind: output, shape index: {}]  }
   0x1 LB: > { %s9752_s13 = sadd.s32 4294967295, %s10186_s12   ;;  %p9756_p0 = scmp.ge.s32.totalorder %s10186_s12, 1  ;;  %s10186_s12 = sphi %s10211_s12, %s13_s12  }
   0x2   : > { %p150_p1 = scmp.lt.s32.totalorder %s10186_s12, 3 }
   0x4   : > { %p151_p2 = pnand %p9756_p0, %p150_p1 }
   0x6   : > { %154 = sbr.rel (%p151_p2) target bundleno = 2636 (0xa4c), region = 32 }
   0xd   : > { %v247_v0 = vld [vmem:[%s15923_s2 + $0x80] sm:$0xff]  ;;  %v248_v1 = vld [vmem:[%s15923_s2 + $0x88] sm:$0xff]  ;;  %s9757_s20 = sshll.u32 %s9752_s13, 4  ;;  %v249_v5 = vld [vmem:[%s15923_s2 + $0x90] sm:$0xff]  ;;  %v428_v62 = vlaneseq  ;;  %vm16259_vm1 = vcmask 130048  }
   0xe   : > { %v231_v2 = vld [vmem:[%s15923_s2] sm:$0xff]  ;;  %v10119_v3 = vpack.c.bf16 %v248_v1, %v247_v0  ;;  %v232_v4 = vld [vmem:[%s15923_s2 + $0x8] sm:$0xff]  ;;  %v250_v6 = vld [vmem:[%s15923_s2 + $0x98] sm:$0xff]  ;;  %p181_p3 = scmp.lt.s32.totalorder %s9757_s20, 31 }
   0xf   : > { %v10121_v7 = vpack.c.bf16 %v232_v4, %v231_v2  ;;  %v10123_v8 = vpack.c.bf16 %v250_v6, %v249_v5  ;;  %v233_v9 = vld [vmem:[%s15923_s2 + $0x10] sm:$0xff]  ;;  %v234_v10 = vld [vmem:[%s15923_s2 + $0x18] sm:$0xff]  ;;  %v251_v11 = vld [vmem:[%s15923_s2 + $0xa0] sm:$0xff]  ;;  %v10337_v63 = vshrl.u32 %v428_v62, 7  ;;  %v8250_v0 = vand.u32 127, %v428_v62 }
  0x10   : > { %10120 = vmatprep.subr.bf16.mxu0 %v10119_v3  ;;  %v252_v12 = vld [vmem:[%s15923_s2 + $0xa8] sm:$0xff]  ;;  %10151 = vmatprep.subr.bf16.mxu1 %v10119_v3  ;;  %s18144_s20 = smov (!%p181_p3, %s9757_s20), 31  ;;  %v10125_v13 = vpack.c.bf16 %v234_v10, %v233_v9  ;;  %v235_v15 = vld [vmem:[%s15923_s2 + $0x20] sm:$0xff]  ;;  %v253_v17 = vld [vmem:[%s15923_s2 + $0xb0] sm:$0xff] }
  0x11   : > { %10122 = vmatpush3.bf16.msra.mxu0 %v10121_v7  ;;  %10159 = vmatpush3.bf16.msra.mxu1 %v10121_v7  ;;  %v10127_v14 = vpack.c.bf16 %v252_v12, %v251_v11  ;;  %v236_v16 = vld [vmem:[%s15923_s2 + $0x28] sm:$0xff]  ;;  %s10038_s13 = sshll.u32 %s18144_s20, 4  ;;  %v254_v18 = vld [vmem:[%s15923_s2 + $0xb8] sm:$0xff]  ;;  %v237_v21 = vld [vmem:[%s15923_s2 + $0x30] sm:$0xff]  ;;  %v10340_v1 = vsub.s32 %v8250_v0, %v10337_v63  ;;  %v8255_v2 = vadd.s32 4294967288, %v8250_v0 }
  0x12   : > { %10124 = vmatprep.subr.bf16.mxu0 %v10123_v8  ;;  %10152 = vmatprep.subr.bf16.mxu1 %v10123_v8  ;;  %s10267_s21 = scalar_lea.vmem %s15922_s1, %s10038_s13  ;;  %v10129_v19 = vpack.c.bf16 %v236_v16, %v235_v15  ;;  %v10131_v20 = vpack.c.bf16 %v254_v18, %v253_v17  ;;  %v238_v22 = vld [vmem:[%s15923_s2 + $0x38] sm:$0xff]  ;;  %v255_v23 = vld [vmem:[%s15923_s2 + $0xc0] sm:$0xff]  ;;  %v256_v24 = vld [vmem:[%s15923_s2 + $0xc8] sm:$0xff] }
  0x13   : > { %v200_v25 = vld [vmem:[%s10267_s21 + $0x8] sm:$0xff]  ;;  %v10133_v27 = vpack.c.bf16 %v238_v22, %v237_v21  ;;  %v10135_v28 = vpack.c.bf16 %v256_v24, %v255_v23  ;;  %v239_v29 = vld [vmem:[%s15923_s2 + $0x40] sm:$0xff]  ;;  %v257_v31 = vld [vmem:[%s15923_s2 + $0xd0] sm:$0xff]  ;;  %16260 = vst [vmem:[#allocation2_spill] sm:$0xff] %v10340_v1  ;;  %v10345_v5 = vsub.s32 %v8255_v2, %v10337_v63 }
  0x14   : > { %327 = vmatprep.mubr.f32.mxu0 %v200_v25  ;;  %v216_v26 = vld [vmem:[%s10267_s21 + $0x88] sm:$0xff]  ;;  %v258_v32 = vld [vmem:[%s15923_s2 + $0xd8] sm:$0xff]  ;;  %v241_v35 = vld [vmem:[%s15923_s2 + $0x50] sm:$0xff]  ;;  %v10376_v25 = vsub.s32 2, %v10337_v63 }
  0x15   : > { %10126 = vmatpush3.bf16.msra.mxu0 %v10125_v13  ;;  %10160 = vmatpush3.bf16.msra.mxu1 %v10125_v13  ;;  %v240_v30 = vld [vmem:[%s15923_s2 + $0x48] sm:$0xff]  ;;  %v10139_v34 = vpack.c.bf16 %v258_v32, %v257_v31  ;;  %v242_v36 = vld [vmem:[%s15923_s2 + $0x58] sm:$0xff]  ;;  %v259_v37 = vld [vmem:[%s15923_s2 + $0xe0] sm:$0xff]  ;;  %16261 = vst [vmem:[#allocation3_spill] sm:$0xff] %v10345_v5  ;;  %v10354_v13 = vsub.s32 0, %v10337_v63  ;;  %v10389_v32 = vsub.s32 3, %v10337_v63 }
  0x16   : > { %10128 = vmatprep.subr.bf16.mxu0 %v10127_v14  ;;  %10153 = vmatprep.subr.bf16.mxu1 %v10127_v14  ;;  %v10137_v33 = vpack.c.bf16 %v240_v30, %v239_v29  ;;  %v260_v38 = vld [vmem:[%s15923_s2 + $0xe8] sm:$0xff]  ;;  %v10141_v39 = vpack.c.bf16 %v242_v36, %v241_v35  ;;  %v243_v41 = vld [vmem:[%s15923_s2 + $0x60] sm:$0xff]  ;;  %v261_v43 = vld [vmem:[%s15923_s2 + $0xf0] sm:$0xff]  ;;  %v10357_v14 = vsub.s32 1, %v10337_v63 }
  0x17   : > { %367 = vmatprep.mubr.f32.mxu1 %v216_v26  ;;  %v10143_v40 = vpack.c.bf16 %v260_v38, %v259_v37  ;;  %v244_v42 = vld [vmem:[%s15923_s2 + $0x68] sm:$0xff]  ;;  %v262_v44 = vld [vmem:[%s15923_s2 + $0xf8] sm:$0xff]  ;;  %v245_v47 = vld [vmem:[%s15923_s2 + $0x70] sm:$0xff]  ;;  %v10400_v37 = vsub.s32 4, %v10337_v63 }
  0x18   : > { %v10145_v45 = vpack.c.bf16 %v244_v42, %v243_v41  ;;  %v10147_v46 = vpack.c.bf16 %v262_v44, %v261_v43  ;;  %v246_v48 = vld [vmem:[%s15923_s2 + $0x78] sm:$0xff]  ;;  %v199_v50 = vld [vmem:[%s10267_s21] sm:$0xff]  ;;  %v201_v53 = vld [vmem:[%s10267_s21 + $0x10] sm:$0xff]  ;;  %v10418_v41 = vsub.s32 6, %v10337_v63 }
  0x19   : > { %10130 = vmatpush3.bf16.msra.mxu0 %v10129_v19  ;;  %10161 = vmatpush3.bf16.msra.mxu1 %v10129_v19  ;;  %v10149_v49 = vpack.c.bf16 %v246_v48, %v245_v47  ;;  %v215_v51 = vld [vmem:[%s10267_s21 + $0x80] sm:$0xff]  ;;  %v202_v52 = vld [vmem:[%s10267_s21 + $0x18] sm:$0xff]  ;;  %v204_v54 = vld [vmem:[%s10267_s21 + $0x28] sm:$0xff] }
  0x1a   : > { %10132 = vmatprep.subr.bf16.mxu0 %v10131_v20  ;;  %10154 = vmatprep.subr.bf16.mxu1 %v10131_v20  ;;  %v203_v55 = vld [vmem:[%s10267_s21 + $0x20] sm:$0xff]  ;;  %v206_v56 = vld [vmem:[%s10267_s21 + $0x38] sm:$0xff]  ;;  %v205_v57 = vld [vmem:[%s10267_s21 + $0x30] sm:$0xff] }
  0x1b   : > { %v208_v58 = vld [vmem:[%s10267_s21 + $0x48] sm:$0xff]  ;;  %v207_v59 = vld [vmem:[%s10267_s21 + $0x40] sm:$0xff]  ;;  %v210_v60 = vld [vmem:[%s10267_s21 + $0x58] sm:$0xff] }
  0x1c   : > { %v209_v61 = vld [vmem:[%s10267_s21 + $0x50] sm:$0xff]  ;;  %v212_v3 = vld [vmem:[%s10267_s21 + $0x68] sm:$0xff]  ;;  %v211_v4 = vld [vmem:[%s10267_s21 + $0x60] sm:$0xff] }
  0x1d   : > { %10134 = vmatpush3.bf16.msra.mxu0 %v10133_v27  ;;  %10162 = vmatpush3.bf16.msra.mxu1 %v10133_v27  ;;  %v214_v6 = vld [vmem:[%s10267_s21 + $0x78] sm:$0xff]  ;;  %v213_v7 = vld [vmem:[%s10267_s21 + $0x70] sm:$0xff]  ;;  %v220_v10 = vld [vmem:[%s10267_s21 + $0xa8] sm:$0xff] }
  0x1e   : > { %10136 = vmatprep.subr.bf16.mxu0 %v10135_v28  ;;  %10155 = vmatprep.subr.bf16.mxu1 %v10135_v28  ;;  %v218_v8 = vld [vmem:[%s10267_s21 + $0x98] sm:$0xff]  ;;  %v217_v9 = vld [vmem:[%s10267_s21 + $0x90] sm:$0xff]  ;;  %v219_v11 = vld [vmem:[%s10267_s21 + $0xa0] sm:$0xff] }
  0x1f   : > { %v222_v28 = vld [vmem:[%s10267_s21 + $0xb8] sm:$0xff]  ;;  %v221_v29 = vld [vmem:[%s10267_s21 + $0xb0] sm:$0xff] }
  0x20   : > { %v226_v0 = vld [vmem:[%s10267_s21 + $0xd8] sm:$0xff]  ;;  %v225_v2 = vld [vmem:[%s10267_s21 + $0xd0] sm:$0xff] }
  0x21   : > { %10138 = vmatpush3.bf16.msra.mxu0 %v10137_v33  ;;  %10163 = vmatpush3.bf16.msra.mxu1 %v10137_v33  ;;  %v230_v1 = vld [vmem:[%s10267_s21 + $0xf8] sm:$0xff]  ;;  %v229_v5 = vld [vmem:[%s10267_s21 + $0xf0] sm:$0xff] }
  0x22   : > { %10140 = vmatprep.subr.bf16.mxu0 %v10139_v34  ;;  %10156 = vmatprep.subr.bf16.mxu1 %v10139_v34 }
  0x25   : > { %10142 = vmatpush3.bf16.msra.mxu0 %v10141_v39  ;;  %10164 = vmatpush3.bf16.msra.mxu1 %v10141_v39  ;;  %v10409_v39 = vsub.s32 5, %v10337_v63 }
  0x26   : > { %10144 = vmatprep.subr.bf16.mxu0 %v10143_v40  ;;  %10157 = vmatprep.subr.bf16.mxu1 %v10143_v40 }
  0x29   : > { %10146 = vmatpush3.bf16.msra.mxu0 %v10145_v45  ;;  %10165 = vmatpush3.bf16.msra.mxu1 %v10145_v45  ;;  %v10427_v45 = vsub.s32 7, %v10337_v63 }
  0x2a   : > { %10148 = vmatprep.subr.bf16.mxu0 %v10147_v46  ;;  %10158 = vmatprep.subr.bf16.mxu1 %v10147_v46 }
  0x2d   : > { %10150 = vmatpush3.bf16.msra.mxu0 %v10149_v49  ;;  %10166 = vmatpush3.bf16.msra.mxu1 %v10149_v49 }
  0x30   : > { %328 = vmatmul.mubr.f32.vlgmr.msra.gmra.mrb[0].mxu0 %v199_v50  ;;  %368 = vmatmul.mubr.f32.vlgmr.msra.gmra.mrb[0].mxu1 %v215_v51  ;;  %v224_v50 = vld [vmem:[%s10267_s21 + $0xc8] sm:$0xff]  ;;  %v223_v51 = vld [vmem:[%s10267_s21 + $0xc0] sm:$0xff] }
  0x31   : > { %332 = vmatprep.mubr.f32.mxu0 %v202_v52  ;;  %372 = vmatprep.mubr.f32.mxu1 %v218_v8 }
  0x34   : > { %333 = vmatmul.mubr.f32.gmra.mrb[2].mxu0 %v201_v53  ;;  %373 = vmatmul.mubr.f32.gmra.mrb[2].mxu1 %v217_v9 }
  0x35   : > { %337 = vmatprep.mubr.f32.mxu0 %v204_v54  ;;  %377 = vmatprep.mubr.f32.mxu1 %v220_v10 }
  0x38   : > { %338 = vmatmul.mubr.f32.gmra.mrb[4].mxu0 %v203_v55  ;;  %378 = vmatmul.mubr.f32.gmra.mrb[4].mxu1 %v219_v11 }
  0x39   : > { %342 = vmatprep.mubr.f32.mxu0 %v206_v56  ;;  %382 = vmatprep.mubr.f32.mxu1 %v222_v28 }
  0x3c   : > { %343 = vmatmul.mubr.f32.gmra.mrb[6].mxu0 %v205_v57  ;;  %383 = vmatmul.mubr.f32.gmra.mrb[6].mxu1 %v221_v29 }
  0x3d   : > { %347 = vmatprep.mubr.f32.mxu0 %v208_v58  ;;  %387 = vmatprep.mubr.f32.mxu1 %v224_v50 }
  0x40   : > { %348 = vmatmul.mubr.f32.gmra.mrb[8].mxu0 %v207_v59  ;;  %388 = vmatmul.mubr.f32.gmra.mrb[8].mxu1 %v223_v51 }
  0x41   : > { %352 = vmatprep.mubr.f32.mxu0 %v210_v60  ;;  %392 = vmatprep.mubr.f32.mxu1 %v226_v0 }
  0x44   : > { %353 = vmatmul.mubr.f32.gmra.mrb[10].mxu0 %v209_v61  ;;  %393 = vmatmul.mubr.f32.gmra.mrb[10].mxu1 %v225_v2 }
  0x45   : > { %357 = vmatprep.mubr.f32.mxu0 %v212_v3 }
  0x48   : > { %358 = vmatmul.mubr.f32.gmra.mrb[12].mxu0 %v211_v4 }
  0x49   : > { %362 = vmatprep.mubr.f32.mxu0 %v214_v6 }
  0x4c   : > { %363 = vmatmul.mubr.f32.gmra.mrb[14].mxu0 %v213_v7 }
 0x103   : > { %v10071_v12 = vpop.f32.mrb[0].mxu0  ;;  %v10095_v15 = vpop.f32.mrb[0].mxu1 }
 0x104   : > { %v10072_v16 = vpop.f32.mrb[1].mxu0  ;;  %v10096_v17 = vpop.f32.mrb[1].mxu1 }
 0x105   : > { %v10359_v18 = vadd.f32 %v10072_v16, %v10071_v12  ;;  %v10361_v19 = vadd.f32 %v10096_v17, %v10095_v15  ;;  %v228_v17 = vld [vmem:[%s10267_s21 + $0xe8] sm:$0xff] }
 0x106   : > { %397 = vmatprep.mubr.f32.mxu1 %v228_v17 }
 0x107   : > { %16262 = vst [vmem:[#allocation4_spill] sm:$0xff] %v10359_v18  ;;  %16263 = vst [vmem:[#allocation5_spill] sm:$0xff] %v10361_v19  ;;  %v10365_v20 = vrot.slane %v10359_v18, %v10357_v14  ;;  %v10369_v21 = vrot.slane %v10359_v18, %v10354_v13  ;;  %v10074_v22 = vpop.f32.mrb[2].mxu0  ;;  %v10386_v31 = vrot.slane %v10359_v18, %v10376_v25 }
 0x108   : > { %v10075_v23 = vpop.f32.mrb[3].mxu0  ;;  %v10397_v36 = vrot.slane %v10359_v18, %v10389_v32  ;;  %v10406_v38 = vrot.slane %v10359_v18, %v10400_v37  ;;  %v10415_v40 = vrot.slane %v10359_v18, %v10409_v39  ;;  %v10424_v44 = vrot.slane %v10359_v18, %v10418_v41 }
 0x109   : > { %16264 = vst [vmem:[#allocation6_spill] sm:$0xff] %v10365_v20  ;;  %16265 = vst [vmem:[#allocation7_spill] sm:$0xff] %v10369_v21  ;;  %1224 = vbcast.lane.b32.xlu1 %v10365_v20, 256  ;;  %1213 = vbcast.lane.b32.xlu0 %v10369_v21, 256  ;;  %v10373_v24 = vadd.f32 %v10075_v23, %v10074_v22  ;;  %v10435_v47 = vrot.slane %v10359_v18, %v10427_v45  ;;  %v227_v22 = vld [vmem:[%s10267_s21 + $0xe0] sm:$0xff]  ;;  %s9758_s21 = sshll.u32 %s18144_s20, 3 }
 0x10a   : > { %16268 = vst [vmem:[#allocation10_spill] sm:$0xff] %v10386_v31  ;;  %16270 = vst [vmem:[#allocation12_spill] sm:$0xff] %v10397_v36  ;;  %v10441_v48 = vrot.slane %v10361_v19, %v10354_v13  ;;  %v10447_v49 = vrot.slane %v10361_v19, %v10357_v14  ;;  %v10455_v52 = vrot.slane %v10361_v19, %v10376_v25  ;;  %398 = vmatmul.mubr.f32.gmra.mrb[12].mxu1 %v227_v22  ;;  %s15831_s9 = scalar_lea.vmem %s15921_s0, %s9758_s21  ;;  %s15838_s13 = scalar_lea.vmem %s15924_s3, %s9758_s21 }
 0x10b   : > { %16266 = vst [vmem:[#allocation8_spill] sm:$0xff] %v10373_v24  ;;  %v10077_v26 = vpop.f32.mrb[4].mxu0  ;;  %16271 = vst [vmem:[#allocation13_spill] sm:$0xff] %v10406_v38  ;;  %v10461_v53 = vrot.slane %v10361_v19, %v10389_v32  ;;  %v10467_v54 = vrot.slane %v10361_v19, %v10400_v37  ;;  %v10473_v55 = vrot.slane %v10361_v19, %v10409_v39  ;;  %402 = vmatprep.mubr.f32.mxu1 %v230_v1 }
 0x10c   : > { %v10078_v27 = vpop.f32.mrb[5].mxu0  ;;  %16272 = vst [vmem:[#allocation14_spill] sm:$0xff] %v10415_v40  ;;  %16273 = vst [vmem:[#allocation15_spill] sm:$0xff] %v10424_v44  ;;  %v10479_v58 = vrot.slane %v10361_v19, %v10418_v41  ;;  %v10487_v60 = vrot.slane %v10373_v24, %v10354_v13  ;;  %v10493_v61 = vrot.slane %v10373_v24, %v10357_v14 }
 0x10d   : > { %1228 = vbcast.lane.b32.xlu1 %v10365_v20, 264  ;;  %1217 = vbcast.lane.b32.xlu0 %v10369_v21, 264  ;;  %v10382_v30 = vadd.f32 %v10078_v27, %v10077_v26  ;;  %16275 = vst [vmem:[#allocation17_spill] sm:$0xff] %v10435_v47  ;;  %16276 = vst [vmem:[#allocation18_spill] sm:$0xff] %v10441_v48  ;;  %v10499_v62 = vrot.slane %v10373_v24, %v10376_v25 }
 0x10e   : > { %16277 = vst [vmem:[#allocation19_spill] sm:$0xff] %v10447_v49  ;;  %16278 = vst [vmem:[#allocation20_spill] sm:$0xff] %v10455_v52  ;;  %v10507_v3 = vrot.slane %v10373_v24, %v10389_v32  ;;  %v10513_v4 = vrot.slane %v10373_v24, %v10400_v37  ;;  %v10519_v6 = vrot.slane %v10373_v24, %v10409_v39  ;;  %403 = vmatmul.mubr.f32.gmra.mrb[14].mxu1 %v229_v5 }
 0x10f   : > { %16267 = vst [vmem:[#allocation9_spill] sm:$0xff] %v10382_v30  ;;  %v10080_v33 = vpop.f32.mrb[6].mxu0  ;;  %16279 = vst [vmem:[#allocation21_spill] sm:$0xff] %v10461_v53  ;;  %v10525_v7 = vrot.slane %v10373_v24, %v10418_v41  ;;  %v10531_v9 = vrot.slane %v10373_v24, %v10427_v45  ;;  %v10539_v12 = vrot.slane %v10382_v30, %v10354_v13 }
 0x110   : > { %v10081_v34 = vpop.f32.mrb[7].mxu0  ;;  %16280 = vst [vmem:[#allocation22_spill] sm:$0xff] %v10467_v54  ;;  %16281 = vst [vmem:[#allocation23_spill] sm:$0xff] %v10473_v55  ;;  %v10545_v15 = vrot.slane %v10382_v30, %v10357_v14  ;;  %v10551_v16 = vrot.slane %v10382_v30, %v10376_v25  ;;  %v10559_v23 = vrot.slane %v10382_v30, %v10389_v32 }
 0x111   : > { %1239 = vbcast.lane.b32.xlu1 %v10386_v31, 264  ;;  %1235 = vbcast.lane.b32.xlu0 %v10386_v31, 256  ;;  %v10393_v35 = vadd.f32 %v10081_v34, %v10080_v33  ;;  %16282 = vst [vmem:[#allocation24_spill] sm:$0xff] %v10479_v58  ;;  %16284 = vst [vmem:[#allocation26_spill] sm:$0xff] %v10487_v60  ;;  %v10565_v26 = vrot.slane %v10382_v30, %v10400_v37 }
 0x112   : > { %16285 = vst [vmem:[#allocation27_spill] sm:$0xff] %v10493_v61  ;;  %16286 = vst [vmem:[#allocation28_spill] sm:$0xff] %v10499_v62  ;;  %v10571_v27 = vrot.slane %v10382_v30, %v10409_v39  ;;  %v10581_v33 = vrot.slane %v10382_v30, %v10418_v41  ;;  %v10591_v50 = vrot.slane %v10382_v30, %v10427_v45 }
 0x113   : > { %16269 = vst [vmem:[#allocation11_spill] sm:$0xff] %v10393_v35  ;;  %v10083_v42 = vpop.f32.mrb[8].mxu0  ;;  %16287 = vst [vmem:[#allocation29_spill] sm:$0xff] %v10507_v3  ;;  %v10613_v17 = vrot.slane %v10393_v35, %v10357_v14  ;;  %v10645_v1 = vrot.slane %v10393_v35, %v10400_v37  ;;  %v10655_v5 = vrot.slane %v10393_v35, %v10409_v39 }
 0x114   : > { %v10084_v43 = vpop.f32.mrb[9].mxu0  ;;  %16288 = vst [vmem:[#allocation30_spill] sm:$0xff] %v10513_v4  ;;  %16289 = vst [vmem:[#allocation31_spill] sm:$0xff] %v10519_v6 }
 0x115   : > { %1250 = vbcast.lane.b32.xlu1 %v10397_v36, 264  ;;  %1246 = vbcast.lane.b32.xlu0 %v10397_v36, 256  ;;  %v10429_v46 = vadd.f32 %v10084_v43, %v10083_v42  ;;  %16290 = vst [vmem:[#allocation32_spill] sm:$0xff] %v10525_v7  ;;  %16291 = vst [vmem:[#allocation33_spill] sm:$0xff] %v10531_v9 }
 0x116   : > { %16293 = vst [vmem:[#allocation35_spill] sm:$0xff] %v10539_v12  ;;  %16294 = vst [vmem:[#allocation36_spill] sm:$0xff] %v10545_v15 }
 0x117   : > { %16274 = vst [vmem:[#allocation16_spill] sm:$0xff] %v10429_v46  ;;  %v10086_v56 = vpop.f32.mrb[10].mxu0  ;;  %16295 = vst [vmem:[#allocation37_spill] sm:$0xff] %v10551_v16 }
 0x118   : > { %v10087_v57 = vpop.f32.mrb[11].mxu0  ;;  %16296 = vst [vmem:[#allocation38_spill] sm:$0xff] %v10559_v23  ;;  %16297 = vst [vmem:[#allocation39_spill] sm:$0xff] %v10565_v26 }
 0x119   : > { %1261 = vbcast.lane.b32.xlu1 %v10406_v38, 264  ;;  %1257 = vbcast.lane.b32.xlu0 %v10406_v38, 256  ;;  %v10481_v59 = vadd.f32 %v10087_v57, %v10086_v56  ;;  %16298 = vst [vmem:[#allocation40_spill] sm:$0xff] %v10571_v27  ;;  %16299 = vst [vmem:[#allocation41_spill] sm:$0xff] %v10581_v33  ;;  %v10597_v56 = vrot.slane %v10393_v35, %v10354_v13 }
 0x11a   : > { %16300 = vst [vmem:[#allocation42_spill] sm:$0xff] %v10591_v50  ;;  %16303 = vst [vmem:[#allocation45_spill] sm:$0xff] %v10613_v17 }
 0x11b   : > { %16283 = vst [vmem:[#allocation25_spill] sm:$0xff] %v10481_v59  ;;  %v10089_v8 = vpop.f32.mrb[12].mxu0  ;;  %16301 = vst [vmem:[#allocation43_spill] sm:$0xff] %v10597_v56 }
 0x11c   : > { %v10090_v10 = vpop.f32.mrb[13].mxu0  ;;  %16306 = vst [vmem:[#allocation48_spill] sm:$0xff] %v10645_v1  ;;  %16307 = vst [vmem:[#allocation49_spill] sm:$0xff] %v10655_v5 }
 0x11d   : > { %1272 = vbcast.lane.b32.xlu1 %v10415_v40, 264  ;;  %1268 = vbcast.lane.b32.xlu0 %v10415_v40, 256  ;;  %v10533_v11 = vadd.f32 %v10090_v10, %v10089_v8 }
 0x11f   : > { %16292 = vst [vmem:[#allocation34_spill] sm:$0xff] %v10533_v11  ;;  %v10092_v34 = vpop.f32.mrb[14].mxu0 }
 0x120   : > { %v10093_v51 = vpop.f32.mrb[15].mxu0 }
 0x121   : > { %1283 = vbcast.lane.b32.xlu1 %v10424_v44, 264  ;;  %1279 = vbcast.lane.b32.xlu0 %v10424_v44, 256  ;;  %v10599_v57 = vadd.f32 %v10093_v51, %v10092_v34  ;;  %v10623_v51 = vrot.slane %v10393_v35, %v10376_v25  ;;  %v10757_v44 = vrot.slane %v10429_v46, %v10427_v45 }
 0x123   : > { %16302 = vst [vmem:[#allocation44_spill] sm:$0xff] %v10599_v57  ;;  %16304 = vst [vmem:[#allocation46_spill] sm:$0xff] %v10623_v51 }
 0x124   : > { %16332 = vst [vmem:[#allocation74_spill] sm:$0xff] %v10757_v44 }
 0x125   : > { %1294 = vbcast.lane.b32.xlu1 %v10435_v47, 264  ;;  %1290 = vbcast.lane.b32.xlu0 %v10435_v47, 256 }
 0x129   : > { %1921 = vbcast.lane.b32.xlu1 %v10441_v48, 264  ;;  %1917 = vbcast.lane.b32.xlu0 %v10441_v48, 256 }
 0x12d   : > { %1932 = vbcast.lane.b32.xlu1 %v10447_v49, 264  ;;  %1928 = vbcast.lane.b32.xlu0 %v10447_v49, 256 }
 0x131   : > { %1943 = vbcast.lane.b32.xlu1 %v10455_v52, 264  ;;  %1939 = vbcast.lane.b32.xlu0 %v10455_v52, 256 }
 0x135   : > { %1954 = vbcast.lane.b32.xlu1 %v10461_v53, 264  ;;  %1950 = vbcast.lane.b32.xlu0 %v10461_v53, 256 }
 0x139   : > { %1965 = vbcast.lane.b32.xlu1 %v10467_v54, 264  ;;  %1961 = vbcast.lane.b32.xlu0 %v10467_v54, 256  ;;  %v10635_v54 = vrot.slane %v10393_v35, %v10389_v32 }
 0x13b   : > { %16305 = vst [vmem:[#allocation47_spill] sm:$0xff] %v10635_v54 }
 0x13d   : > { %1976 = vbcast.lane.b32.xlu1 %v10473_v55, 264  ;;  %1972 = vbcast.lane.b32.xlu0 %v10473_v55, 256 }
 0x141   : > { %1987 = vbcast.lane.b32.xlu1 %v10479_v58, 264  ;;  %1983 = vbcast.lane.b32.xlu0 %v10479_v58, 256 }
 0x145   : > { %1305 = vbcast.lane.b32.xlu1 %v10487_v60, 264  ;;  %1301 = vbcast.lane.b32.xlu0 %v10487_v60, 256  ;;  %v10747_v60 = vrot.slane %v10429_v46, %v10418_v41 }
 0x147   : > { %16331 = vst [vmem:[#allocation73_spill] sm:$0xff] %v10747_v60 }
 0x149   : > { %1316 = vbcast.lane.b32.xlu1 %v10493_v61, 264  ;;  %1312 = vbcast.lane.b32.xlu0 %v10493_v61, 256 }
 0x14d   : > { %1327 = vbcast.lane.b32.xlu1 %v10499_v62, 264  ;;  %1323 = vbcast.lane.b32.xlu0 %v10499_v62, 256  ;;  %v10737_v62 = vrot.slane %v10429_v46, %v10409_v39 }
 0x14f   : > { %16330 = vst [vmem:[#allocation72_spill] sm:$0xff] %v10737_v62 }
 0x151   : > { %1338 = vbcast.lane.b32.xlu1 %v10507_v3, 264  ;;  %1334 = vbcast.lane.b32.xlu0 %v10507_v3, 256 }
 0x155   : > { %1349 = vbcast.lane.b32.xlu1 %v10513_v4, 264  ;;  %1345 = vbcast.lane.b32.xlu0 %v10513_v4, 256  ;;  %v10727_v4 = vrot.slane %v10429_v46, %v10400_v37 }
 0x157   : > { %16329 = vst [vmem:[#allocation71_spill] sm:$0xff] %v10727_v4 }
 0x159   : > { %1360 = vbcast.lane.b32.xlu1 %v10519_v6, 264  ;;  %1356 = vbcast.lane.b32.xlu0 %v10519_v6, 256 }
 0x15d   : > { %1371 = vbcast.lane.b32.xlu1 %v10525_v7, 264  ;;  %1367 = vbcast.lane.b32.xlu0 %v10525_v7, 256  ;;  %v10717_v7 = vrot.slane %v10429_v46, %v10389_v32 }
 0x15f   : > { %16326 = vst [vmem:[#allocation68_spill] sm:$0xff] %v10717_v7 }
 0x161   : > { %1382 = vbcast.lane.b32.xlu1 %v10531_v9, 264  ;;  %1378 = vbcast.lane.b32.xlu0 %v10531_v9, 256 }
 0x165   : > { %1393 = vbcast.lane.b32.xlu1 %v10539_v12, 264  ;;  %1389 = vbcast.lane.b32.xlu0 %v10539_v12, 256 }
 0x169   : > { %1404 = vbcast.lane.b32.xlu1 %v10545_v15, 264  ;;  %1400 = vbcast.lane.b32.xlu0 %v10545_v15, 256 }
 0x16d   : > { %1415 = vbcast.lane.b32.xlu1 %v10551_v16, 264  ;;  %1411 = vbcast.lane.b32.xlu0 %v10551_v16, 256 }
 0x171   : > { %1426 = vbcast.lane.b32.xlu1 %v10559_v23, 264  ;;  %1422 = vbcast.lane.b32.xlu0 %v10559_v23, 256 }
 0x175   : > { %1437 = vbcast.lane.b32.xlu1 %v10565_v26, 264  ;;  %1433 = vbcast.lane.b32.xlu0 %v10565_v26, 256 }
 0x179   : > { %1448 = vbcast.lane.b32.xlu1 %v10571_v27, 264  ;;  %1444 = vbcast.lane.b32.xlu0 %v10571_v27, 256 }
 0x17b   : > { %v10575_v28 = vpop.permute.xlu1 %1224  ;;  %v10577_v29 = vpop.permute.xlu0 %1213 }
 0x17d   : > { %1459 = vbcast.lane.b32.xlu1 %v10581_v33, 264  ;;  %1455 = vbcast.lane.b32.xlu0 %v10581_v33, 256  ;;  %v10098_v33 = vpop.f32.mrb[2].mxu1 }
 0x17e   : > { %v10099_v26 = vpop.f32.mrb[3].mxu1 }
 0x17f   : > { %v10585_v42 = vpop.permute.xlu1 %1228  ;;  %v10587_v43 = vpop.permute.xlu0 %1217  ;;  %v10689_v23 = vadd.f32 %v10099_v26, %v10098_v33  ;;  %v10707_v26 = vrot.slane %v10429_v46, %v10376_v25 }
 0x180   : > { %v10101_v40 = vpop.f32.mrb[4].mxu1 }
 0x181   : > { %1470 = vbcast.lane.b32.xlu1 %v10591_v50, 264  ;;  %1466 = vbcast.lane.b32.xlu0 %v10591_v50, 256  ;;  %v10675_v50 = vrot.slane %v10393_v35, %v10427_v45  ;;  %16317 = vst [vmem:[#allocation59_spill] sm:$0xff] %v10689_v23  ;;  %16323 = vst [vmem:[#allocation65_spill] sm:$0xff] %v10707_v26  ;;  %v10102_v36 = vpop.f32.mrb[5].mxu1 }
 0x182   : > { %v10771_v31 = vadd.f32 %v10102_v36, %v10101_v40  ;;  %v10789_v36 = vrot.slane %v10481_v59, %v10376_v25 }
 0x183   : > { %v10601_v0 = vpop.permute.xlu1 %1239  ;;  %v10603_v2 = vpop.permute.xlu0 %1235  ;;  %16313 = vst [vmem:[#allocation55_spill] sm:$0xff] %v10675_v50 }
 0x184   : > { %16334 = vst [vmem:[#allocation76_spill] sm:$0xff] %v10771_v31  ;;  %16336 = vst [vmem:[#allocation78_spill] sm:$0xff] %v10789_v36 }
 0x185   : > { %1481 = vbcast.lane.b32.xlu1 %v10597_v56, 264  ;;  %1477 = vbcast.lane.b32.xlu0 %v10597_v56, 256 }
 0x187   : > { %v10607_v8 = vpop.permute.xlu1 %1250  ;;  %v10609_v10 = vpop.permute.xlu0 %1246 }
 0x189   : > { %1492 = vbcast.lane.b32.xlu1 %v10613_v17, 264  ;;  %1488 = vbcast.lane.b32.xlu0 %v10613_v17, 256  ;;  %v10665_v17 = vrot.slane %v10393_v35, %v10418_v41 }
 0x18b   : > { %v10617_v22 = vpop.permute.xlu1 %1261  ;;  %v10619_v34 = vpop.permute.xlu0 %1257  ;;  %16310 = vst [vmem:[#allocation52_spill] sm:$0xff] %v10665_v17 }
 0x18d   : > { %1503 = vbcast.lane.b32.xlu1 %v10623_v51, 264  ;;  %1499 = vbcast.lane.b32.xlu0 %v10623_v51, 256 }
 0x18f   : > { %v10629_v58 = vpop.permute.xlu1 %1272  ;;  %v10631_v55 = vpop.permute.xlu0 %1268 }
 0x191   : > { %1514 = vbcast.lane.b32.xlu1 %v10635_v54, 264  ;;  %1510 = vbcast.lane.b32.xlu0 %v10635_v54, 256 }
 0x193   : > { %v10639_v53 = vpop.permute.xlu1 %1283  ;;  %v10641_v52 = vpop.permute.xlu0 %1279 }
 0x195   : > { %1525 = vbcast.lane.b32.xlu1 %v10645_v1, 264  ;;  %1521 = vbcast.lane.b32.xlu0 %v10645_v1, 256 }
 0x197   : > { %v10649_v49 = vpop.permute.xlu1 %1294  ;;  %v10651_v48 = vpop.permute.xlu0 %1290 }
 0x199   : > { %1536 = vbcast.lane.b32.xlu1 %v10655_v5, 264  ;;  %1532 = vbcast.lane.b32.xlu0 %v10655_v5, 256  ;;  %v10681_v5 = vrot.slane %v10429_v46, %v10354_v13 }
 0x19b   : > { %v10659_v54 = vpop.permute.xlu1 %1921  ;;  %v10661_v51 = vpop.permute.xlu0 %1917  ;;  %16314 = vst [vmem:[#allocation56_spill] sm:$0xff] %v10681_v5 }
 0x19c   : > { %16308 = vst [vmem:[#allocation50_spill] sm:$0xff] %v10659_v54  ;;  %16309 = vst [vmem:[#allocation51_spill] sm:$0xff] %v10661_v51 }
 0x19d   : > { %1547 = vbcast.lane.b32.xlu1 %v10665_v17, 264  ;;  %1543 = vbcast.lane.b32.xlu0 %v10665_v17, 256 }
 0x19f   : > { %v10669_v1 = vpop.permute.xlu1 %1932  ;;  %v10671_v56 = vpop.permute.xlu0 %1928 }
 0x1a0   : > { %16311 = vst [vmem:[#allocation53_spill] sm:$0xff] %v10669_v1  ;;  %16312 = vst [vmem:[#allocation54_spill] sm:$0xff] %v10671_v56  ;;  %v10839_v1 = vrot.slane %v10481_v59, %v10427_v45  ;;  %v10104_v56 = vpop.f32.mrb[6].mxu1 }
 0x1a1   : > { %1558 = vbcast.lane.b32.xlu1 %v10675_v50, 264  ;;  %1554 = vbcast.lane.b32.xlu0 %v10675_v50, 256  ;;  %v10697_v50 = vrot.slane %v10429_v46, %v10357_v14  ;;  %v10105_v51 = vpop.f32.mrb[7].mxu1 }
 0x1a2   : > { %16341 = vst [vmem:[#allocation83_spill] sm:$0xff] %v10839_v1 }
 0x1a3   : > { %v10683_v27 = vpop.permute.xlu1 %1943  ;;  %v10685_v17 = vpop.permute.xlu0 %1939  ;;  %16320 = vst [vmem:[#allocation62_spill] sm:$0xff] %v10697_v50 }
 0x1a4   : > { %16315 = vst [vmem:[#allocation57_spill] sm:$0xff] %v10683_v27  ;;  %16316 = vst [vmem:[#allocation58_spill] sm:$0xff] %v10685_v17  ;;  %v10829_v27 = vrot.slane %v10481_v59, %v10418_v41 }
 0x1a5   : > { %1569 = vbcast.lane.b32.xlu1 %v10681_v5, 264  ;;  %1565 = vbcast.lane.b32.xlu0 %v10681_v5, 256 }
 0x1a6   : > { %16340 = vst [vmem:[#allocation82_spill] sm:$0xff] %v10829_v27 }
 0x1a7   : > { %v10691_v16 = vpop.permute.xlu1 %1954  ;;  %v10693_v15 = vpop.permute.xlu0 %1950 }
 0x1a8   : > { %16318 = vst [vmem:[#allocation60_spill] sm:$0xff] %v10691_v16  ;;  %16319 = vst [vmem:[#allocation61_spill] sm:$0xff] %v10693_v15  ;;  %v10819_v16 = vrot.slane %v10481_v59, %v10409_v39 }
 0x1a9   : > { %1580 = vbcast.lane.b32.xlu1 %v10697_v50, 264  ;;  %1576 = vbcast.lane.b32.xlu0 %v10697_v50, 256 }
 0x1aa   : > { %16339 = vst [vmem:[#allocation81_spill] sm:$0xff] %v10819_v16 }
 0x1ab   : > { %v10701_v12 = vpop.permute.xlu1 %1965  ;;  %v10703_v9 = vpop.permute.xlu0 %1961 }
 0x1ac   : > { %16321 = vst [vmem:[#allocation63_spill] sm:$0xff] %v10701_v12  ;;  %16322 = vst [vmem:[#allocation64_spill] sm:$0xff] %v10703_v9  ;;  %v10809_v12 = vrot.slane %v10481_v59, %v10400_v37 }
 0x1ad   : > { %1591 = vbcast.lane.b32.xlu1 %v10707_v26, 264  ;;  %1587 = vbcast.lane.b32.xlu0 %v10707_v26, 256 }
 0x1ae   : > { %16338 = vst [vmem:[#allocation80_spill] sm:$0xff] %v10809_v12 }
 0x1af   : > { %v10711_v33 = vpop.permute.xlu1 %1976  ;;  %v10713_v5 = vpop.permute.xlu0 %1972 }
 0x1b0   : > { %16324 = vst [vmem:[#allocation66_spill] sm:$0xff] %v10711_v33  ;;  %16325 = vst [vmem:[#allocation67_spill] sm:$0xff] %v10713_v5  ;;  %v10799_v33 = vrot.slane %v10481_v59, %v10389_v32 }
 0x1b1   : > { %1602 = vbcast.lane.b32.xlu1 %v10717_v7, 264  ;;  %1598 = vbcast.lane.b32.xlu0 %v10717_v7, 256 }
 0x1b2   : > { %16337 = vst [vmem:[#allocation79_spill] sm:$0xff] %v10799_v33 }
 0x1b3   : > { %v10721_v50 = vpop.permute.xlu1 %1987  ;;  %v10723_v6 = vpop.permute.xlu0 %1983 }
 0x1b4   : > { %16327 = vst [vmem:[#allocation69_spill] sm:$0xff] %v10721_v50  ;;  %16328 = vst [vmem:[#allocation70_spill] sm:$0xff] %v10723_v6 }
 0x1b5   : > { %1613 = vbcast.lane.b32.xlu1 %v10727_v4, 264  ;;  %1609 = vbcast.lane.b32.xlu0 %v10727_v4, 256 }
 0x1b7   : > { %v10731_v26 = vpop.permute.xlu1 %1305  ;;  %v10733_v3 = vpop.permute.xlu0 %1301 }
 0x1b9   : > { %1624 = vbcast.lane.b32.xlu1 %v10737_v62, 264  ;;  %1620 = vbcast.lane.b32.xlu0 %v10737_v62, 256  ;;  %v10763_v62 = vrot.slane %v10481_v59, %v10354_v13 }
 0x1bb   : > { %v10741_v7 = vpop.permute.xlu1 %1316  ;;  %v10743_v61 = vpop.permute.xlu0 %1312  ;;  %16333 = vst [vmem:[#allocation75_spill] sm:$0xff] %v10763_v62 }
 0x1bd   : > { %1635 = vbcast.lane.b32.xlu1 %v10747_v60, 264  ;;  %1631 = vbcast.lane.b32.xlu0 %v10747_v60, 256 }
 0x1bf   : > { %v10751_v4 = vpop.permute.xlu1 %1327  ;;  %v10753_v47 = vpop.permute.xlu0 %1323 }
 0x1c1   : > { %1646 = vbcast.lane.b32.xlu1 %v10757_v44, 264  ;;  %1642 = vbcast.lane.b32.xlu0 %v10757_v44, 256  ;;  %v10779_v44 = vrot.slane %v10481_v59, %v10357_v14  ;;  %v10853_v59 = vadd.f32 %v10105_v51, %v10104_v56  ;;  %v10871_v56 = vrot.slane %v10533_v11, %v10376_v25 }
 0x1c3   : > { %v10765_v38 = vpop.permute.xlu1 %1338  ;;  %v10767_v60 = vpop.permute.xlu0 %1334  ;;  %16335 = vst [vmem:[#allocation77_spill] sm:$0xff] %v10779_v44  ;;  %16345 = vst [vmem:[#allocation87_spill] sm:$0xff] %v10853_v59 }
 0x1c4   : > { %16351 = vst [vmem:[#allocation93_spill] sm:$0xff] %v10871_v56 }
 0x1c5   : > { %1657 = vbcast.lane.b32.xlu1 %v10763_v62, 264  ;;  %1653 = vbcast.lane.b32.xlu0 %v10763_v62, 256 }
 0x1c7   : > { %v10773_v20 = vpop.permute.xlu1 %1349  ;;  %v10775_v21 = vpop.permute.xlu0 %1345 }
 0x1c9   : > { %1668 = vbcast.lane.b32.xlu1 %v10779_v44, 264  ;;  %1664 = vbcast.lane.b32.xlu0 %v10779_v44, 256 }
 0x1cb   : > { %v10783_v50 = vpop.permute.xlu1 %1360  ;;  %v10785_v6 = vpop.permute.xlu0 %1356 }
 0x1cd   : > { %1679 = vbcast.lane.b32.xlu1 %v10789_v36, 264  ;;  %1675 = vbcast.lane.b32.xlu0 %v10789_v36, 256 }
 0x1cf   : > { %v10793_v40 = vpop.permute.xlu1 %1371  ;;  %v10795_v62 = vpop.permute.xlu0 %1367 }
 0x1d1   : > { %1690 = vbcast.lane.b32.xlu1 %v10799_v33, 264  ;;  %1686 = vbcast.lane.b32.xlu0 %v10799_v33, 256 }
 0x1d3   : > { %v10803_v44 = vpop.permute.xlu1 %1382  ;;  %v10805_v5 = vpop.permute.xlu0 %1378 }
 0x1d5   : > { %1701 = vbcast.lane.b32.xlu1 %v10809_v12, 264  ;;  %1697 = vbcast.lane.b32.xlu0 %v10809_v12, 256 }
 0x1d7   : > { %v10813_v36 = vpop.permute.xlu1 %1393  ;;  %v10815_v9 = vpop.permute.xlu0 %1389 }
 0x1d9   : > { %1712 = vbcast.lane.b32.xlu1 %v10819_v16, 264  ;;  %1708 = vbcast.lane.b32.xlu0 %v10819_v16, 256  ;;  %v10845_v16 = vrot.slane %v10533_v11, %v10354_v13 }
 0x1db   : > { %v10823_v33 = vpop.permute.xlu1 %1404  ;;  %v10825_v15 = vpop.permute.xlu0 %1400  ;;  %16342 = vst [vmem:[#allocation84_spill] sm:$0xff] %v10845_v16 }
 0x1dd   : > { %1723 = vbcast.lane.b32.xlu1 %v10829_v27, 264  ;;  %1719 = vbcast.lane.b32.xlu0 %v10829_v27, 256 }
 0x1df   : > { %v10833_v12 = vpop.permute.xlu1 %1415  ;;  %v10835_v17 = vpop.permute.xlu0 %1411 }
 0x1e1   : > { %1734 = vbcast.lane.b32.xlu1 %v10839_v1, 264  ;;  %1730 = vbcast.lane.b32.xlu0 %v10839_v1, 256  ;;  %v10861_v1 = vrot.slane %v10533_v11, %v10357_v14 }
 0x1e3   : > { %v10847_v54 = vpop.permute.xlu1 %1426  ;;  %v10849_v27 = vpop.permute.xlu0 %1422  ;;  %16348 = vst [vmem:[#allocation90_spill] sm:$0xff] %v10861_v1 }
 0x1e4   : > { %16343 = vst [vmem:[#allocation85_spill] sm:$0xff] %v10847_v54  ;;  %16344 = vst [vmem:[#allocation86_spill] sm:$0xff] %v10849_v27 }
 0x1e5   : > { %1745 = vbcast.lane.b32.xlu1 %v10845_v16, 264  ;;  %1741 = vbcast.lane.b32.xlu0 %v10845_v16, 256 }
 0x1e7   : > { %v10855_v46 = vpop.permute.xlu1 %1437  ;;  %v10857_v35 = vpop.permute.xlu0 %1433 }
 0x1e8   : > { %16346 = vst [vmem:[#allocation88_spill] sm:$0xff] %v10855_v46  ;;  %16347 = vst [vmem:[#allocation89_spill] sm:$0xff] %v10857_v35  ;;  %v10881_v46 = vrot.slane %v10533_v11, %v10389_v32 }
 0x1e9   : > { %1756 = vbcast.lane.b32.xlu1 %v10861_v1, 264  ;;  %1752 = vbcast.lane.b32.xlu0 %v10861_v1, 256 }
 0x1ea   : > { %16354 = vst [vmem:[#allocation96_spill] sm:$0xff] %v10881_v46 }
 0x1eb   : > { %v10865_v54 = vpop.permute.xlu1 %1448  ;;  %v10867_v27 = vpop.permute.xlu0 %1444 }
 0x1ec   : > { %16349 = vst [vmem:[#allocation91_spill] sm:$0xff] %v10865_v54  ;;  %16350 = vst [vmem:[#allocation92_spill] sm:$0xff] %v10867_v27  ;;  %v10891_v27 = vrot.slane %v10533_v11, %v10400_v37 }
 0x1ed   : > { %1767 = vbcast.lane.b32.xlu1 %v10871_v56, 264  ;;  %1763 = vbcast.lane.b32.xlu0 %v10871_v56, 256 }
 0x1ee   : > { %16357 = vst [vmem:[#allocation99_spill] sm:$0xff] %v10891_v27 }
 0x1ef   : > { %v10875_v51 = vpop.permute.xlu1 %1459  ;;  %v10877_v16 = vpop.permute.xlu0 %1455 }
 0x1f0   : > { %16352 = vst [vmem:[#allocation94_spill] sm:$0xff] %v10875_v51  ;;  %16353 = vst [vmem:[#allocation95_spill] sm:$0xff] %v10877_v16  ;;  %v10901_v16 = vrot.slane %v10533_v11, %v10409_v39 }
 0x1f1   : > { %1778 = vbcast.lane.b32.xlu1 %v10881_v46, 264  ;;  %1774 = vbcast.lane.b32.xlu0 %v10881_v46, 256 }
 0x1f2   : > { %16360 = vst [vmem:[#allocation102_spill] sm:$0xff] %v10901_v16 }
 0x1f3   : > { %v10885_v1 = vpop.permute.xlu1 %1470  ;;  %v10887_v54 = vpop.permute.xlu0 %1466 }
 0x1f4   : > { %16355 = vst [vmem:[#allocation97_spill] sm:$0xff] %v10885_v1  ;;  %16356 = vst [vmem:[#allocation98_spill] sm:$0xff] %v10887_v54  ;;  %v10911_v54 = vrot.slane %v10533_v11, %v10418_v41 }
 0x1f5   : > { %1789 = vbcast.lane.b32.xlu1 %v10891_v27, 264  ;;  %1785 = vbcast.lane.b32.xlu0 %v10891_v27, 256 }
 0x1f6   : > { %16363 = vst [vmem:[#allocation105_spill] sm:$0xff] %v10911_v54 }
 0x1f7   : > { %v10895_v56 = vpop.permute.xlu1 %1481  ;;  %v10897_v51 = vpop.permute.xlu0 %1477 }
 0x1f8   : > { %16358 = vst [vmem:[#allocation100_spill] sm:$0xff] %v10895_v56  ;;  %16359 = vst [vmem:[#allocation101_spill] sm:$0xff] %v10897_v51  ;;  %v10921_v51 = vrot.slane %v10533_v11, %v10427_v45 }
 0x1f9   : > { %1800 = vbcast.lane.b32.xlu1 %v10901_v16, 264  ;;  %1796 = vbcast.lane.b32.xlu0 %v10901_v16, 256  ;;  %v10927_v16 = vrot.slane %v10599_v57, %v10354_v13 }
 0x1fa   : > { %16366 = vst [vmem:[#allocation108_spill] sm:$0xff] %v10921_v51 }
 0x1fb   : > { %v10905_v46 = vpop.permute.xlu1 %1492  ;;  %v10907_v1 = vpop.permute.xlu0 %1488  ;;  %16367 = vst [vmem:[#allocation109_spill] sm:$0xff] %v10927_v16 }
 0x1fc   : > { %16361 = vst [vmem:[#allocation103_spill] sm:$0xff] %v10905_v46  ;;  %16362 = vst [vmem:[#allocation104_spill] sm:$0xff] %v10907_v1  ;;  %v10107_v46 = vpop.f32.mrb[8].mxu1 }
 0x1fd   : > { %1811 = vbcast.lane.b32.xlu1 %v10911_v54, 264  ;;  %1807 = vbcast.lane.b32.xlu0 %v10911_v54, 256 }
 0x1ff   : > { %v10915_v27 = vpop.permute.xlu1 %1503  ;;  %v10917_v56 = vpop.permute.xlu0 %1499 }
 0x200   : > { %16364 = vst [vmem:[#allocation106_spill] sm:$0xff] %v10915_v27  ;;  %16365 = vst [vmem:[#allocation107_spill] sm:$0xff] %v10917_v56  ;;  %v10108_v27 = vpop.f32.mrb[9].mxu1 }
 0x201   : > { %1822 = vbcast.lane.b32.xlu1 %v10921_v51, 264  ;;  %1818 = vbcast.lane.b32.xlu0 %v10921_v51, 256  ;;  %v10935_v11 = vadd.f32 %v10108_v27, %v10107_v46  ;;  %v10943_v51 = vrot.slane %v10599_v57, %v10357_v14  ;;  %v10953_v46 = vrot.slane %v10599_v57, %v10376_v25 }
 0x203   : > { %v10929_v1 = vpop.permute.xlu1 %1514  ;;  %v10931_v54 = vpop.permute.xlu0 %1510  ;;  %16370 = vst [vmem:[#allocation112_spill] sm:$0xff] %v10935_v11  ;;  %16372 = vst [vmem:[#allocation114_spill] sm:$0xff] %v10943_v51 }
 0x204   : > { %16368 = vst [vmem:[#allocation110_spill] sm:$0xff] %v10929_v1  ;;  %16369 = vst [vmem:[#allocation111_spill] sm:$0xff] %v10931_v54 }
 0x205   : > { %1833 = vbcast.lane.b32.xlu1 %v10927_v16, 264  ;;  %1829 = vbcast.lane.b32.xlu0 %v10927_v16, 256  ;;  %16375 = vst [vmem:[#allocation117_spill] sm:$0xff] %v10953_v46 }
 0x207   : > { %v10937_v56 = vpop.permute.xlu1 %1525  ;;  %v10939_v35 = vpop.permute.xlu0 %1521 }
 0x208   : > { %16371 = vst [vmem:[#allocation113_spill] sm:$0xff] %v10937_v56  ;;  %v10963_v56 = vrot.slane %v10599_v57, %v10389_v32 }
 0x209   : > { %1844 = vbcast.lane.b32.xlu1 %v10943_v51, 264  ;;  %1840 = vbcast.lane.b32.xlu0 %v10943_v51, 256 }
 0x20a   : > { %16378 = vst [vmem:[#allocation120_spill] sm:$0xff] %v10963_v56 }
 0x20b   : > { %v10947_v1 = vpop.permute.xlu1 %1536  ;;  %v10949_v54 = vpop.permute.xlu0 %1532 }
 0x20c   : > { %16373 = vst [vmem:[#allocation115_spill] sm:$0xff] %v10947_v1  ;;  %16374 = vst [vmem:[#allocation116_spill] sm:$0xff] %v10949_v54  ;;  %v10973_v54 = vrot.slane %v10599_v57, %v10400_v37 }
 0x20d   : > { %1855 = vbcast.lane.b32.xlu1 %v10953_v46, 264  ;;  %1851 = vbcast.lane.b32.xlu0 %v10953_v46, 256 }
 0x20e   : > { %16381 = vst [vmem:[#allocation123_spill] sm:$0xff] %v10973_v54 }
 0x20f   : > { %v10957_v27 = vpop.permute.xlu1 %1547  ;;  %v10959_v16 = vpop.permute.xlu0 %1543 }
 0x210   : > { %16376 = vst [vmem:[#allocation118_spill] sm:$0xff] %v10957_v27  ;;  %16377 = vst [vmem:[#allocation119_spill] sm:$0xff] %v10959_v16  ;;  %v10983_v16 = vrot.slane %v10599_v57, %v10409_v39 }
 0x211   : > { %1866 = vbcast.lane.b32.xlu1 %v10963_v56, 264  ;;  %1862 = vbcast.lane.b32.xlu0 %v10963_v56, 256 }
 0x212   : > { %16384 = vst [vmem:[#allocation126_spill] sm:$0xff] %v10983_v16 }
 0x213   : > { %v10967_v51 = vpop.permute.xlu1 %1558  ;;  %v10969_v1 = vpop.permute.xlu0 %1554 }
 0x214   : > { %16379 = vst [vmem:[#allocation121_spill] sm:$0xff] %v10967_v51  ;;  %16380 = vst [vmem:[#allocation122_spill] sm:$0xff] %v10969_v1  ;;  %v10993_v1 = vrot.slane %v10599_v57, %v10418_v41 }
 0x215   : > { %1877 = vbcast.lane.b32.xlu1 %v10973_v54, 264  ;;  %1873 = vbcast.lane.b32.xlu0 %v10973_v54, 256 }
 0x216   : > { %16387 = vst [vmem:[#allocation129_spill] sm:$0xff] %v10993_v1 }
 0x217   : > { %v10977_v46 = vpop.permute.xlu1 %1569  ;;  %v10979_v27 = vpop.permute.xlu0 %1565 }
 0x218   : > { %16382 = vst [vmem:[#allocation124_spill] sm:$0xff] %v10977_v46  ;;  %16383 = vst [vmem:[#allocation125_spill] sm:$0xff] %v10979_v27  ;;  %v11003_v27 = vrot.slane %v10599_v57, %v10427_v45  ;;  %v11019_v57 = vrot.slane %v10689_v23, %v10354_v13 }
 0x219   : > { %1888 = vbcast.lane.b32.xlu1 %v10983_v16, 264  ;;  %1884 = vbcast.lane.b32.xlu0 %v10983_v16, 256  ;;  %v10110_v16 = vpop.f32.mrb[10].mxu1 }
 0x21a   : > { %16390 = vst [vmem:[#allocation132_spill] sm:$0xff] %v11003_v27  ;;  %16394 = vst [vmem:[#allocation136_spill] sm:$0xff] %v11019_v57 }
 0x21b   : > { %v10987_v56 = vpop.permute.xlu1 %1580  ;;  %v10989_v51 = vpop.permute.xlu0 %1576 }
 0x21c   : > { %16385 = vst [vmem:[#allocation127_spill] sm:$0xff] %v10987_v56  ;;  %16386 = vst [vmem:[#allocation128_spill] sm:$0xff] %v10989_v51 }
 0x21d   : > { %1899 = vbcast.lane.b32.xlu1 %v10993_v1, 264  ;;  %1895 = vbcast.lane.b32.xlu0 %v10993_v1, 256  ;;  %v11013_v1 = vrot.slane %v10361_v19, %v10427_v45 }
 0x21f   : > { %v10997_v54 = vpop.permute.xlu1 %1591  ;;  %v10999_v46 = vpop.permute.xlu0 %1587  ;;  %16393 = vst [vmem:[#allocation135_spill] sm:$0xff] %v11013_v1 }
 0x220   : > { %16388 = vst [vmem:[#allocation130_spill] sm:$0xff] %v10997_v54  ;;  %16389 = vst [vmem:[#allocation131_spill] sm:$0xff] %v10999_v46  ;;  %v10111_v54 = vpop.f32.mrb[11].mxu1 }
 0x221   : > { %1910 = vbcast.lane.b32.xlu1 %v11003_v27, 264  ;;  %1906 = vbcast.lane.b32.xlu0 %v11003_v27, 256  ;;  %v11021_v46 = vadd.f32 %v10111_v54, %v10110_v16 }
 0x223   : > { %v11007_v56 = vpop.permute.xlu1 %1602  ;;  %v11009_v51 = vpop.permute.xlu0 %1598  ;;  %16395 = vst [vmem:[#allocation137_spill] sm:$0xff] %v11021_v46 }
 0x224   : > { %16391 = vst [vmem:[#allocation133_spill] sm:$0xff] %v11007_v56  ;;  %16392 = vst [vmem:[#allocation134_spill] sm:$0xff] %v11009_v51 }
 0x225   : > { %1998 = vbcast.lane.b32.xlu1 %v11013_v1, 264  ;;  %1994 = vbcast.lane.b32.xlu0 %v11013_v1, 256  ;;  %v11035_v1 = vrot.slane %v10689_v23, %v10357_v14 }
 0x227   : > { %v11023_v27 = vpop.permute.xlu1 %1613  ;;  %v11025_v56 = vpop.permute.xlu0 %1609  ;;  %16400 = vst [vmem:[#allocation142_spill] sm:$0xff] %v11035_v1 }
 0x228   : > { %16396 = vst [vmem:[#allocation138_spill] sm:$0xff] %v11023_v27  ;;  %16397 = vst [vmem:[#allocation139_spill] sm:$0xff] %v11025_v56  ;;  %v11045_v27 = vrot.slane %v10689_v23, %v10376_v25 }
 0x229   : > { %2009 = vbcast.lane.b32.xlu1 %v11019_v57, 264  ;;  %2005 = vbcast.lane.b32.xlu0 %v11019_v57, 256 }
 0x22a   : > { %16403 = vst [vmem:[#allocation145_spill] sm:$0xff] %v11045_v27 }
 0x22b   : > { %v11029_v19 = vpop.permute.xlu1 %1624  ;;  %v11031_v51 = vpop.permute.xlu0 %1620 }
 0x22c   : > { %16398 = vst [vmem:[#allocation140_spill] sm:$0xff] %v11029_v19  ;;  %16399 = vst [vmem:[#allocation141_spill] sm:$0xff] %v11031_v51  ;;  %v11055_v51 = vrot.slane %v10689_v23, %v10389_v32 }
 0x22d   : > { %2020 = vbcast.lane.b32.xlu1 %v11035_v1, 264  ;;  %2016 = vbcast.lane.b32.xlu0 %v11035_v1, 256 }
 0x22e   : > { %16406 = vst [vmem:[#allocation148_spill] sm:$0xff] %v11055_v51 }
 0x22f   : > { %v11039_v54 = vpop.permute.xlu1 %1635  ;;  %v11041_v16 = vpop.permute.xlu0 %1631 }
 0x230   : > { %16401 = vst [vmem:[#allocation143_spill] sm:$0xff] %v11039_v54  ;;  %16402 = vst [vmem:[#allocation144_spill] sm:$0xff] %v11041_v16  ;;  %v11065_v16 = vrot.slane %v10689_v23, %v10400_v37 }
 0x231   : > { %2031 = vbcast.lane.b32.xlu1 %v11045_v27, 264  ;;  %2027 = vbcast.lane.b32.xlu0 %v11045_v27, 256 }
 0x232   : > { %16409 = vst [vmem:[#allocation151_spill] sm:$0xff] %v11065_v16 }
 0x233   : > { %v11049_v57 = vpop.permute.xlu1 %1646  ;;  %v11051_v19 = vpop.permute.xlu0 %1642 }
 0x234   : > { %16404 = vst [vmem:[#allocation146_spill] sm:$0xff] %v11049_v57  ;;  %16405 = vst [vmem:[#allocation147_spill] sm:$0xff] %v11051_v19  ;;  %v11075_v19 = vrot.slane %v10689_v23, %v10409_v39 }
 0x235   : > { %2042 = vbcast.lane.b32.xlu1 %v11055_v51, 264  ;;  %2038 = vbcast.lane.b32.xlu0 %v11055_v51, 256 }
 0x236   : > { %16412 = vst [vmem:[#allocation154_spill] sm:$0xff] %v11075_v19 }
 0x237   : > { %v11059_v1 = vpop.permute.xlu1 %1657  ;;  %v11061_v54 = vpop.permute.xlu0 %1653 }
 0x238   : > { %16407 = vst [vmem:[#allocation149_spill] sm:$0xff] %v11059_v1  ;;  %16408 = vst [vmem:[#allocation150_spill] sm:$0xff] %v11061_v54  ;;  %v11085_v54 = vrot.slane %v10689_v23, %v10418_v41 }
 0x239   : > { %2053 = vbcast.lane.b32.xlu1 %v11065_v16, 264  ;;  %2049 = vbcast.lane.b32.xlu0 %v11065_v16, 256  ;;  %v10113_v16 = vpop.f32.mrb[12].mxu1 }
 0x23a   : > { %16415 = vst [vmem:[#allocation157_spill] sm:$0xff] %v11085_v54 }
 0x23b   : > { %v11069_v27 = vpop.permute.xlu1 %1668  ;;  %v11071_v57 = vpop.permute.xlu0 %1664 }
 0x23c   : > { %16410 = vst [vmem:[#allocation152_spill] sm:$0xff] %v11069_v27  ;;  %16411 = vst [vmem:[#allocation153_spill] sm:$0xff] %v11071_v57 }
 0x23d   : > { %2064 = vbcast.lane.b32.xlu1 %v11075_v19, 264  ;;  %2060 = vbcast.lane.b32.xlu0 %v11075_v19, 256  ;;  %v11095_v19 = vrot.slane %v10689_v23, %v10427_v45 }
 0x23f   : > { %v11079_v51 = vpop.permute.xlu1 %1679  ;;  %v11081_v1 = vpop.permute.xlu0 %1675  ;;  %16418 = vst [vmem:[#allocation160_spill] sm:$0xff] %v11095_v19 }
 0x240   : > { %16413 = vst [vmem:[#allocation155_spill] sm:$0xff] %v11079_v51  ;;  %16414 = vst [vmem:[#allocation156_spill] sm:$0xff] %v11081_v1  ;;  %v10114_v51 = vpop.f32.mrb[13].mxu1  ;;  %v11101_v1 = vrot.slane %v10771_v31, %v10354_v13 }
 0x241   : > { %2075 = vbcast.lane.b32.xlu1 %v11085_v54, 264  ;;  %2071 = vbcast.lane.b32.xlu0 %v11085_v54, 256  ;;  %v11103_v56 = vadd.f32 %v10114_v51, %v10113_v16 }
 0x242   : > { %16419 = vst [vmem:[#allocation161_spill] sm:$0xff] %v11101_v1 }
 0x243   : > { %v11089_v27 = vpop.permute.xlu1 %1690  ;;  %v11091_v57 = vpop.permute.xlu0 %1686  ;;  %16420 = vst [vmem:[#allocation162_spill] sm:$0xff] %v11103_v56 }
 0x244   : > { %16416 = vst [vmem:[#allocation158_spill] sm:$0xff] %v11089_v27  ;;  %16417 = vst [vmem:[#allocation159_spill] sm:$0xff] %v11091_v57 }
 0x245   : > { %2086 = vbcast.lane.b32.xlu1 %v11095_v19, 264  ;;  %2082 = vbcast.lane.b32.xlu0 %v11095_v19, 256  ;;  %v11117_v19 = vrot.slane %v10771_v31, %v10357_v14 }
 0x247   : > { %v11105_v54 = vpop.permute.xlu1 %1701  ;;  %v11107_v27 = vpop.permute.xlu0 %1697  ;;  %16425 = vst [vmem:[#allocation167_spill] sm:$0xff] %v11117_v19 }
 0x248   : > { %16421 = vst [vmem:[#allocation163_spill] sm:$0xff] %v11105_v54  ;;  %16422 = vst [vmem:[#allocation164_spill] sm:$0xff] %v11107_v27  ;;  %v11127_v54 = vrot.slane %v10771_v31, %v10376_v25 }
 0x249   : > { %2097 = vbcast.lane.b32.xlu1 %v11101_v1, 264  ;;  %2093 = vbcast.lane.b32.xlu0 %v11101_v1, 256 }
 0x24a   : > { %16428 = vst [vmem:[#allocation170_spill] sm:$0xff] %v11127_v54 }
 0x24b   : > { %v11111_v23 = vpop.permute.xlu1 %1712  ;;  %v11113_v57 = vpop.permute.xlu0 %1708 }
 0x24c   : > { %16423 = vst [vmem:[#allocation165_spill] sm:$0xff] %v11111_v23  ;;  %16424 = vst [vmem:[#allocation166_spill] sm:$0xff] %v11113_v57  ;;  %v11137_v57 = vrot.slane %v10771_v31, %v10389_v32 }
 0x24d   : > { %2108 = vbcast.lane.b32.xlu1 %v11117_v19, 264  ;;  %2104 = vbcast.lane.b32.xlu0 %v11117_v19, 256 }
 0x24e   : > { %16431 = vst [vmem:[#allocation173_spill] sm:$0xff] %v11137_v57 }
 0x24f   : > { %v11121_v51 = vpop.permute.xlu1 %1723  ;;  %v11123_v16 = vpop.permute.xlu0 %1719 }
 0x250   : > { %16426 = vst [vmem:[#allocation168_spill] sm:$0xff] %v11121_v51  ;;  %16427 = vst [vmem:[#allocation169_spill] sm:$0xff] %v11123_v16  ;;  %v11147_v16 = vrot.slane %v10771_v31, %v10400_v37 }
 0x251   : > { %2119 = vbcast.lane.b32.xlu1 %v11127_v54, 264  ;;  %2115 = vbcast.lane.b32.xlu0 %v11127_v54, 256 }
 0x252   : > { %16434 = vst [vmem:[#allocation176_spill] sm:$0xff] %v11147_v16 }
 0x253   : > { %v11131_v1 = vpop.permute.xlu1 %1734  ;;  %v11133_v23 = vpop.permute.xlu0 %1730 }
 0x254   : > { %16429 = vst [vmem:[#allocation171_spill] sm:$0xff] %v11131_v1  ;;  %16430 = vst [vmem:[#allocation172_spill] sm:$0xff] %v11133_v23  ;;  %v11157_v23 = vrot.slane %v10771_v31, %v10409_v39 }
 0x255   : > { %2130 = vbcast.lane.b32.xlu1 %v11137_v57, 264  ;;  %2126 = vbcast.lane.b32.xlu0 %v11137_v57, 256 }
 0x256   : > { %16437 = vst [vmem:[#allocation179_spill] sm:$0xff] %v11157_v23 }
 0x257   : > { %v11141_v19 = vpop.permute.xlu1 %1745  ;;  %v11143_v51 = vpop.permute.xlu0 %1741 }
 0x258   : > { %16432 = vst [vmem:[#allocation174_spill] sm:$0xff] %v11141_v19  ;;  %16433 = vst [vmem:[#allocation175_spill] sm:$0xff] %v11143_v51  ;;  %v11167_v51 = vrot.slane %v10771_v31, %v10418_v41 }
 0x259   : > { %2141 = vbcast.lane.b32.xlu1 %v11147_v16, 264  ;;  %2137 = vbcast.lane.b32.xlu0 %v11147_v16, 256  ;;  %v10116_v16 = vpop.f32.mrb[14].mxu1 }
 0x25a   : > { %16440 = vst [vmem:[#allocation182_spill] sm:$0xff] %v11167_v51 }
 0x25b   : > { %v11151_v54 = vpop.permute.xlu1 %1756  ;;  %v11153_v1 = vpop.permute.xlu0 %1752 }
 0x25c   : > { %16435 = vst [vmem:[#allocation177_spill] sm:$0xff] %v11151_v54  ;;  %16436 = vst [vmem:[#allocation178_spill] sm:$0xff] %v11153_v1 }
 0x25d   : > { %2152 = vbcast.lane.b32.xlu1 %v11157_v23, 264  ;;  %2148 = vbcast.lane.b32.xlu0 %v11157_v23, 256  ;;  %v11177_v23 = vrot.slane %v10771_v31, %v10427_v45 }
 0x25f   : > { %v11161_v57 = vpop.permute.xlu1 %1767  ;;  %v11163_v19 = vpop.permute.xlu0 %1763  ;;  %16443 = vst [vmem:[#allocation185_spill] sm:$0xff] %v11177_v23 }
 0x260   : > { %16438 = vst [vmem:[#allocation180_spill] sm:$0xff] %v11161_v57  ;;  %16439 = vst [vmem:[#allocation181_spill] sm:$0xff] %v11163_v19  ;;  %v10117_v57 = vpop.f32.mrb[15].mxu1  ;;  %v11183_v19 = vrot.slane %v10853_v59, %v10354_v13 }
 0x261   : > { %2163 = vbcast.lane.b32.xlu1 %v11167_v51, 264  ;;  %2159 = vbcast.lane.b32.xlu0 %v11167_v51, 256  ;;  %v11185_v27 = vadd.f32 %v10117_v57, %v10116_v16 }
 0x262   : > { %16444 = vst [vmem:[#allocation186_spill] sm:$0xff] %v11183_v19 }
 0x263   : > { %v11171_v54 = vpop.permute.xlu1 %1778  ;;  %v11173_v1 = vpop.permute.xlu0 %1774  ;;  %16445 = vst [vmem:[#allocation187_spill] sm:$0xff] %v11185_v27 }
 0x264   : > { %16441 = vst [vmem:[#allocation183_spill] sm:$0xff] %v11171_v54  ;;  %16442 = vst [vmem:[#allocation184_spill] sm:$0xff] %v11173_v1 }
 0x265   : > { %2174 = vbcast.lane.b32.xlu1 %v11177_v23, 264  ;;  %2170 = vbcast.lane.b32.xlu0 %v11177_v23, 256  ;;  %v11199_v23 = vrot.slane %v10853_v59, %v10357_v14 }
 0x267   : > { %v11187_v51 = vpop.permute.xlu1 %1789  ;;  %v11189_v54 = vpop.permute.xlu0 %1785  ;;  %16449 = vst [vmem:[#allocation191_spill] sm:$0xff] %v11199_v23 }
 0x268   : > { %16446 = vst [vmem:[#allocation188_spill] sm:$0xff] %v11187_v51  ;;  %v11209_v51 = vrot.slane %v10853_v59, %v10376_v25 }
 0x269   : > { %2185 = vbcast.lane.b32.xlu1 %v11183_v19, 264  ;;  %2181 = vbcast.lane.b32.xlu0 %v11183_v19, 256 }
 0x26a   : > { %16452 = vst [vmem:[#allocation194_spill] sm:$0xff] %v11209_v51 }
 0x26b   : > { %v11193_v31 = vpop.permute.xlu1 %1800  ;;  %v11195_v1 = vpop.permute.xlu0 %1796 }
 0x26c   : > { %16447 = vst [vmem:[#allocation189_spill] sm:$0xff] %v11193_v31  ;;  %16448 = vst [vmem:[#allocation190_spill] sm:$0xff] %v11195_v1  ;;  %v11219_v1 = vrot.slane %v10853_v59, %v10389_v32 }
 0x26d   : > { %2196 = vbcast.lane.b32.xlu1 %v11199_v23, 264  ;;  %2192 = vbcast.lane.b32.xlu0 %v11199_v23, 256 }
 0x26e   : > { %16455 = vst [vmem:[#allocation197_spill] sm:$0xff] %v11219_v1 }
 0x26f   : > { %v11203_v57 = vpop.permute.xlu1 %1811  ;;  %v11205_v16 = vpop.permute.xlu0 %1807 }
 0x270   : > { %16450 = vst [vmem:[#allocation192_spill] sm:$0xff] %v11203_v57  ;;  %16451 = vst [vmem:[#allocation193_spill] sm:$0xff] %v11205_v16  ;;  %v11229_v16 = vrot.slane %v10853_v59, %v10400_v37 }
 0x271   : > { %2207 = vbcast.lane.b32.xlu1 %v11209_v51, 264  ;;  %2203 = vbcast.lane.b32.xlu0 %v11209_v51, 256 }
 0x272   : > { %16458 = vst [vmem:[#allocation200_spill] sm:$0xff] %v11229_v16 }
 0x273   : > { %v11213_v19 = vpop.permute.xlu1 %1822  ;;  %v11215_v31 = vpop.permute.xlu0 %1818 }
 0x274   : > { %16453 = vst [vmem:[#allocation195_spill] sm:$0xff] %v11213_v19  ;;  %16454 = vst [vmem:[#allocation196_spill] sm:$0xff] %v11215_v31  ;;  %v11239_v31 = vrot.slane %v10853_v59, %v10409_v39 }
 0x275   : > { %2218 = vbcast.lane.b32.xlu1 %v11219_v1, 264  ;;  %2214 = vbcast.lane.b32.xlu0 %v11219_v1, 256 }
 0x276   : > { %16461 = vst [vmem:[#allocation203_spill] sm:$0xff] %v11239_v31 }
 0x277   : > { %v11223_v23 = vpop.permute.xlu1 %1833  ;;  %v11225_v57 = vpop.permute.xlu0 %1829 }
 0x278   : > { %16456 = vst [vmem:[#allocation198_spill] sm:$0xff] %v11223_v23  ;;  %16457 = vst [vmem:[#allocation199_spill] sm:$0xff] %v11225_v57  ;;  %v11249_v57 = vrot.slane %v10853_v59, %v10418_v41 }
 0x279   : > { %2229 = vbcast.lane.b32.xlu1 %v11229_v16, 264  ;;  %2225 = vbcast.lane.b32.xlu0 %v11229_v16, 256 }
 0x27a   : > { %16464 = vst [vmem:[#allocation206_spill] sm:$0xff] %v11249_v57 }
 0x27b   : > { %v11233_v51 = vpop.permute.xlu1 %1844  ;;  %v11235_v19 = vpop.permute.xlu0 %1840 }
 0x27c   : > { %16459 = vst [vmem:[#allocation201_spill] sm:$0xff] %v11233_v51  ;;  %16460 = vst [vmem:[#allocation202_spill] sm:$0xff] %v11235_v19  ;;  %v11259_v19 = vrot.slane %v10853_v59, %v10427_v45 }
 0x27d   : > { %2240 = vbcast.lane.b32.xlu1 %v11239_v31, 264  ;;  %2236 = vbcast.lane.b32.xlu0 %v11239_v31, 256  ;;  %v11265_v31 = vrot.slane %v10935_v11, %v10354_v13 }
 0x27e   : > { %16466 = vst [vmem:[#allocation208_spill] sm:$0xff] %v11259_v19 }
 0x27f   : > { %v11243_v1 = vpop.permute.xlu1 %1855  ;;  %v11245_v23 = vpop.permute.xlu0 %1851  ;;  %16467 = vst [vmem:[#allocation209_spill] sm:$0xff] %v11265_v31 }
 0x280   : > { %16462 = vst [vmem:[#allocation204_spill] sm:$0xff] %v11243_v1  ;;  %16463 = vst [vmem:[#allocation205_spill] sm:$0xff] %v11245_v23 }
 0x281   : > { %2251 = vbcast.lane.b32.xlu1 %v11249_v57, 264  ;;  %2247 = vbcast.lane.b32.xlu0 %v11249_v57, 256 }
 0x283   : > { %v11253_v16 = vpop.permute.xlu1 %1866  ;;  %v11255_v51 = vpop.permute.xlu0 %1862 }
 0x284   : > { %16465 = vst [vmem:[#allocation207_spill] sm:$0xff] %v11253_v16  ;;  %v11279_v16 = vrot.slane %v10935_v11, %v10357_v14 }
 0x285   : > { %2262 = vbcast.lane.b32.xlu1 %v11259_v19, 264  ;;  %2258 = vbcast.lane.b32.xlu0 %v11259_v19, 256 }
 0x286   : > { %16472 = vst [vmem:[#allocation214_spill] sm:$0xff] %v11279_v16 }
 0x287   : > { %v11267_v1 = vpop.permute.xlu1 %1877  ;;  %v11269_v23 = vpop.permute.xlu0 %1873 }
 0x288   : > { %16468 = vst [vmem:[#allocation210_spill] sm:$0xff] %v11267_v1  ;;  %16469 = vst [vmem:[#allocation211_spill] sm:$0xff] %v11269_v23  ;;  %v11289_v23 = vrot.slane %v10935_v11, %v10376_v25 }
 0x289   : > { %2273 = vbcast.lane.b32.xlu1 %v11265_v31, 264  ;;  %2269 = vbcast.lane.b32.xlu0 %v11265_v31, 256 }
 0x28a   : > { %16475 = vst [vmem:[#allocation217_spill] sm:$0xff] %v11289_v23 }
 0x28b   : > { %v11273_v57 = vpop.permute.xlu1 %1888  ;;  %v11275_v59 = vpop.permute.xlu0 %1884 }
 0x28c   : > { %16470 = vst [vmem:[#allocation212_spill] sm:$0xff] %v11273_v57  ;;  %16471 = vst [vmem:[#allocation213_spill] sm:$0xff] %v11275_v59  ;;  %v11299_v59 = vrot.slane %v10935_v11, %v10389_v32 }
 0x28d   : > { %2284 = vbcast.lane.b32.xlu1 %v11279_v16, 264  ;;  %2280 = vbcast.lane.b32.xlu0 %v11279_v16, 256 }
 0x28e   : > { %16478 = vst [vmem:[#allocation220_spill] sm:$0xff] %v11299_v59 }
 0x28f   : > { %v11283_v19 = vpop.permute.xlu1 %1899  ;;  %v11285_v1 = vpop.permute.xlu0 %1895 }
 0x290   : > { %16473 = vst [vmem:[#allocation215_spill] sm:$0xff] %v11283_v19  ;;  %16474 = vst [vmem:[#allocation216_spill] sm:$0xff] %v11285_v1  ;;  %v11309_v1 = vrot.slane %v10935_v11, %v10400_v37 }
 0x291   : > { %2295 = vbcast.lane.b32.xlu1 %v11289_v23, 264  ;;  %2291 = vbcast.lane.b32.xlu0 %v11289_v23, 256 }
 0x292   : > { %16481 = vst [vmem:[#allocation223_spill] sm:$0xff] %v11309_v1 }
 0x293   : > { %v11293_v31 = vpop.permute.xlu1 %1910  ;;  %v11295_v57 = vpop.permute.xlu0 %1906 }
 0x294   : > { %16476 = vst [vmem:[#allocation218_spill] sm:$0xff] %v11293_v31  ;;  %16477 = vst [vmem:[#allocation219_spill] sm:$0xff] %v11295_v57  ;;  %v11319_v57 = vrot.slane %v10935_v11, %v10409_v39 }
 0x295   : > { %2306 = vbcast.lane.b32.xlu1 %v11299_v59, 264  ;;  %2302 = vbcast.lane.b32.xlu0 %v11299_v59, 256 }
 0x296   : > { %16484 = vst [vmem:[#allocation226_spill] sm:$0xff] %v11319_v57 }
 0x297   : > { %v11303_v16 = vpop.permute.xlu1 %1998  ;;  %v11305_v19 = vpop.permute.xlu0 %1994 }
 0x298   : > { %16479 = vst [vmem:[#allocation221_spill] sm:$0xff] %v11303_v16  ;;  %16480 = vst [vmem:[#allocation222_spill] sm:$0xff] %v11305_v19  ;;  %v11329_v19 = vrot.slane %v10935_v11, %v10418_v41 }
 0x299   : > { %2317 = vbcast.lane.b32.xlu1 %v11309_v1, 264  ;;  %2313 = vbcast.lane.b32.xlu0 %v11309_v1, 256 }
 0x29a   : > { %16487 = vst [vmem:[#allocation229_spill] sm:$0xff] %v11329_v19 }
 0x29b   : > { %v11313_v23 = vpop.permute.xlu1 %2009  ;;  %v11315_v31 = vpop.permute.xlu0 %2005 }
 0x29c   : > { %16482 = vst [vmem:[#allocation224_spill] sm:$0xff] %v11313_v23  ;;  %16483 = vst [vmem:[#allocation225_spill] sm:$0xff] %v11315_v31  ;;  %v11339_v31 = vrot.slane %v10935_v11, %v10427_v45 }
 0x29d   : > { %2328 = vbcast.lane.b32.xlu1 %v11319_v57, 264  ;;  %2324 = vbcast.lane.b32.xlu0 %v11319_v57, 256  ;;  %v11345_v57 = vrot.slane %v11021_v46, %v10354_v13 }
 0x29e   : > { %16489 = vst [vmem:[#allocation231_spill] sm:$0xff] %v11339_v31 }
 0x29f   : > { %v11323_v59 = vpop.permute.xlu1 %2020  ;;  %v11325_v16 = vpop.permute.xlu0 %2016  ;;  %16490 = vst [vmem:[#allocation232_spill] sm:$0xff] %v11345_v57 }
 0x2a0   : > { %16485 = vst [vmem:[#allocation227_spill] sm:$0xff] %v11323_v59  ;;  %16486 = vst [vmem:[#allocation228_spill] sm:$0xff] %v11325_v16 }
 0x2a1   : > { %2339 = vbcast.lane.b32.xlu1 %v11329_v19, 264  ;;  %2335 = vbcast.lane.b32.xlu0 %v11329_v19, 256 }
 0x2a3   : > { %v11333_v1 = vpop.permute.xlu1 %2031  ;;  %v11335_v23 = vpop.permute.xlu0 %2027 }
 0x2a4   : > { %16488 = vst [vmem:[#allocation230_spill] sm:$0xff] %v11333_v1  ;;  %v11359_v1 = vrot.slane %v11021_v46, %v10357_v14 }
 0x2a5   : > { %2350 = vbcast.lane.b32.xlu1 %v11339_v31, 264  ;;  %2346 = vbcast.lane.b32.xlu0 %v11339_v31, 256 }
 0x2a6   : > { %16495 = vst [vmem:[#allocation237_spill] sm:$0xff] %v11359_v1 }
 0x2a7   : > { %v11347_v59 = vpop.permute.xlu1 %2042  ;;  %v11349_v16 = vpop.permute.xlu0 %2038 }
 0x2a8   : > { %16491 = vst [vmem:[#allocation233_spill] sm:$0xff] %v11347_v59  ;;  %16492 = vst [vmem:[#allocation234_spill] sm:$0xff] %v11349_v16  ;;  %v11369_v16 = vrot.slane %v11021_v46, %v10376_v25 }
 0x2a9   : > { %2361 = vbcast.lane.b32.xlu1 %v11345_v57, 264  ;;  %2357 = vbcast.lane.b32.xlu0 %v11345_v57, 256 }
 0x2aa   : > { %16498 = vst [vmem:[#allocation240_spill] sm:$0xff] %v11369_v16 }
 0x2ab   : > { %v11353_v19 = vpop.permute.xlu1 %2053  ;;  %v11355_v11 = vpop.permute.xlu0 %2049 }
 0x2ac   : > { %16493 = vst [vmem:[#allocation235_spill] sm:$0xff] %v11353_v19  ;;  %16494 = vst [vmem:[#allocation236_spill] sm:$0xff] %v11355_v11  ;;  %v11379_v11 = vrot.slane %v11021_v46, %v10389_v32 }
 0x2ad   : > { %2372 = vbcast.lane.b32.xlu1 %v11359_v1, 264  ;;  %2368 = vbcast.lane.b32.xlu0 %v11359_v1, 256 }
 0x2ae   : > { %16501 = vst [vmem:[#allocation243_spill] sm:$0xff] %v11379_v11 }
 0x2af   : > { %v11363_v31 = vpop.permute.xlu1 %2064  ;;  %v11365_v59 = vpop.permute.xlu0 %2060 }
 0x2b0   : > { %16496 = vst [vmem:[#allocation238_spill] sm:$0xff] %v11363_v31  ;;  %16497 = vst [vmem:[#allocation239_spill] sm:$0xff] %v11365_v59  ;;  %v11389_v59 = vrot.slane %v11021_v46, %v10400_v37 }
 0x2b1   : > { %2383 = vbcast.lane.b32.xlu1 %v11369_v16, 264  ;;  %2379 = vbcast.lane.b32.xlu0 %v11369_v16, 256 }
 0x2b2   : > { %16504 = vst [vmem:[#allocation246_spill] sm:$0xff] %v11389_v59 }
 0x2b3   : > { %v11373_v57 = vpop.permute.xlu1 %2075  ;;  %v11375_v19 = vpop.permute.xlu0 %2071 }
 0x2b4   : > { %16499 = vst [vmem:[#allocation241_spill] sm:$0xff] %v11373_v57  ;;  %16500 = vst [vmem:[#allocation242_spill] sm:$0xff] %v11375_v19  ;;  %v11399_v19 = vrot.slane %v11021_v46, %v10409_v39 }
 0x2b5   : > { %2394 = vbcast.lane.b32.xlu1 %v11379_v11, 264  ;;  %2390 = vbcast.lane.b32.xlu0 %v11379_v11, 256 }
 0x2b6   : > { %16507 = vst [vmem:[#allocation249_spill] sm:$0xff] %v11399_v19 }
 0x2b7   : > { %v11383_v1 = vpop.permute.xlu1 %2086  ;;  %v11385_v31 = vpop.permute.xlu0 %2082 }
 0x2b8   : > { %16502 = vst [vmem:[#allocation244_spill] sm:$0xff] %v11383_v1  ;;  %16503 = vst [vmem:[#allocation245_spill] sm:$0xff] %v11385_v31  ;;  %v11409_v31 = vrot.slane %v11021_v46, %v10418_v41 }
 0x2b9   : > { %2405 = vbcast.lane.b32.xlu1 %v11389_v59, 264  ;;  %2401 = vbcast.lane.b32.xlu0 %v11389_v59, 256 }
 0x2ba   : > { %16510 = vst [vmem:[#allocation252_spill] sm:$0xff] %v11409_v31 }
 0x2bb   : > { %v11393_v16 = vpop.permute.xlu1 %2097  ;;  %v11395_v57 = vpop.permute.xlu0 %2093 }
 0x2bc   : > { %16505 = vst [vmem:[#allocation247_spill] sm:$0xff] %v11393_v16  ;;  %16506 = vst [vmem:[#allocation248_spill] sm:$0xff] %v11395_v57  ;;  %v11419_v57 = vrot.slane %v11021_v46, %v10427_v45 }
 0x2bd   : > { %2416 = vbcast.lane.b32.xlu1 %v11399_v19, 264  ;;  %2412 = vbcast.lane.b32.xlu0 %v11399_v19, 256  ;;  %v11425_v19 = vrot.slane %v11103_v56, %v10354_v13 }
 0x2be   : > { %16512 = vst [vmem:[#allocation254_spill] sm:$0xff] %v11419_v57 }
 0x2bf   : > { %v11403_v11 = vpop.permute.xlu1 %2108  ;;  %v11405_v1 = vpop.permute.xlu0 %2104  ;;  %16513 = vst [vmem:[#allocation255_spill] sm:$0xff] %v11425_v19 }
 0x2c0   : > { %16508 = vst [vmem:[#allocation250_spill] sm:$0xff] %v11403_v11  ;;  %16509 = vst [vmem:[#allocation251_spill] sm:$0xff] %v11405_v1 }
 0x2c1   : > { %2427 = vbcast.lane.b32.xlu1 %v11409_v31, 264  ;;  %2423 = vbcast.lane.b32.xlu0 %v11409_v31, 256 }
 0x2c3   : > { %v11413_v59 = vpop.permute.xlu1 %2119  ;;  %v11415_v16 = vpop.permute.xlu0 %2115 }
 0x2c4   : > { %16511 = vst [vmem:[#allocation253_spill] sm:$0xff] %v11413_v59  ;;  %v11439_v59 = vrot.slane %v11103_v56, %v10357_v14 }
 0x2c5   : > { %2438 = vbcast.lane.b32.xlu1 %v11419_v57, 264  ;;  %2434 = vbcast.lane.b32.xlu0 %v11419_v57, 256 }
 0x2c6   : > { %16518 = vst [vmem:[#allocation260_spill] sm:$0xff] %v11439_v59 }
 0x2c7   : > { %v11427_v11 = vpop.permute.xlu1 %2130  ;;  %v11429_v1 = vpop.permute.xlu0 %2126 }
 0x2c8   : > { %16514 = vst [vmem:[#allocation256_spill] sm:$0xff] %v11427_v11  ;;  %16515 = vst [vmem:[#allocation257_spill] sm:$0xff] %v11429_v1  ;;  %v11449_v1 = vrot.slane %v11103_v56, %v10376_v25 }
 0x2c9   : > { %2449 = vbcast.lane.b32.xlu1 %v11425_v19, 264  ;;  %2445 = vbcast.lane.b32.xlu0 %v11425_v19, 256 }
 0x2ca   : > { %16521 = vst [vmem:[#allocation263_spill] sm:$0xff] %v11449_v1 }
 0x2cb   : > { %v11433_v31 = vpop.permute.xlu1 %2141  ;;  %v11435_v46 = vpop.permute.xlu0 %2137 }
 0x2cc   : > { %16516 = vst [vmem:[#allocation258_spill] sm:$0xff] %v11433_v31  ;;  %16517 = vst [vmem:[#allocation259_spill] sm:$0xff] %v11435_v46  ;;  %v11459_v46 = vrot.slane %v11103_v56, %v10389_v32 }
 0x2cd   : > { %2460 = vbcast.lane.b32.xlu1 %v11439_v59, 264  ;;  %2456 = vbcast.lane.b32.xlu0 %v11439_v59, 256 }
 0x2ce   : > { %16524 = vst [vmem:[#allocation266_spill] sm:$0xff] %v11459_v46 }
 0x2cf   : > { %v11443_v57 = vpop.permute.xlu1 %2152  ;;  %v11445_v11 = vpop.permute.xlu0 %2148 }
 0x2d0   : > { %16519 = vst [vmem:[#allocation261_spill] sm:$0xff] %v11443_v57  ;;  %16520 = vst [vmem:[#allocation262_spill] sm:$0xff] %v11445_v11  ;;  %v11469_v11 = vrot.slane %v11103_v56, %v10400_v37 }
 0x2d1   : > { %2471 = vbcast.lane.b32.xlu1 %v11449_v1, 264  ;;  %2467 = vbcast.lane.b32.xlu0 %v11449_v1, 256 }
 0x2d2   : > { %16527 = vst [vmem:[#allocation269_spill] sm:$0xff] %v11469_v11 }
 0x2d3   : > { %v11453_v19 = vpop.permute.xlu1 %2163  ;;  %v11455_v31 = vpop.permute.xlu0 %2159 }
 0x2d4   : > { %16522 = vst [vmem:[#allocation264_spill] sm:$0xff] %v11453_v19  ;;  %16523 = vst [vmem:[#allocation265_spill] sm:$0xff] %v11455_v31  ;;  %v11479_v31 = vrot.slane %v11103_v56, %v10409_v39 }
 0x2d5   : > { %2482 = vbcast.lane.b32.xlu1 %v11459_v46, 264  ;;  %2478 = vbcast.lane.b32.xlu0 %v11459_v46, 256 }
 0x2d6   : > { %16530 = vst [vmem:[#allocation272_spill] sm:$0xff] %v11479_v31 }
 0x2d7   : > { %v11463_v59 = vpop.permute.xlu1 %2174  ;;  %v11465_v57 = vpop.permute.xlu0 %2170 }
 0x2d8   : > { %16525 = vst [vmem:[#allocation267_spill] sm:$0xff] %v11463_v59  ;;  %16526 = vst [vmem:[#allocation268_spill] sm:$0xff] %v11465_v57  ;;  %v11489_v57 = vrot.slane %v11103_v56, %v10418_v41 }
 0x2d9   : > { %2493 = vbcast.lane.b32.xlu1 %v11469_v11, 264  ;;  %2489 = vbcast.lane.b32.xlu0 %v11469_v11, 256 }
 0x2da   : > { %16533 = vst [vmem:[#allocation275_spill] sm:$0xff] %v11489_v57 }
 0x2db   : > { %v11473_v1 = vpop.permute.xlu1 %2185  ;;  %v11475_v19 = vpop.permute.xlu0 %2181 }
 0x2dc   : > { %16528 = vst [vmem:[#allocation270_spill] sm:$0xff] %v11473_v1  ;;  %16529 = vst [vmem:[#allocation271_spill] sm:$0xff] %v11475_v19  ;;  %v11499_v19 = vrot.slane %v11103_v56, %v10427_v45 }
 0x2dd   : > { %2504 = vbcast.lane.b32.xlu1 %v11479_v31, 264  ;;  %2500 = vbcast.lane.b32.xlu0 %v11479_v31, 256  ;;  %v11505_v31 = vrot.slane %v11185_v27, %v10354_v13 }
 0x2de   : > { %16535 = vst [vmem:[#allocation277_spill] sm:$0xff] %v11499_v19 }
 0x2df   : > { %v11483_v46 = vpop.permute.xlu1 %2196  ;;  %v11485_v59 = vpop.permute.xlu0 %2192  ;;  %16536 = vst [vmem:[#allocation278_spill] sm:$0xff] %v11505_v31 }
 0x2e0   : > { %16531 = vst [vmem:[#allocation273_spill] sm:$0xff] %v11483_v46  ;;  %16532 = vst [vmem:[#allocation274_spill] sm:$0xff] %v11485_v59 }
 0x2e1   : > { %2515 = vbcast.lane.b32.xlu1 %v11489_v57, 264  ;;  %2511 = vbcast.lane.b32.xlu0 %v11489_v57, 256 }
 0x2e3   : > { %v11493_v11 = vpop.permute.xlu1 %2207  ;;  %v11495_v1 = vpop.permute.xlu0 %2203 }
 0x2e4   : > { %16534 = vst [vmem:[#allocation276_spill] sm:$0xff] %v11493_v11  ;;  %v11519_v11 = vrot.slane %v11185_v27, %v10357_v14 }
 0x2e5   : > { %2526 = vbcast.lane.b32.xlu1 %v11499_v19, 264  ;;  %2522 = vbcast.lane.b32.xlu0 %v11499_v19, 256 }
 0x2e6   : > { %16540 = vst [vmem:[#allocation282_spill] sm:$0xff] %v11519_v11 }
 0x2e7   : > { %v11507_v46 = vpop.permute.xlu1 %2218  ;;  %v11509_v59 = vpop.permute.xlu0 %2214 }
 0x2e8   : > { %16537 = vst [vmem:[#allocation279_spill] sm:$0xff] %v11507_v46  ;;  %16538 = vst [vmem:[#allocation280_spill] sm:$0xff] %v11509_v59  ;;  %v11529_v59 = vrot.slane %v11185_v27, %v10376_v25 }
 0x2e9   : > { %2537 = vbcast.lane.b32.xlu1 %v11505_v31, 264  ;;  %2533 = vbcast.lane.b32.xlu0 %v11505_v31, 256 }
 0x2ea   : > { %16542 = vst [vmem:[#allocation284_spill] sm:$0xff] %v11529_v59 }
 0x2eb   : > { %v11513_v57 = vpop.permute.xlu1 %2229  ;;  %v11515_v56 = vpop.permute.xlu0 %2225 }
 0x2ec   : > { %16539 = vst [vmem:[#allocation281_spill] sm:$0xff] %v11513_v57  ;;  %v11539_v57 = vrot.slane %v11185_v27, %v10389_v32 }
 0x2ed   : > { %2548 = vbcast.lane.b32.xlu1 %v11519_v11, 264  ;;  %2544 = vbcast.lane.b32.xlu0 %v11519_v11, 256 }
 0x2ee   : > { %16544 = vst [vmem:[#allocation286_spill] sm:$0xff] %v11539_v57 }
 0x2ef   : > { %v11523_v19 = vpop.permute.xlu1 %2240  ;;  %v11525_v46 = vpop.permute.xlu0 %2236 }
 0x2f0   : > { %16541 = vst [vmem:[#allocation283_spill] sm:$0xff] %v11523_v19  ;;  %v11549_v19 = vrot.slane %v11185_v27, %v10400_v37 }
 0x2f1   : > { %2559 = vbcast.lane.b32.xlu1 %v11529_v59, 264  ;;  %2555 = vbcast.lane.b32.xlu0 %v11529_v59, 256 }
 0x2f2   : > { %16547 = vst [vmem:[#allocation289_spill] sm:$0xff] %v11549_v19 }
 0x2f3   : > { %v11533_v31 = vpop.permute.xlu1 %2251  ;;  %v11535_v14 = vpop.permute.xlu0 %2247 }
 0x2f4   : > { %16543 = vst [vmem:[#allocation285_spill] sm:$0xff] %v11533_v31  ;;  %v11559_v31 = vrot.slane %v11185_v27, %v10409_v39  ;;  %v11577_v39 = vrot.slane %v11185_v27, %v10427_v45 }
 0x2f5   : > { %2570 = vbcast.lane.b32.xlu1 %v11539_v57, 264  ;;  %2566 = vbcast.lane.b32.xlu0 %v11539_v57, 256 }
 0x2f6   : > { %16550 = vst [vmem:[#allocation292_spill] sm:$0xff] %v11559_v31  ;;  %16555 = vst [vmem:[#allocation297_spill] sm:$0xff] %v11577_v39 }
 0x2f7   : > { %v11543_v11 = vpop.permute.xlu1 %2262  ;;  %v11545_v25 = vpop.permute.xlu0 %2258 }
 0x2f8   : > { %16545 = vst [vmem:[#allocation287_spill] sm:$0xff] %v11543_v11  ;;  %16546 = vst [vmem:[#allocation288_spill] sm:$0xff] %v11545_v25  ;;  %v11569_v11 = vrot.slane %v11185_v27, %v10418_v41 }
 0x2f9   : > { %2581 = vbcast.lane.b32.xlu1 %v11549_v19, 264  ;;  %2577 = vbcast.lane.b32.xlu0 %v11549_v19, 256 }
 0x2fa   : > { %16553 = vst [vmem:[#allocation295_spill] sm:$0xff] %v11569_v11 }
 0x2fb   : > { %v11553_v59 = vpop.permute.xlu1 %2273  ;;  %v11555_v32 = vpop.permute.xlu0 %2269 }
 0x2fc   : > { %16548 = vst [vmem:[#allocation290_spill] sm:$0xff] %v11553_v59  ;;  %16549 = vst [vmem:[#allocation291_spill] sm:$0xff] %v11555_v32 }
 0x2fd   : > { %2592 = vbcast.lane.b32.xlu1 %v11559_v31, 264  ;;  %2588 = vbcast.lane.b32.xlu0 %v11559_v31, 256  ;;  %v10188_v31 = vmov 1966171168  }
 0x2ff   : > { %v11563_v57 = vpop.permute.xlu1 %2284  ;;  %v11565_v37 = vpop.permute.xlu0 %2280 }
 0x300   : > { %16551 = vst [vmem:[#allocation293_spill] sm:$0xff] %v11563_v57  ;;  %16552 = vst [vmem:[#allocation294_spill] sm:$0xff] %v11565_v37  ;;  %v426_v57 = vunpack.c.l.s4 %v10188_v31 }
 0x301   : > { %2603 = vbcast.lane.b32.xlu1 %v11569_v11, 264  ;;  %2599 = vbcast.lane.b32.xlu0 %v11569_v11, 256 }
 0x302   : > { %v427_v32 = vunpack.c.0.s8 %v426_v57 }
 0x303   : > { %v11573_v19 = vpop.permute.xlu0 %2291  ;;  %v11579_v59 = vpop.permute.xlu1 %2295 }
 0x304   : > { %16554 = vst [vmem:[#allocation296_spill] sm:$0xff] %v11573_v19  ;;  %16556 = vst [vmem:[#allocation298_spill] sm:$0xff] %v11579_v59  ;;  %v11590_v19 = vsub.s32 %v427_v32, %v10337_v63 }
 0x305   : > { %2614 = vbcast.lane.b32.xlu1 %v11577_v39, 264  ;;  %2610 = vbcast.lane.b32.xlu0 %v11577_v39, 256 }
 0x306   : > { %v431_v59 = vrot.slane %v10359_v18, %v11590_v19 }
 0x307   : > { %v11583_v41 = vpop.permute.xlu0 %2302  ;;  %v11585_v37 = vpop.permute.xlu1 %2306 }
 0x308   : > { %16557 = vst [vmem:[#allocation299_spill] sm:$0xff] %v11583_v41  ;;  %16558 = vst [vmem:[#allocation300_spill] sm:$0xff] %v11585_v37  ;;  %v439_v31 = vcombine.high %v431_v59, %v431_v59  ;;  %v447_v41 = vrot.slane %v431_v59, %v11590_v19  ;;  %v16225_v37 = vmov 0.0  }
 0x30a   : > { %v461_v57 = vrot.slane %v439_v31, %v11590_v19 }
 0x30b   : > { %v11587_v11 = vpop.permute.xlu0 %2313  ;;  %v11592_v45 = vpop.permute.xlu1 %2317 }
 0x30c   : > { %16559 = vst [vmem:[#allocation301_spill] sm:$0xff] %v11587_v11  ;;  %16560 = vst [vmem:[#allocation302_spill] sm:$0xff] %v11592_v45  ;;  %v2619_v11 = vrot.slane %v447_v41, %v10354_v13  ;;  %v469_v45 = vcombine.high %v447_v41, %v447_v41 }
 0x30e   : > { %vm3256_vm0 = vcmp.gt.f32.partialorder %v2619_v11, %v10577_v29  ;;  %vm3257_vm3 = vcmp.gt.f32.partialorder %v2619_v11, %v10587_v43 }
 0x30f   : > { %v11594_v27 = vpop.permute.xlu0 %2324  ;;  %v11598_v39 = vpop.permute.xlu1 %2328  ;;  %v9764_v59 = vsel %vm3256_vm0, 1.0, %v16225_v37 }
 0x310   : > { %16561 = vst [vmem:[#allocation303_spill] sm:$0xff] %v11594_v27  ;;  %16562 = vst [vmem:[#allocation304_spill] sm:$0xff] %v11598_v39  ;;  %v2623_v27 = vrot.slane %v461_v57, %v10354_v13  ;;  %v424_v39 = vcombine.high %v10359_v18, %v10359_v18  ;;  %v471_v18 = vcombine.high %v461_v57, %v461_v57 }
 0x312   : > { %vm3258_vm2 = vcmp.gt.f32.partialorder %v2623_v27, %v10575_v28  ;;  %v438_v29 = vrot.slane %v424_v39, %v11590_v19  ;;  %vm3259_vm4 = vcmp.gt.f32.partialorder %v2623_v27, %v10585_v42  ;;  %v9765_v28 = vsel %vm3257_vm3, 1.0, %v16225_v37 }
 0x313   : > { %v11601_v25 = vpop.permute.xlu0 %2335  ;;  %v11605_v63 = vpop.permute.xlu1 %2339  ;;  %v9766_v41 = vsel %vm3258_vm2, 1.0, %v16225_v37  ;;  %v2631_v39 = vrot.slane %v471_v18, %v10354_v13  ;;  %v9767_v57 = vsel %vm3259_vm4, 1.0, %v16225_v37 }
 0x314   : > { %16563 = vst [vmem:[#allocation305_spill] sm:$0xff] %v11601_v25  ;;  %16564 = vst [vmem:[#allocation306_spill] sm:$0xff] %v11605_v63  ;;  %v2627_v25 = vrot.slane %v469_v45, %v10354_v13  ;;  %v454_v11 = vrot.slane %v438_v29, %v11590_v19  ;;  %v4031_v43 = vsel %vm16259_vm1, %v9766_v41, 0.0  ;;  %v4028_v45 = vsel %vm16259_vm1, %v9765_v28, 0.0 }
 0x315   : > { %vm3262_vm7 = vcmp.gt.f32.partialorder %v2631_v39, %v10609_v10  ;;  %v4034_v27 = vsel %vm16259_vm1, %v9767_v57, 0.0  ;;  %vm3263_vm8 = vcmp.gt.f32.partialorder %v2631_v39, %v10607_v8 }
 0x316   : > { %vm3260_vm5 = vcmp.gt.f32.partialorder %v2627_v25, %v10603_v2  ;;  %vm3261_vm6 = vcmp.gt.f32.partialorder %v2627_v25, %v10601_v0  ;;  %v2635_v18 = vrot.slane %v454_v11, %v10354_v13  ;;  %v9770_v0 = vsel %vm3262_vm7, 1.0, %v16225_v37 }
 0x317   : > { %v11608_v32 = vpop.permute.xlu0 %2346  ;;  %v11616_v31 = vpop.permute.xlu1 %2350  ;;  %v9768_v2 = vsel %vm3260_vm5, 1.0, %v16225_v37  ;;  %v9769_v41 = vsel %vm3261_vm6, 1.0, %v16225_v37  ;;  %v9771_v57 = vsel %vm3263_vm8, 1.0, %v16225_v37 }
 0x318   : > { %16565 = vst [vmem:[#allocation307_spill] sm:$0xff] %v11608_v32  ;;  %v4025_v32 = vsel %vm16259_vm1, %v9764_v59, 0.0  ;;  %vm3264_vm9 = vcmp.gt.f32.partialorder %v2635_v18, %v10619_v34  ;;  %v4040_v28 = vsel %vm16259_vm1, %v9769_v41, 0.0  ;;  %vm3265_vm10 = vcmp.gt.f32.partialorder %v2635_v18, %v10617_v22 }
 0x319   : > { %v9772_v8 = vsel %vm3264_vm9, 1.0, %v16225_v37  ;;  %v4046_v39 = vsel %vm16259_vm1, %v9771_v57, 0.0  ;;  %v9773_v22 = vsel %vm3265_vm10, 1.0, %v16225_v37 }
 0x31a   : > { %v4052_v41 = vsel %vm16259_vm1, %v9773_v22, 0.0 }
 0x31b   : > { %v11619_v63 = vpop.permute.xlu0 %2357  ;;  %v11630_v59 = vpop.permute.xlu1 %2361 }
 0x31c   : > { %16566 = vst [vmem:[#allocation308_spill] sm:$0xff] %v11619_v63  ;;  %v440_v63 = vcombine.high %v438_v29, %v438_v29  ;;  %v4037_v29 = vsel %vm16259_vm1, %v9768_v2, 0.0 }
 0x31f   : > { %v11635_v42 = vpop.permute.xlu0 %2368  ;;  %v11647_v25 = vpop.permute.xlu1 %2372 }
 0x323   : > { %v11649_v10 = vpop.permute.xlu0 %2379 }
 0x324   : > { %4026 = vadd.xlane.f32.xlu0 %v4025_v32  ;;  %v468_v32 = vrot.slane %v440_v63, %v11590_v19 }
 0x326   : > { %v2639_v63 = vrot.slane %v468_v32, %v10354_v13  ;;  %v472_v34 = vcombine.high %v468_v32, %v468_v32 }
 0x327   : > { %v11667_v18 = vpop.permute.xlu0 %2390 }
 0x328   : > { %4032 = vadd.xlane.f32.xlu0 %v4031_v43  ;;  %v470_v43 = vcombine.high %v454_v11, %v454_v11  ;;  %vm3266_vm11 = vcmp.gt.f32.partialorder %v2639_v63, %v10631_v55  ;;  %v480_v11 = vrot.slane %v10373_v24, %v11590_v19  ;;  %vm3267_vm12 = vcmp.gt.f32.partialorder %v2639_v63, %v10629_v58 }
 0x329   : > { %4029 = vadd.xlane.f32.xlu1 %v4028_v45  ;;  %v4043_v45 = vsel %vm16259_vm1, %v9770_v0, 0.0  ;;  %v9774_v55 = vsel %vm3266_vm11, 1.0, %v16225_v37  ;;  %v2647_v32 = vrot.slane %v472_v34, %v10354_v13 }
 0x32a   : > { %v2643_v2 = vrot.slane %v470_v43, %v10354_v13  ;;  %v496_v0 = vrot.slane %v480_v11, %v11590_v19  ;;  %v4055_v43 = vsel %vm16259_vm1, %v9774_v55, 0.0 }
 0x32b   : > { %vm3270_vm15 = vcmp.gt.f32.partialorder %v2647_v32, %v10651_v48  ;;  %v11681_v63 = vpop.permute.xlu0 %2401  ;;  %vm3271_vm0 = vcmp.gt.f32.partialorder %v2647_v32, %v10649_v49 }
 0x32c   : > { %4035 = vadd.xlane.f32.xlu0 %v4034_v27  ;;  %v11662_v27 = vpop.permute.xlu1 %2383  ;;  %vm3268_vm13 = vcmp.gt.f32.partialorder %v2643_v2, %v10641_v52  ;;  %vm3269_vm14 = vcmp.gt.f32.partialorder %v2643_v2, %v10639_v53  ;;  %v9778_v48 = vsel %vm3270_vm15, 1.0, %v16225_v37  ;;  %v473_v2 = vcombine.high %v10373_v24, %v10373_v24 }
 0x32d   : > { %4038 = vadd.xlane.f32.xlu1 %v4037_v29  ;;  %v4049_v29 = vsel %vm16259_vm1, %v9772_v8, 0.0  ;;  %v9776_v58 = vsel %vm3268_vm13, 1.0, %v16225_v37  ;;  %v2651_v8 = vrot.slane %v496_v0, %v10354_v13  ;;  %v9777_v53 = vsel %vm3269_vm14, 1.0, %v16225_v37 }
 0x32e   : > { %v518_v22 = vcombine.high %v496_v0, %v496_v0  ;;  %v9779_v49 = vsel %vm3271_vm0, 1.0, %v16225_v37 }
 0x32f   : > { %vm3272_vm2 = vcmp.gt.f32.partialorder %v2651_v8, %v10733_v3  ;;  %vm3273_vm3 = vcmp.gt.f32.partialorder %v2651_v8, %v10731_v26  ;;  %v11700_v32 = vpop.permute.xlu0 %2412  ;;  %v4070_v0 = vsel %vm16259_vm1, %v9779_v49, 0.0 }
 0x330   : > { %4041 = vadd.xlane.f32.xlu0 %v4040_v28  ;;  %v488_v28 = vcombine.high %v480_v11, %v480_v11  ;;  %v11679_v52 = vpop.permute.xlu1 %2394  ;;  %v4064_v11 = vsel %vm16259_vm1, %v9777_v53, 0.0  ;;  %v9780_v3 = vsel %vm3272_vm2, 1.0, %v16225_v37 }
 0x331   : > { %4044 = vadd.xlane.f32.xlu1 %v4043_v45  ;;  %v9775_v45 = vsel %vm3267_vm12, 1.0, %v16225_v37 }
 0x332   : > { %v4058_v57 = vsel %vm16259_vm1, %v9775_v45, 0.0  ;;  %v510_v34 = vrot.slane %v488_v28, %v11590_v19  ;;  %v487_v28 = vrot.slane %v473_v2, %v11590_v19 }
 0x334   : > { %4047 = vadd.xlane.f32.xlu0 %v4046_v39  ;;  %v4061_v39 = vsel %vm16259_vm1, %v9776_v58, 0.0  ;;  %v11695_v55 = vpop.permute.xlu1 %2405  ;;  %v520_v45 = vcombine.high %v510_v34, %v510_v34  ;;  %v4073_v58 = vsel %vm16259_vm1, %v9780_v3, 0.0  ;;  %v503_v8 = vrot.slane %v487_v28, %v11590_v19 }
 0x335   : > { %4050 = vadd.xlane.f32.xlu1 %v4049_v29  ;;  %v2655_v29 = vrot.slane %v510_v34, %v10354_v13 }
 0x336   : > { %v2663_v53 = vrot.slane %v520_v45, %v10354_v13 }
 0x337   : > { %vm3274_vm4 = vcmp.gt.f32.partialorder %v2655_v29, %v10743_v61  ;;  %vm3275_vm5 = vcmp.gt.f32.partialorder %v2655_v29, %v10741_v7  ;;  %v2667_v29 = vrot.slane %v503_v8, %v10354_v13 }
 0x338   : > { %4053 = vadd.xlane.f32.xlu0 %v4052_v41  ;;  %v4067_v41 = vsel %vm16259_vm1, %v9778_v48, 0.0  ;;  %v9782_v26 = vsel %vm3274_vm4, 1.0, %v16225_v37  ;;  %v11712_v61 = vpop.permute.xlu1 %2416  ;;  %v489_v48 = vcombine.high %v487_v28, %v487_v28  ;;  %v9783_v7 = vsel %vm3275_vm5, 1.0, %v16225_v37 }
 0x339   : > { %4056 = vadd.xlane.f32.xlu1 %v4055_v43  ;;  %v2659_v43 = vrot.slane %v518_v22, %v10354_v13  ;;  %v4079_v2 = vsel %vm16259_vm1, %v9782_v26, 0.0  ;;  %vm3278_vm8 = vcmp.gt.f32.partialorder %v2663_v53, %v10767_v60  ;;  %vm3279_vm9 = vcmp.gt.f32.partialorder %v2663_v53, %v10765_v38 }
 0x33a   : > { %v517_v22 = vrot.slane %v489_v48, %v11590_v19  ;;  %v9786_v60 = vsel %vm3278_vm8, 1.0, %v16225_v37  ;;  %vm3280_vm10 = vcmp.gt.f32.partialorder %v2667_v29, %v10775_v21  ;;  %vm3281_vm11 = vcmp.gt.f32.partialorder %v2667_v29, %v10773_v20 }
 0x33b   : > { %vm3276_vm6 = vcmp.gt.f32.partialorder %v2659_v43, %v10753_v47  ;;  %vm3277_vm7 = vcmp.gt.f32.partialorder %v2659_v43, %v10751_v4  ;;  %v519_v43 = vcombine.high %v503_v8, %v503_v8  ;;  %v4091_v45 = vsel %vm16259_vm1, %v9786_v60, 0.0 }
 0x33c   : > { %4059 = vadd.xlane.f32.xlu0 %v4058_v57  ;;  %v9781_v57 = vsel %vm3273_vm3, 1.0, %v16225_v37  ;;  %v9784_v47 = vsel %vm3276_vm6, 1.0, %v16225_v37  ;;  %v9785_v3 = vsel %vm3277_vm7, 1.0, %v16225_v37  ;;  %v9788_v38 = vsel %vm3280_vm10, 1.0, %v16225_v37 }
 0x33d   : > { %4062 = vadd.xlane.f32.xlu1 %v4061_v39  ;;  %v11715_v39 = vpop.permute.xlu0 %2423  ;;  %v4076_v34 = vsel %vm16259_vm1, %v9781_v57, 0.0  ;;  %v4085_v49 = vsel %vm16259_vm1, %v9784_v47, 0.0  ;;  %v4088_v28 = vsel %vm16259_vm1, %v9785_v3, 0.0  ;;  %v529_v21 = vrot.slane %v10382_v30, %v11590_v19 }
 0x33e   : > { %v521_v53 = vcombine.high %v517_v22, %v517_v22  ;;  %v4097_v20 = vsel %vm16259_vm1, %v9788_v38, 0.0  ;;  %v9789_v48 = vsel %vm3281_vm11, 1.0, %v16225_v37 }
 0x340   : > { %4065 = vadd.xlane.f32.xlu0 %v4064_v11  ;;  %v4082_v11 = vsel %vm16259_vm1, %v9783_v7, 0.0  ;;  %v4100_v7 = vsel %vm16259_vm1, %v9789_v48, 0.0  ;;  %v2679_v47 = vrot.slane %v521_v53, %v10354_v13 }
 0x341   : > { %4068 = vadd.xlane.f32.xlu1 %v4067_v41  ;;  %v11727_v41 = vpop.permute.xlu1 %2427  ;;  %v11732_v4 = vpop.permute.xlu0 %2434 }
 0x342   : > { %vm3286_vm0 = vcmp.gt.f32.partialorder %v2679_v47, %v10805_v5  ;;  %vm3287_vm2 = vcmp.gt.f32.partialorder %v2679_v47, %v10803_v44  ;;  %v522_v5 = vcombine.high %v10382_v30, %v10382_v30 }
 0x344   : > { %4071 = vadd.xlane.f32.xlu0 %v4070_v0  ;;  %v2671_v0 = vrot.slane %v517_v22, %v10354_v13  ;;  %v536_v53 = vrot.slane %v522_v5, %v11590_v19 }
 0x345   : > { %4074 = vadd.xlane.f32.xlu1 %v4073_v58  ;;  %v9787_v58 = vsel %vm3279_vm9, 1.0, %v16225_v37  ;;  %v11743_v57 = vpop.permute.xlu1 %2438  ;;  %v11747_v26 = vpop.permute.xlu0 %2445 }
 0x346   : > { %vm3282_vm12 = vcmp.gt.f32.partialorder %v2671_v0, %v10785_v6  ;;  %v4094_v8 = vsel %vm16259_vm1, %v9787_v58, 0.0  ;;  %vm3283_vm13 = vcmp.gt.f32.partialorder %v2671_v0, %v10783_v50 }
 0x347   : > { %v9790_v6 = vsel %vm3282_vm12, 1.0, %v16225_v37 }
 0x348   : > { %4077 = vadd.xlane.f32.xlu0 %v4076_v34  ;;  %v2675_v34 = vrot.slane %v519_v43, %v10354_v13  ;;  %v4103_v22 = vsel %vm16259_vm1, %v9790_v6, 0.0 }
 0x349   : > { %4080 = vadd.xlane.f32.xlu1 %v4079_v2  ;;  %v545_v2 = vrot.slane %v529_v21, %v11590_v19  ;;  %v11759_v29 = vpop.permute.xlu1 %2449  ;;  %v11764_v50 = vpop.permute.xlu0 %2456 }
 0x34a   : > { %vm3284_vm14 = vcmp.gt.f32.partialorder %v2675_v34, %v10795_v62  ;;  %vm3285_vm15 = vcmp.gt.f32.partialorder %v2675_v34, %v10793_v40  ;;  %v9794_v40 = vsel %vm3286_vm0, 1.0, %v16225_v37  ;;  %v9795_v34 = vsel %vm3287_vm2, 1.0, %v16225_v37 }
 0x34b   : > { %v9792_v62 = vsel %vm3284_vm14, 1.0, %v16225_v37  ;;  %v2683_v60 = vrot.slane %v545_v2, %v10354_v13  ;;  %v9793_v43 = vsel %vm3285_vm15, 1.0, %v16225_v37  ;;  %v4115_v44 = vsel %vm16259_vm1, %v9794_v40, 0.0 }
 0x34c   : > { %4083 = vadd.xlane.f32.xlu0 %v4082_v11  ;;  %v537_v11 = vcombine.high %v529_v21, %v529_v21  ;;  %v4109_v0 = vsel %vm16259_vm1, %v9792_v62, 0.0  ;;  %v4112_v38 = vsel %vm16259_vm1, %v9793_v43, 0.0  ;;  %v538_v62 = vcombine.high %v536_v53, %v536_v53 }
 0x34d   : > { %4086 = vadd.xlane.f32.xlu1 %v4085_v49  ;;  %v9791_v49 = vsel %vm3283_vm13, 1.0, %v16225_v37  ;;  %vm3288_vm3 = vcmp.gt.f32.partialorder %v2683_v60, %v10815_v9  ;;  %v11780_v58 = vpop.permute.xlu0 %2467  ;;  %vm3289_vm4 = vcmp.gt.f32.partialorder %v2683_v60, %v10813_v36 }
 0x34e   : > { %v4106_v3 = vsel %vm16259_vm1, %v9791_v49, 0.0  ;;  %v9796_v9 = vsel %vm3288_vm3, 1.0, %v16225_v37  ;;  %v9797_v47 = vsel %vm3289_vm4, 1.0, %v16225_v37  ;;  %v566_v5 = vrot.slane %v538_v62, %v11590_v19 }
 0x350   : > { %4089 = vadd.xlane.f32.xlu0 %v4088_v28  ;;  %v559_v28 = vrot.slane %v537_v11, %v11590_v19  ;;  %v552_v11 = vrot.slane %v536_v53, %v11590_v19 }
 0x351   : > { %4092 = vadd.xlane.f32.xlu1 %v4091_v45  ;;  %v11776_v45 = vpop.permute.xlu1 %2460  ;;  %v11797_v36 = vpop.permute.xlu0 %2478 }
 0x352   : > { %v2687_v21 = vrot.slane %v559_v28, %v10354_v13  ;;  %v569_v6 = vcombine.high %v559_v28, %v559_v28  ;;  %v16567_v28 = vld [vmem:[#allocation86_spill] sm:$0xff]  ;;  %v2699_v40 = vrot.slane %v552_v11, %v10354_v13  ;;  %v568_v53 = vcombine.high %v552_v11, %v552_v11 }
 0x354   : > { %4095 = vadd.xlane.f32.xlu0 %v4094_v8  ;;  %v567_v8 = vcombine.high %v545_v2, %v545_v2  ;;  %vm3290_vm5 = vcmp.gt.f32.partialorder %v2687_v21, %v10825_v15  ;;  %vm3291_vm6 = vcmp.gt.f32.partialorder %v2687_v21, %v10823_v33  ;;  %v2695_v49 = vrot.slane %v569_v6, %v10354_v13  ;;  %v16568_v21 = vld [vmem:[#allocation85_spill] sm:$0xff] }
 0x355   : > { %4098 = vadd.xlane.f32.xlu1 %v4097_v20  ;;  %v4118_v20 = vsel %vm16259_vm1, %v9795_v34, 0.0  ;;  %v11792_v2 = vpop.permute.xlu1 %2471  ;;  %v9798_v15 = vsel %vm3290_vm5, 1.0, %v16225_v37  ;;  %v9799_v60 = vsel %vm3291_vm6, 1.0, %v16225_v37 }
 0x356   : > { %v2691_v48 = vrot.slane %v567_v8, %v10354_v13  ;;  %vm3294_vm9 = vcmp.gt.f32.partialorder %v2695_v49, %v16567_v28  ;;  %v4130_v43 = vsel %vm16259_vm1, %v9799_v60, 0.0  ;;  %vm3295_vm10 = vcmp.gt.f32.partialorder %v2695_v49, %v16568_v21  ;;  %v16572_v49 = vld [vmem:[#allocation11_spill] sm:$0xff] }
 0x357   : > { %v9802_v8 = vsel %vm3294_vm9, 1.0, %v16225_v37  ;;  %v9803_v6 = vsel %vm3295_vm10, 1.0, %v16225_v37  ;;  %v578_v62 = vrot.slane %v16572_v49, %v11590_v19  ;;  %v570_v60 = vcombine.high %v566_v5, %v566_v5 }
 0x358   : > { %4101 = vadd.xlane.f32.xlu0 %v4100_v7  ;;  %v4121_v7 = vsel %vm16259_vm1, %v9796_v9, 0.0  ;;  %vm3292_vm7 = vcmp.gt.f32.partialorder %v2691_v48, %v10835_v17  ;;  %vm3293_vm8 = vcmp.gt.f32.partialorder %v2691_v48, %v10833_v12  ;;  %v2703_v9 = vrot.slane %v566_v5, %v10354_v13 }
 0x359   : > { %4104 = vadd.xlane.f32.xlu1 %v4103_v22  ;;  %v4124_v22 = vsel %vm16259_vm1, %v9797_v47, 0.0  ;;  %v9800_v33 = vsel %vm3292_vm7, 1.0, %v16225_v37  ;;  %v11809_v17 = vpop.permute.xlu1 %2482  ;;  %v9801_v12 = vsel %vm3293_vm8, 1.0, %v16225_v37  ;;  %v4139_v48 = vsel %vm16259_vm1, %v9802_v8, 0.0 }
 0x35a   : > { %v4136_v34 = vsel %vm16259_vm1, %v9801_v12, 0.0  ;;  %v4142_v11 = vsel %vm16259_vm1, %v9803_v6, 0.0  ;;  %v594_v21 = vrot.slane %v578_v62, %v11590_v19 }
 0x35c   : > { %4107 = vadd.xlane.f32.xlu0 %v4106_v3  ;;  %v4127_v3 = vsel %vm16259_vm1, %v9798_v15, 0.0 }
 0x35d   : > { %4110 = vadd.xlane.f32.xlu1 %v4109_v0  ;;  %v11811_v0 = vpop.permute.xlu0 %2489 }
 0x360   : > { %4113 = vadd.xlane.f32.xlu0 %v4112_v38  ;;  %v4133_v38 = vsel %vm16259_vm1, %v9800_v33, 0.0 }
 0x361   : > { %4116 = vadd.xlane.f32.xlu1 %v4115_v44  ;;  %v16569_v44 = vld [vmem:[#allocation89_spill] sm:$0xff]  ;;  %v11828_v47 = vpop.permute.xlu0 %2500 }
 0x362   : > { %vm3296_vm11 = vcmp.gt.f32.partialorder %v2699_v40, %v16569_v44  ;;  %v2711_v44 = vrot.slane %v570_v60, %v10354_v13 }
 0x363   : > { %v9804_v15 = vsel %vm3296_vm11, 1.0, %v16225_v37 }
 0x364   : > { %4119 = vadd.xlane.f32.xlu0 %v4118_v20  ;;  %v11823_v20 = vpop.permute.xlu1 %2493  ;;  %v4145_v33 = vsel %vm16259_vm1, %v9804_v15, 0.0 }
 0x365   : > { %4122 = vadd.xlane.f32.xlu1 %v4121_v7  ;;  %v16570_v7 = vld [vmem:[#allocation88_spill] sm:$0xff]  ;;  %v11844_v8 = vpop.permute.xlu0 %2511 }
 0x366   : > { %vm3297_vm12 = vcmp.gt.f32.partialorder %v2699_v40, %v16570_v7  ;;  %v16576_v7 = vld [vmem:[#allocation98_spill] sm:$0xff] }
 0x367   : > { %v9805_v28 = vsel %vm3297_vm12, 1.0, %v16225_v37  ;;  %vm3302_vm2 = vcmp.gt.f32.partialorder %v2711_v44, %v16576_v7  ;;  %v16580_v7 = vld [vmem:[#allocation104_spill] sm:$0xff] }
 0x368   : > { %4125 = vadd.xlane.f32.xlu0 %v4124_v22  ;;  %v16571_v22 = vld [vmem:[#allocation92_spill] sm:$0xff]  ;;  %v11841_v12 = vpop.permute.xlu1 %2504  ;;  %v4148_v5 = vsel %vm16259_vm1, %v9805_v28, 0.0  ;;  %v16577_v28 = vld [vmem:[#allocation97_spill] sm:$0xff] }
 0x369   : > { %4128 = vadd.xlane.f32.xlu1 %v4127_v3  ;;  %vm3298_vm13 = vcmp.gt.f32.partialorder %v2703_v9, %v16571_v22  ;;  %v2707_v3 = vrot.slane %v568_v53, %v10354_v13  ;;  %v2715_v22 = vrot.slane %v594_v21, %v10354_v13  ;;  %vm3303_vm3 = vcmp.gt.f32.partialorder %v2711_v44, %v16577_v28 }
 0x36a   : > { %v9806_v40 = vsel %vm3298_vm13, 1.0, %v16225_v37  ;;  %v9811_v44 = vsel %vm3303_vm3, 1.0, %v16225_v37 }
 0x36b   : > { %v4151_v53 = vsel %vm16259_vm1, %v9806_v40, 0.0  ;;  %v16578_v40 = vld [vmem:[#allocation101_spill] sm:$0xff] }
 0x36c   : > { %4131 = vadd.xlane.f32.xlu0 %v4130_v43  ;;  %v16573_v43 = vld [vmem:[#allocation91_spill] sm:$0xff]  ;;  %v11856_v60 = vpop.permute.xlu1 %2515  ;;  %vm3304_vm4 = vcmp.gt.f32.partialorder %v2715_v22, %v16578_v40 }
 0x36d   : > { %4134 = vadd.xlane.f32.xlu1 %v4133_v38  ;;  %vm3299_vm14 = vcmp.gt.f32.partialorder %v2703_v9, %v16573_v43  ;;  %v16574_v38 = vld [vmem:[#allocation95_spill] sm:$0xff]  ;;  %v9810_v43 = vsel %vm3302_vm2, 1.0, %v16225_v37 }
 0x36e   : > { %vm3300_vm15 = vcmp.gt.f32.partialorder %v2707_v3, %v16574_v38  ;;  %v9807_v9 = vsel %vm3299_vm14, 1.0, %v16225_v37  ;;  %v571_v38 = vcombine.high %v16572_v49, %v16572_v49  ;;  %v16585_v49 = vld [vmem:[#allocation110_spill] sm:$0xff] }
 0x36f   : > { %v9808_v6 = vsel %vm3300_vm15, 1.0, %v16225_v37  ;;  %v4154_v15 = vsel %vm16259_vm1, %v9807_v9, 0.0  ;;  %v4163_v9 = vsel %vm16259_vm1, %v9810_v43, 0.0 }
 0x370   : > { %4137 = vadd.xlane.f32.xlu0 %v4136_v34  ;;  %v586_v34 = vcombine.high %v578_v62, %v578_v62  ;;  %v4157_v62 = vsel %vm16259_vm1, %v9808_v6, 0.0  ;;  %v9812_v6 = vsel %vm3304_vm4, 1.0, %v16225_v37 }
 0x371   : > { %4140 = vadd.xlane.f32.xlu1 %v4139_v48  ;;  %v16575_v48 = vld [vmem:[#allocation94_spill] sm:$0xff]  ;;  %v4169_v40 = vsel %vm16259_vm1, %v9812_v6, 0.0 }
 0x372   : > { %vm3301_vm0 = vcmp.gt.f32.partialorder %v2707_v3, %v16575_v48  ;;  %v11861_v3 = vpop.permute.xlu0 %2522  ;;  %v16579_v48 = vld [vmem:[#allocation100_spill] sm:$0xff] }
 0x373   : > { %vm3305_vm5 = vcmp.gt.f32.partialorder %v2715_v22, %v16579_v48  ;;  %v16582_v48 = vld [vmem:[#allocation107_spill] sm:$0xff] }
 0x374   : > { %4143 = vadd.xlane.f32.xlu0 %v4142_v11  ;;  %v608_v11 = vrot.slane %v586_v34, %v11590_v19  ;;  %v9813_v22 = vsel %vm3305_vm5, 1.0, %v16225_v37 }
 0x375   : > { %4146 = vadd.xlane.f32.xlu1 %v4145_v33  ;;  %v9809_v33 = vsel %vm3301_vm0, 1.0, %v16225_v37 }
 0x376   : > { %v2719_v34 = vrot.slane %v608_v11, %v10354_v13  ;;  %v618_v43 = vcombine.high %v608_v11, %v608_v11 }
 0x378   : > { %4149 = vadd.xlane.f32.xlu0 %v4148_v5  ;;  %v4160_v5 = vsel %vm16259_vm1, %v9809_v33, 0.0  ;;  %vm3306_vm6 = vcmp.gt.f32.partialorder %v2719_v34, %v16580_v7  ;;  %v11877_v33 = vpop.permute.xlu0 %2533  ;;  %v4172_v7 = vsel %vm16259_vm1, %v9813_v22, 0.0 }
 0x379   : > { %4152 = vadd.xlane.f32.xlu1 %v4151_v53  ;;  %v616_v53 = vcombine.high %v594_v21, %v594_v21  ;;  %v4166_v21 = vsel %vm16259_vm1, %v9811_v44, 0.0  ;;  %v2727_v44 = vrot.slane %v618_v43, %v10354_v13 }
 0x37b   : > { %v2723_v28 = vrot.slane %v616_v53, %v10354_v13  ;;  %vm3311_vm11 = vcmp.gt.f32.partialorder %v2727_v44, %v16585_v49  ;;  %v16587_v49 = vld [vmem:[#allocation113_spill] sm:$0xff] }
 0x37c   : > { %4155 = vadd.xlane.f32.xlu0 %v4154_v15  ;;  %v11874_v15 = vpop.permute.xlu1 %2526 }
 0x37d   : > { %4158 = vadd.xlane.f32.xlu1 %v4157_v62  ;;  %v585_v62 = vrot.slane %v571_v38, %v11590_v19  ;;  %vm3308_vm8 = vcmp.gt.f32.partialorder %v2723_v28, %v16582_v48  ;;  %v16584_v48 = vld [vmem:[#allocation111_spill] sm:$0xff] }
 0x37e   : > { %vm3310_vm10 = vcmp.gt.f32.partialorder %v2727_v44, %v16584_v48 }
 0x37f   : > { %v601_v38 = vrot.slane %v585_v62, %v11590_v19  ;;  %v587_v53 = vcombine.high %v585_v62, %v585_v62 }
 0x380   : > { %4161 = vadd.xlane.f32.xlu0 %v4160_v5  ;;  %v16581_v5 = vld [vmem:[#allocation103_spill] sm:$0xff]  ;;  %v11889_v11 = vpop.permute.xlu1 %2537 }
 0x381   : > { %4164 = vadd.xlane.f32.xlu1 %v4163_v9  ;;  %vm3307_vm7 = vcmp.gt.f32.partialorder %v2719_v34, %v16581_v5  ;;  %v9814_v9 = vsel %vm3306_vm6, 1.0, %v16225_v37  ;;  %v16583_v34 = vld [vmem:[#allocation106_spill] sm:$0xff]  ;;  %v9816_v5 = vsel %vm3308_vm8, 1.0, %v16225_v37  ;;  %v2731_v62 = vrot.slane %v601_v38, %v10354_v13 }
 0x382   : > { %v4175_v6 = vsel %vm16259_vm1, %v9814_v9, 0.0  ;;  %vm3309_vm9 = vcmp.gt.f32.partialorder %v2723_v28, %v16583_v34  ;;  %v615_v43 = vrot.slane %v587_v53, %v11590_v19  ;;  %v4181_v9 = vsel %vm16259_vm1, %v9816_v5, 0.0 }
 0x383   : > { %v9818_v28 = vsel %vm3310_vm10, 1.0, %v16225_v37  ;;  %vm3312_vm12 = vcmp.gt.f32.partialorder %v2731_v62, %v10939_v35  ;;  %v617_v48 = vcombine.high %v601_v38, %v601_v38  ;;  %vm3313_vm13 = vcmp.gt.f32.partialorder %v2731_v62, %v16587_v49  ;;  %v16588_v35 = vld [vmem:[#allocation116_spill] sm:$0xff] }
 0x384   : > { %4167 = vadd.xlane.f32.xlu0 %v4166_v21  ;;  %v9815_v21 = vsel %vm3307_vm7, 1.0, %v16225_v37  ;;  %v2735_v53 = vrot.slane %v615_v43, %v10354_v13  ;;  %v4187_v5 = vsel %vm16259_vm1, %v9818_v28, 0.0  ;;  %v9820_v44 = vsel %vm3312_vm12, 1.0, %v16225_v37 }
 0x385   : > { %4170 = vadd.xlane.f32.xlu1 %v4169_v40  ;;  %v11894_v40 = vpop.permute.xlu0 %2544  ;;  %v4178_v22 = vsel %vm16259_vm1, %v9815_v21, 0.0  ;;  %v2739_v24 = vrot.slane %v617_v48, %v10354_v13  ;;  %v619_v38 = vcombine.high %v615_v43, %v615_v43  ;;  %v4193_v28 = vsel %vm16259_vm1, %v9820_v44, 0.0 }
 0x386   : > { %vm3314_vm14 = vcmp.gt.f32.partialorder %v2735_v53, %v16588_v35  ;;  %v9821_v62 = vsel %vm3313_vm13, 1.0, %v16225_v37 }
 0x387   : > { %v9822_v35 = vsel %vm3314_vm14, 1.0, %v16225_v37  ;;  %v4196_v43 = vsel %vm16259_vm1, %v9821_v62, 0.0  ;;  %v2743_v48 = vrot.slane %v619_v38, %v10354_v13 }
 0x388   : > { %4173 = vadd.xlane.f32.xlu0 %v4172_v7  ;;  %v9817_v7 = vsel %vm3309_vm9, 1.0, %v16225_v37  ;;  %v4199_v44 = vsel %vm16259_vm1, %v9822_v35, 0.0 }
 0x389   : > { %4176 = vadd.xlane.f32.xlu1 %v4175_v6  ;;  %v11906_v6 = vpop.permute.xlu1 %2548  ;;  %v11908_v34 = vpop.permute.xlu0 %2555  ;;  %v4184_v21 = vsel %vm16259_vm1, %v9817_v7, 0.0 }
 0x38a   : > { %16586 = vst [vmem:[#allocation86_spill] sm:$0xff] %v11908_v34  ;;  %v16593_v34 = vld [vmem:[#allocation119_spill] sm:$0xff] }
 0x38b   : > { %vm3316_vm0 = vcmp.gt.f32.partialorder %v2739_v24, %v16593_v34 }
 0x38c   : > { %4179 = vadd.xlane.f32.xlu0 %v4178_v22  ;;  %v9819_v22 = vsel %vm3311_vm11, 1.0, %v16225_v37 }
 0x38d   : > { %4182 = vadd.xlane.f32.xlu1 %v4181_v9  ;;  %v16589_v9 = vld [vmem:[#allocation16_spill] sm:$0xff]  ;;  %v4190_v7 = vsel %vm16259_vm1, %v9819_v22, 0.0  ;;  %v11926_v49 = vpop.permute.xlu0 %2566 }
 0x38e   : > { %v627_v30 = vrot.slane %v16589_v9, %v11590_v19  ;;  %16592 = vst [vmem:[#allocation89_spill] sm:$0xff] %v11926_v49 }
 0x390   : > { %4185 = vadd.xlane.f32.xlu0 %v4184_v21  ;;  %v11921_v21 = vpop.permute.xlu1 %2559  ;;  %v643_v22 = vrot.slane %v627_v30, %v11590_v19 }
 0x391   : > { %4188 = vadd.xlane.f32.xlu1 %v4187_v5  ;;  %16590 = vst [vmem:[#allocation85_spill] sm:$0xff] %v11921_v21  ;;  %v16591_v5 = vld [vmem:[#allocation115_spill] sm:$0xff]  ;;  %v11940_v49 = vpop.permute.xlu0 %2577 }
 0x392   : > { %vm3315_vm15 = vcmp.gt.f32.partialorder %v2735_v53, %v16591_v5  ;;  %v16594_v53 = vld [vmem:[#allocation118_spill] sm:$0xff]  ;;  %16597 = vst [vmem:[#allocation92_spill] sm:$0xff] %v11940_v49 }
 0x393   : > { %v9823_v21 = vsel %vm3315_vm15, 1.0, %v16225_v37  ;;  %vm3317_vm2 = vcmp.gt.f32.partialorder %v2739_v24, %v16594_v53  ;;  %v16595_v5 = vld [vmem:[#allocation122_spill] sm:$0xff]  ;;  %v16599_v53 = vld [vmem:[#allocation125_spill] sm:$0xff] }
 0x394   : > { %4191 = vadd.xlane.f32.xlu0 %v4190_v7  ;;  %v635_v7 = vcombine.high %v627_v30, %v627_v30  ;;  %vm3318_vm3 = vcmp.gt.f32.partialorder %v2743_v48, %v16595_v5  ;;  %v11938_v34 = vpop.permute.xlu1 %2570  ;;  %v4202_v62 = vsel %vm16259_vm1, %v9823_v21, 0.0  ;;  %v2747_v30 = vrot.slane %v643_v22, %v10354_v13 }
 0x395   : > { %4194 = vadd.xlane.f32.xlu1 %v4193_v28  ;;  %v9824_v28 = vsel %vm3316_vm0, 1.0, %v16225_v37  ;;  %16596 = vst [vmem:[#allocation88_spill] sm:$0xff] %v11938_v34  ;;  %v9825_v24 = vsel %vm3317_vm2, 1.0, %v16225_v37  ;;  %v620_v5 = vcombine.high %v16589_v9, %v16589_v9  ;;  %v16603_v9 = vld [vmem:[#allocation128_spill] sm:$0xff] }
 0x396   : > { %v657_v38 = vrot.slane %v635_v7, %v11590_v19  ;;  %v4205_v35 = vsel %vm16259_vm1, %v9824_v28, 0.0  ;;  %vm3320_vm5 = vcmp.gt.f32.partialorder %v2747_v30, %v16599_v53  ;;  %v4208_v21 = vsel %vm16259_vm1, %v9825_v24, 0.0 }
 0x397   : > { %v665_v7 = vcombine.high %v643_v22, %v643_v22  ;;  %v9828_v53 = vsel %vm3320_vm5, 1.0, %v16225_v37  ;;  %v634_v24 = vrot.slane %v620_v5, %v11590_v19 }
 0x398   : > { %4197 = vadd.xlane.f32.xlu0 %v4196_v43  ;;  %v16598_v43 = vld [vmem:[#allocation121_spill] sm:$0xff]  ;;  %v2751_v49 = vrot.slane %v657_v38, %v10354_v13 }
 0x399   : > { %4200 = vadd.xlane.f32.xlu1 %v4199_v44  ;;  %vm3319_vm4 = vcmp.gt.f32.partialorder %v2743_v48, %v16598_v43  ;;  %v9826_v44 = vsel %vm3318_vm3, 1.0, %v16225_v37  ;;  %v11959_v43 = vpop.permute.xlu0 %2588  ;;  %v650_v5 = vrot.slane %v634_v24, %v11590_v19 }
 0x39a   : > { %v4211_v28 = vsel %vm16259_vm1, %v9826_v44, 0.0  ;;  %v9827_v48 = vsel %vm3319_vm4, 1.0, %v16225_v37  ;;  %16602 = vst [vmem:[#allocation95_spill] sm:$0xff] %v11959_v43  ;;  %vm3322_vm7 = vcmp.gt.f32.partialorder %v2751_v49, %v16603_v9  ;;  %v4217_v44 = vsel %vm16259_vm1, %v9828_v53, 0.0 }
 0x39b   : > { %v4214_v22 = vsel %vm16259_vm1, %v9827_v48, 0.0  ;;  %v636_v53 = vcombine.high %v634_v24, %v634_v24 }
 0x39c   : > { %4203 = vadd.xlane.f32.xlu0 %v4202_v62  ;;  %v11954_v62 = vpop.permute.xlu1 %2581 }
 0x39d   : > { %4206 = vadd.xlane.f32.xlu1 %v4205_v35  ;;  %16600 = vst [vmem:[#allocation91_spill] sm:$0xff] %v11954_v62  ;;  %v16601_v35 = vld [vmem:[#allocation124_spill] sm:$0xff]  ;;  %v2755_v62 = vrot.slane %v665_v7, %v10354_v13  ;;  %v11974_v48 = vpop.permute.xlu0 %2599 }
 0x39e   : > { %vm3321_vm6 = vcmp.gt.f32.partialorder %v2747_v30, %v16601_v35  ;;  %v16604_v30 = vld [vmem:[#allocation127_spill] sm:$0xff]  ;;  %16607 = vst [vmem:[#allocation98_spill] sm:$0xff] %v11974_v48  ;;  %v2763_v48 = vrot.slane %v650_v5, %v10354_v13 }
 0x39f   : > { %v9829_v34 = vsel %vm3321_vm6, 1.0, %v16225_v37  ;;  %vm3323_vm8 = vcmp.gt.f32.partialorder %v2751_v49, %v16604_v30  ;;  %v16605_v35 = vld [vmem:[#allocation131_spill] sm:$0xff] }
 0x3a0   : > { %4209 = vadd.xlane.f32.xlu0 %v4208_v21  ;;  %v667_v21 = vcombine.high %v657_v38, %v657_v38  ;;  %vm3324_vm9 = vcmp.gt.f32.partialorder %v2755_v62, %v16605_v35  ;;  %v11971_v9 = vpop.permute.xlu1 %2592  ;;  %v4220_v38 = vsel %vm16259_vm1, %v9829_v34, 0.0  ;;  %v9831_v49 = vsel %vm3323_vm8, 1.0, %v16225_v37  ;;  %v16609_v35 = vld [vmem:[#allocation134_spill] sm:$0xff] }
 0x3a1   : > { %4212 = vadd.xlane.f32.xlu1 %v4211_v28  ;;  %v9830_v28 = vsel %vm3322_vm7, 1.0, %v16225_v37  ;;  %16606 = vst [vmem:[#allocation94_spill] sm:$0xff] %v11971_v9  ;;  %v9832_v30 = vsel %vm3324_vm9, 1.0, %v16225_v37  ;;  %v4226_v9 = vsel %vm16259_vm1, %v9831_v49, 0.0  ;;  %v664_v34 = vrot.slane %v636_v53, %v11590_v19 }
 0x3a2   : > { %v2759_v7 = vrot.slane %v667_v21, %v10354_v13  ;;  %v4229_v24 = vsel %vm16259_vm1, %v9832_v30, 0.0 }
 0x3a3   : > { %v2767_v53 = vrot.slane %v664_v34, %v10354_v13 }
 0x3a4   : > { %4215 = vadd.xlane.f32.xlu0 %v4214_v22  ;;  %v4223_v22 = vsel %vm16259_vm1, %v9830_v28, 0.0  ;;  %vm3326_vm11 = vcmp.gt.f32.partialorder %v2759_v7, %v16609_v35  ;;  %v11986_v21 = vpop.permute.xlu1 %2603  ;;  %v666_v35 = vcombine.high %v650_v5, %v650_v5 }
 0x3a5   : > { %4218 = vadd.xlane.f32.xlu1 %v4217_v44  ;;  %v16608_v44 = vld [vmem:[#allocation130_spill] sm:$0xff]  ;;  %16610 = vst [vmem:[#allocation97_spill] sm:$0xff] %v11986_v21 }
 0x3a6   : > { %vm3325_vm10 = vcmp.gt.f32.partialorder %v2755_v62, %v16608_v44  ;;  %v11991_v62 = vpop.permute.xlu0 %2610  ;;  %v16613_v44 = vld [vmem:[#allocation139_spill] sm:$0xff]  ;;  %v16614_v21 = vld [vmem:[#allocation138_spill] sm:$0xff]  ;;  %v2771_v5 = vrot.slane %v666_v35, %v10354_v13 }
 0x3a7   : > { %v9833_v28 = vsel %vm3325_vm10, 1.0, %v16225_v37  ;;  %16612 = vst [vmem:[#allocation101_spill] sm:$0xff] %v11991_v62  ;;  %vm3328_vm13 = vcmp.gt.f32.partialorder %v2763_v48, %v16613_v44  ;;  %vm3329_vm14 = vcmp.gt.f32.partialorder %v2763_v48, %v16614_v21 }
 0x3a8   : > { %4221 = vadd.xlane.f32.xlu0 %v4220_v38  ;;  %v16611_v38 = vld [vmem:[#allocation133_spill] sm:$0xff]  ;;  %v4232_v49 = vsel %vm16259_vm1, %v9833_v28, 0.0  ;;  %v12004_v44 = vpop.permute.xlu1 %2614  ;;  %v668_v28 = vcombine.high %v664_v34, %v664_v34  ;;  %v9837_v21 = vsel %vm3329_vm14, 1.0, %v16225_v37  ;;  %v16621_v34 = vld [vmem:[#allocation144_spill] sm:$0xff] }
 0x3a9   : > { %4224 = vadd.xlane.f32.xlu1 %v4223_v22  ;;  %vm3327_vm12 = vcmp.gt.f32.partialorder %v2759_v7, %v16611_v38  ;;  %v9834_v22 = vsel %vm3326_vm11, 1.0, %v16225_v37  ;;  %v16616_v38 = vld [vmem:[#allocation141_spill] sm:$0xff]  ;;  %16617 = vst [vmem:[#allocation104_spill] sm:$0xff] %v12004_v44  ;;  %vm3332_vm2 = vcmp.gt.f32.partialorder %v2771_v5, %v16621_v34  ;;  %v4244_v44 = vsel %vm16259_vm1, %v9837_v21, 0.0 }
 0x3aa   : > { %v9835_v30 = vsel %vm3327_vm12, 1.0, %v16225_v37  ;;  %vm3330_vm15 = vcmp.gt.f32.partialorder %v2767_v53, %v16616_v38  ;;  %v2775_v35 = vrot.slane %v668_v28, %v10354_v13  ;;  %v9840_v34 = vsel %vm3332_vm2, 1.0, %v16225_v37 }
 0x3ab   : > { %v4238_v62 = vsel %vm16259_vm1, %v9835_v30, 0.0  ;;  %v9838_v38 = vsel %vm3330_vm15, 1.0, %v16225_v37 }
 0x3ac   : > { %4227 = vadd.xlane.f32.xlu0 %v4226_v9  ;;  %v4235_v9 = vsel %vm16259_vm1, %v9834_v22, 0.0  ;;  %v16618_v22 = vld [vmem:[#allocation25_spill] sm:$0xff]  ;;  %v4247_v43 = vsel %vm16259_vm1, %v9838_v38, 0.0  ;;  %v4253_v38 = vsel %vm16259_vm1, %v9840_v34, 0.0 }
 0x3ad   : > { %4230 = vadd.xlane.f32.xlu1 %v4229_v24  ;;  %v9836_v24 = vsel %vm3328_vm13, 1.0, %v16225_v37 }
 0x3ae   : > { %v4241_v48 = vsel %vm16259_vm1, %v9836_v24, 0.0 }
 0x3b0   : > { %4233 = vadd.xlane.f32.xlu0 %v4232_v49  ;;  %v676_v49 = vrot.slane %v16618_v22, %v11590_v19 }
 0x3b1   : > { %v12000_v7 = vpop.xlane.xlu0 %4026  ;;  %4236 = vadd.xlane.f32.xlu1 %v4235_v9  ;;  %v16619_v9 = vld [vmem:[#allocation140_spill] sm:$0xff] }
 0x3b2   : > { %16615 = vst [vmem:[#allocation100_spill] sm:$0xff] %v12000_v7  ;;  %vm3331_vm0 = vcmp.gt.f32.partialorder %v2767_v53, %v16619_v9  ;;  %v684_v24 = vcombine.high %v676_v49, %v676_v49  ;;  %v16623_v9 = vld [vmem:[#allocation143_spill] sm:$0xff] }
 0x3b3   : > { %v9839_v53 = vsel %vm3331_vm0, 1.0, %v16225_v37  ;;  %vm3333_vm3 = vcmp.gt.f32.partialorder %v2771_v5, %v16623_v9  ;;  %v16627_v9 = vld [vmem:[#allocation146_spill] sm:$0xff] }
 0x3b4   : > { %4239 = vadd.xlane.f32.xlu0 %v4238_v62  ;;  %v692_v62 = vrot.slane %v676_v49, %v11590_v19  ;;  %v4250_v21 = vsel %vm16259_vm1, %v9839_v53, 0.0  ;;  %v9841_v5 = vsel %vm3333_vm3, 1.0, %v16225_v37  ;;  %vm3335_vm5 = vcmp.gt.f32.partialorder %v2775_v35, %v16627_v9 }
 0x3b5   : > { %v12013_v7 = vpop.xlane.xlu0 %4032  ;;  %4242 = vadd.xlane.f32.xlu1 %v4241_v48  ;;  %v669_v53 = vcombine.high %v16618_v22, %v16618_v22  ;;  %v9843_v9 = vsel %vm3335_vm5, 1.0, %v16225_v37 }
 0x3b6   : > { %16620 = vst [vmem:[#allocation103_spill] sm:$0xff] %v12013_v7  ;;  %v12017_v30 = vpop.xlane.xlu1 %4029  ;;  %v16625_v7 = vld [vmem:[#allocation147_spill] sm:$0xff]  ;;  %v2779_v49 = vrot.slane %v692_v62, %v10354_v13 }
 0x3b7   : > { %16622 = vst [vmem:[#allocation107_spill] sm:$0xff] %v12017_v30  ;;  %vm3334_vm4 = vcmp.gt.f32.partialorder %v2775_v35, %v16625_v7 }
 0x3b8   : > { %4245 = vadd.xlane.f32.xlu0 %v4244_v44  ;;  %v706_v44 = vrot.slane %v684_v24, %v11590_v19  ;;  %v9842_v7 = vsel %vm3334_vm4, 1.0, %v16225_v37  ;;  %v4256_v24 = vsel %vm16259_vm1, %v9841_v5, 0.0  ;;  %v683_v5 = vrot.slane %v669_v53, %v11590_v19 }
 0x3b9   : > { %v12025_v48 = vpop.xlane.xlu0 %4035  ;;  %4248 = vadd.xlane.f32.xlu1 %v4247_v43  ;;  %v4259_v35 = vsel %vm16259_vm1, %v9842_v7, 0.0 }
 0x3ba   : > { %16624 = vst [vmem:[#allocation106_spill] sm:$0xff] %v12025_v48  ;;  %v12029_v28 = vpop.xlane.xlu1 %4038  ;;  %v16629_v48 = vld [vmem:[#allocation150_spill] sm:$0xff]  ;;  %v2783_v34 = vrot.slane %v706_v44, %v10354_v13  ;;  %v716_v7 = vcombine.high %v706_v44, %v706_v44 }
 0x3bb   : > { %16626 = vst [vmem:[#allocation111_spill] sm:$0xff] %v12029_v28  ;;  %vm3336_vm6 = vcmp.gt.f32.partialorder %v2779_v49, %v16629_v48 }
 0x3bc   : > { %4251 = vadd.xlane.f32.xlu0 %v4250_v21  ;;  %v714_v21 = vcombine.high %v692_v62, %v692_v62  ;;  %v9844_v48 = vsel %vm3336_vm6, 1.0, %v16225_v37  ;;  %v4262_v62 = vsel %vm16259_vm1, %v9843_v9, 0.0  ;;  %v699_v9 = vrot.slane %v683_v5, %v11590_v19 }
 0x3bd   : > { %v12037_v43 = vpop.xlane.xlu0 %4041  ;;  %4254 = vadd.xlane.f32.xlu1 %v4253_v38  ;;  %v16631_v38 = vld [vmem:[#allocation149_spill] sm:$0xff]  ;;  %v4265_v30 = vsel %vm16259_vm1, %v9844_v48, 0.0  ;;  %v685_v48 = vcombine.high %v683_v5, %v683_v5 }
 0x3be   : > { %16628 = vst [vmem:[#allocation110_spill] sm:$0xff] %v12037_v43  ;;  %v12041_v28 = vpop.xlane.xlu1 %4044  ;;  %vm3337_vm7 = vcmp.gt.f32.partialorder %v2779_v49, %v16631_v38  ;;  %v16635_v38 = vld [vmem:[#allocation152_spill] sm:$0xff]  ;;  %v2795_v5 = vrot.slane %v699_v9, %v10354_v13 }
 0x3bf   : > { %16630 = vst [vmem:[#allocation113_spill] sm:$0xff] %v12041_v28  ;;  %v16633_v28 = vld [vmem:[#allocation153_spill] sm:$0xff]  ;;  %v9845_v49 = vsel %vm3337_vm7, 1.0, %v16225_v37  ;;  %vm3339_vm9 = vcmp.gt.f32.partialorder %v2783_v34, %v16635_v38  ;;  %v16639_v38 = vld [vmem:[#allocation155_spill] sm:$0xff] }
 0x3c0   : > { %4257 = vadd.xlane.f32.xlu0 %v4256_v24  ;;  %vm3338_vm8 = vcmp.gt.f32.partialorder %v2783_v34, %v16633_v28  ;;  %v2787_v24 = vrot.slane %v714_v21, %v10354_v13  ;;  %v4268_v44 = vsel %vm16259_vm1, %v9845_v49, 0.0  ;;  %v2791_v21 = vrot.slane %v716_v7, %v10354_v13 }
 0x3c1   : > { %v12050_v43 = vpop.xlane.xlu0 %4047  ;;  %4260 = vadd.xlane.f32.xlu1 %v4259_v35  ;;  %v9846_v28 = vsel %vm3338_vm8, 1.0, %v16225_v37  ;;  %v9847_v34 = vsel %vm3339_vm9, 1.0, %v16225_v37  ;;  %v713_v7 = vrot.slane %v685_v48, %v11590_v19 }
 0x3c2   : > { %16632 = vst [vmem:[#allocation116_spill] sm:$0xff] %v12050_v43  ;;  %v12054_v22 = vpop.xlane.xlu1 %4050  ;;  %vm3341_vm11 = vcmp.gt.f32.partialorder %v2787_v24, %v16639_v38  ;;  %v4274_v49 = vsel %vm16259_vm1, %v9847_v34, 0.0  ;;  %v16645_v38 = vld [vmem:[#allocation164_spill] sm:$0xff] }
 0x3c3   : > { %16634 = vst [vmem:[#allocation115_spill] sm:$0xff] %v12054_v22  ;;  %v16637_v22 = vld [vmem:[#allocation156_spill] sm:$0xff]  ;;  %vm3344_vm14 = vcmp.gt.f32.partialorder %v2795_v5, %v16645_v38  ;;  %v2799_v48 = vrot.slane %v713_v7, %v10354_v13  ;;  %v16649_v38 = vld [vmem:[#allocation166_spill] sm:$0xff] }
 0x3c4   : > { %4263 = vadd.xlane.f32.xlu0 %v4262_v62  ;;  %vm3340_vm10 = vcmp.gt.f32.partialorder %v2787_v24, %v16637_v22  ;;  %v4271_v62 = vsel %vm16259_vm1, %v9846_v28, 0.0  ;;  %v9849_v24 = vsel %vm3341_vm11, 1.0, %v16225_v37 }
 0x3c5   : > { %v12062_v35 = vpop.xlane.xlu0 %4053  ;;  %4266 = vadd.xlane.f32.xlu1 %v4265_v30  ;;  %v9848_v22 = vsel %vm3340_vm10, 1.0, %v16225_v37  ;;  %v4280_v34 = vsel %vm16259_vm1, %v9849_v24, 0.0  ;;  %vm3346_vm0 = vcmp.gt.f32.partialorder %v2799_v48, %v16649_v38  ;;  %v717_v24 = vcombine.high %v713_v7, %v713_v7  ;;  %v16654_v7 = vld [vmem:[#allocation169_spill] sm:$0xff] }
 0x3c6   : > { %16636 = vst [vmem:[#allocation119_spill] sm:$0xff] %v12062_v35  ;;  %v12066_v53 = vpop.xlane.xlu1 %4056  ;;  %v4277_v28 = vsel %vm16259_vm1, %v9848_v22, 0.0  ;;  %v9854_v38 = vsel %vm3346_vm0, 1.0, %v16225_v37 }
 0x3c7   : > { %16638 = vst [vmem:[#allocation118_spill] sm:$0xff] %v12066_v53  ;;  %v16641_v53 = vld [vmem:[#allocation159_spill] sm:$0xff]  ;;  %v4295_v43 = vsel %vm16259_vm1, %v9854_v38, 0.0 }
 0x3c8   : > { %4269 = vadd.xlane.f32.xlu0 %v4268_v44  ;;  %vm3342_vm12 = vcmp.gt.f32.partialorder %v2791_v21, %v16641_v53  ;;  %v16643_v44 = vld [vmem:[#allocation158_spill] sm:$0xff] }
 0x3c9   : > { %v12074_v30 = vpop.xlane.xlu0 %4059  ;;  %4272 = vadd.xlane.f32.xlu1 %v4271_v62  ;;  %vm3343_vm13 = vcmp.gt.f32.partialorder %v2791_v21, %v16643_v44  ;;  %v9850_v53 = vsel %vm3342_vm12, 1.0, %v16225_v37  ;;  %v16647_v21 = vld [vmem:[#allocation163_spill] sm:$0xff] }
 0x3ca   : > { %16640 = vst [vmem:[#allocation122_spill] sm:$0xff] %v12074_v30  ;;  %v12078_v35 = vpop.xlane.xlu1 %4062  ;;  %v4283_v22 = vsel %vm16259_vm1, %v9850_v53, 0.0  ;;  %v9851_v30 = vsel %vm3343_vm13, 1.0, %v16225_v37  ;;  %vm3345_vm15 = vcmp.gt.f32.partialorder %v2795_v5, %v16647_v21  ;;  %v16651_v53 = vld [vmem:[#allocation34_spill] sm:$0xff] }
 0x3cb   : > { %16642 = vst [vmem:[#allocation121_spill] sm:$0xff] %v12078_v35  ;;  %v9853_v21 = vsel %vm3345_vm15, 1.0, %v16225_v37 }
 0x3cc   : > { %4275 = vadd.xlane.f32.xlu0 %v4274_v49  ;;  %v715_v49 = vcombine.high %v699_v9, %v699_v9 }
 0x3cd   : > { %v12086_v62 = vpop.xlane.xlu0 %4065  ;;  %4278 = vadd.xlane.f32.xlu1 %v4277_v28  ;;  %v9852_v28 = vsel %vm3344_vm14, 1.0, %v16225_v37 }
 0x3ce   : > { %16644 = vst [vmem:[#allocation125_spill] sm:$0xff] %v12086_v62  ;;  %v12090_v35 = vpop.xlane.xlu1 %4068  ;;  %v4286_v62 = vsel %vm16259_vm1, %v9851_v30, 0.0  ;;  %v2803_v9 = vrot.slane %v715_v49, %v10354_v13  ;;  %v4289_v5 = vsel %vm16259_vm1, %v9852_v28, 0.0  ;;  %v2807_v49 = vrot.slane %v717_v24, %v10354_v13 }
 0x3cf   : > { %16646 = vst [vmem:[#allocation124_spill] sm:$0xff] %v12090_v35 }
 0x3d0   : > { %4281 = vadd.xlane.f32.xlu0 %v4280_v34  ;;  %v725_v34 = vrot.slane %v16651_v53, %v11590_v19  ;;  %vm3348_vm3 = vcmp.gt.f32.partialorder %v2803_v9, %v16654_v7 }
 0x3d1   : > { %v12097_v44 = vpop.xlane.xlu0 %4071  ;;  %4284 = vadd.xlane.f32.xlu1 %v4283_v22  ;;  %v16652_v22 = vld [vmem:[#allocation165_spill] sm:$0xff]  ;;  %v9856_v7 = vsel %vm3348_vm3, 1.0, %v16225_v37 }
 0x3d2   : > { %16648 = vst [vmem:[#allocation128_spill] sm:$0xff] %v12097_v44  ;;  %v12101_v35 = vpop.xlane.xlu1 %4074  ;;  %vm3347_vm2 = vcmp.gt.f32.partialorder %v2799_v48, %v16652_v22  ;;  %v733_v28 = vcombine.high %v725_v34, %v725_v34  ;;  %v16656_v22 = vld [vmem:[#allocation168_spill] sm:$0xff]  ;;  %v4301_v38 = vsel %vm16259_vm1, %v9856_v7, 0.0 }
 0x3d3   : > { %16650 = vst [vmem:[#allocation127_spill] sm:$0xff] %v12101_v35  ;;  %v4292_v35 = vsel %vm16259_vm1, %v9853_v21, 0.0  ;;  %v9855_v48 = vsel %vm3347_vm2, 1.0, %v16225_v37  ;;  %vm3349_vm4 = vcmp.gt.f32.partialorder %v2803_v9, %v16656_v22  ;;  %v16660_v22 = vld [vmem:[#allocation171_spill] sm:$0xff] }
 0x3d4   : > { %4287 = vadd.xlane.f32.xlu0 %v4286_v62  ;;  %v741_v62 = vrot.slane %v725_v34, %v11590_v19  ;;  %v4298_v21 = vsel %vm16259_vm1, %v9855_v48, 0.0  ;;  %v9857_v9 = vsel %vm3349_vm4, 1.0, %v16225_v37  ;;  %vm3351_vm6 = vcmp.gt.f32.partialorder %v2807_v49, %v16660_v22 }
 0x3d5   : > { %v12110_v44 = vpop.xlane.xlu0 %4077  ;;  %4290 = vadd.xlane.f32.xlu1 %v4289_v5  ;;  %v718_v48 = vcombine.high %v16651_v53, %v16651_v53  ;;  %v9859_v22 = vsel %vm3351_vm6, 1.0, %v16225_v37 }
 0x3d6   : > { %16653 = vst [vmem:[#allocation131_spill] sm:$0xff] %v12110_v44  ;;  %v12114_v30 = vpop.xlane.xlu1 %4080  ;;  %v2811_v34 = vrot.slane %v741_v62, %v10354_v13 }
 0x3d7   : > { %16655 = vst [vmem:[#allocation130_spill] sm:$0xff] %v12114_v30  ;;  %v16658_v30 = vld [vmem:[#allocation172_spill] sm:$0xff] }
 0x3d8   : > { %4293 = vadd.xlane.f32.xlu0 %v4292_v35  ;;  %vm3350_vm5 = vcmp.gt.f32.partialorder %v2807_v49, %v16658_v30  ;;  %v755_v35 = vrot.slane %v733_v28, %v11590_v19  ;;  %v4304_v28 = vsel %vm16259_vm1, %v9857_v9, 0.0  ;;  %v732_v9 = vrot.slane %v718_v48, %v11590_v19 }
 0x3d9   : > { %v12122_v5 = vpop.xlane.xlu0 %4083  ;;  %4296 = vadd.xlane.f32.xlu1 %v4295_v43  ;;  %v9858_v30 = vsel %vm3350_vm5, 1.0, %v16225_v37 }
 0x3da   : > { %16657 = vst [vmem:[#allocation134_spill] sm:$0xff] %v12122_v5  ;;  %v12126_v24 = vpop.xlane.xlu1 %4086  ;;  %v16662_v5 = vld [vmem:[#allocation175_spill] sm:$0xff]  ;;  %v2815_v7 = vrot.slane %v755_v35, %v10354_v13  ;;  %v4307_v49 = vsel %vm16259_vm1, %v9858_v30, 0.0  ;;  %v765_v30 = vcombine.high %v755_v35, %v755_v35 }
 0x3db   : > { %16659 = vst [vmem:[#allocation133_spill] sm:$0xff] %v12126_v24  ;;  %vm3352_vm7 = vcmp.gt.f32.partialorder %v2811_v34, %v16662_v5 }
 0x3dc   : > { %4299 = vadd.xlane.f32.xlu0 %v4298_v21  ;;  %v763_v21 = vcombine.high %v741_v62, %v741_v62  ;;  %v9860_v5 = vsel %vm3352_vm7, 1.0, %v16225_v37  ;;  %v4310_v62 = vsel %vm16259_vm1, %v9859_v22, 0.0  ;;  %v748_v22 = vrot.slane %v732_v9, %v11590_v19 }
 0x3dd   : > { %v12134_v43 = vpop.xlane.xlu0 %4089  ;;  %4302 = vadd.xlane.f32.xlu1 %v4301_v38  ;;  %v16664_v38 = vld [vmem:[#allocation174_spill] sm:$0xff]  ;;  %v4313_v44 = vsel %vm16259_vm1, %v9860_v5, 0.0  ;;  %v734_v5 = vcombine.high %v732_v9, %v732_v9 }
 0x3de   : > { %16661 = vst [vmem:[#allocation139_spill] sm:$0xff] %v12134_v43  ;;  %v12138_v24 = vpop.xlane.xlu1 %4092  ;;  %vm3353_vm8 = vcmp.gt.f32.partialorder %v2811_v34, %v16664_v38  ;;  %v16667_v38 = vld [vmem:[#allocation177_spill] sm:$0xff]  ;;  %v2827_v9 = vrot.slane %v748_v22, %v10354_v13 }
 0x3df   : > { %16663 = vst [vmem:[#allocation138_spill] sm:$0xff] %v12138_v24  ;;  %v16665_v24 = vld [vmem:[#allocation178_spill] sm:$0xff]  ;;  %v9861_v34 = vsel %vm3353_vm8, 1.0, %v16225_v37  ;;  %vm3355_vm10 = vcmp.gt.f32.partialorder %v2815_v7, %v16667_v38  ;;  %v16671_v38 = vld [vmem:[#allocation180_spill] sm:$0xff] }
 0x3e0   : > { %4305 = vadd.xlane.f32.xlu0 %v4304_v28  ;;  %vm3354_vm9 = vcmp.gt.f32.partialorder %v2815_v7, %v16665_v24  ;;  %v2819_v28 = vrot.slane %v763_v21, %v10354_v13  ;;  %v4316_v35 = vsel %vm16259_vm1, %v9861_v34, 0.0  ;;  %v2823_v21 = vrot.slane %v765_v30, %v10354_v13 }
 0x3e1   : > { %v12147_v43 = vpop.xlane.xlu0 %4095  ;;  %4308 = vadd.xlane.f32.xlu1 %v4307_v49  ;;  %v9862_v24 = vsel %vm3354_vm9, 1.0, %v16225_v37  ;;  %v9863_v7 = vsel %vm3355_vm10, 1.0, %v16225_v37  ;;  %v762_v30 = vrot.slane %v734_v5, %v11590_v19  ;;  %vm3360_vm15 = vcmp.gt.f32.partialorder %v2827_v9, %v11189_v54  ;;  %v16680_v54 = vld [vmem:[#allocation190_spill] sm:$0xff] }
 0x3e2   : > { %v12151_v53 = vpop.xlane.xlu1 %4098  ;;  %vm3357_vm12 = vcmp.gt.f32.partialorder %v2819_v28, %v16671_v38  ;;  %v4322_v34 = vsel %vm16259_vm1, %v9863_v7, 0.0 }
 0x3e3   : > { %16666 = vst [vmem:[#allocation141_spill] sm:$0xff] %v12151_v53  ;;  %v16669_v53 = vld [vmem:[#allocation181_spill] sm:$0xff]  ;;  %v2831_v5 = vrot.slane %v762_v30, %v10354_v13 }
 0x3e4   : > { %4311 = vadd.xlane.f32.xlu0 %v4310_v62  ;;  %vm3356_vm11 = vcmp.gt.f32.partialorder %v2819_v28, %v16669_v53  ;;  %v4319_v62 = vsel %vm16259_vm1, %v9862_v24, 0.0  ;;  %v9865_v28 = vsel %vm3357_vm12, 1.0, %v16225_v37 }
 0x3e5   : > { %v12159_v49 = vpop.xlane.xlu0 %4101  ;;  %4314 = vadd.xlane.f32.xlu1 %v4313_v44  ;;  %v9864_v53 = vsel %vm3356_vm11, 1.0, %v16225_v37  ;;  %v4328_v7 = vsel %vm16259_vm1, %v9865_v28, 0.0  ;;  %vm3362_vm2 = vcmp.gt.f32.partialorder %v2831_v5, %v16680_v54  ;;  %v766_v28 = vcombine.high %v762_v30, %v762_v30  ;;  %v16685_v30 = vld [vmem:[#allocation193_spill] sm:$0xff] }
 0x3e6   : > { %16668 = vst [vmem:[#allocation140_spill] sm:$0xff] %v12159_v49  ;;  %v12163_v48 = vpop.xlane.xlu1 %4104  ;;  %v4325_v24 = vsel %vm16259_vm1, %v9864_v53, 0.0  ;;  %v9870_v54 = vsel %vm3362_vm2, 1.0, %v16225_v37 }
 0x3e7   : > { %16670 = vst [vmem:[#allocation144_spill] sm:$0xff] %v12163_v48  ;;  %v16673_v48 = vld [vmem:[#allocation184_spill] sm:$0xff] }
 0x3e8   : > { %4317 = vadd.xlane.f32.xlu0 %v4316_v35  ;;  %vm3358_vm13 = vcmp.gt.f32.partialorder %v2823_v21, %v16673_v48  ;;  %v16675_v35 = vld [vmem:[#allocation183_spill] sm:$0xff] }
 0x3e9   : > { %v12171_v44 = vpop.xlane.xlu0 %4107  ;;  %4320 = vadd.xlane.f32.xlu1 %v4319_v62  ;;  %vm3359_vm14 = vcmp.gt.f32.partialorder %v2823_v21, %v16675_v35  ;;  %v9866_v48 = vsel %vm3358_vm13, 1.0, %v16225_v37  ;;  %v16678_v21 = vld [vmem:[#allocation188_spill] sm:$0xff] }
 0x3ea   : > { %16672 = vst [vmem:[#allocation143_spill] sm:$0xff] %v12171_v44  ;;  %v12175_v49 = vpop.xlane.xlu1 %4110  ;;  %v4331_v53 = vsel %vm16259_vm1, %v9866_v48, 0.0  ;;  %vm3361_vm0 = vcmp.gt.f32.partialorder %v2827_v9, %v16678_v21  ;;  %v16682_v48 = vld [vmem:[#allocation44_spill] sm:$0xff]  ;;  %v4343_v44 = vsel %vm16259_vm1, %v9870_v54, 0.0 }
 0x3eb   : > { %16674 = vst [vmem:[#allocation147_spill] sm:$0xff] %v12175_v49  ;;  %v9867_v49 = vsel %vm3359_vm14, 1.0, %v16225_v37  ;;  %v9869_v21 = vsel %vm3361_vm0, 1.0, %v16225_v37 }
 0x3ec   : > { %4323 = vadd.xlane.f32.xlu0 %v4322_v34  ;;  %v764_v34 = vcombine.high %v748_v22, %v748_v22 }
 0x3ed   : > { %v12183_v62 = vpop.xlane.xlu0 %4113  ;;  %4326 = vadd.xlane.f32.xlu1 %v4325_v24  ;;  %v9868_v24 = vsel %vm3360_vm15, 1.0, %v16225_v37 }
 0x3ee   : > { %16676 = vst [vmem:[#allocation146_spill] sm:$0xff] %v12183_v62  ;;  %v12187_v38 = vpop.xlane.xlu1 %4116  ;;  %v4334_v62 = vsel %vm16259_vm1, %v9867_v49, 0.0  ;;  %v2835_v22 = vrot.slane %v764_v34, %v10354_v13  ;;  %v4337_v9 = vsel %vm16259_vm1, %v9868_v24, 0.0  ;;  %v2839_v34 = vrot.slane %v766_v28, %v10354_v13 }
 0x3ef   : > { %16677 = vst [vmem:[#allocation150_spill] sm:$0xff] %v12187_v38 }
 0x3f0   : > { %4329 = vadd.xlane.f32.xlu0 %v4328_v7  ;;  %v774_v7 = vrot.slane %v16682_v48, %v11590_v19  ;;  %vm3364_vm4 = vcmp.gt.f32.partialorder %v2835_v22, %v16685_v30 }
 0x3f1   : > { %v12194_v35 = vpop.xlane.xlu0 %4119  ;;  %4332 = vadd.xlane.f32.xlu1 %v4331_v53  ;;  %v16683_v53 = vld [vmem:[#allocation189_spill] sm:$0xff]  ;;  %v9872_v30 = vsel %vm3364_vm4, 1.0, %v16225_v37 }
 0x3f2   : > { %16679 = vst [vmem:[#allocation149_spill] sm:$0xff] %v12194_v35  ;;  %v12198_v38 = vpop.xlane.xlu1 %4122  ;;  %vm3363_vm3 = vcmp.gt.f32.partialorder %v2831_v5, %v16683_v53  ;;  %v782_v24 = vcombine.high %v774_v7, %v774_v7  ;;  %v16687_v53 = vld [vmem:[#allocation192_spill] sm:$0xff]  ;;  %v4349_v54 = vsel %vm16259_vm1, %v9872_v30, 0.0 }
 0x3f3   : > { %16681 = vst [vmem:[#allocation153_spill] sm:$0xff] %v12198_v38  ;;  %v4340_v38 = vsel %vm16259_vm1, %v9869_v21, 0.0  ;;  %v9871_v5 = vsel %vm3363_vm3, 1.0, %v16225_v37  ;;  %vm3365_vm5 = vcmp.gt.f32.partialorder %v2835_v22, %v16687_v53  ;;  %v16691_v53 = vld [vmem:[#allocation195_spill] sm:$0xff] }
 0x3f4   : > { %4335 = vadd.xlane.f32.xlu0 %v4334_v62  ;;  %v790_v62 = vrot.slane %v774_v7, %v11590_v19  ;;  %v4346_v21 = vsel %vm16259_vm1, %v9871_v5, 0.0  ;;  %v9873_v22 = vsel %vm3365_vm5, 1.0, %v16225_v37  ;;  %vm3367_vm7 = vcmp.gt.f32.partialorder %v2839_v34, %v16691_v53 }
 0x3f5   : > { %v12207_v35 = vpop.xlane.xlu0 %4125  ;;  %4338 = vadd.xlane.f32.xlu1 %v4337_v9  ;;  %v767_v5 = vcombine.high %v16682_v48, %v16682_v48  ;;  %v9875_v53 = vsel %vm3367_vm7, 1.0, %v16225_v37 }
 0x3f6   : > { %16684 = vst [vmem:[#allocation152_spill] sm:$0xff] %v12207_v35  ;;  %v12211_v49 = vpop.xlane.xlu1 %4128  ;;  %v2843_v7 = vrot.slane %v790_v62, %v10354_v13 }
 0x3f7   : > { %16686 = vst [vmem:[#allocation156_spill] sm:$0xff] %v12211_v49  ;;  %v16689_v49 = vld [vmem:[#allocation196_spill] sm:$0xff] }
 0x3f8   : > { %4341 = vadd.xlane.f32.xlu0 %v4340_v38  ;;  %vm3366_vm6 = vcmp.gt.f32.partialorder %v2839_v34, %v16689_v49  ;;  %v804_v38 = vrot.slane %v782_v24, %v11590_v19  ;;  %v4352_v24 = vsel %vm16259_vm1, %v9873_v22, 0.0  ;;  %v781_v22 = vrot.slane %v767_v5, %v11590_v19 }
 0x3f9   : > { %v12219_v9 = vpop.xlane.xlu0 %4131  ;;  %4344 = vadd.xlane.f32.xlu1 %v4343_v44  ;;  %v9874_v49 = vsel %vm3366_vm6, 1.0, %v16225_v37 }
 0x3fa   : > { %16688 = vst [vmem:[#allocation155_spill] sm:$0xff] %v12219_v9  ;;  %v12223_v28 = vpop.xlane.xlu1 %4134  ;;  %v16693_v9 = vld [vmem:[#allocation199_spill] sm:$0xff]  ;;  %v2847_v30 = vrot.slane %v804_v38, %v10354_v13  ;;  %v4355_v34 = vsel %vm16259_vm1, %v9874_v49, 0.0  ;;  %v814_v49 = vcombine.high %v804_v38, %v804_v38 }
 0x3fb   : > { %16690 = vst [vmem:[#allocation159_spill] sm:$0xff] %v12223_v28  ;;  %vm3368_vm8 = vcmp.gt.f32.partialorder %v2843_v7, %v16693_v9 }
 0x3fc   : > { %4347 = vadd.xlane.f32.xlu0 %v4346_v21  ;;  %v812_v21 = vcombine.high %v790_v62, %v790_v62  ;;  %v9876_v9 = vsel %vm3368_vm8, 1.0, %v16225_v37  ;;  %v4358_v62 = vsel %vm16259_vm1, %v9875_v53, 0.0  ;;  %v797_v53 = vrot.slane %v781_v22, %v11590_v19 }
 0x3fd   : > { %v12231_v44 = vpop.xlane.xlu0 %4137  ;;  %4350 = vadd.xlane.f32.xlu1 %v4349_v54  ;;  %v16695_v54 = vld [vmem:[#allocation198_spill] sm:$0xff]  ;;  %v4361_v35 = vsel %vm16259_vm1, %v9876_v9, 0.0  ;;  %v783_v9 = vcombine.high %v781_v22, %v781_v22 }
 0x3fe   : > { %16692 = vst [vmem:[#allocation158_spill] sm:$0xff] %v12231_v44  ;;  %v12235_v28 = vpop.xlane.xlu1 %4140  ;;  %vm3369_vm9 = vcmp.gt.f32.partialorder %v2843_v7, %v16695_v54  ;;  %v16698_v54 = vld [vmem:[#allocation201_spill] sm:$0xff]  ;;  %v2859_v22 = vrot.slane %v797_v53, %v10354_v13 }
 0x3ff   : > { %16694 = vst [vmem:[#allocation164_spill] sm:$0xff] %v12235_v28  ;;  %v16696_v28 = vld [vmem:[#allocation202_spill] sm:$0xff]  ;;  %v9877_v7 = vsel %vm3369_vm9, 1.0, %v16225_v37  ;;  %vm3371_vm11 = vcmp.gt.f32.partialorder %v2847_v30, %v16698_v54  ;;  %v16702_v54 = vld [vmem:[#allocation204_spill] sm:$0xff] }
 0x400   : > { %4353 = vadd.xlane.f32.xlu0 %v4352_v24  ;;  %vm3370_vm10 = vcmp.gt.f32.partialorder %v2847_v30, %v16696_v28  ;;  %v2851_v24 = vrot.slane %v812_v21, %v10354_v13  ;;  %v4364_v38 = vsel %vm16259_vm1, %v9877_v7, 0.0  ;;  %v2855_v21 = vrot.slane %v814_v49, %v10354_v13 }
 0x401   : > { %v12244_v44 = vpop.xlane.xlu0 %4143  ;;  %4356 = vadd.xlane.f32.xlu1 %v4355_v34  ;;  %v9878_v28 = vsel %vm3370_vm10, 1.0, %v16225_v37  ;;  %v9879_v30 = vsel %vm3371_vm11, 1.0, %v16225_v37  ;;  %v811_v49 = vrot.slane %v783_v9, %v11590_v19 }
 0x402   : > { %v12248_v48 = vpop.xlane.xlu1 %4146  ;;  %vm3373_vm13 = vcmp.gt.f32.partialorder %v2851_v24, %v16702_v54  ;;  %vm3374_vm14 = vcmp.gt.f32.partialorder %v2855_v21, %v11255_v51  ;;  %v4370_v7 = vsel %vm16259_vm1, %v9879_v30, 0.0  ;;  %v16707_v54 = vld [vmem:[#allocation211_spill] sm:$0xff] }
 0x403   : > { %16697 = vst [vmem:[#allocation163_spill] sm:$0xff] %v12248_v48  ;;  %v16700_v48 = vld [vmem:[#allocation205_spill] sm:$0xff]  ;;  %v9882_v51 = vsel %vm3374_vm14, 1.0, %v16225_v37  ;;  %vm3376_vm0 = vcmp.gt.f32.partialorder %v2859_v22, %v16707_v54  ;;  %v2863_v9 = vrot.slane %v811_v49, %v10354_v13 }
 0x404   : > { %4359 = vadd.xlane.f32.xlu0 %v4358_v62  ;;  %vm3372_vm12 = vcmp.gt.f32.partialorder %v2851_v24, %v16700_v48  ;;  %v4367_v62 = vsel %vm16259_vm1, %v9878_v28, 0.0  ;;  %v9881_v24 = vsel %vm3373_vm13, 1.0, %v16225_v37  ;;  %v16711_v54 = vld [vmem:[#allocation213_spill] sm:$0xff] }
 0x405   : > { %v12256_v34 = vpop.xlane.xlu0 %4149  ;;  %4362 = vadd.xlane.f32.xlu1 %v4361_v35  ;;  %v9880_v48 = vsel %vm3372_vm12, 1.0, %v16225_v37  ;;  %v4376_v30 = vsel %vm16259_vm1, %v9881_v24, 0.0  ;;  %vm3378_vm3 = vcmp.gt.f32.partialorder %v2863_v9, %v16711_v54  ;;  %v16713_v24 = vld [vmem:[#allocation5_spill] sm:$0xff] }
 0x406   : > { %16699 = vst [vmem:[#allocation166_spill] sm:$0xff] %v12256_v34  ;;  %v12260_v5 = vpop.xlane.xlu1 %4152  ;;  %v4373_v28 = vsel %vm16259_vm1, %v9880_v48, 0.0  ;;  %v4379_v48 = vsel %vm16259_vm1, %v9882_v51, 0.0  ;;  %v9886_v54 = vsel %vm3378_vm3, 1.0, %v16225_v37 }
 0x407   : > { %16701 = vst [vmem:[#allocation165_spill] sm:$0xff] %v12260_v5 }
 0x408   : > { %4365 = vadd.xlane.f32.xlu0 %v4364_v38  ;;  %v16705_v38 = vld [vmem:[#allocation207_spill] sm:$0xff] }
 0x409   : > { %v12268_v35 = vpop.xlane.xlu0 %4155  ;;  %4368 = vadd.xlane.f32.xlu1 %v4367_v62  ;;  %vm3375_vm15 = vcmp.gt.f32.partialorder %v2855_v21, %v16705_v38  ;;  %v16709_v21 = vld [vmem:[#allocation210_spill] sm:$0xff] }
 0x40a   : > { %16703 = vst [vmem:[#allocation169_spill] sm:$0xff] %v12268_v35  ;;  %v12272_v5 = vpop.xlane.xlu1 %4158  ;;  %v9883_v35 = vsel %vm3375_vm15, 1.0, %v16225_v37  ;;  %vm3377_vm2 = vcmp.gt.f32.partialorder %v2859_v22, %v16709_v21 }
 0x40b   : > { %16704 = vst [vmem:[#allocation168_spill] sm:$0xff] %v12272_v5  ;;  %v9885_v21 = vsel %vm3377_vm2, 1.0, %v16225_v37 }
 0x40c   : > { %4371 = vadd.xlane.f32.xlu0 %v4370_v7  ;;  %v813_v7 = vcombine.high %v797_v53, %v797_v53  ;;  %v4382_v53 = vsel %vm16259_vm1, %v9883_v35, 0.0 }
 0x40d   : > { %v12280_v62 = vpop.xlane.xlu0 %4161  ;;  %4374 = vadd.xlane.f32.xlu1 %v4373_v28  ;;  %v9884_v28 = vsel %vm3376_vm0, 1.0, %v16225_v37 }
 0x40e   : > { %16706 = vst [vmem:[#allocation172_spill] sm:$0xff] %v12280_v62  ;;  %v12284_v5 = vpop.xlane.xlu1 %4164  ;;  %v823_v62 = vrot.slane %v16713_v24, %v11590_v19  ;;  %v2867_v51 = vrot.slane %v813_v7, %v10354_v13  ;;  %v4385_v22 = vsel %vm16259_vm1, %v9884_v28, 0.0 }
 0x40f   : > { %16708 = vst [vmem:[#allocation171_spill] sm:$0xff] %v12284_v5 }
 0x410   : > { %4377 = vadd.xlane.f32.xlu0 %v4376_v30  ;;  %v815_v30 = vcombine.high %v811_v49, %v811_v49  ;;  %v839_v35 = vrot.slane %v823_v62, %v11590_v19  ;;  %v4388_v49 = vsel %vm16259_vm1, %v9885_v21, 0.0  ;;  %v831_v7 = vcombine.high %v823_v62, %v823_v62 }
 0x411   : > { %v12291_v38 = vpop.xlane.xlu0 %4167  ;;  %4380 = vadd.xlane.f32.xlu1 %v4379_v48  ;;  %v16714_v48 = vld [vmem:[#allocation212_spill] sm:$0xff] }
 0x412   : > { %16710 = vst [vmem:[#allocation175_spill] sm:$0xff] %v12291_v38  ;;  %v12295_v5 = vpop.xlane.xlu1 %4170  ;;  %vm3379_vm4 = vcmp.gt.f32.partialorder %v2863_v9, %v16714_v48  ;;  %v2871_v28 = vrot.slane %v815_v30, %v10354_v13  ;;  %v16718_v48 = vld [vmem:[#allocation215_spill] sm:$0xff]  ;;  %v2875_v30 = vrot.slane %v839_v35, %v10354_v13  ;;  %v853_v21 = vrot.slane %v831_v7, %v11590_v19 }
 0x413   : > { %16712 = vst [vmem:[#allocation174_spill] sm:$0xff] %v12295_v5  ;;  %v16716_v5 = vld [vmem:[#allocation216_spill] sm:$0xff]  ;;  %v9887_v9 = vsel %vm3379_vm4, 1.0, %v16225_v37  ;;  %vm3381_vm6 = vcmp.gt.f32.partialorder %v2867_v51, %v16718_v48  ;;  %v16724_v48 = vld [vmem:[#allocation51_spill] sm:$0xff] }
 0x414   : > { %4383 = vadd.xlane.f32.xlu0 %v4382_v53  ;;  %vm3380_vm5 = vcmp.gt.f32.partialorder %v2867_v51, %v16716_v5  ;;  %v4391_v53 = vsel %vm16259_vm1, %v9886_v54, 0.0  ;;  %v4394_v62 = vsel %vm16259_vm1, %v9887_v9, 0.0  ;;  %v9889_v51 = vsel %vm3381_vm6, 1.0, %v16225_v37 }
 0x415   : > { %v12304_v38 = vpop.xlane.xlu0 %4173  ;;  %4386 = vadd.xlane.f32.xlu1 %v4385_v22  ;;  %v9888_v5 = vsel %vm3380_vm5, 1.0, %v16225_v37  ;;  %vm3384_vm9 = vcmp.gt.f32.partialorder %v2875_v30, %v16724_v48  ;;  %v816_v9 = vcombine.high %v16713_v24, %v16713_v24  ;;  %v4400_v7 = vsel %vm16259_vm1, %v9889_v51, 0.0 }
 0x416   : > { %16715 = vst [vmem:[#allocation178_spill] sm:$0xff] %v12304_v38  ;;  %v12308_v34 = vpop.xlane.xlu1 %4176  ;;  %v4397_v54 = vsel %vm16259_vm1, %v9888_v5, 0.0  ;;  %v2879_v5 = vrot.slane %v853_v21, %v10354_v13  ;;  %v9892_v48 = vsel %vm3384_vm9, 1.0, %v16225_v37  ;;  %v863_v51 = vcombine.high %v853_v21, %v853_v21 }
 0x417   : > { %16717 = vst [vmem:[#allocation177_spill] sm:$0xff] %v12308_v34  ;;  %v16720_v34 = vld [vmem:[#allocation219_spill] sm:$0xff] }
 0x418   : > { %4389 = vadd.xlane.f32.xlu0 %v4388_v49  ;;  %vm3382_vm7 = vcmp.gt.f32.partialorder %v2871_v28, %v16720_v34  ;;  %v16722_v49 = vld [vmem:[#allocation218_spill] sm:$0xff] }
 0x419   : > { %v12316_v22 = vpop.xlane.xlu0 %4179  ;;  %4392 = vadd.xlane.f32.xlu1 %v4391_v53  ;;  %vm3383_vm8 = vcmp.gt.f32.partialorder %v2871_v28, %v16722_v49  ;;  %v9890_v34 = vsel %vm3382_vm7, 1.0, %v16225_v37 }
 0x41a   : > { %16719 = vst [vmem:[#allocation181_spill] sm:$0xff] %v12316_v22  ;;  %v12320_v38 = vpop.xlane.xlu1 %4182  ;;  %v4403_v28 = vsel %vm16259_vm1, %v9890_v34, 0.0  ;;  %v9891_v49 = vsel %vm3383_vm8, 1.0, %v16225_v37  ;;  %v830_v34 = vrot.slane %v816_v9, %v11590_v19 }
 0x41b   : > { %16721 = vst [vmem:[#allocation180_spill] sm:$0xff] %v12320_v38  ;;  %v4406_v22 = vsel %vm16259_vm1, %v9891_v49, 0.0 }
 0x41c   : > { %4395 = vadd.xlane.f32.xlu0 %v4394_v62  ;;  %v861_v62 = vcombine.high %v839_v35, %v839_v35  ;;  %v832_v49 = vcombine.high %v830_v34, %v830_v34 }
 0x41d   : > { %v12328_v53 = vpop.xlane.xlu0 %4185  ;;  %4398 = vadd.xlane.f32.xlu1 %v4397_v54  ;;  %v16726_v54 = vld [vmem:[#allocation50_spill] sm:$0xff] }
 0x41e   : > { %16723 = vst [vmem:[#allocation184_spill] sm:$0xff] %v12328_v53  ;;  %v12332_v38 = vpop.xlane.xlu1 %4188  ;;  %vm3385_vm10 = vcmp.gt.f32.partialorder %v2875_v30, %v16726_v54  ;;  %v2883_v35 = vrot.slane %v861_v62, %v10354_v13  ;;  %v16730_v54 = vld [vmem:[#allocation53_spill] sm:$0xff]  ;;  %v2887_v62 = vrot.slane %v863_v51, %v10354_v13 }
 0x41f   : > { %16725 = vst [vmem:[#allocation183_spill] sm:$0xff] %v12332_v38  ;;  %v16728_v38 = vld [vmem:[#allocation54_spill] sm:$0xff]  ;;  %v9893_v30 = vsel %vm3385_vm10, 1.0, %v16225_v37  ;;  %vm3387_vm12 = vcmp.gt.f32.partialorder %v2879_v5, %v16730_v54  ;;  %v16734_v54 = vld [vmem:[#allocation57_spill] sm:$0xff] }
 0x420   : > { %4401 = vadd.xlane.f32.xlu0 %v4400_v7  ;;  %vm3386_vm11 = vcmp.gt.f32.partialorder %v2879_v5, %v16728_v38  ;;  %v4409_v7 = vsel %vm16259_vm1, %v9892_v48, 0.0  ;;  %v4412_v9 = vsel %vm16259_vm1, %v9893_v30, 0.0  ;;  %v9895_v5 = vsel %vm3387_vm12, 1.0, %v16225_v37 }
 0x421   : > { %v12341_v53 = vpop.xlane.xlu0 %4191  ;;  %4404 = vadd.xlane.f32.xlu1 %v4403_v28  ;;  %v9894_v38 = vsel %vm3386_vm11, 1.0, %v16225_v37  ;;  %vm3389_vm14 = vcmp.gt.f32.partialorder %v2883_v35, %v16734_v54  ;;  %v4418_v30 = vsel %vm16259_vm1, %v9895_v5, 0.0  ;;  %v16738_v54 = vld [vmem:[#allocation60_spill] sm:$0xff] }
 0x422   : > { %16727 = vst [vmem:[#allocation188_spill] sm:$0xff] %v12341_v53  ;;  %v12345_v24 = vpop.xlane.xlu1 %4194  ;;  %v4415_v48 = vsel %vm16259_vm1, %v9894_v38, 0.0  ;;  %vm3391_vm0 = vcmp.gt.f32.partialorder %v2887_v62, %v16738_v54 }
 0x423   : > { %16729 = vst [vmem:[#allocation190_spill] sm:$0xff] %v12345_v24  ;;  %v16732_v24 = vld [vmem:[#allocation58_spill] sm:$0xff] }
 0x424   : > { %4407 = vadd.xlane.f32.xlu0 %v4406_v22  ;;  %vm3388_vm13 = vcmp.gt.f32.partialorder %v2883_v35, %v16732_v24  ;;  %v846_v22 = vrot.slane %v830_v34, %v11590_v19  ;;  %v9897_v35 = vsel %vm3389_vm14, 1.0, %v16225_v37 }
 0x425   : > { %v12353_v28 = vpop.xlane.xlu0 %4197  ;;  %4410 = vadd.xlane.f32.xlu1 %v4409_v7  ;;  %v9896_v24 = vsel %vm3388_vm13, 1.0, %v16225_v37  ;;  %v4424_v5 = vsel %vm16259_vm1, %v9897_v35, 0.0 }
 0x426   : > { %16731 = vst [vmem:[#allocation189_spill] sm:$0xff] %v12353_v28  ;;  %v12357_v21 = vpop.xlane.xlu1 %4200  ;;  %v2891_v34 = vrot.slane %v846_v22, %v10354_v13  ;;  %v4421_v38 = vsel %vm16259_vm1, %v9896_v24, 0.0  ;;  %v9899_v28 = vsel %vm3391_vm0, 1.0, %v16225_v37 }
 0x427   : > { %16733 = vst [vmem:[#allocation193_spill] sm:$0xff] %v12357_v21  ;;  %v16736_v21 = vld [vmem:[#allocation61_spill] sm:$0xff] }
 0x428   : > { %4413 = vadd.xlane.f32.xlu0 %v4412_v9  ;;  %vm3390_vm15 = vcmp.gt.f32.partialorder %v2887_v62, %v16736_v21  ;;  %v860_v9 = vrot.slane %v832_v49, %v11590_v19  ;;  %v16742_v62 = vld [vmem:[#allocation63_spill] sm:$0xff] }
 0x429   : > { %v12365_v7 = vpop.xlane.xlu0 %4203  ;;  %4416 = vadd.xlane.f32.xlu1 %v4415_v48  ;;  %v9898_v21 = vsel %vm3390_vm15, 1.0, %v16225_v37  ;;  %vm3393_vm3 = vcmp.gt.f32.partialorder %v2891_v34, %v16742_v62 }
 0x42a   : > { %16735 = vst [vmem:[#allocation192_spill] sm:$0xff] %v12365_v7  ;;  %v12369_v51 = vpop.xlane.xlu1 %4206  ;;  %v16740_v7 = vld [vmem:[#allocation64_spill] sm:$0xff]  ;;  %v2895_v49 = vrot.slane %v860_v9, %v10354_v13  ;;  %v4427_v24 = vsel %vm16259_vm1, %v9898_v21, 0.0  ;;  %v864_v35 = vcombine.high %v860_v9, %v860_v9  ;;  %v16746_v21 = vld [vmem:[#allocation59_spill] sm:$0xff]  ;;  %v9901_v62 = vsel %vm3393_vm3, 1.0, %v16225_v37  ;;  %v16749_v9 = vld [vmem:[#allocation70_spill] sm:$0xff] }
 0x42b   : > { %16737 = vst [vmem:[#allocation196_spill] sm:$0xff] %v12369_v51  ;;  %vm3392_vm2 = vcmp.gt.f32.partialorder %v2891_v34, %v16740_v7  ;;  %v16744_v7 = vld [vmem:[#allocation67_spill] sm:$0xff] }
 0x42c   : > { %4419 = vadd.xlane.f32.xlu0 %v4418_v30  ;;  %v862_v30 = vcombine.high %v846_v22, %v846_v22  ;;  %vm3394_vm4 = vcmp.gt.f32.partialorder %v2895_v49, %v16744_v7 }
 0x42d   : > { %v12377_v48 = vpop.xlane.xlu0 %4209  ;;  %4422 = vadd.xlane.f32.xlu1 %v4421_v38  ;;  %v9900_v38 = vsel %vm3392_vm2, 1.0, %v16225_v37  ;;  %v9902_v7 = vsel %vm3394_vm4, 1.0, %v16225_v37 }
 0x42e   : > { %16739 = vst [vmem:[#allocation195_spill] sm:$0xff] %v12377_v48  ;;  %v12381_v51 = vpop.xlane.xlu1 %4212  ;;  %v4430_v48 = vsel %vm16259_vm1, %v9899_v28, 0.0  ;;  %v2899_v22 = vrot.slane %v862_v30, %v10354_v13  ;;  %v4433_v34 = vsel %vm16259_vm1, %v9900_v38, 0.0  ;;  %v2903_v30 = vrot.slane %v864_v35, %v10354_v13 }
 0x42f   : > { %16741 = vst [vmem:[#allocation199_spill] sm:$0xff] %v12381_v51  ;;  %v4439_v53 = vsel %vm16259_vm1, %v9902_v7, 0.0 }
 0x430   : > { %4425 = vadd.xlane.f32.xlu0 %v4424_v5  ;;  %v872_v5 = vrot.slane %v16746_v21, %v11590_v19  ;;  %vm3396_vm6 = vcmp.gt.f32.partialorder %v2899_v22, %v16749_v9 }
 0x431   : > { %v12388_v54 = vpop.xlane.xlu0 %4215  ;;  %4428 = vadd.xlane.f32.xlu1 %v4427_v24  ;;  %v16747_v24 = vld [vmem:[#allocation66_spill] sm:$0xff]  ;;  %v9904_v9 = vsel %vm3396_vm6, 1.0, %v16225_v37 }
 0x432   : > { %16743 = vst [vmem:[#allocation198_spill] sm:$0xff] %v12388_v54  ;;  %v12392_v51 = vpop.xlane.xlu1 %4218  ;;  %vm3395_vm5 = vcmp.gt.f32.partialorder %v2895_v49, %v16747_v24  ;;  %v880_v38 = vcombine.high %v872_v5, %v872_v5  ;;  %v16751_v24 = vld [vmem:[#allocation69_spill] sm:$0xff]  ;;  %v4445_v7 = vsel %vm16259_vm1, %v9904_v9, 0.0 }
 0x433   : > { %16745 = vst [vmem:[#allocation202_spill] sm:$0xff] %v12392_v51  ;;  %v4436_v51 = vsel %vm16259_vm1, %v9901_v62, 0.0  ;;  %v9903_v49 = vsel %vm3395_vm5, 1.0, %v16225_v37  ;;  %vm3397_vm7 = vcmp.gt.f32.partialorder %v2899_v22, %v16751_v24  ;;  %v16755_v24 = vld [vmem:[#allocation221_spill] sm:$0xff] }
 0x434   : > { %4431 = vadd.xlane.f32.xlu0 %v4430_v48  ;;  %v888_v48 = vrot.slane %v872_v5, %v11590_v19  ;;  %v4442_v62 = vsel %vm16259_vm1, %v9903_v49, 0.0  ;;  %v9905_v22 = vsel %vm3397_vm7, 1.0, %v16225_v37  ;;  %vm3399_vm9 = vcmp.gt.f32.partialorder %v2903_v30, %v16755_v24 }
 0x435   : > { %v12401_v54 = vpop.xlane.xlu0 %4221  ;;  %4434 = vadd.xlane.f32.xlu1 %v4433_v34  ;;  %v865_v49 = vcombine.high %v16746_v21, %v16746_v21  ;;  %v9907_v24 = vsel %vm3399_vm9, 1.0, %v16225_v37 }
 0x436   : > { %16748 = vst [vmem:[#allocation201_spill] sm:$0xff] %v12401_v54  ;;  %v12405_v28 = vpop.xlane.xlu1 %4224  ;;  %v2907_v5 = vrot.slane %v888_v48, %v10354_v13 }
 0x437   : > { %16750 = vst [vmem:[#allocation205_spill] sm:$0xff] %v12405_v28  ;;  %v16753_v28 = vld [vmem:[#allocation222_spill] sm:$0xff] }
 0x438   : > { %4437 = vadd.xlane.f32.xlu0 %v4436_v51  ;;  %vm3398_vm8 = vcmp.gt.f32.partialorder %v2903_v30, %v16753_v28  ;;  %v902_v51 = vrot.slane %v880_v38, %v11590_v19  ;;  %v4448_v38 = vsel %vm16259_vm1, %v9905_v22, 0.0  ;;  %v879_v22 = vrot.slane %v865_v49, %v11590_v19 }
 0x439   : > { %v12413_v34 = vpop.xlane.xlu0 %4227  ;;  %4440 = vadd.xlane.f32.xlu1 %v4439_v53  ;;  %v9906_v28 = vsel %vm3398_vm8, 1.0, %v16225_v37 }
 0x43a   : > { %16752 = vst [vmem:[#allocation204_spill] sm:$0xff] %v12413_v34  ;;  %v12417_v35 = vpop.xlane.xlu1 %4230  ;;  %v16757_v34 = vld [vmem:[#allocation225_spill] sm:$0xff]  ;;  %v2911_v9 = vrot.slane %v902_v51, %v10354_v13  ;;  %v4451_v30 = vsel %vm16259_vm1, %v9906_v28, 0.0  ;;  %v912_v28 = vcombine.high %v902_v51, %v902_v51 }
 0x43b   : > { %16754 = vst [vmem:[#allocation207_spill] sm:$0xff] %v12417_v35  ;;  %vm3400_vm10 = vcmp.gt.f32.partialorder %v2907_v5, %v16757_v34 }
 0x43c   : > { %4443 = vadd.xlane.f32.xlu0 %v4442_v62  ;;  %v910_v62 = vcombine.high %v888_v48, %v888_v48  ;;  %v9908_v34 = vsel %vm3400_vm10, 1.0, %v16225_v37  ;;  %v4454_v48 = vsel %vm16259_vm1, %v9907_v24, 0.0  ;;  %v895_v24 = vrot.slane %v879_v22, %v11590_v19 }
 0x43d   : > { %v12425_v53 = vpop.xlane.xlu0 %4233  ;;  %4446 = vadd.xlane.f32.xlu1 %v4445_v7  ;;  %v16759_v7 = vld [vmem:[#allocation224_spill] sm:$0xff]  ;;  %v4457_v54 = vsel %vm16259_vm1, %v9908_v34, 0.0  ;;  %v881_v34 = vcombine.high %v879_v22, %v879_v22 }
 0x43e   : > { %16756 = vst [vmem:[#allocation211_spill] sm:$0xff] %v12425_v53  ;;  %v12429_v35 = vpop.xlane.xlu1 %4236  ;;  %vm3401_vm11 = vcmp.gt.f32.partialorder %v2907_v5, %v16759_v7  ;;  %v16763_v7 = vld [vmem:[#allocation227_spill] sm:$0xff]  ;;  %v2923_v22 = vrot.slane %v895_v24, %v10354_v13 }
 0x43f   : > { %16758 = vst [vmem:[#allocation210_spill] sm:$0xff] %v12429_v35  ;;  %v16761_v35 = vld [vmem:[#allocation228_spill] sm:$0xff]  ;;  %v9909_v5 = vsel %vm3401_vm11, 1.0, %v16225_v37  ;;  %vm3403_vm13 = vcmp.gt.f32.partialorder %v2911_v9, %v16763_v7  ;;  %v16766_v7 = vld [vmem:[#allocation230_spill] sm:$0xff] }
 0x440   : > { %4449 = vadd.xlane.f32.xlu0 %v4448_v38  ;;  %vm3402_vm12 = vcmp.gt.f32.partialorder %v2911_v9, %v16761_v35  ;;  %v2915_v38 = vrot.slane %v910_v62, %v10354_v13  ;;  %v4460_v51 = vsel %vm16259_vm1, %v9909_v5, 0.0  ;;  %v2919_v62 = vrot.slane %v912_v28, %v10354_v13 }
 0x441   : > { %v12438_v53 = vpop.xlane.xlu0 %4239  ;;  %4452 = vadd.xlane.f32.xlu1 %v4451_v30  ;;  %v9910_v35 = vsel %vm3402_vm12, 1.0, %v16225_v37  ;;  %v9911_v9 = vsel %vm3403_vm13, 1.0, %v16225_v37  ;;  %v909_v28 = vrot.slane %v881_v34, %v11590_v19 }
 0x442   : > { %16760 = vst [vmem:[#allocation213_spill] sm:$0xff] %v12438_v53  ;;  %v12442_v21 = vpop.xlane.xlu1 %4242  ;;  %vm3404_vm14 = vcmp.gt.f32.partialorder %v2915_v38, %v11335_v23  ;;  %vm3405_vm15 = vcmp.gt.f32.partialorder %v2915_v38, %v16766_v7  ;;  %v4466_v5 = vsel %vm16259_vm1, %v9911_v9, 0.0  ;;  %v16772_v7 = vld [vmem:[#allocation236_spill] sm:$0xff] }
 0x443   : > { %16762 = vst [vmem:[#allocation212_spill] sm:$0xff] %v12442_v21  ;;  %v9912_v23 = vsel %vm3404_vm14, 1.0, %v16225_v37  ;;  %v9913_v38 = vsel %vm3405_vm15, 1.0, %v16225_v37  ;;  %vm3408_vm3 = vcmp.gt.f32.partialorder %v2923_v22, %v16772_v7  ;;  %v2927_v34 = vrot.slane %v909_v28, %v10354_v13  ;;  %v16776_v7 = vld [vmem:[#allocation239_spill] sm:$0xff] }
 0x444   : > { %4455 = vadd.xlane.f32.xlu0 %v4454_v48  ;;  %v4463_v48 = vsel %vm16259_vm1, %v9910_v35, 0.0  ;;  %v4469_v35 = vsel %vm16259_vm1, %v9912_v23, 0.0  ;;  %v4472_v9 = vsel %vm16259_vm1, %v9913_v38, 0.0  ;;  %v913_v38 = vcombine.high %v909_v28, %v909_v28  ;;  %v16781_v28 = vld [vmem:[#allocation242_spill] sm:$0xff] }
 0x445   : > { %v12450_v30 = vpop.xlane.xlu0 %4245  ;;  %4458 = vadd.xlane.f32.xlu1 %v4457_v54  ;;  %vm3410_vm5 = vcmp.gt.f32.partialorder %v2927_v34, %v16776_v7 }
 0x446   : > { %16764 = vst [vmem:[#allocation216_spill] sm:$0xff] %v12450_v30  ;;  %v12454_v49 = vpop.xlane.xlu1 %4248  ;;  %v9918_v7 = vsel %vm3410_vm5, 1.0, %v16225_v37 }
 0x447   : > { %16765 = vst [vmem:[#allocation215_spill] sm:$0xff] %v12454_v49  ;;  %v16768_v49 = vld [vmem:[#allocation234_spill] sm:$0xff]  ;;  %v4487_v21 = vsel %vm16259_vm1, %v9918_v7, 0.0 }
 0x448   : > { %4461 = vadd.xlane.f32.xlu0 %v4460_v51  ;;  %vm3406_vm0 = vcmp.gt.f32.partialorder %v2919_v62, %v16768_v49  ;;  %v16770_v51 = vld [vmem:[#allocation233_spill] sm:$0xff] }
 0x449   : > { %v12462_v54 = vpop.xlane.xlu0 %4251  ;;  %4464 = vadd.xlane.f32.xlu1 %v4463_v48  ;;  %vm3407_vm2 = vcmp.gt.f32.partialorder %v2919_v62, %v16770_v51  ;;  %v9914_v49 = vsel %vm3406_vm0, 1.0, %v16225_v37  ;;  %v16774_v62 = vld [vmem:[#allocation235_spill] sm:$0xff] }
 0x44a   : > { %16767 = vst [vmem:[#allocation219_spill] sm:$0xff] %v12462_v54  ;;  %v12466_v30 = vpop.xlane.xlu1 %4254  ;;  %v4475_v23 = vsel %vm16259_vm1, %v9914_v49, 0.0  ;;  %v9915_v54 = vsel %vm3407_vm2, 1.0, %v16225_v37  ;;  %vm3409_vm4 = vcmp.gt.f32.partialorder %v2923_v22, %v16774_v62  ;;  %v16778_v49 = vld [vmem:[#allocation76_spill] sm:$0xff] }
 0x44b   : > { %16769 = vst [vmem:[#allocation218_spill] sm:$0xff] %v12466_v30  ;;  %v9917_v62 = vsel %vm3409_vm4, 1.0, %v16225_v37 }
 0x44c   : > { %4467 = vadd.xlane.f32.xlu0 %v4466_v5  ;;  %v911_v5 = vcombine.high %v895_v24, %v895_v24 }
 0x44d   : > { %v12474_v48 = vpop.xlane.xlu0 %4257  ;;  %4470 = vadd.xlane.f32.xlu1 %v4469_v35  ;;  %v9916_v35 = vsel %vm3408_vm3, 1.0, %v16225_v37 }
 0x44e   : > { %16771 = vst [vmem:[#allocation51_spill] sm:$0xff] %v12474_v48  ;;  %v12478_v30 = vpop.xlane.xlu1 %4260  ;;  %v4478_v48 = vsel %vm16259_vm1, %v9915_v54, 0.0  ;;  %v2931_v24 = vrot.slane %v911_v5, %v10354_v13  ;;  %v4481_v22 = vsel %vm16259_vm1, %v9916_v35, 0.0  ;;  %v2935_v5 = vrot.slane %v913_v38, %v10354_v13 }
 0x44f   : > { %16773 = vst [vmem:[#allocation50_spill] sm:$0xff] %v12478_v30 }
 0x450   : > { %4473 = vadd.xlane.f32.xlu0 %v4472_v9  ;;  %v921_v9 = vrot.slane %v16778_v49, %v11590_v19  ;;  %vm3412_vm7 = vcmp.gt.f32.partialorder %v2931_v24, %v16781_v28 }
 0x451   : > { %v12485_v51 = vpop.xlane.xlu0 %4263  ;;  %4476 = vadd.xlane.f32.xlu1 %v4475_v23  ;;  %v16779_v23 = vld [vmem:[#allocation238_spill] sm:$0xff]  ;;  %v9920_v28 = vsel %vm3412_vm7, 1.0, %v16225_v37 }
 0x452   : > { %16775 = vst [vmem:[#allocation54_spill] sm:$0xff] %v12485_v51  ;;  %v12489_v30 = vpop.xlane.xlu1 %4266  ;;  %vm3411_vm6 = vcmp.gt.f32.partialorder %v2927_v34, %v16779_v23  ;;  %v929_v35 = vcombine.high %v921_v9, %v921_v9  ;;  %v16783_v23 = vld [vmem:[#allocation241_spill] sm:$0xff]  ;;  %v4493_v7 = vsel %vm16259_vm1, %v9920_v28, 0.0 }
 0x453   : > { %16777 = vst [vmem:[#allocation53_spill] sm:$0xff] %v12489_v30  ;;  %v4484_v30 = vsel %vm16259_vm1, %v9917_v62, 0.0  ;;  %v9919_v34 = vsel %vm3411_vm6, 1.0, %v16225_v37  ;;  %vm3413_vm8 = vcmp.gt.f32.partialorder %v2931_v24, %v16783_v23  ;;  %v16787_v23 = vld [vmem:[#allocation244_spill] sm:$0xff] }
 0x454   : > { %4479 = vadd.xlane.f32.xlu0 %v4478_v48  ;;  %v937_v48 = vrot.slane %v921_v9, %v11590_v19  ;;  %v4490_v62 = vsel %vm16259_vm1, %v9919_v34, 0.0  ;;  %v9921_v24 = vsel %vm3413_vm8, 1.0, %v16225_v37  ;;  %vm3415_vm10 = vcmp.gt.f32.partialorder %v2935_v5, %v16787_v23 }
 0x455   : > { %v12498_v51 = vpop.xlane.xlu0 %4269  ;;  %4482 = vadd.xlane.f32.xlu1 %v4481_v22  ;;  %v914_v34 = vcombine.high %v16778_v49, %v16778_v49  ;;  %v9923_v23 = vsel %vm3415_vm10, 1.0, %v16225_v37 }
 0x456   : > { %16780 = vst [vmem:[#allocation58_spill] sm:$0xff] %v12498_v51  ;;  %v12502_v54 = vpop.xlane.xlu1 %4272  ;;  %v2939_v9 = vrot.slane %v937_v48, %v10354_v13 }
 0x457   : > { %16782 = vst [vmem:[#allocation57_spill] sm:$0xff] %v12502_v54  ;;  %v16785_v54 = vld [vmem:[#allocation245_spill] sm:$0xff] }
 0x458   : > { %4485 = vadd.xlane.f32.xlu0 %v4484_v30  ;;  %vm3414_vm9 = vcmp.gt.f32.partialorder %v2935_v5, %v16785_v54  ;;  %v951_v30 = vrot.slane %v929_v35, %v11590_v19  ;;  %v4496_v35 = vsel %vm16259_vm1, %v9921_v24, 0.0  ;;  %v928_v24 = vrot.slane %v914_v34, %v11590_v19 }
 0x459   : > { %v12510_v22 = vpop.xlane.xlu0 %4275  ;;  %4488 = vadd.xlane.f32.xlu1 %v4487_v21  ;;  %v9922_v54 = vsel %vm3414_vm9, 1.0, %v16225_v37 }
 0x45a   : > { %16784 = vst [vmem:[#allocation61_spill] sm:$0xff] %v12510_v22  ;;  %v12514_v38 = vpop.xlane.xlu1 %4278  ;;  %v16789_v22 = vld [vmem:[#allocation248_spill] sm:$0xff]  ;;  %v2943_v28 = vrot.slane %v951_v30, %v10354_v13  ;;  %v4499_v5 = vsel %vm16259_vm1, %v9922_v54, 0.0  ;;  %v961_v54 = vcombine.high %v951_v30, %v951_v30 }
 0x45b   : > { %16786 = vst [vmem:[#allocation60_spill] sm:$0xff] %v12514_v38  ;;  %vm3416_vm11 = vcmp.gt.f32.partialorder %v2939_v9, %v16789_v22 }
 0x45c   : > { %4491 = vadd.xlane.f32.xlu0 %v4490_v62  ;;  %v959_v62 = vcombine.high %v937_v48, %v937_v48  ;;  %v9924_v22 = vsel %vm3416_vm11, 1.0, %v16225_v37  ;;  %v4502_v48 = vsel %vm16259_vm1, %v9923_v23, 0.0  ;;  %v944_v23 = vrot.slane %v928_v24, %v11590_v19 }
 0x45d   : > { %v12522_v21 = vpop.xlane.xlu0 %4281  ;;  %4494 = vadd.xlane.f32.xlu1 %v4493_v7  ;;  %v16791_v7 = vld [vmem:[#allocation247_spill] sm:$0xff]  ;;  %v4505_v51 = vsel %vm16259_vm1, %v9924_v22, 0.0  ;;  %v930_v22 = vcombine.high %v928_v24, %v928_v24 }
 0x45e   : > { %16788 = vst [vmem:[#allocation64_spill] sm:$0xff] %v12522_v21  ;;  %v12526_v38 = vpop.xlane.xlu1 %4284  ;;  %vm3417_vm12 = vcmp.gt.f32.partialorder %v2939_v9, %v16791_v7  ;;  %v16795_v7 = vld [vmem:[#allocation250_spill] sm:$0xff]  ;;  %v2955_v24 = vrot.slane %v944_v23, %v10354_v13 }
 0x45f   : > { %16790 = vst [vmem:[#allocation63_spill] sm:$0xff] %v12526_v38  ;;  %v16793_v38 = vld [vmem:[#allocation251_spill] sm:$0xff]  ;;  %v9925_v9 = vsel %vm3417_vm12, 1.0, %v16225_v37  ;;  %vm3419_vm14 = vcmp.gt.f32.partialorder %v2943_v28, %v16795_v7  ;;  %v16798_v7 = vld [vmem:[#allocation253_spill] sm:$0xff] }
 0x460   : > { %4497 = vadd.xlane.f32.xlu0 %v4496_v35  ;;  %vm3418_vm13 = vcmp.gt.f32.partialorder %v2943_v28, %v16793_v38  ;;  %v2947_v35 = vrot.slane %v959_v62, %v10354_v13  ;;  %v4508_v30 = vsel %vm16259_vm1, %v9925_v9, 0.0  ;;  %v2951_v62 = vrot.slane %v961_v54, %v10354_v13 }
 0x461   : > { %v12535_v21 = vpop.xlane.xlu0 %4287  ;;  %4500 = vadd.xlane.f32.xlu1 %v4499_v5  ;;  %v9926_v38 = vsel %vm3418_vm13, 1.0, %v16225_v37  ;;  %v9927_v28 = vsel %vm3419_vm14, 1.0, %v16225_v37  ;;  %v958_v54 = vrot.slane %v930_v22, %v11590_v19 }
 0x462   : > { %16792 = vst [vmem:[#allocation67_spill] sm:$0xff] %v12535_v21  ;;  %v12539_v49 = vpop.xlane.xlu1 %4290  ;;  %vm3420_vm15 = vcmp.gt.f32.partialorder %v2947_v35, %v11415_v16  ;;  %vm3421_vm0 = vcmp.gt.f32.partialorder %v2947_v35, %v16798_v7  ;;  %v4514_v9 = vsel %vm16259_vm1, %v9927_v28, 0.0  ;;  %v16804_v7 = vld [vmem:[#allocation259_spill] sm:$0xff] }
 0x463   : > { %16794 = vst [vmem:[#allocation66_spill] sm:$0xff] %v12539_v49  ;;  %v9928_v16 = vsel %vm3420_vm15, 1.0, %v16225_v37  ;;  %v9929_v35 = vsel %vm3421_vm0, 1.0, %v16225_v37  ;;  %vm3424_vm4 = vcmp.gt.f32.partialorder %v2955_v24, %v16804_v7  ;;  %v2959_v22 = vrot.slane %v958_v54, %v10354_v13  ;;  %v16808_v7 = vld [vmem:[#allocation262_spill] sm:$0xff] }
 0x464   : > { %4503 = vadd.xlane.f32.xlu0 %v4502_v48  ;;  %v4511_v48 = vsel %vm16259_vm1, %v9926_v38, 0.0  ;;  %v4517_v38 = vsel %vm16259_vm1, %v9928_v16, 0.0  ;;  %v4520_v28 = vsel %vm16259_vm1, %v9929_v35, 0.0  ;;  %v962_v35 = vcombine.high %v958_v54, %v958_v54  ;;  %v16813_v54 = vld [vmem:[#allocation265_spill] sm:$0xff] }
 0x465   : > { %v12547_v5 = vpop.xlane.xlu0 %4293  ;;  %4506 = vadd.xlane.f32.xlu1 %v4505_v51  ;;  %vm3426_vm6 = vcmp.gt.f32.partialorder %v2959_v22, %v16808_v7 }
 0x466   : > { %16796 = vst [vmem:[#allocation70_spill] sm:$0xff] %v12547_v5  ;;  %v12551_v34 = vpop.xlane.xlu1 %4296  ;;  %v9934_v7 = vsel %vm3426_vm6, 1.0, %v16225_v37 }
 0x467   : > { %16797 = vst [vmem:[#allocation69_spill] sm:$0xff] %v12551_v34  ;;  %v16800_v34 = vld [vmem:[#allocation257_spill] sm:$0xff]  ;;  %v4535_v49 = vsel %vm16259_vm1, %v9934_v7, 0.0 }
 0x468   : > { %4509 = vadd.xlane.f32.xlu0 %v4508_v30  ;;  %vm3422_vm2 = vcmp.gt.f32.partialorder %v2951_v62, %v16800_v34  ;;  %v16802_v30 = vld [vmem:[#allocation256_spill] sm:$0xff] }
 0x469   : > { %v12559_v51 = vpop.xlane.xlu0 %4299  ;;  %4512 = vadd.xlane.f32.xlu1 %v4511_v48  ;;  %vm3423_vm3 = vcmp.gt.f32.partialorder %v2951_v62, %v16802_v30  ;;  %v9930_v34 = vsel %vm3422_vm2, 1.0, %v16225_v37  ;;  %v16806_v62 = vld [vmem:[#allocation258_spill] sm:$0xff] }
 0x46a   : > { %16799 = vst [vmem:[#allocation222_spill] sm:$0xff] %v12559_v51  ;;  %v12563_v5 = vpop.xlane.xlu1 %4302  ;;  %v4523_v16 = vsel %vm16259_vm1, %v9930_v34, 0.0  ;;  %v9931_v51 = vsel %vm3423_vm3, 1.0, %v16225_v37  ;;  %vm3425_vm5 = vcmp.gt.f32.partialorder %v2955_v24, %v16806_v62  ;;  %v16810_v34 = vld [vmem:[#allocation87_spill] sm:$0xff] }
 0x46b   : > { %16801 = vst [vmem:[#allocation221_spill] sm:$0xff] %v12563_v5  ;;  %v9933_v62 = vsel %vm3425_vm5, 1.0, %v16225_v37 }
 0x46c   : > { %4515 = vadd.xlane.f32.xlu0 %v4514_v9  ;;  %v960_v9 = vcombine.high %v944_v23, %v944_v23 }
 0x46d   : > { %v12571_v48 = vpop.xlane.xlu0 %4305  ;;  %4518 = vadd.xlane.f32.xlu1 %v4517_v38  ;;  %v9932_v38 = vsel %vm3424_vm4, 1.0, %v16225_v37 }
 0x46e   : > { %16803 = vst [vmem:[#allocation225_spill] sm:$0xff] %v12571_v48  ;;  %v12575_v5 = vpop.xlane.xlu1 %4308  ;;  %v4526_v48 = vsel %vm16259_vm1, %v9931_v51, 0.0  ;;  %v2963_v23 = vrot.slane %v960_v9, %v10354_v13  ;;  %v4529_v24 = vsel %vm16259_vm1, %v9932_v38, 0.0  ;;  %v2967_v9 = vrot.slane %v962_v35, %v10354_v13 }
 0x46f   : > { %16805 = vst [vmem:[#allocation224_spill] sm:$0xff] %v12575_v5 }
 0x470   : > { %4521 = vadd.xlane.f32.xlu0 %v4520_v28  ;;  %v970_v28 = vrot.slane %v16810_v34, %v11590_v19  ;;  %vm3428_vm8 = vcmp.gt.f32.partialorder %v2963_v23, %v16813_v54 }
 0x471   : > { %v12582_v30 = vpop.xlane.xlu0 %4311  ;;  %4524 = vadd.xlane.f32.xlu1 %v4523_v16  ;;  %v16811_v16 = vld [vmem:[#allocation261_spill] sm:$0xff]  ;;  %v9936_v54 = vsel %vm3428_vm8, 1.0, %v16225_v37 }
 0x472   : > { %16807 = vst [vmem:[#allocation228_spill] sm:$0xff] %v12582_v30  ;;  %v12586_v5 = vpop.xlane.xlu1 %4314  ;;  %vm3427_vm7 = vcmp.gt.f32.partialorder %v2959_v22, %v16811_v16  ;;  %v978_v38 = vcombine.high %v970_v28, %v970_v28  ;;  %v16815_v16 = vld [vmem:[#allocation264_spill] sm:$0xff]  ;;  %v4541_v7 = vsel %vm16259_vm1, %v9936_v54, 0.0 }
 0x473   : > { %16809 = vst [vmem:[#allocation227_spill] sm:$0xff] %v12586_v5  ;;  %v4532_v5 = vsel %vm16259_vm1, %v9933_v62, 0.0  ;;  %v9935_v22 = vsel %vm3427_vm7, 1.0, %v16225_v37  ;;  %vm3429_vm9 = vcmp.gt.f32.partialorder %v2963_v23, %v16815_v16  ;;  %v16819_v16 = vld [vmem:[#allocation267_spill] sm:$0xff] }
 0x474   : > { %4527 = vadd.xlane.f32.xlu0 %v4526_v48  ;;  %v986_v48 = vrot.slane %v970_v28, %v11590_v19  ;;  %v4538_v62 = vsel %vm16259_vm1, %v9935_v22, 0.0  ;;  %v9937_v23 = vsel %vm3429_vm9, 1.0, %v16225_v37  ;;  %vm3431_vm11 = vcmp.gt.f32.partialorder %v2967_v9, %v16819_v16 }
 0x475   : > { %v12595_v30 = vpop.xlane.xlu0 %4317  ;;  %4530 = vadd.xlane.f32.xlu1 %v4529_v24  ;;  %v963_v22 = vcombine.high %v16810_v34, %v16810_v34  ;;  %v9939_v16 = vsel %vm3431_vm11, 1.0, %v16225_v37 }
 0x476   : > { %16812 = vst [vmem:[#allocation230_spill] sm:$0xff] %v12595_v30  ;;  %v12599_v51 = vpop.xlane.xlu1 %4320  ;;  %v2971_v28 = vrot.slane %v986_v48, %v10354_v13 }
 0x477   : > { %16814 = vst [vmem:[#allocation234_spill] sm:$0xff] %v12599_v51  ;;  %v16817_v51 = vld [vmem:[#allocation268_spill] sm:$0xff] }
 0x478   : > { %4533 = vadd.xlane.f32.xlu0 %v4532_v5  ;;  %vm3430_vm10 = vcmp.gt.f32.partialorder %v2967_v9, %v16817_v51  ;;  %v1000_v5 = vrot.slane %v978_v38, %v11590_v19  ;;  %v4544_v38 = vsel %vm16259_vm1, %v9937_v23, 0.0  ;;  %v977_v23 = vrot.slane %v963_v22, %v11590_v19 }
 0x479   : > { %v12607_v24 = vpop.xlane.xlu0 %4323  ;;  %4536 = vadd.xlane.f32.xlu1 %v4535_v49  ;;  %v9938_v51 = vsel %vm3430_vm10, 1.0, %v16225_v37 }
 0x47a   : > { %16816 = vst [vmem:[#allocation233_spill] sm:$0xff] %v12607_v24  ;;  %v12611_v35 = vpop.xlane.xlu1 %4326  ;;  %v16821_v24 = vld [vmem:[#allocation271_spill] sm:$0xff]  ;;  %v2975_v54 = vrot.slane %v1000_v5, %v10354_v13  ;;  %v4547_v9 = vsel %vm16259_vm1, %v9938_v51, 0.0  ;;  %v1010_v51 = vcombine.high %v1000_v5, %v1000_v5 }
 0x47b   : > { %16818 = vst [vmem:[#allocation236_spill] sm:$0xff] %v12611_v35  ;;  %vm3432_vm12 = vcmp.gt.f32.partialorder %v2971_v28, %v16821_v24 }
 0x47c   : > { %4539 = vadd.xlane.f32.xlu0 %v4538_v62  ;;  %v1008_v62 = vcombine.high %v986_v48, %v986_v48  ;;  %v9940_v24 = vsel %vm3432_vm12, 1.0, %v16225_v37  ;;  %v4550_v48 = vsel %vm16259_vm1, %v9939_v16, 0.0  ;;  %v993_v16 = vrot.slane %v977_v23, %v11590_v19 }
 0x47d   : > { %v12619_v49 = vpop.xlane.xlu0 %4329  ;;  %4542 = vadd.xlane.f32.xlu1 %v4541_v7  ;;  %v16823_v7 = vld [vmem:[#allocation270_spill] sm:$0xff]  ;;  %v4553_v30 = vsel %vm16259_vm1, %v9940_v24, 0.0  ;;  %v979_v24 = vcombine.high %v977_v23, %v977_v23 }
 0x47e   : > { %16820 = vst [vmem:[#allocation235_spill] sm:$0xff] %v12619_v49  ;;  %v12623_v35 = vpop.xlane.xlu1 %4332  ;;  %vm3433_vm13 = vcmp.gt.f32.partialorder %v2971_v28, %v16823_v7  ;;  %v16827_v7 = vld [vmem:[#allocation273_spill] sm:$0xff]  ;;  %v2987_v23 = vrot.slane %v993_v16, %v10354_v13 }
 0x47f   : > { %16822 = vst [vmem:[#allocation239_spill] sm:$0xff] %v12623_v35  ;;  %v16825_v35 = vld [vmem:[#allocation274_spill] sm:$0xff]  ;;  %v9941_v28 = vsel %vm3433_vm13, 1.0, %v16225_v37  ;;  %vm3435_vm15 = vcmp.gt.f32.partialorder %v2975_v54, %v16827_v7  ;;  %v16830_v7 = vld [vmem:[#allocation276_spill] sm:$0xff] }
 0x480   : > { %4545 = vadd.xlane.f32.xlu0 %v4544_v38  ;;  %vm3434_vm14 = vcmp.gt.f32.partialorder %v2975_v54, %v16825_v35  ;;  %v2979_v38 = vrot.slane %v1008_v62, %v10354_v13  ;;  %v4556_v5 = vsel %vm16259_vm1, %v9941_v28, 0.0  ;;  %v2983_v62 = vrot.slane %v1010_v51, %v10354_v13 }
 0x481   : > { %v12632_v49 = vpop.xlane.xlu0 %4335  ;;  %4548 = vadd.xlane.f32.xlu1 %v4547_v9  ;;  %v9942_v35 = vsel %vm3434_vm14, 1.0, %v16225_v37  ;;  %v9943_v54 = vsel %vm3435_vm15, 1.0, %v16225_v37  ;;  %v1007_v51 = vrot.slane %v979_v24, %v11590_v19  ;;  %vm3440_vm5 = vcmp.gt.f32.partialorder %v2987_v23, %v11515_v56 }
 0x482   : > { %16824 = vst [vmem:[#allocation238_spill] sm:$0xff] %v12632_v49  ;;  %v12636_v34 = vpop.xlane.xlu1 %4338  ;;  %vm3436_vm0 = vcmp.gt.f32.partialorder %v2979_v38, %v11495_v1  ;;  %vm3437_vm2 = vcmp.gt.f32.partialorder %v2979_v38, %v16830_v7  ;;  %v4562_v28 = vsel %vm16259_vm1, %v9943_v54, 0.0 }
 0x483   : > { %16826 = vst [vmem:[#allocation242_spill] sm:$0xff] %v12636_v34  ;;  %v9944_v1 = vsel %vm3436_vm0, 1.0, %v16225_v37  ;;  %v9945_v38 = vsel %vm3437_vm2, 1.0, %v16225_v37  ;;  %v2991_v24 = vrot.slane %v1007_v51, %v10354_v13 }
 0x484   : > { %4551 = vadd.xlane.f32.xlu0 %v4550_v48  ;;  %v4559_v48 = vsel %vm16259_vm1, %v9942_v35, 0.0  ;;  %v4565_v35 = vsel %vm16259_vm1, %v9944_v1, 0.0  ;;  %v4568_v54 = vsel %vm16259_vm1, %v9945_v38, 0.0  ;;  %v1011_v38 = vcombine.high %v1007_v51, %v1007_v51 }
 0x485   : > { %v12644_v9 = vpop.xlane.xlu0 %4341  ;;  %4554 = vadd.xlane.f32.xlu1 %v4553_v30  ;;  %vm3442_vm7 = vcmp.gt.f32.partialorder %v2991_v24, %v11525_v46 }
 0x486   : > { %16828 = vst [vmem:[#allocation241_spill] sm:$0xff] %v12644_v9  ;;  %v12648_v22 = vpop.xlane.xlu1 %4344  ;;  %v9950_v46 = vsel %vm3442_vm7, 1.0, %v16225_v37  ;;  %v2999_v51 = vrot.slane %v1011_v38, %v10354_v13 }
 0x487   : > { %16829 = vst [vmem:[#allocation245_spill] sm:$0xff] %v12648_v22  ;;  %v16832_v22 = vld [vmem:[#allocation280_spill] sm:$0xff] }
 0x488   : > { %4557 = vadd.xlane.f32.xlu0 %v4556_v5  ;;  %vm3438_vm3 = vcmp.gt.f32.partialorder %v2983_v62, %v16832_v22  ;;  %v16834_v5 = vld [vmem:[#allocation279_spill] sm:$0xff] }
 0x489   : > { %v12656_v30 = vpop.xlane.xlu0 %4347  ;;  %4560 = vadd.xlane.f32.xlu1 %v4559_v48  ;;  %vm3439_vm4 = vcmp.gt.f32.partialorder %v2983_v62, %v16834_v5  ;;  %v9946_v22 = vsel %vm3438_vm3, 1.0, %v16225_v37  ;;  %v16837_v62 = vld [vmem:[#allocation281_spill] sm:$0xff] }
 0x48a   : > { %16831 = vst [vmem:[#allocation244_spill] sm:$0xff] %v12656_v30  ;;  %v12660_v9 = vpop.xlane.xlu1 %4350  ;;  %v4571_v1 = vsel %vm16259_vm1, %v9946_v22, 0.0  ;;  %vm3441_vm6 = vcmp.gt.f32.partialorder %v2987_v23, %v16837_v62  ;;  %v16840_v22 = vld [vmem:[#allocation112_spill] sm:$0xff] }
 0x48b   : > { %16833 = vst [vmem:[#allocation248_spill] sm:$0xff] %v12660_v9  ;;  %v9947_v9 = vsel %vm3439_vm4, 1.0, %v16225_v37  ;;  %v9949_v62 = vsel %vm3441_vm6, 1.0, %v16225_v37 }
 0x48c   : > { %4563 = vadd.xlane.f32.xlu0 %v4562_v28  ;;  %v1009_v28 = vcombine.high %v993_v16, %v993_v16 }
 0x48d   : > { %v12668_v48 = vpop.xlane.xlu0 %4353  ;;  %4566 = vadd.xlane.f32.xlu1 %v4565_v35  ;;  %v9948_v35 = vsel %vm3440_vm5, 1.0, %v16225_v37 }
 0x48e   : > { %16835 = vst [vmem:[#allocation247_spill] sm:$0xff] %v12668_v48  ;;  %v12672_v7 = vpop.xlane.xlu1 %4356  ;;  %v2995_v16 = vrot.slane %v1009_v28, %v10354_v13  ;;  %v4577_v23 = vsel %vm16259_vm1, %v9948_v35, 0.0  ;;  %v4580_v28 = vsel %vm16259_vm1, %v9949_v62, 0.0 }
 0x48f   : > { %16836 = vst [vmem:[#allocation251_spill] sm:$0xff] %v12672_v7  ;;  %v4574_v7 = vsel %vm16259_vm1, %v9947_v9, 0.0 }
 0x490   : > { %4569 = vadd.xlane.f32.xlu0 %v4568_v54  ;;  %v1019_v54 = vrot.slane %v16840_v22, %v11590_v19  ;;  %vm3444_vm9 = vcmp.gt.f32.partialorder %v2995_v16, %v11535_v14 }
 0x491   : > { %v12679_v5 = vpop.xlane.xlu0 %4359  ;;  %4572 = vadd.xlane.f32.xlu1 %v4571_v1  ;;  %v16841_v1 = vld [vmem:[#allocation283_spill] sm:$0xff]  ;;  %v9952_v14 = vsel %vm3444_vm9, 1.0, %v16225_v37 }
 0x492   : > { %16838 = vst [vmem:[#allocation250_spill] sm:$0xff] %v12679_v5  ;;  %v12683_v56 = vpop.xlane.xlu1 %4362  ;;  %vm3443_vm8 = vcmp.gt.f32.partialorder %v2991_v24, %v16841_v1  ;;  %v1027_v35 = vcombine.high %v1019_v54, %v1019_v54  ;;  %v16844_v1 = vld [vmem:[#allocation285_spill] sm:$0xff] }
 0x493   : > { %16839 = vst [vmem:[#allocation253_spill] sm:$0xff] %v12683_v56  ;;  %v4583_v56 = vsel %vm16259_vm1, %v9950_v46, 0.0  ;;  %v9951_v24 = vsel %vm3443_vm8, 1.0, %v16225_v37  ;;  %vm3445_vm10 = vcmp.gt.f32.partialorder %v2995_v16, %v16844_v1  ;;  %v4589_v46 = vsel %vm16259_vm1, %v9952_v14, 0.0  ;;  %v16848_v1 = vld [vmem:[#allocation287_spill] sm:$0xff] }
 0x494   : > { %4575 = vadd.xlane.f32.xlu0 %v4574_v7  ;;  %v1035_v7 = vrot.slane %v1019_v54, %v11590_v19  ;;  %v4586_v62 = vsel %vm16259_vm1, %v9951_v24, 0.0  ;;  %v9953_v16 = vsel %vm3445_vm10, 1.0, %v16225_v37  ;;  %vm3447_vm12 = vcmp.gt.f32.partialorder %v2999_v51, %v16848_v1 }
 0x495   : > { %v12692_v5 = vpop.xlane.xlu0 %4365  ;;  %4578 = vadd.xlane.f32.xlu1 %v4577_v23  ;;  %v1012_v24 = vcombine.high %v16840_v22, %v16840_v22  ;;  %v9955_v1 = vsel %vm3447_vm12, 1.0, %v16225_v37 }
 0x496   : > { %16842 = vst [vmem:[#allocation257_spill] sm:$0xff] %v12692_v5  ;;  %v12696_v9 = vpop.xlane.xlu1 %4368  ;;  %v3003_v54 = vrot.slane %v1035_v7, %v10354_v13 }
 0x497   : > { %16843 = vst [vmem:[#allocation256_spill] sm:$0xff] %v12696_v9  ;;  %v16846_v9 = vld [vmem:[#allocation288_spill] sm:$0xff] }
 0x498   : > { %4581 = vadd.xlane.f32.xlu0 %v4580_v28  ;;  %vm3446_vm11 = vcmp.gt.f32.partialorder %v2999_v51, %v16846_v9  ;;  %v1049_v28 = vrot.slane %v1027_v35, %v11590_v19  ;;  %v4592_v35 = vsel %vm16259_vm1, %v9953_v16, 0.0  ;;  %v1026_v16 = vrot.slane %v1012_v24, %v11590_v19 }
 0x499   : > { %v12704_v23 = vpop.xlane.xlu0 %4371  ;;  %4584 = vadd.xlane.f32.xlu1 %v4583_v56  ;;  %v9954_v9 = vsel %vm3446_vm11, 1.0, %v16225_v37 }
 0x49a   : > { %16845 = vst [vmem:[#allocation259_spill] sm:$0xff] %v12704_v23  ;;  %v12708_v38 = vpop.xlane.xlu1 %4374  ;;  %v16850_v23 = vld [vmem:[#allocation291_spill] sm:$0xff]  ;;  %v3007_v14 = vrot.slane %v1049_v28, %v10354_v13  ;;  %v4595_v51 = vsel %vm16259_vm1, %v9954_v9, 0.0  ;;  %v1059_v9 = vcombine.high %v1049_v28, %v1049_v28 }
 0x49b   : > { %16847 = vst [vmem:[#allocation258_spill] sm:$0xff] %v12708_v38  ;;  %vm3448_vm13 = vcmp.gt.f32.partialorder %v3003_v54, %v16850_v23 }
 0x49c   : > { %4587 = vadd.xlane.f32.xlu0 %v4586_v62  ;;  %v1057_v62 = vcombine.high %v1035_v7, %v1035_v7  ;;  %v9956_v23 = vsel %vm3448_vm13, 1.0, %v16225_v37  ;;  %v4598_v7 = vsel %vm16259_vm1, %v9955_v1, 0.0  ;;  %v1042_v1 = vrot.slane %v1026_v16, %v11590_v19 }
 0x49d   : > { %v12716_v56 = vpop.xlane.xlu0 %4377  ;;  %4590 = vadd.xlane.f32.xlu1 %v4589_v46  ;;  %v16852_v46 = vld [vmem:[#allocation290_spill] sm:$0xff]  ;;  %v4601_v5 = vsel %vm16259_vm1, %v9956_v23, 0.0  ;;  %v1028_v23 = vcombine.high %v1026_v16, %v1026_v16 }
 0x49e   : > { %16849 = vst [vmem:[#allocation262_spill] sm:$0xff] %v12716_v56  ;;  %v12720_v38 = vpop.xlane.xlu1 %4380  ;;  %vm3449_vm14 = vcmp.gt.f32.partialorder %v3003_v54, %v16852_v46  ;;  %v16856_v46 = vld [vmem:[#allocation293_spill] sm:$0xff]  ;;  %v3019_v16 = vrot.slane %v1042_v1, %v10354_v13 }
 0x49f   : > { %16851 = vst [vmem:[#allocation261_spill] sm:$0xff] %v12720_v38  ;;  %v16854_v38 = vld [vmem:[#allocation294_spill] sm:$0xff]  ;;  %v9957_v54 = vsel %vm3449_vm14, 1.0, %v16225_v37  ;;  %vm3451_vm0 = vcmp.gt.f32.partialorder %v3007_v14, %v16856_v46 }
 0x4a0   : > { %4593 = vadd.xlane.f32.xlu0 %v4592_v35  ;;  %vm3450_vm15 = vcmp.gt.f32.partialorder %v3007_v14, %v16854_v38  ;;  %v3011_v35 = vrot.slane %v1057_v62, %v10354_v13  ;;  %v4604_v28 = vsel %vm16259_vm1, %v9957_v54, 0.0  ;;  %v3015_v62 = vrot.slane %v1059_v9, %v10354_v13  ;;  %v16860_v46 = vld [vmem:[#allocation298_spill] sm:$0xff] }
 0x4a1   : > { %v12729_v56 = vpop.xlane.xlu0 %4383  ;;  %4596 = vadd.xlane.f32.xlu1 %v4595_v51  ;;  %v9958_v38 = vsel %vm3450_vm15, 1.0, %v16225_v37  ;;  %v9959_v14 = vsel %vm3451_vm0, 1.0, %v16225_v37  ;;  %v1056_v9 = vrot.slane %v1028_v23, %v11590_v19 }
 0x4a2   : > { %16853 = vst [vmem:[#allocation265_spill] sm:$0xff] %v12729_v56  ;;  %v12733_v22 = vpop.xlane.xlu1 %4386  ;;  %vm3453_vm3 = vcmp.gt.f32.partialorder %v3011_v35, %v16860_v46  ;;  %v4610_v54 = vsel %vm16259_vm1, %v9959_v14, 0.0  ;;  %v16866_v46 = vld [vmem:[#allocation301_spill] sm:$0xff] }
 0x4a3   : > { %16855 = vst [vmem:[#allocation264_spill] sm:$0xff] %v12733_v22  ;;  %v16858_v22 = vld [vmem:[#allocation296_spill] sm:$0xff]  ;;  %vm3456_vm6 = vcmp.gt.f32.partialorder %v3019_v16, %v16866_v46  ;;  %v3023_v23 = vrot.slane %v1056_v9, %v10354_v13  ;;  %v16870_v46 = vld [vmem:[#allocation303_spill] sm:$0xff] }
 0x4a4   : > { %4599 = vadd.xlane.f32.xlu0 %v4598_v7  ;;  %vm3452_vm2 = vcmp.gt.f32.partialorder %v3011_v35, %v16858_v22  ;;  %v4607_v7 = vsel %vm16259_vm1, %v9958_v38, 0.0  ;;  %v9961_v35 = vsel %vm3453_vm3, 1.0, %v16225_v37 }
 0x4a5   : > { %v12741_v51 = vpop.xlane.xlu0 %4389  ;;  %4602 = vadd.xlane.f32.xlu1 %v4601_v5  ;;  %v9960_v22 = vsel %vm3452_vm2, 1.0, %v16225_v37  ;;  %v4616_v14 = vsel %vm16259_vm1, %v9961_v35, 0.0  ;;  %vm3458_vm8 = vcmp.gt.f32.partialorder %v3023_v23, %v16870_v46  ;;  %v1060_v35 = vcombine.high %v1056_v9, %v1056_v9  ;;  %v16875_v9 = vld [vmem:[#allocation305_spill] sm:$0xff] }
 0x4a6   : > { %16857 = vst [vmem:[#allocation268_spill] sm:$0xff] %v12741_v51  ;;  %v12745_v24 = vpop.xlane.xlu1 %4392  ;;  %v4613_v38 = vsel %vm16259_vm1, %v9960_v22, 0.0  ;;  %v9966_v46 = vsel %vm3458_vm8, 1.0, %v16225_v37 }
 0x4a7   : > { %16859 = vst [vmem:[#allocation267_spill] sm:$0xff] %v12745_v24  ;;  %v16862_v24 = vld [vmem:[#allocation299_spill] sm:$0xff]  ;;  %v4631_v56 = vsel %vm16259_vm1, %v9966_v46, 0.0 }
 0x4a8   : > { %4605 = vadd.xlane.f32.xlu0 %v4604_v28  ;;  %vm3454_vm4 = vcmp.gt.f32.partialorder %v3015_v62, %v16862_v24  ;;  %v16864_v28 = vld [vmem:[#allocation300_spill] sm:$0xff] }
 0x4a9   : > { %v12753_v5 = vpop.xlane.xlu0 %4395  ;;  %4608 = vadd.xlane.f32.xlu1 %v4607_v7  ;;  %vm3455_vm5 = vcmp.gt.f32.partialorder %v3015_v62, %v16864_v28  ;;  %v9962_v24 = vsel %vm3454_vm4, 1.0, %v16225_v37  ;;  %v16868_v62 = vld [vmem:[#allocation302_spill] sm:$0xff] }
 0x4aa   : > { %16861 = vst [vmem:[#allocation271_spill] sm:$0xff] %v12753_v5  ;;  %v12757_v51 = vpop.xlane.xlu1 %4398  ;;  %v4619_v22 = vsel %vm16259_vm1, %v9962_v24, 0.0  ;;  %v9963_v5 = vsel %vm3455_vm5, 1.0, %v16225_v37  ;;  %vm3457_vm7 = vcmp.gt.f32.partialorder %v3019_v16, %v16868_v62  ;;  %v16872_v24 = vld [vmem:[#allocation137_spill] sm:$0xff] }
 0x4ab   : > { %16863 = vst [vmem:[#allocation270_spill] sm:$0xff] %v12757_v51  ;;  %v9965_v62 = vsel %vm3457_vm7, 1.0, %v16225_v37 }
 0x4ac   : > { %4611 = vadd.xlane.f32.xlu0 %v4610_v54  ;;  %v1058_v54 = vcombine.high %v1042_v1, %v1042_v1 }
 0x4ad   : > { %v12765_v7 = vpop.xlane.xlu0 %4401  ;;  %4614 = vadd.xlane.f32.xlu1 %v4613_v38  ;;  %v9964_v38 = vsel %vm3456_vm6, 1.0, %v16225_v37 }
 0x4ae   : > { %16865 = vst [vmem:[#allocation274_spill] sm:$0xff] %v12765_v7  ;;  %v12769_v51 = vpop.xlane.xlu1 %4404  ;;  %v4622_v7 = vsel %vm16259_vm1, %v9963_v5, 0.0  ;;  %v3027_v1 = vrot.slane %v1058_v54, %v10354_v13  ;;  %v4625_v16 = vsel %vm16259_vm1, %v9964_v38, 0.0  ;;  %v3031_v54 = vrot.slane %v1060_v35, %v10354_v13 }
 0x4af   : > { %16867 = vst [vmem:[#allocation273_spill] sm:$0xff] %v12769_v51 }
 0x4b0   : > { %4617 = vadd.xlane.f32.xlu0 %v4616_v14  ;;  %v1068_v14 = vrot.slane %v16872_v24, %v11590_v19  ;;  %vm3460_vm10 = vcmp.gt.f32.partialorder %v3027_v1, %v16875_v9  ;;  %vm3463_vm13 = vcmp.gt.f32.partialorder %v3031_v54, %v11616_v31 }
 0x4b1   : > { %v12776_v28 = vpop.xlane.xlu0 %4407  ;;  %4620 = vadd.xlane.f32.xlu1 %v4619_v22  ;;  %v16873_v22 = vld [vmem:[#allocation304_spill] sm:$0xff]  ;;  %v9968_v9 = vsel %vm3460_vm10, 1.0, %v16225_v37 }
 0x4b2   : > { %16869 = vst [vmem:[#allocation276_spill] sm:$0xff] %v12776_v28  ;;  %v12780_v51 = vpop.xlane.xlu1 %4410  ;;  %vm3459_vm9 = vcmp.gt.f32.partialorder %v3023_v23, %v16873_v22  ;;  %v1076_v38 = vcombine.high %v1068_v14, %v1068_v14  ;;  %v16877_v22 = vld [vmem:[#allocation306_spill] sm:$0xff]  ;;  %v4637_v46 = vsel %vm16259_vm1, %v9968_v9, 0.0 }
 0x4b3   : > { %16871 = vst [vmem:[#allocation280_spill] sm:$0xff] %v12780_v51  ;;  %v4628_v51 = vsel %vm16259_vm1, %v9965_v62, 0.0  ;;  %v9967_v23 = vsel %vm3459_vm9, 1.0, %v16225_v37  ;;  %vm3461_vm11 = vcmp.gt.f32.partialorder %v3027_v1, %v16877_v22  ;;  %v16882_v22 = vld [vmem:[#allocation308_spill] sm:$0xff] }
 0x4b4   : > { %4623 = vadd.xlane.f32.xlu0 %v4622_v7  ;;  %v1084_v7 = vrot.slane %v1068_v14, %v11590_v19  ;;  %v4634_v62 = vsel %vm16259_vm1, %v9967_v23, 0.0  ;;  %v9969_v1 = vsel %vm3461_vm11, 1.0, %v16225_v37  ;;  %v1061_v23 = vcombine.high %v16872_v24, %v16872_v24 }
 0x4b5   : > { %v12789_v28 = vpop.xlane.xlu0 %4413  ;;  %4626 = vadd.xlane.f32.xlu1 %v4625_v16 }
 0x4b6   : > { %16874 = vst [vmem:[#allocation279_spill] sm:$0xff] %v12789_v28  ;;  %v12793_v5 = vpop.xlane.xlu1 %4416  ;;  %v3035_v14 = vrot.slane %v1084_v7, %v10354_v13 }
 0x4b7   : > { %16876 = vst [vmem:[#allocation281_spill] sm:$0xff] %v12793_v5  ;;  %v16879_v5 = vld [vmem:[#allocation307_spill] sm:$0xff] }
 0x4b8   : > { %4629 = vadd.xlane.f32.xlu0 %v4628_v51  ;;  %vm3462_vm12 = vcmp.gt.f32.partialorder %v3031_v54, %v16879_v5  ;;  %v1098_v51 = vrot.slane %v1076_v38, %v11590_v19  ;;  %vm3464_vm14 = vcmp.gt.f32.partialorder %v3035_v14, %v16882_v22  ;;  %v4640_v38 = vsel %vm16259_vm1, %v9969_v1, 0.0 }
 0x4b9   : > { %v12801_v16 = vpop.xlane.xlu0 %4419  ;;  %4632 = vadd.xlane.f32.xlu1 %v4631_v56  ;;  %v9970_v5 = vsel %vm3462_vm12, 1.0, %v16225_v37  ;;  %v9971_v54 = vsel %vm3463_vm13, 1.0, %v16225_v37  ;;  %vm3465_vm15 = vcmp.gt.f32.partialorder %v3035_v14, %v11630_v59  ;;  %v9972_v22 = vsel %vm3464_vm14, 1.0, %v16225_v37 }
 0x4ba   : > { %16878 = vst [vmem:[#allocation283_spill] sm:$0xff] %v12801_v16  ;;  %v12805_v35 = vpop.xlane.xlu1 %4422  ;;  %v3039_v9 = vrot.slane %v1098_v51, %v10354_v13  ;;  %v4643_v31 = vsel %vm16259_vm1, %v9970_v5, 0.0  ;;  %v1075_v1 = vrot.slane %v1061_v23, %v11590_v19  ;;  %v1108_v5 = vcombine.high %v1098_v51, %v1098_v51 }
 0x4bb   : > { %16880 = vst [vmem:[#allocation285_spill] sm:$0xff] %v12805_v35  ;;  %v9973_v59 = vsel %vm3465_vm15, 1.0, %v16225_v37 }
 0x4bc   : > { %4635 = vadd.xlane.f32.xlu0 %v4634_v62  ;;  %v1106_v62 = vcombine.high %v1084_v7, %v1084_v7  ;;  %vm3466_vm0 = vcmp.gt.f32.partialorder %v3039_v9, %v11635_v42  ;;  %v4646_v7 = vsel %vm16259_vm1, %v9971_v54, 0.0  ;;  %vm3467_vm2 = vcmp.gt.f32.partialorder %v3039_v9, %v11647_v25 }
 0x4bd   : > { %v12813_v56 = vpop.xlane.xlu0 %4425  ;;  %4638 = vadd.xlane.f32.xlu1 %v4637_v46  ;;  %v9974_v42 = vsel %vm3466_vm0, 1.0, %v16225_v37  ;;  %v4652_v51 = vsel %vm16259_vm1, %v9973_v59, 0.0  ;;  %v1077_v54 = vcombine.high %v1075_v1, %v1075_v1  ;;  %v9975_v25 = vsel %vm3467_vm2, 1.0, %v16225_v37 }
 0x4be   : > { %16881 = vst [vmem:[#allocation288_spill] sm:$0xff] %v12813_v56  ;;  %v12817_v35 = vpop.xlane.xlu1 %4428 }
 0x4bf   : > { %16883 = vst [vmem:[#allocation287_spill] sm:$0xff] %v12817_v35  ;;  %v4649_v35 = vsel %vm16259_vm1, %v9972_v22, 0.0  ;;  %v4655_v22 = vsel %vm16259_vm1, %v9974_v42, 0.0 }
 0x4c0   : > { %4641 = vadd.xlane.f32.xlu0 %v4640_v38  ;;  %v3043_v38 = vrot.slane %v1106_v62, %v10354_v13  ;;  %v3047_v62 = vrot.slane %v1108_v5, %v10354_v13  ;;  %v1105_v5 = vrot.slane %v1077_v54, %v11590_v19 }
 0x4c1   : > { %v12826_v46 = vpop.xlane.xlu0 %4431  ;;  %4644 = vadd.xlane.f32.xlu1 %v4643_v31  ;;  %v1091_v31 = vrot.slane %v1075_v1, %v11590_v19 }
 0x4c2   : > { %16884 = vst [vmem:[#allocation291_spill] sm:$0xff] %v12826_v46  ;;  %v12830_v24 = vpop.xlane.xlu1 %4434  ;;  %vm3468_vm3 = vcmp.gt.f32.partialorder %v3043_v38, %v11649_v10  ;;  %vm3469_vm4 = vcmp.gt.f32.partialorder %v3043_v38, %v11662_v27  ;;  %vm3470_vm5 = vcmp.gt.f32.partialorder %v3047_v62, %v11667_v18  ;;  %vm3471_vm6 = vcmp.gt.f32.partialorder %v3047_v62, %v11679_v52 }
 0x4c3   : > { %16885 = vst [vmem:[#allocation290_spill] sm:$0xff] %v12830_v24  ;;  %v9976_v10 = vsel %vm3468_vm3, 1.0, %v16225_v37  ;;  %v3051_v1 = vrot.slane %v1091_v31, %v10354_v13  ;;  %v9977_v27 = vsel %vm3469_vm4, 1.0, %v16225_v37  ;;  %v9978_v18 = vsel %vm3470_vm5, 1.0, %v16225_v37 }
 0x4c4   : > { %4647 = vadd.xlane.f32.xlu0 %v4646_v7  ;;  %v4658_v7 = vsel %vm16259_vm1, %v9975_v25, 0.0  ;;  %v4661_v59 = vsel %vm16259_vm1, %v9976_v10, 0.0  ;;  %v3055_v54 = vrot.slane %v1105_v5, %v10354_v13  ;;  %v4667_v25 = vsel %vm16259_vm1, %v9978_v18, 0.0 }
 0x4c5   : > { %v12838_v14 = vpop.xlane.xlu0 %4437  ;;  %4650 = vadd.xlane.f32.xlu1 %v4649_v35  ;;  %vm3472_vm7 = vcmp.gt.f32.partialorder %v3051_v1, %v11681_v63  ;;  %v9979_v10 = vsel %vm3471_vm6, 1.0, %v16225_v37  ;;  %vm3473_vm8 = vcmp.gt.f32.partialorder %v3051_v1, %v11695_v55 }
 0x4c6   : > { %16886 = vst [vmem:[#allocation294_spill] sm:$0xff] %v12838_v14  ;;  %v12842_v23 = vpop.xlane.xlu1 %4440  ;;  %v9980_v62 = vsel %vm3472_vm7, 1.0, %v16225_v37  ;;  %vm3474_vm9 = vcmp.gt.f32.partialorder %v3055_v54, %v11700_v32  ;;  %v9981_v1 = vsel %vm3473_vm8, 1.0, %v16225_v37  ;;  %vm3475_vm10 = vcmp.gt.f32.partialorder %v3055_v54, %v11712_v61 }
 0x4c7   : > { %16887 = vst [vmem:[#allocation293_spill] sm:$0xff] %v12842_v23  ;;  %v4673_v55 = vsel %vm16259_vm1, %v9980_v62, 0.0  ;;  %v9982_v32 = vsel %vm3474_vm9, 1.0, %v16225_v37  ;;  %v9983_v61 = vsel %vm3475_vm10, 1.0, %v16225_v37 }
 0x4c8   : > { %4653 = vadd.xlane.f32.xlu0 %v4652_v51  ;;  %v4664_v51 = vsel %vm16259_vm1, %v9977_v27, 0.0  ;;  %v16894_v27 = vld [vmem:[#allocation162_spill] sm:$0xff] }
 0x4c9   : > { %v12850_v35 = vpop.xlane.xlu0 %4443  ;;  %4656 = vadd.xlane.f32.xlu1 %v4655_v22  ;;  %v1107_v22 = vcombine.high %v1091_v31, %v1091_v31  ;;  %v1117_v18 = vrot.slane %v16894_v27, %v11590_v19 }
 0x4ca   : > { %16888 = vst [vmem:[#allocation296_spill] sm:$0xff] %v12850_v35  ;;  %v12854_v9 = vpop.xlane.xlu1 %4446 }
 0x4cb   : > { %16889 = vst [vmem:[#allocation298_spill] sm:$0xff] %v12854_v9  ;;  %v3059_v31 = vrot.slane %v1107_v22, %v10354_v13  ;;  %v1125_v62 = vcombine.high %v1117_v18, %v1117_v18 }
 0x4cc   : > { %4659 = vadd.xlane.f32.xlu0 %v4658_v7  ;;  %v1109_v7 = vcombine.high %v1105_v5, %v1105_v5 }
 0x4cd   : > { %v12862_v38 = vpop.xlane.xlu0 %4449  ;;  %4662 = vadd.xlane.f32.xlu1 %v4661_v59  ;;  %v4670_v59 = vsel %vm16259_vm1, %v9979_v10, 0.0  ;;  %vm3476_vm11 = vcmp.gt.f32.partialorder %v3059_v31, %v11715_v39  ;;  %v1133_v10 = vrot.slane %v1117_v18, %v11590_v19  ;;  %vm3477_vm12 = vcmp.gt.f32.partialorder %v3059_v31, %v11727_v41 }
 0x4ce   : > { %16890 = vst [vmem:[#allocation299_spill] sm:$0xff] %v12862_v38  ;;  %v12866_v42 = vpop.xlane.xlu1 %4452  ;;  %v3063_v22 = vrot.slane %v1109_v7, %v10354_v13  ;;  %v9984_v39 = vsel %vm3476_vm11, 1.0, %v16225_v37  ;;  %v9985_v41 = vsel %vm3477_vm12, 1.0, %v16225_v37 }
 0x4cf   : > { %16891 = vst [vmem:[#allocation300_spill] sm:$0xff] %v12866_v42  ;;  %v3067_v18 = vrot.slane %v1133_v10, %v10354_v13 }
 0x4d0   : > { %4665 = vadd.xlane.f32.xlu0 %v4664_v51  ;;  %vm3478_vm13 = vcmp.gt.f32.partialorder %v3063_v22, %v11732_v4  ;;  %vm3479_vm14 = vcmp.gt.f32.partialorder %v3063_v22, %v11743_v57 }
 0x4d1   : > { %v12873_v52 = vpop.xlane.xlu0 %4455  ;;  %4668 = vadd.xlane.f32.xlu1 %v4667_v25  ;;  %v4676_v25 = vsel %vm16259_vm1, %v9981_v1, 0.0  ;;  %v1147_v1 = vrot.slane %v1125_v62, %v11590_v19  ;;  %v9986_v4 = vsel %vm3478_vm13, 1.0, %v16225_v37  ;;  %vm3480_vm15 = vcmp.gt.f32.partialorder %v3067_v18, %v11747_v26 }
 0x4d2   : > { %16892 = vst [vmem:[#allocation301_spill] sm:$0xff] %v12873_v52  ;;  %v12877_v63 = vpop.xlane.xlu1 %4458  ;;  %v4688_v62 = vsel %vm16259_vm1, %v9985_v41, 0.0  ;;  %v4691_v57 = vsel %vm16259_vm1, %v9986_v4, 0.0  ;;  %v9987_v22 = vsel %vm3479_vm14, 1.0, %v16225_v37  ;;  %vm3481_vm0 = vcmp.gt.f32.partialorder %v3067_v18, %v11759_v29 }
 0x4d3   : > { %16893 = vst [vmem:[#allocation302_spill] sm:$0xff] %v12877_v63  ;;  %v9988_v26 = vsel %vm3480_vm15, 1.0, %v16225_v37  ;;  %v1157_v4 = vcombine.high %v1147_v1, %v1147_v1  ;;  %v9989_v29 = vsel %vm3481_vm0, 1.0, %v16225_v37 }
 0x4d4   : > { %4671 = vadd.xlane.f32.xlu0 %v4670_v59  ;;  %v4679_v59 = vsel %vm16259_vm1, %v9982_v32, 0.0  ;;  %v4685_v32 = vsel %vm16259_vm1, %v9984_v39, 0.0  ;;  %v1155_v39 = vcombine.high %v1133_v10, %v1133_v10  ;;  %v4694_v10 = vsel %vm16259_vm1, %v9987_v22, 0.0 }
 0x4d5   : > { %v12886_v51 = vpop.xlane.xlu0 %4461  ;;  %4674 = vadd.xlane.f32.xlu1 %v4673_v55  ;;  %v4682_v55 = vsel %vm16259_vm1, %v9983_v61, 0.0  ;;  %v3071_v61 = vrot.slane %v1147_v1, %v10354_v13  ;;  %v4700_v1 = vsel %vm16259_vm1, %v9989_v29, 0.0 }
 0x4d6   : > { %16895 = vst [vmem:[#allocation303_spill] sm:$0xff] %v12886_v51  ;;  %v12890_v5 = vpop.xlane.xlu1 %4464 }
 0x4d7   : > { %16896 = vst [vmem:[#allocation304_spill] sm:$0xff] %v12890_v5  ;;  %vm3482_vm2 = vcmp.gt.f32.partialorder %v3071_v61, %v11764_v50  ;;  %vm3483_vm3 = vcmp.gt.f32.partialorder %v3071_v61, %v11776_v45 }
 0x4d8   : > { %4677 = vadd.xlane.f32.xlu0 %v4676_v25  ;;  %v9990_v50 = vsel %vm3482_vm2, 1.0, %v16225_v37  ;;  %v9991_v45 = vsel %vm3483_vm3, 1.0, %v16225_v37 }
 0x4d9   : > { %v12898_v54 = vpop.xlane.xlu0 %4467  ;;  %4680 = vadd.xlane.f32.xlu1 %v4679_v59  ;;  %v1110_v59 = vcombine.high %v16894_v27, %v16894_v27  ;;  %v4697_v27 = vsel %vm16259_vm1, %v9988_v26, 0.0  ;;  %v4703_v26 = vsel %vm16259_vm1, %v9990_v50, 0.0 }
 0x4da   : > { %16897 = vst [vmem:[#allocation305_spill] sm:$0xff] %v12898_v54  ;;  %v12902_v7 = vpop.xlane.xlu1 %4470 }
 0x4db   : > { %16898 = vst [vmem:[#allocation306_spill] sm:$0xff] %v12902_v7  ;;  %v1124_v41 = vrot.slane %v1110_v59, %v11590_v19 }
 0x4dc   : > { %4683 = vadd.xlane.f32.xlu0 %v4682_v55 }
 0x4dd   : > { %v12910_v31 = vpop.xlane.xlu0 %4473  ;;  %4686 = vadd.xlane.f32.xlu1 %v4685_v32  ;;  %v1126_v22 = vcombine.high %v1124_v41, %v1124_v41 }
 0x4de   : > { %16899 = vst [vmem:[#allocation307_spill] sm:$0xff] %v12910_v31  ;;  %v12914_v25 = vpop.xlane.xlu1 %4476 }
 0x4df   : > { %16900 = vst [vmem:[#allocation308_spill] sm:$0xff] %v12914_v25 }
 0x4e0   : > { %4689 = vadd.xlane.f32.xlu0 %v4688_v62  ;;  %v3075_v62 = vrot.slane %v1155_v39, %v10354_v13  ;;  %v3079_v39 = vrot.slane %v1157_v4, %v10354_v13  ;;  %v1154_v4 = vrot.slane %v1126_v22, %v11590_v19 }
 0x4e1   : > { %v12923_v55 = vpop.xlane.xlu0 %4479  ;;  %4692 = vadd.xlane.f32.xlu1 %v4691_v57  ;;  %v1140_v57 = vrot.slane %v1124_v41, %v11590_v19 }
 0x4e2   : > { %16901 = vst [vmem:[#allocation309_spill] sm:$0xff] %v12923_v55  ;;  %v12927_v32 = vpop.xlane.xlu1 %4482  ;;  %vm3484_vm4 = vcmp.gt.f32.partialorder %v3075_v62, %v11780_v58  ;;  %vm3485_vm5 = vcmp.gt.f32.partialorder %v3075_v62, %v11792_v2  ;;  %vm3486_vm6 = vcmp.gt.f32.partialorder %v3079_v39, %v11797_v36  ;;  %vm3487_vm7 = vcmp.gt.f32.partialorder %v3079_v39, %v11809_v17 }
 0x4e3   : > { %16902 = vst [vmem:[#allocation310_spill] sm:$0xff] %v12927_v32  ;;  %v9992_v58 = vsel %vm3484_vm4, 1.0, %v16225_v37  ;;  %v3083_v41 = vrot.slane %v1140_v57, %v10354_v13  ;;  %v9993_v2 = vsel %vm3485_vm5, 1.0, %v16225_v37  ;;  %v9994_v36 = vsel %vm3486_vm6, 1.0, %v16225_v37 }
 0x4e4   : > { %4695 = vadd.xlane.f32.xlu0 %v4694_v10  ;;  %v4706_v10 = vsel %vm16259_vm1, %v9991_v45, 0.0  ;;  %v4709_v29 = vsel %vm16259_vm1, %v9992_v58, 0.0  ;;  %v3087_v22 = vrot.slane %v1154_v4, %v10354_v13  ;;  %v4715_v45 = vsel %vm16259_vm1, %v9994_v36, 0.0 }
 0x4e5   : > { %v12935_v18 = vpop.xlane.xlu0 %4485  ;;  %4698 = vadd.xlane.f32.xlu1 %v4697_v27  ;;  %vm3488_vm8 = vcmp.gt.f32.partialorder %v3083_v41, %v11811_v0  ;;  %v9995_v58 = vsel %vm3487_vm7, 1.0, %v16225_v37  ;;  %vm3489_vm9 = vcmp.gt.f32.partialorder %v3083_v41, %v11823_v20 }
 0x4e6   : > { %16903 = vst [vmem:[#allocation311_spill] sm:$0xff] %v12935_v18  ;;  %v12939_v59 = vpop.xlane.xlu1 %4488  ;;  %v9996_v39 = vsel %vm3488_vm8, 1.0, %v16225_v37  ;;  %vm3490_vm10 = vcmp.gt.f32.partialorder %v3087_v22, %v11828_v47  ;;  %v9997_v41 = vsel %vm3489_vm9, 1.0, %v16225_v37  ;;  %vm3491_vm11 = vcmp.gt.f32.partialorder %v3087_v22, %v11841_v12 }
 0x4e7   : > { %16904 = vst [vmem:[#allocation312_spill] sm:$0xff] %v12939_v59  ;;  %v4721_v20 = vsel %vm16259_vm1, %v9996_v39, 0.0  ;;  %v9998_v47 = vsel %vm3490_vm10, 1.0, %v16225_v37  ;;  %v9999_v12 = vsel %vm3491_vm11, 1.0, %v16225_v37 }
 0x4e8   : > { %4701 = vadd.xlane.f32.xlu0 %v4700_v1  ;;  %v4712_v1 = vsel %vm16259_vm1, %v9993_v2, 0.0  ;;  %v16911_v2 = vld [vmem:[#allocation187_spill] sm:$0xff] }
 0x4e9   : > { %v12947_v27 = vpop.xlane.xlu0 %4491  ;;  %4704 = vadd.xlane.f32.xlu1 %v4703_v26  ;;  %v1156_v26 = vcombine.high %v1140_v57, %v1140_v57  ;;  %v1166_v36 = vrot.slane %v16911_v2, %v11590_v19 }
 0x4ea   : > { %16905 = vst [vmem:[#allocation313_spill] sm:$0xff] %v12947_v27  ;;  %v12951_v61 = vpop.xlane.xlu1 %4494 }
 0x4eb   : > { %16906 = vst [vmem:[#allocation314_spill] sm:$0xff] %v12951_v61  ;;  %v3091_v57 = vrot.slane %v1156_v26, %v10354_v13  ;;  %v1174_v39 = vcombine.high %v1166_v36, %v1166_v36 }
 0x4ec   : > { %4707 = vadd.xlane.f32.xlu0 %v4706_v10  ;;  %v1158_v10 = vcombine.high %v1154_v4, %v1154_v4 }
 0x4ed   : > { %v12959_v62 = vpop.xlane.xlu0 %4497  ;;  %4710 = vadd.xlane.f32.xlu1 %v4709_v29  ;;  %v4718_v29 = vsel %vm16259_vm1, %v9995_v58, 0.0  ;;  %vm3492_vm12 = vcmp.gt.f32.partialorder %v3091_v57, %v11844_v8  ;;  %v1182_v58 = vrot.slane %v1166_v36, %v11590_v19  ;;  %vm3493_vm13 = vcmp.gt.f32.partialorder %v3091_v57, %v11856_v60 }
 0x4ee   : > { %16907 = vst [vmem:[#allocation315_spill] sm:$0xff] %v12959_v62  ;;  %v12963_v50 = vpop.xlane.xlu1 %4500  ;;  %v3095_v26 = vrot.slane %v1158_v10, %v10354_v13  ;;  %v10000_v8 = vsel %vm3492_vm12, 1.0, %v16225_v37  ;;  %v10001_v60 = vsel %vm3493_vm13, 1.0, %v16225_v37 }
 0x4ef   : > { %16908 = vst [vmem:[#allocation316_spill] sm:$0xff] %v12963_v50  ;;  %v3099_v36 = vrot.slane %v1182_v58, %v10354_v13 }
 0x4f0   : > { %4713 = vadd.xlane.f32.xlu0 %v4712_v1  ;;  %vm3494_vm14 = vcmp.gt.f32.partialorder %v3095_v26, %v11861_v3  ;;  %vm3495_vm15 = vcmp.gt.f32.partialorder %v3095_v26, %v11874_v15 }
 0x4f1   : > { %v12970_v17 = vpop.xlane.xlu0 %4503  ;;  %4716 = vadd.xlane.f32.xlu1 %v4715_v45  ;;  %v4724_v45 = vsel %vm16259_vm1, %v9997_v41, 0.0  ;;  %v1196_v41 = vrot.slane %v1174_v39, %v11590_v19  ;;  %v10002_v3 = vsel %vm3494_vm14, 1.0, %v16225_v37  ;;  %vm3496_vm0 = vcmp.gt.f32.partialorder %v3099_v36, %v11877_v33 }
 0x4f2   : > { %16909 = vst [vmem:[#allocation317_spill] sm:$0xff] %v12970_v17  ;;  %v12974_v0 = vpop.xlane.xlu1 %4506  ;;  %v4736_v39 = vsel %vm16259_vm1, %v10001_v60, 0.0  ;;  %v4739_v15 = vsel %vm16259_vm1, %v10002_v3, 0.0  ;;  %v10003_v26 = vsel %vm3495_vm15, 1.0, %v16225_v37  ;;  %vm3497_vm2 = vcmp.gt.f32.partialorder %v3099_v36, %v11889_v11 }
 0x4f3   : > { %16910 = vst [vmem:[#allocation318_spill] sm:$0xff] %v12974_v0  ;;  %v10004_v33 = vsel %vm3496_vm0, 1.0, %v16225_v37  ;;  %v1206_v3 = vcombine.high %v1196_v41, %v1196_v41  ;;  %v10005_v11 = vsel %vm3497_vm2, 1.0, %v16225_v37 }
 0x4f4   : > { %4719 = vadd.xlane.f32.xlu0 %v4718_v29  ;;  %v4727_v29 = vsel %vm16259_vm1, %v9998_v47, 0.0  ;;  %v4733_v47 = vsel %vm16259_vm1, %v10000_v8, 0.0  ;;  %v1204_v8 = vcombine.high %v1182_v58, %v1182_v58  ;;  %v4742_v58 = vsel %vm16259_vm1, %v10003_v26, 0.0 }
 0x4f5   : > { %v12983_v1 = vpop.xlane.xlu0 %4509  ;;  %4722 = vadd.xlane.f32.xlu1 %v4721_v20  ;;  %v4730_v20 = vsel %vm16259_vm1, %v9999_v12, 0.0  ;;  %v3103_v12 = vrot.slane %v1196_v41, %v10354_v13  ;;  %v4748_v41 = vsel %vm16259_vm1, %v10005_v11, 0.0 }
 0x4f6   : > { %16912 = vst [vmem:[#allocation319_spill] sm:$0xff] %v12983_v1  ;;  %v12987_v4 = vpop.xlane.xlu1 %4512 }
 0x4f7   : > { %16913 = vst [vmem:[#allocation320_spill] sm:$0xff] %v12987_v4  ;;  %vm3498_vm3 = vcmp.gt.f32.partialorder %v3103_v12, %v11894_v40  ;;  %vm3499_vm4 = vcmp.gt.f32.partialorder %v3103_v12, %v11906_v6  ;;  %v16923_v12 = vld [vmem:[#allocation85_spill] sm:$0xff] }
 0x4f8   : > { %4725 = vadd.xlane.f32.xlu0 %v4724_v45  ;;  %v10006_v40 = vsel %vm3498_vm3, 1.0, %v16225_v37  ;;  %v10007_v6 = vsel %vm3499_vm4, 1.0, %v16225_v37 }
 0x4f9   : > { %v12995_v22 = vpop.xlane.xlu0 %4515  ;;  %4728 = vadd.xlane.f32.xlu1 %v4727_v29  ;;  %v1159_v29 = vcombine.high %v16911_v2, %v16911_v2  ;;  %v4745_v2 = vsel %vm16259_vm1, %v10004_v33, 0.0  ;;  %v4754_v11 = vsel %vm16259_vm1, %v10007_v6, 0.0 }
 0x4fa   : > { %16914 = vst [vmem:[#allocation321_spill] sm:$0xff] %v12995_v22  ;;  %v12999_v10 = vpop.xlane.xlu1 %4518 }
 0x4fb   : > { %16915 = vst [vmem:[#allocation322_spill] sm:$0xff] %v12999_v10  ;;  %v1173_v60 = vrot.slane %v1159_v29, %v11590_v19 }
 0x4fc   : > { %4731 = vadd.xlane.f32.xlu0 %v4730_v20 }
 0x4fd   : > { %v13007_v57 = vpop.xlane.xlu0 %4521  ;;  %4734 = vadd.xlane.f32.xlu1 %v4733_v47  ;;  %v1189_v26 = vrot.slane %v1173_v60, %v11590_v19  ;;  %v1175_v33 = vcombine.high %v1173_v60, %v1173_v60 }
 0x4fe   : > { %16916 = vst [vmem:[#allocation323_spill] sm:$0xff] %v13007_v57  ;;  %v13011_v45 = vpop.xlane.xlu1 %4524 }
 0x4ff   : > { %16917 = vst [vmem:[#allocation324_spill] sm:$0xff] %v13011_v45  ;;  %v3115_v60 = vrot.slane %v1189_v26, %v10354_v13 }
 0x500   : > { %4737 = vadd.xlane.f32.xlu0 %v4736_v39  ;;  %v3107_v39 = vrot.slane %v1204_v8, %v10354_v13  ;;  %v3111_v8 = vrot.slane %v1206_v3, %v10354_v13  ;;  %v1203_v3 = vrot.slane %v1175_v33, %v11590_v19  ;;  %v1205_v33 = vcombine.high %v1189_v26, %v1189_v26 }
 0x501   : > { %v13020_v20 = vpop.xlane.xlu0 %4527  ;;  %4740 = vadd.xlane.f32.xlu1 %v4739_v15  ;;  %v16921_v15 = vld [vmem:[#allocation86_spill] sm:$0xff] }
 0x502   : > { %16918 = vst [vmem:[#allocation325_spill] sm:$0xff] %v13020_v20  ;;  %v13024_v47 = vpop.xlane.xlu1 %4530  ;;  %vm3500_vm5 = vcmp.gt.f32.partialorder %v3107_v39, %v16921_v15  ;;  %vm3501_vm6 = vcmp.gt.f32.partialorder %v3107_v39, %v16923_v12  ;;  %v16929_v12 = vld [vmem:[#allocation92_spill] sm:$0xff]  ;;  %v3119_v19 = vrot.slane %v1203_v3, %v10354_v13  ;;  %v3123_v26 = vrot.slane %v1205_v33, %v10354_v13 }
 0x503   : > { %16919 = vst [vmem:[#allocation326_spill] sm:$0xff] %v13024_v47  ;;  %v10008_v15 = vsel %vm3500_vm5, 1.0, %v16225_v37  ;;  %v10009_v39 = vsel %vm3501_vm6, 1.0, %v16225_v37  ;;  %vm3504_vm9 = vcmp.gt.f32.partialorder %v3115_v60, %v16929_v12  ;;  %v16933_v12 = vld [vmem:[#allocation95_spill] sm:$0xff] }
 0x504   : > { %4743 = vadd.xlane.f32.xlu0 %v4742_v58  ;;  %v4751_v58 = vsel %vm16259_vm1, %v10006_v40, 0.0  ;;  %v4757_v40 = vsel %vm16259_vm1, %v10008_v15, 0.0  ;;  %v4760_v6 = vsel %vm16259_vm1, %v10009_v39, 0.0  ;;  %vm3506_vm11 = vcmp.gt.f32.partialorder %v3119_v19, %v16933_v12  ;;  %v16937_v12 = vld [vmem:[#allocation98_spill] sm:$0xff] }
 0x505   : > { %v13032_v36 = vpop.xlane.xlu0 %4533  ;;  %4746 = vadd.xlane.f32.xlu1 %v4745_v2  ;;  %vm3508_vm13 = vcmp.gt.f32.partialorder %v3123_v26, %v16937_v12 }
 0x506   : > { %16920 = vst [vmem:[#allocation327_spill] sm:$0xff] %v13032_v36  ;;  %v13036_v29 = vpop.xlane.xlu1 %4536 }
 0x507   : > { %16922 = vst [vmem:[#allocation86_spill] sm:$0xff] %v13036_v29  ;;  %v16925_v29 = vld [vmem:[#allocation89_spill] sm:$0xff] }
 0x508   : > { %4749 = vadd.xlane.f32.xlu0 %v4748_v41  ;;  %vm3502_vm7 = vcmp.gt.f32.partialorder %v3111_v8, %v16925_v29  ;;  %v16927_v41 = vld [vmem:[#allocation88_spill] sm:$0xff] }
 0x509   : > { %v13044_v2 = vpop.xlane.xlu0 %4539  ;;  %4752 = vadd.xlane.f32.xlu1 %v4751_v58  ;;  %vm3503_vm8 = vcmp.gt.f32.partialorder %v3111_v8, %v16927_v41  ;;  %v10010_v29 = vsel %vm3502_vm7, 1.0, %v16225_v37  ;;  %v16931_v8 = vld [vmem:[#allocation91_spill] sm:$0xff] }
 0x50a   : > { %16924 = vst [vmem:[#allocation85_spill] sm:$0xff] %v13044_v2  ;;  %v13048_v36 = vpop.xlane.xlu1 %4542  ;;  %v4763_v15 = vsel %vm16259_vm1, %v10010_v29, 0.0  ;;  %vm3505_vm10 = vcmp.gt.f32.partialorder %v3115_v60, %v16931_v8  ;;  %v16935_v60 = vld [vmem:[#allocation94_spill] sm:$0xff] }
 0x50b   : > { %16926 = vst [vmem:[#allocation89_spill] sm:$0xff] %v13048_v36  ;;  %vm3507_vm12 = vcmp.gt.f32.partialorder %v3119_v19, %v16935_v60  ;;  %v16941_v60 = vld [vmem:[#allocation101_spill] sm:$0xff] }
 0x50c   : > { %4755 = vadd.xlane.f32.xlu0 %v4754_v11  ;;  %v10011_v11 = vsel %vm3503_vm8, 1.0, %v16225_v37 }
 0x50d   : > { %v13056_v58 = vpop.xlane.xlu0 %4545  ;;  %4758 = vadd.xlane.f32.xlu1 %v4757_v40  ;;  %v10012_v40 = vsel %vm3504_vm9, 1.0, %v16225_v37  ;;  %v4766_v39 = vsel %vm16259_vm1, %v10011_v11, 0.0 }
 0x50e   : > { %16928 = vst [vmem:[#allocation88_spill] sm:$0xff] %v13056_v58  ;;  %v13060_v36 = vpop.xlane.xlu1 %4548  ;;  %v4769_v29 = vsel %vm16259_vm1, %v10012_v40, 0.0  ;;  %v10013_v58 = vsel %vm3505_vm10, 1.0, %v16225_v37  ;;  %v10015_v40 = vsel %vm3507_vm12, 1.0, %v16225_v37 }
 0x50f   : > { %16930 = vst [vmem:[#allocation92_spill] sm:$0xff] %v13060_v36  ;;  %v4772_v11 = vsel %vm16259_vm1, %v10013_v58, 0.0  ;;  %v4778_v58 = vsel %vm16259_vm1, %v10015_v40, 0.0 }
 0x510   : > { %4761 = vadd.xlane.f32.xlu0 %v4760_v6  ;;  %v1207_v6 = vcombine.high %v1203_v3, %v1203_v3 }
 0x511   : > { %v13067_v41 = vpop.xlane.xlu0 %4551  ;;  %4764 = vadd.xlane.f32.xlu1 %v4763_v15  ;;  %v10014_v15 = vsel %vm3506_vm11, 1.0, %v16225_v37 }
 0x512   : > { %16932 = vst [vmem:[#allocation91_spill] sm:$0xff] %v13067_v41  ;;  %v13071_v36 = vpop.xlane.xlu1 %4554  ;;  %v3127_v3 = vrot.slane %v1207_v6, %v10354_v13  ;;  %v4775_v33 = vsel %vm16259_vm1, %v10014_v15, 0.0  ;;  %v16943_v15 = vld [vmem:[#allocation104_spill] sm:$0xff] }
 0x513   : > { %16934 = vst [vmem:[#allocation95_spill] sm:$0xff] %v13071_v36 }
 0x514   : > { %4767 = vadd.xlane.f32.xlu0 %v4766_v39  ;;  %v16939_v39 = vld [vmem:[#allocation97_spill] sm:$0xff]  ;;  %vm3510_vm15 = vcmp.gt.f32.partialorder %v3127_v3, %v16941_v60  ;;  %vm3511_vm0 = vcmp.gt.f32.partialorder %v3127_v3, %v16943_v15 }
 0x515   : > { %v13078_v8 = vpop.xlane.xlu0 %4557  ;;  %4770 = vadd.xlane.f32.xlu1 %v4769_v29  ;;  %vm3509_vm14 = vcmp.gt.f32.partialorder %v3123_v26, %v16939_v39  ;;  %v10016_v29 = vsel %vm3508_vm13, 1.0, %v16225_v37  ;;  %v10018_v26 = vsel %vm3510_vm15, 1.0, %v16225_v37  ;;  %v10019_v40 = vsel %vm3511_vm0, 1.0, %v16225_v37 }
 0x516   : > { %16936 = vst [vmem:[#allocation94_spill] sm:$0xff] %v13078_v8  ;;  %v13082_v36 = vpop.xlane.xlu1 %4560  ;;  %v4781_v13 = vsel %vm16259_vm1, %v10016_v29, 0.0  ;;  %v10017_v6 = vsel %vm3509_vm14, 1.0, %v16225_v37  ;;  %v4787_v60 = vsel %vm16259_vm1, %v10018_v26, 0.0  ;;  %v4790_v3 = vsel %vm16259_vm1, %v10019_v40, 0.0 }
 0x517   : > { %16938 = vst [vmem:[#allocation98_spill] sm:$0xff] %v13082_v36  ;;  %v4784_v39 = vsel %vm16259_vm1, %v10017_v6, 0.0  ;;  %vm8260_vm1 = vcmask 130112  }
 0x518   : > { %4773 = vadd.xlane.f32.xlu0 %v4772_v11 }
 0x519   : > { %v13089_v19 = vpop.xlane.xlu0 %4563  ;;  %4776 = vadd.xlane.f32.xlu1 %v4775_v33 }
 0x51a   : > { %16940 = vst [vmem:[#allocation97_spill] sm:$0xff] %v13089_v19  ;;  %v13093_v12 = vpop.xlane.xlu1 %4566 }
 0x51b   : > { %16942 = vst [vmem:[#allocation101_spill] sm:$0xff] %v13093_v12 }
 0x51c   : > { %4779 = vadd.xlane.f32.xlu0 %v4778_v58 }
 0x51d   : > { %v13099_v11 = vpop.xlane.xlu0 %4569  ;;  %4782 = vadd.xlane.f32.xlu1 %v4781_v13 }
 0x51e   : > { %16944 = vst [vmem:[#allocation104_spill] sm:$0xff] %v13099_v11  ;;  %v13102_v33 = vpop.xlane.xlu1 %4572 }
 0x51f   : > { %16945 = vst [vmem:[#allocation328_spill] sm:$0xff] %v13102_v33 }
 0x520   : > { %4785 = vadd.xlane.f32.xlu0 %v4784_v39 }
 0x521   : > { %v13107_v58 = vpop.xlane.xlu0 %4575  ;;  %4788 = vadd.xlane.f32.xlu1 %v4787_v60  ;;  %v16955_v60 = vld [vmem:[#allocation7_spill] sm:$0xff] }
 0x522   : > { %16946 = vst [vmem:[#allocation329_spill] sm:$0xff] %v13107_v58  ;;  %v13109_v29 = vpop.xlane.xlu1 %4578 }
 0x523   : > { %16947 = vst [vmem:[#allocation330_spill] sm:$0xff] %v13109_v29 }
 0x524   : > { %4791 = vadd.xlane.f32.xlu0 %v4790_v3  ;;  %v16958_v3 = vld [vmem:[#allocation6_spill] sm:$0xff] }
 0x525   : > { %v13112_v13 = vpop.xlane.xlu0 %4581 }
 0x526   : > { %16948 = vst [vmem:[#allocation331_spill] sm:$0xff] %v13112_v13  ;;  %v13114_v15 = vpop.xlane.xlu1 %4584 }
 0x527   : > { %16949 = vst [vmem:[#allocation332_spill] sm:$0xff] %v13114_v15 }
 0x529   : > { %v13116_v33 = vpop.xlane.xlu0 %4587 }
 0x52a   : > { %16950 = vst [vmem:[#allocation333_spill] sm:$0xff] %v13116_v33  ;;  %v13118_v6 = vpop.xlane.xlu1 %4590 }
 0x52b   : > { %16951 = vst [vmem:[#allocation334_spill] sm:$0xff] %v13118_v6  ;;  %v16966_v6 = vld [vmem:[#allocation12_spill] sm:$0xff] }
 0x52d   : > { %v13120_v39 = vpop.xlane.xlu0 %4593 }
 0x52e   : > { %16952 = vst [vmem:[#allocation335_spill] sm:$0xff] %v13120_v39  ;;  %v13122_v26 = vpop.xlane.xlu1 %4596 }
 0x52f   : > { %16953 = vst [vmem:[#allocation336_spill] sm:$0xff] %v13122_v26 }
 0x531   : > { %v13124_v37 = vpop.xlane.xlu0 %4599 }
 0x532   : > { %16954 = vst [vmem:[#allocation337_spill] sm:$0xff] %v13124_v37  ;;  %5310 = vbcast.lane.b32.xlu1 %v16955_v60, 256  ;;  %v13127_v29 = vpop.xlane.xlu1 %4602  ;;  %v16963_v37 = vld [vmem:[#allocation10_spill] sm:$0xff] }
 0x533   : > { %16956 = vst [vmem:[#allocation7_spill] sm:$0xff] %v13127_v29 }
 0x535   : > { %v13129_v40 = vpop.xlane.xlu0 %4605 }
 0x536   : > { %16957 = vst [vmem:[#allocation338_spill] sm:$0xff] %v13129_v40  ;;  %5321 = vbcast.lane.b32.xlu1 %v16958_v3, 256  ;;  %v13132_v13 = vpop.xlane.xlu1 %4608 }
 0x537   : > { %16959 = vst [vmem:[#allocation6_spill] sm:$0xff] %v13132_v13 }
 0x539   : > { %v13134_v15 = vpop.xlane.xlu0 %4611 }
 0x53a   : > { %16960 = vst [vmem:[#allocation339_spill] sm:$0xff] %v13134_v15  ;;  %5314 = vbcast.lane.b32.xlu0 %v16955_v60, 264  ;;  %5325 = vbcast.lane.b32.xlu1 %v16958_v3, 264  ;;  %v13138_v39 = vpop.xlane.xlu1 %4614  ;;  %v16969_v3 = vld [vmem:[#allocation13_spill] sm:$0xff] }
 0x53b   : > { %16961 = vst [vmem:[#allocation340_spill] sm:$0xff] %v13138_v39 }
 0x53d   : > { %v13140_v26 = vpop.xlane.xlu0 %4617 }
 0x53e   : > { %16962 = vst [vmem:[#allocation341_spill] sm:$0xff] %v13140_v26  ;;  %5332 = vbcast.lane.b32.xlu0 %v16963_v37, 256  ;;  %5336 = vbcast.lane.b32.xlu1 %v16963_v37, 264  ;;  %v13144_v29 = vpop.xlane.xlu1 %4620  ;;  %v16972_v37 = vld [vmem:[#allocation14_spill] sm:$0xff] }
 0x53f   : > { %16964 = vst [vmem:[#allocation10_spill] sm:$0xff] %v13144_v29 }
 0x541   : > { %v13146_v40 = vpop.xlane.xlu0 %4623 }
 0x542   : > { %16965 = vst [vmem:[#allocation342_spill] sm:$0xff] %v13146_v40  ;;  %5343 = vbcast.lane.b32.xlu0 %v16966_v6, 256  ;;  %5347 = vbcast.lane.b32.xlu1 %v16966_v6, 264  ;;  %v13150_v15 = vpop.xlane.xlu1 %4626  ;;  %v16975_v6 = vld [vmem:[#allocation15_spill] sm:$0xff] }
 0x543   : > { %16967 = vst [vmem:[#allocation12_spill] sm:$0xff] %v13150_v15 }
 0x545   : > { %v13152_v60 = vpop.xlane.xlu0 %4629 }
 0x546   : > { %16968 = vst [vmem:[#allocation343_spill] sm:$0xff] %v13152_v60  ;;  %5354 = vbcast.lane.b32.xlu0 %v16969_v3, 256  ;;  %5358 = vbcast.lane.b32.xlu1 %v16969_v3, 264  ;;  %v13156_v26 = vpop.xlane.xlu1 %4632  ;;  %v16978_v3 = vld [vmem:[#allocation17_spill] sm:$0xff] }
 0x547   : > { %16970 = vst [vmem:[#allocation13_spill] sm:$0xff] %v13156_v26 }
 0x549   : > { %v13158_v39 = vpop.xlane.xlu0 %4635 }
 0x54a   : > { %16971 = vst [vmem:[#allocation344_spill] sm:$0xff] %v13158_v39  ;;  %5365 = vbcast.lane.b32.xlu0 %v16972_v37, 256  ;;  %5369 = vbcast.lane.b32.xlu1 %v16972_v37, 264  ;;  %v13162_v40 = vpop.xlane.xlu1 %4638  ;;  %v16981_v37 = vld [vmem:[#allocation26_spill] sm:$0xff] }
 0x54b   : > { %16973 = vst [vmem:[#allocation14_spill] sm:$0xff] %v13162_v40 }
 0x54d   : > { %v13164_v29 = vpop.xlane.xlu0 %4641 }
 0x54e   : > { %16974 = vst [vmem:[#allocation345_spill] sm:$0xff] %v13164_v29  ;;  %5376 = vbcast.lane.b32.xlu0 %v16975_v6, 256  ;;  %5380 = vbcast.lane.b32.xlu1 %v16975_v6, 264  ;;  %v13168_v60 = vpop.xlane.xlu1 %4644  ;;  %v16984_v6 = vld [vmem:[#allocation27_spill] sm:$0xff] }
 0x54f   : > { %16976 = vst [vmem:[#allocation15_spill] sm:$0xff] %v13168_v60 }
 0x551   : > { %v13170_v15 = vpop.xlane.xlu0 %4647 }
 0x552   : > { %16977 = vst [vmem:[#allocation346_spill] sm:$0xff] %v13170_v15  ;;  %5387 = vbcast.lane.b32.xlu0 %v16978_v3, 256  ;;  %5391 = vbcast.lane.b32.xlu1 %v16978_v3, 264  ;;  %v13174_v39 = vpop.xlane.xlu1 %4650  ;;  %v16987_v3 = vld [vmem:[#allocation28_spill] sm:$0xff] }
 0x553   : > { %16979 = vst [vmem:[#allocation17_spill] sm:$0xff] %v13174_v39 }
 0x555   : > { %v13176_v26 = vpop.xlane.xlu0 %4653 }
 0x556   : > { %16980 = vst [vmem:[#allocation347_spill] sm:$0xff] %v13176_v26  ;;  %5398 = vbcast.lane.b32.xlu0 %v16981_v37, 256  ;;  %5402 = vbcast.lane.b32.xlu1 %v16981_v37, 264  ;;  %v13180_v29 = vpop.xlane.xlu1 %4656  ;;  %v16990_v37 = vld [vmem:[#allocation29_spill] sm:$0xff] }
 0x557   : > { %16982 = vst [vmem:[#allocation26_spill] sm:$0xff] %v13180_v29 }
 0x559   : > { %v13182_v40 = vpop.xlane.xlu0 %4659 }
 0x55a   : > { %16983 = vst [vmem:[#allocation348_spill] sm:$0xff] %v13182_v40  ;;  %5409 = vbcast.lane.b32.xlu0 %v16984_v6, 256  ;;  %5413 = vbcast.lane.b32.xlu1 %v16984_v6, 264  ;;  %v13186_v15 = vpop.xlane.xlu1 %4662  ;;  %v16993_v6 = vld [vmem:[#allocation30_spill] sm:$0xff] }
 0x55b   : > { %16985 = vst [vmem:[#allocation27_spill] sm:$0xff] %v13186_v15 }
 0x55d   : > { %v13188_v60 = vpop.xlane.xlu0 %4665 }
 0x55e   : > { %16986 = vst [vmem:[#allocation349_spill] sm:$0xff] %v13188_v60  ;;  %5420 = vbcast.lane.b32.xlu0 %v16987_v3, 256  ;;  %5424 = vbcast.lane.b32.xlu1 %v16987_v3, 264  ;;  %v13192_v26 = vpop.xlane.xlu1 %4668  ;;  %v16996_v3 = vld [vmem:[#allocation31_spill] sm:$0xff] }
 0x55f   : > { %16988 = vst [vmem:[#allocation28_spill] sm:$0xff] %v13192_v26 }
 0x561   : > { %v13194_v39 = vpop.xlane.xlu0 %4671 }
 0x562   : > { %16989 = vst [vmem:[#allocation350_spill] sm:$0xff] %v13194_v39  ;;  %5431 = vbcast.lane.b32.xlu0 %v16990_v37, 256  ;;  %5435 = vbcast.lane.b32.xlu1 %v16990_v37, 264  ;;  %v13198_v40 = vpop.xlane.xlu1 %4674  ;;  %v16999_v37 = vld [vmem:[#allocation32_spill] sm:$0xff] }
 0x563   : > { %16991 = vst [vmem:[#allocation29_spill] sm:$0xff] %v13198_v40 }
 0x565   : > { %v13200_v29 = vpop.xlane.xlu0 %4677 }
 0x566   : > { %16992 = vst [vmem:[#allocation351_spill] sm:$0xff] %v13200_v29  ;;  %5442 = vbcast.lane.b32.xlu0 %v16993_v6, 256  ;;  %5446 = vbcast.lane.b32.xlu1 %v16993_v6, 264  ;;  %v13204_v60 = vpop.xlane.xlu1 %4680  ;;  %v17002_v6 = vld [vmem:[#allocation33_spill] sm:$0xff] }
 0x567   : > { %16994 = vst [vmem:[#allocation30_spill] sm:$0xff] %v13204_v60 }
 0x569   : > { %v13206_v15 = vpop.xlane.xlu0 %4683 }
 0x56a   : > { %16995 = vst [vmem:[#allocation352_spill] sm:$0xff] %v13206_v15  ;;  %5453 = vbcast.lane.b32.xlu0 %v16996_v3, 256  ;;  %5457 = vbcast.lane.b32.xlu1 %v16996_v3, 264  ;;  %v13210_v39 = vpop.xlane.xlu1 %4686  ;;  %v17005_v3 = vld [vmem:[#allocation35_spill] sm:$0xff] }
 0x56b   : > { %16997 = vst [vmem:[#allocation31_spill] sm:$0xff] %v13210_v39 }
 0x56d   : > { %v13212_v26 = vpop.xlane.xlu0 %4689 }
 0x56e   : > { %16998 = vst [vmem:[#allocation353_spill] sm:$0xff] %v13212_v26  ;;  %5464 = vbcast.lane.b32.xlu0 %v16999_v37, 256  ;;  %5468 = vbcast.lane.b32.xlu1 %v16999_v37, 264  ;;  %v13216_v29 = vpop.xlane.xlu1 %4692  ;;  %v17008_v37 = vld [vmem:[#allocation36_spill] sm:$0xff] }
 0x56f   : > { %17000 = vst [vmem:[#allocation32_spill] sm:$0xff] %v13216_v29 }
 0x571   : > { %v13218_v40 = vpop.xlane.xlu0 %4695 }
 0x572   : > { %17001 = vst [vmem:[#allocation354_spill] sm:$0xff] %v13218_v40  ;;  %5475 = vbcast.lane.b32.xlu0 %v17002_v6, 256  ;;  %5479 = vbcast.lane.b32.xlu1 %v17002_v6, 264  ;;  %v13222_v15 = vpop.xlane.xlu1 %4698  ;;  %v17011_v6 = vld [vmem:[#allocation37_spill] sm:$0xff] }
 0x573   : > { %17003 = vst [vmem:[#allocation33_spill] sm:$0xff] %v13222_v15 }
 0x575   : > { %v13224_v60 = vpop.xlane.xlu0 %4701 }
 0x576   : > { %17004 = vst [vmem:[#allocation355_spill] sm:$0xff] %v13224_v60  ;;  %5486 = vbcast.lane.b32.xlu0 %v17005_v3, 256  ;;  %5490 = vbcast.lane.b32.xlu1 %v17005_v3, 264  ;;  %v13228_v26 = vpop.xlane.xlu1 %4704  ;;  %v17014_v3 = vld [vmem:[#allocation38_spill] sm:$0xff] }
 0x577   : > { %17006 = vst [vmem:[#allocation35_spill] sm:$0xff] %v13228_v26 }
 0x579   : > { %v13230_v39 = vpop.xlane.xlu0 %4707 }
 0x57a   : > { %17007 = vst [vmem:[#allocation356_spill] sm:$0xff] %v13230_v39  ;;  %5497 = vbcast.lane.b32.xlu0 %v17008_v37, 256  ;;  %5501 = vbcast.lane.b32.xlu1 %v17008_v37, 264  ;;  %v13234_v40 = vpop.xlane.xlu1 %4710  ;;  %v17017_v37 = vld [vmem:[#allocation39_spill] sm:$0xff] }
 0x57b   : > { %17009 = vst [vmem:[#allocation36_spill] sm:$0xff] %v13234_v40 }
 0x57d   : > { %v13236_v29 = vpop.xlane.xlu0 %4713 }
 0x57e   : > { %17010 = vst [vmem:[#allocation357_spill] sm:$0xff] %v13236_v29  ;;  %5508 = vbcast.lane.b32.xlu0 %v17011_v6, 256  ;;  %5512 = vbcast.lane.b32.xlu1 %v17011_v6, 264  ;;  %v13240_v60 = vpop.xlane.xlu1 %4716  ;;  %v17020_v6 = vld [vmem:[#allocation40_spill] sm:$0xff] }
 0x57f   : > { %17012 = vst [vmem:[#allocation37_spill] sm:$0xff] %v13240_v60 }
 0x581   : > { %v13242_v15 = vpop.xlane.xlu0 %4719 }
 0x582   : > { %17013 = vst [vmem:[#allocation358_spill] sm:$0xff] %v13242_v15  ;;  %5519 = vbcast.lane.b32.xlu0 %v17014_v3, 256  ;;  %5523 = vbcast.lane.b32.xlu1 %v17014_v3, 264  ;;  %v13246_v39 = vpop.xlane.xlu1 %4722  ;;  %v17023_v3 = vld [vmem:[#allocation41_spill] sm:$0xff] }
 0x583   : > { %17015 = vst [vmem:[#allocation38_spill] sm:$0xff] %v13246_v39 }
 0x585   : > { %v13248_v26 = vpop.xlane.xlu0 %4725 }
 0x586   : > { %17016 = vst [vmem:[#allocation359_spill] sm:$0xff] %v13248_v26  ;;  %5530 = vbcast.lane.b32.xlu0 %v17017_v37, 256  ;;  %5534 = vbcast.lane.b32.xlu1 %v17017_v37, 264  ;;  %v13252_v29 = vpop.xlane.xlu1 %4728  ;;  %v17026_v37 = vld [vmem:[#allocation42_spill] sm:$0xff] }
 0x587   : > { %17018 = vst [vmem:[#allocation39_spill] sm:$0xff] %v13252_v29 }
 0x589   : > { %v13254_v40 = vpop.xlane.xlu0 %4731 }
 0x58a   : > { %17019 = vst [vmem:[#allocation360_spill] sm:$0xff] %v13254_v40  ;;  %5541 = vbcast.lane.b32.xlu0 %v17020_v6, 256  ;;  %5545 = vbcast.lane.b32.xlu1 %v17020_v6, 264  ;;  %v13258_v15 = vpop.xlane.xlu1 %4734  ;;  %v17029_v6 = vld [vmem:[#allocation43_spill] sm:$0xff] }
 0x58b   : > { %17021 = vst [vmem:[#allocation40_spill] sm:$0xff] %v13258_v15 }
 0x58d   : > { %v13260_v60 = vpop.xlane.xlu0 %4737 }
 0x58e   : > { %17022 = vst [vmem:[#allocation361_spill] sm:$0xff] %v13260_v60  ;;  %5552 = vbcast.lane.b32.xlu0 %v17023_v3, 256  ;;  %5556 = vbcast.lane.b32.xlu1 %v17023_v3, 264  ;;  %v13264_v26 = vpop.xlane.xlu1 %4740  ;;  %v17032_v3 = vld [vmem:[#allocation45_spill] sm:$0xff] }
 0x58f   : > { %17024 = vst [vmem:[#allocation41_spill] sm:$0xff] %v13264_v26 }
 0x591   : > { %v13266_v39 = vpop.xlane.xlu0 %4743 }
 0x592   : > { %17025 = vst [vmem:[#allocation362_spill] sm:$0xff] %v13266_v39  ;;  %5563 = vbcast.lane.b32.xlu0 %v17026_v37, 256  ;;  %5567 = vbcast.lane.b32.xlu1 %v17026_v37, 264  ;;  %v13270_v40 = vpop.xlane.xlu1 %4746  ;;  %v17035_v37 = vld [vmem:[#allocation46_spill] sm:$0xff] }
 0x593   : > { %17027 = vst [vmem:[#allocation42_spill] sm:$0xff] %v13270_v40 }
 0x595   : > { %v13272_v29 = vpop.xlane.xlu0 %4749 }
 0x596   : > { %17028 = vst [vmem:[#allocation363_spill] sm:$0xff] %v13272_v29  ;;  %5574 = vbcast.lane.b32.xlu0 %v17029_v6, 256  ;;  %5578 = vbcast.lane.b32.xlu1 %v17029_v6, 264  ;;  %v13276_v60 = vpop.xlane.xlu1 %4752  ;;  %v17038_v6 = vld [vmem:[#allocation47_spill] sm:$0xff] }
 0x597   : > { %17030 = vst [vmem:[#allocation43_spill] sm:$0xff] %v13276_v60 }
 0x599   : > { %v13278_v15 = vpop.xlane.xlu0 %4755 }
 0x59a   : > { %17031 = vst [vmem:[#allocation364_spill] sm:$0xff] %v13278_v15  ;;  %5585 = vbcast.lane.b32.xlu0 %v17032_v3, 256  ;;  %5589 = vbcast.lane.b32.xlu1 %v17032_v3, 264  ;;  %v13282_v39 = vpop.xlane.xlu1 %4758  ;;  %v17041_v3 = vld [vmem:[#allocation48_spill] sm:$0xff] }
 0x59b   : > { %17033 = vst [vmem:[#allocation45_spill] sm:$0xff] %v13282_v39 }
 0x59d   : > { %v13284_v26 = vpop.xlane.xlu0 %4761 }
 0x59e   : > { %17034 = vst [vmem:[#allocation365_spill] sm:$0xff] %v13284_v26  ;;  %5596 = vbcast.lane.b32.xlu0 %v17035_v37, 256  ;;  %5600 = vbcast.lane.b32.xlu1 %v17035_v37, 264  ;;  %v13288_v29 = vpop.xlane.xlu1 %4764  ;;  %v17044_v37 = vld [vmem:[#allocation49_spill] sm:$0xff] }
 0x59f   : > { %17036 = vst [vmem:[#allocation46_spill] sm:$0xff] %v13288_v29 }
 0x5a1   : > { %v13290_v40 = vpop.xlane.xlu0 %4767 }
 0x5a2   : > { %17037 = vst [vmem:[#allocation366_spill] sm:$0xff] %v13290_v40  ;;  %5607 = vbcast.lane.b32.xlu0 %v17038_v6, 256  ;;  %5611 = vbcast.lane.b32.xlu1 %v17038_v6, 264  ;;  %v13294_v15 = vpop.xlane.xlu1 %4770  ;;  %v17047_v6 = vld [vmem:[#allocation52_spill] sm:$0xff] }
 0x5a3   : > { %17039 = vst [vmem:[#allocation47_spill] sm:$0xff] %v13294_v15 }
 0x5a5   : > { %v13296_v60 = vpop.xlane.xlu0 %4773 }
 0x5a6   : > { %17040 = vst [vmem:[#allocation367_spill] sm:$0xff] %v13296_v60  ;;  %5618 = vbcast.lane.b32.xlu0 %v17041_v3, 256  ;;  %5622 = vbcast.lane.b32.xlu1 %v17041_v3, 264  ;;  %v13300_v26 = vpop.xlane.xlu1 %4776  ;;  %v17050_v3 = vld [vmem:[#allocation55_spill] sm:$0xff] }
 0x5a7   : > { %17042 = vst [vmem:[#allocation48_spill] sm:$0xff] %v13300_v26 }
 0x5a9   : > { %v13302_v39 = vpop.xlane.xlu0 %4779 }
 0x5aa   : > { %17043 = vst [vmem:[#allocation368_spill] sm:$0xff] %v13302_v39  ;;  %5629 = vbcast.lane.b32.xlu0 %v17044_v37, 256  ;;  %5633 = vbcast.lane.b32.xlu1 %v17044_v37, 264  ;;  %v13306_v40 = vpop.xlane.xlu1 %4782  ;;  %v17051_v37 = vld [vmem:[#allocation56_spill] sm:$0xff] }
 0x5ab   : > { %17045 = vst [vmem:[#allocation49_spill] sm:$0xff] %v13306_v40 }
 0x5ad   : > { %v13308_v29 = vpop.xlane.xlu0 %4785 }
 0x5ae   : > { %17046 = vst [vmem:[#allocation369_spill] sm:$0xff] %v13308_v29  ;;  %5640 = vbcast.lane.b32.xlu0 %v17047_v6, 256  ;;  %5644 = vbcast.lane.b32.xlu1 %v17047_v6, 264  ;;  %v13312_v60 = vpop.xlane.xlu1 %4788  ;;  %v17052_v6 = vld [vmem:[#allocation62_spill] sm:$0xff] }
 0x5af   : > { %17048 = vst [vmem:[#allocation52_spill] sm:$0xff] %v13312_v60 }
 0x5b1   : > { %v13314_v15 = vpop.xlane.xlu0 %4791 }
 0x5b2   : > { %17049 = vst [vmem:[#allocation370_spill] sm:$0xff] %v13314_v15  ;;  %5651 = vbcast.lane.b32.xlu0 %v17050_v3, 256  ;;  %5655 = vbcast.lane.b32.xlu1 %v17050_v3, 264  ;;  %v13318_v39 = vpop.permute.xlu1 %5310  ;;  %v17053_v3 = vld [vmem:[#allocation65_spill] sm:$0xff] }
 0x5b5   : > { %v13320_v26 = vpop.permute.xlu0 %5314 }
 0x5b6   : > { %5662 = vbcast.lane.b32.xlu0 %v17051_v37, 256  ;;  %5666 = vbcast.lane.b32.xlu1 %v17051_v37, 264  ;;  %v13324_v29 = vpop.permute.xlu1 %5321  ;;  %v17054_v37 = vld [vmem:[#allocation68_spill] sm:$0xff] }
 0x5b9   : > { %v13326_v40 = vpop.permute.xlu0 %5332 }
 0x5ba   : > { %5673 = vbcast.lane.b32.xlu0 %v17052_v6, 256  ;;  %5677 = vbcast.lane.b32.xlu1 %v17052_v6, 264  ;;  %v13330_v15 = vpop.permute.xlu1 %5325  ;;  %v17055_v6 = vld [vmem:[#allocation71_spill] sm:$0xff] }
 0x5bd   : > { %v13332_v60 = vpop.permute.xlu0 %5343 }
 0x5be   : > { %5684 = vbcast.lane.b32.xlu0 %v17053_v3, 256  ;;  %5688 = vbcast.lane.b32.xlu1 %v17053_v3, 264  ;;  %v13336_v13 = vpop.permute.xlu1 %5336  ;;  %v17056_v3 = vld [vmem:[#allocation72_spill] sm:$0xff] }
 0x5c1   : > { %v13338_v33 = vpop.permute.xlu0 %5354 }
 0x5c2   : > { %5695 = vbcast.lane.b32.xlu0 %v17054_v37, 256  ;;  %5699 = vbcast.lane.b32.xlu1 %v17054_v37, 264  ;;  %v13342_v58 = vpop.permute.xlu1 %5347  ;;  %v17057_v37 = vld [vmem:[#allocation73_spill] sm:$0xff] }
 0x5c5   : > { %v13344_v11 = vpop.permute.xlu0 %5365 }
 0x5c6   : > { %5706 = vbcast.lane.b32.xlu0 %v17055_v6, 256  ;;  %5710 = vbcast.lane.b32.xlu1 %v17055_v6, 264  ;;  %v13348_v12 = vpop.permute.xlu1 %5358  ;;  %v17058_v6 = vld [vmem:[#allocation74_spill] sm:$0xff] }
 0x5c9   : > { %v13350_v19 = vpop.permute.xlu0 %5376 }
 0x5ca   : > { %5717 = vbcast.lane.b32.xlu0 %v17056_v3, 256  ;;  %5721 = vbcast.lane.b32.xlu1 %v17056_v3, 264  ;;  %v13354_v36 = vpop.permute.xlu1 %5369  ;;  %v17059_v3 = vld [vmem:[#allocation75_spill] sm:$0xff] }
 0x5cd   : > { %v13356_v8 = vpop.permute.xlu0 %5387 }
 0x5ce   : > { %5728 = vbcast.lane.b32.xlu0 %v17057_v37, 256  ;;  %5732 = vbcast.lane.b32.xlu1 %v17057_v37, 264  ;;  %v13360_v41 = vpop.permute.xlu1 %5380  ;;  %v17060_v37 = vld [vmem:[#allocation77_spill] sm:$0xff] }
 0x5d1   : > { %v13362_v2 = vpop.permute.xlu0 %5398 }
 0x5d2   : > { %5739 = vbcast.lane.b32.xlu0 %v17058_v6, 256  ;;  %5743 = vbcast.lane.b32.xlu1 %v17058_v6, 264  ;;  %v13366_v47 = vpop.permute.xlu1 %5391  ;;  %v17061_v6 = vld [vmem:[#allocation78_spill] sm:$0xff] }
 0x5d5   : > { %v13368_v20 = vpop.permute.xlu0 %5409 }
 0x5d6   : > { %5750 = vbcast.lane.b32.xlu0 %v17059_v3, 256  ;;  %5754 = vbcast.lane.b32.xlu1 %v17059_v3, 264  ;;  %v13372_v45 = vpop.permute.xlu1 %5402  ;;  %v17062_v3 = vld [vmem:[#allocation79_spill] sm:$0xff] }
 0x5d9   : > { %v13374_v57 = vpop.permute.xlu0 %5420 }
 0x5da   : > { %5761 = vbcast.lane.b32.xlu0 %v17060_v37, 256  ;;  %5765 = vbcast.lane.b32.xlu1 %v17060_v37, 264  ;;  %v13378_v10 = vpop.permute.xlu1 %5413  ;;  %v17063_v37 = vld [vmem:[#allocation80_spill] sm:$0xff] }
 0x5dd   : > { %v13380_v22 = vpop.permute.xlu0 %5431 }
 0x5de   : > { %5772 = vbcast.lane.b32.xlu0 %v17061_v6, 256  ;;  %5776 = vbcast.lane.b32.xlu1 %v17061_v6, 264  ;;  %v13384_v4 = vpop.permute.xlu1 %5424  ;;  %v17064_v6 = vld [vmem:[#allocation81_spill] sm:$0xff] }
 0x5e1   : > { %v13386_v1 = vpop.permute.xlu0 %5442 }
 0x5e2   : > { %5783 = vbcast.lane.b32.xlu0 %v17062_v3, 256  ;;  %5787 = vbcast.lane.b32.xlu1 %v17062_v3, 264  ;;  %v13390_v0 = vpop.permute.xlu1 %5435  ;;  %v17065_v3 = vld [vmem:[#allocation82_spill] sm:$0xff] }
 0x5e5   : > { %v13392_v17 = vpop.permute.xlu0 %5453 }
 0x5e6   : > { %5794 = vbcast.lane.b32.xlu0 %v17063_v37, 256  ;;  %5798 = vbcast.lane.b32.xlu1 %v17063_v37, 264  ;;  %v13396_v50 = vpop.permute.xlu1 %5446  ;;  %v17066_v37 = vld [vmem:[#allocation83_spill] sm:$0xff] }
 0x5e9   : > { %v13398_v62 = vpop.permute.xlu0 %5464 }
 0x5ea   : > { %5805 = vbcast.lane.b32.xlu0 %v17064_v6, 256  ;;  %5809 = vbcast.lane.b32.xlu1 %v17064_v6, 264  ;;  %v13402_v61 = vpop.permute.xlu1 %5457  ;;  %v17067_v6 = vld [vmem:[#allocation84_spill] sm:$0xff] }
 0x5ed   : > { %v13404_v27 = vpop.permute.xlu0 %5475 }
 0x5ee   : > { %5816 = vbcast.lane.b32.xlu0 %v17065_v3, 256  ;;  %5820 = vbcast.lane.b32.xlu1 %v17065_v3, 264  ;;  %v13408_v59 = vpop.permute.xlu1 %5468  ;;  %v17068_v3 = vld [vmem:[#allocation90_spill] sm:$0xff] }
 0x5f1   : > { %v13410_v18 = vpop.permute.xlu0 %5486 }
 0x5f2   : > { %5827 = vbcast.lane.b32.xlu0 %v17066_v37, 256  ;;  %5831 = vbcast.lane.b32.xlu1 %v17066_v37, 264  ;;  %v13414_v32 = vpop.permute.xlu1 %5479  ;;  %v17069_v37 = vld [vmem:[#allocation93_spill] sm:$0xff] }
 0x5f5   : > { %v13416_v55 = vpop.permute.xlu0 %5497 }
 0x5f6   : > { %5838 = vbcast.lane.b32.xlu0 %v17067_v6, 256  ;;  %5842 = vbcast.lane.b32.xlu1 %v17067_v6, 264  ;;  %v13420_v25 = vpop.permute.xlu1 %5490  ;;  %v17070_v6 = vld [vmem:[#allocation96_spill] sm:$0xff] }
 0x5f9   : > { %v13422_v31 = vpop.permute.xlu0 %5508 }
 0x5fa   : > { %5849 = vbcast.lane.b32.xlu0 %v17068_v3, 256  ;;  %5853 = vbcast.lane.b32.xlu1 %v17068_v3, 264  ;;  %v13426_v7 = vpop.permute.xlu1 %5501  ;;  %v17071_v3 = vld [vmem:[#allocation99_spill] sm:$0xff] }
 0x5fd   : > { %v13428_v54 = vpop.permute.xlu0 %5519 }
 0x5fe   : > { %5860 = vbcast.lane.b32.xlu0 %v17069_v37, 256  ;;  %5864 = vbcast.lane.b32.xlu1 %v17069_v37, 264  ;;  %v13432_v5 = vpop.permute.xlu1 %5512  ;;  %v17072_v37 = vld [vmem:[#allocation102_spill] sm:$0xff] }
 0x601   : > { %v13434_v51 = vpop.permute.xlu0 %5530 }
 0x602   : > { %5871 = vbcast.lane.b32.xlu0 %v17070_v6, 256  ;;  %5875 = vbcast.lane.b32.xlu1 %v17070_v6, 264  ;;  %v13438_v63 = vpop.permute.xlu1 %5523  ;;  %v17073_v6 = vld [vmem:[#allocation105_spill] sm:$0xff] }
 0x605   : > { %v13440_v52 = vpop.permute.xlu0 %5541 }
 0x606   : > { %5882 = vbcast.lane.b32.xlu0 %v17071_v3, 256  ;;  %5886 = vbcast.lane.b32.xlu1 %v17071_v3, 264  ;;  %v13444_v42 = vpop.permute.xlu1 %5534  ;;  %v17074_v3 = vld [vmem:[#allocation108_spill] sm:$0xff] }
 0x609   : > { %v13446_v38 = vpop.permute.xlu0 %5552 }
 0x60a   : > { %5893 = vbcast.lane.b32.xlu0 %v17072_v37, 256  ;;  %5897 = vbcast.lane.b32.xlu1 %v17072_v37, 264  ;;  %v13450_v9 = vpop.permute.xlu1 %5545  ;;  %v17075_v37 = vld [vmem:[#allocation109_spill] sm:$0xff] }
 0x60d   : > { %v13452_v35 = vpop.permute.xlu0 %5563 }
 0x60e   : > { %5904 = vbcast.lane.b32.xlu0 %v17073_v6, 256  ;;  %5908 = vbcast.lane.b32.xlu1 %v17073_v6, 264  ;;  %v13456_v23 = vpop.permute.xlu1 %5556  ;;  %v17077_v6 = vld [vmem:[#allocation114_spill] sm:$0xff] }
 0x611   : > { %v13458_v14 = vpop.permute.xlu0 %5574 }
 0x612   : > { %5915 = vbcast.lane.b32.xlu0 %v17074_v3, 256  ;;  %5919 = vbcast.lane.b32.xlu1 %v17074_v3, 264  ;;  %v13462_v24 = vpop.permute.xlu1 %5567  ;;  %v17079_v3 = vld [vmem:[#allocation117_spill] sm:$0xff] }
 0x615   : > { %v13464_v46 = vpop.permute.xlu0 %5585 }
 0x616   : > { %5926 = vbcast.lane.b32.xlu0 %v17075_v37, 256  ;;  %5930 = vbcast.lane.b32.xlu1 %v17075_v37, 264  ;;  %v13468_v56 = vpop.permute.xlu1 %5578  ;;  %v17082_v37 = vld [vmem:[#allocation120_spill] sm:$0xff] }
 0x619   : > { %v13470_v16 = vpop.permute.xlu0 %5596 }
 0x61a   : > { %17076 = vst [vmem:[#allocation55_spill] sm:$0xff] %v13470_v16  ;;  %5937 = vbcast.lane.b32.xlu0 %v17077_v6, 256  ;;  %5941 = vbcast.lane.b32.xlu1 %v17077_v6, 264  ;;  %v13474_v28 = vpop.permute.xlu1 %5589  ;;  %v17085_v6 = vld [vmem:[#allocation123_spill] sm:$0xff] }
 0x61d   : > { %v13476_v48 = vpop.permute.xlu0 %5607 }
 0x61e   : > { %17078 = vst [vmem:[#allocation56_spill] sm:$0xff] %v13476_v48  ;;  %5948 = vbcast.lane.b32.xlu0 %v17079_v3, 256  ;;  %5952 = vbcast.lane.b32.xlu1 %v17079_v3, 264  ;;  %v13480_v30 = vpop.permute.xlu1 %5600  ;;  %v17088_v3 = vld [vmem:[#allocation126_spill] sm:$0xff] }
 0x61f   : > { %17080 = vst [vmem:[#allocation62_spill] sm:$0xff] %v13480_v30 }
 0x621   : > { %v13482_v34 = vpop.permute.xlu0 %5618 }
 0x622   : > { %17081 = vst [vmem:[#allocation65_spill] sm:$0xff] %v13482_v34  ;;  %5959 = vbcast.lane.b32.xlu0 %v17082_v37, 256  ;;  %5963 = vbcast.lane.b32.xlu1 %v17082_v37, 264  ;;  %v13486_v49 = vpop.permute.xlu1 %5611  ;;  %v17091_v37 = vld [vmem:[#allocation129_spill] sm:$0xff] }
 0x623   : > { %17083 = vst [vmem:[#allocation68_spill] sm:$0xff] %v13486_v49 }
 0x625   : > { %v13488_v21 = vpop.permute.xlu0 %5629 }
 0x626   : > { %17084 = vst [vmem:[#allocation71_spill] sm:$0xff] %v13488_v21  ;;  %5970 = vbcast.lane.b32.xlu0 %v17085_v6, 256  ;;  %5974 = vbcast.lane.b32.xlu1 %v17085_v6, 264  ;;  %v13492_v53 = vpop.permute.xlu1 %5622  ;;  %v17094_v6 = vld [vmem:[#allocation132_spill] sm:$0xff] }
 0x627   : > { %17086 = vst [vmem:[#allocation72_spill] sm:$0xff] %v13492_v53 }
 0x629   : > { %v13494_v48 = vpop.permute.xlu0 %5640 }
 0x62a   : > { %17087 = vst [vmem:[#allocation73_spill] sm:$0xff] %v13494_v48  ;;  %5981 = vbcast.lane.b32.xlu0 %v17088_v3, 256  ;;  %5985 = vbcast.lane.b32.xlu1 %v17088_v3, 264  ;;  %v13498_v34 = vpop.permute.xlu1 %5633  ;;  %v17097_v3 = vld [vmem:[#allocation18_spill] sm:$0xff] }
 0x62b   : > { %17089 = vst [vmem:[#allocation74_spill] sm:$0xff] %v13498_v34 }
 0x62d   : > { %v13500_v30 = vpop.permute.xlu0 %5651 }
 0x62e   : > { %17090 = vst [vmem:[#allocation75_spill] sm:$0xff] %v13500_v30  ;;  %5992 = vbcast.lane.b32.xlu0 %v17091_v37, 256  ;;  %5996 = vbcast.lane.b32.xlu1 %v17091_v37, 264  ;;  %v13504_v21 = vpop.permute.xlu1 %5644  ;;  %v17100_v37 = vld [vmem:[#allocation19_spill] sm:$0xff] }
 0x62f   : > { %17092 = vst [vmem:[#allocation77_spill] sm:$0xff] %v13504_v21 }
 0x631   : > { %v13506_v49 = vpop.permute.xlu0 %5662 }
 0x632   : > { %17093 = vst [vmem:[#allocation78_spill] sm:$0xff] %v13506_v49  ;;  %6003 = vbcast.lane.b32.xlu0 %v17094_v6, 256  ;;  %6007 = vbcast.lane.b32.xlu1 %v17094_v6, 264  ;;  %v13510_v48 = vpop.permute.xlu1 %5655  ;;  %v17103_v6 = vld [vmem:[#allocation20_spill] sm:$0xff] }
 0x633   : > { %17095 = vst [vmem:[#allocation79_spill] sm:$0xff] %v13510_v48 }
 0x635   : > { %v13512_v53 = vpop.permute.xlu0 %5673 }
 0x636   : > { %17096 = vst [vmem:[#allocation80_spill] sm:$0xff] %v13512_v53  ;;  %6014 = vbcast.lane.b32.xlu0 %v17097_v3, 256  ;;  %6018 = vbcast.lane.b32.xlu1 %v17097_v3, 264  ;;  %v13516_v30 = vpop.permute.xlu1 %5666  ;;  %v17106_v3 = vld [vmem:[#allocation21_spill] sm:$0xff] }
 0x637   : > { %17098 = vst [vmem:[#allocation81_spill] sm:$0xff] %v13516_v30 }
 0x639   : > { %v13518_v34 = vpop.permute.xlu0 %5684 }
 0x63a   : > { %17099 = vst [vmem:[#allocation82_spill] sm:$0xff] %v13518_v34  ;;  %6025 = vbcast.lane.b32.xlu0 %v17100_v37, 256  ;;  %6029 = vbcast.lane.b32.xlu1 %v17100_v37, 264  ;;  %v13522_v49 = vpop.permute.xlu1 %5677  ;;  %v17109_v37 = vld [vmem:[#allocation22_spill] sm:$0xff] }
 0x63b   : > { %17101 = vst [vmem:[#allocation83_spill] sm:$0xff] %v13522_v49 }
 0x63d   : > { %v13524_v21 = vpop.permute.xlu0 %5695 }
 0x63e   : > { %17102 = vst [vmem:[#allocation84_spill] sm:$0xff] %v13524_v21  ;;  %6036 = vbcast.lane.b32.xlu0 %v17103_v6, 256  ;;  %6040 = vbcast.lane.b32.xlu1 %v17103_v6, 264  ;;  %v13528_v53 = vpop.permute.xlu1 %5688  ;;  %v17112_v6 = vld [vmem:[#allocation23_spill] sm:$0xff] }
 0x63f   : > { %17104 = vst [vmem:[#allocation90_spill] sm:$0xff] %v13528_v53 }
 0x641   : > { %v13530_v48 = vpop.permute.xlu0 %5706 }
 0x642   : > { %17105 = vst [vmem:[#allocation93_spill] sm:$0xff] %v13530_v48  ;;  %6047 = vbcast.lane.b32.xlu0 %v17106_v3, 256  ;;  %6051 = vbcast.lane.b32.xlu1 %v17106_v3, 264  ;;  %v13534_v34 = vpop.permute.xlu1 %5699  ;;  %v17115_v3 = vld [vmem:[#allocation24_spill] sm:$0xff] }
 0x643   : > { %17107 = vst [vmem:[#allocation96_spill] sm:$0xff] %v13534_v34 }
 0x645   : > { %v13536_v30 = vpop.permute.xlu0 %5717 }
 0x646   : > { %17108 = vst [vmem:[#allocation99_spill] sm:$0xff] %v13536_v30  ;;  %6058 = vbcast.lane.b32.xlu0 %v17109_v37, 256  ;;  %6062 = vbcast.lane.b32.xlu1 %v17109_v37, 264  ;;  %v13540_v21 = vpop.permute.xlu1 %5710  ;;  %v17118_v37 = vld [vmem:[#allocation135_spill] sm:$0xff] }
 0x647   : > { %17110 = vst [vmem:[#allocation102_spill] sm:$0xff] %v13540_v21 }
 0x649   : > { %v13542_v49 = vpop.permute.xlu0 %5728 }
 0x64a   : > { %17111 = vst [vmem:[#allocation105_spill] sm:$0xff] %v13542_v49  ;;  %6069 = vbcast.lane.b32.xlu0 %v17112_v6, 256  ;;  %6073 = vbcast.lane.b32.xlu1 %v17112_v6, 264  ;;  %v13546_v48 = vpop.permute.xlu1 %5721  ;;  %v17121_v6 = vld [vmem:[#allocation136_spill] sm:$0xff] }
 0x64b   : > { %17113 = vst [vmem:[#allocation108_spill] sm:$0xff] %v13546_v48 }
 0x64d   : > { %v13548_v53 = vpop.permute.xlu0 %5739 }
 0x64e   : > { %17114 = vst [vmem:[#allocation109_spill] sm:$0xff] %v13548_v53  ;;  %6080 = vbcast.lane.b32.xlu0 %v17115_v3, 256  ;;  %6084 = vbcast.lane.b32.xlu1 %v17115_v3, 264  ;;  %v13552_v30 = vpop.permute.xlu1 %5732  ;;  %v17124_v3 = vld [vmem:[#allocation142_spill] sm:$0xff] }
 0x64f   : > { %17116 = vst [vmem:[#allocation114_spill] sm:$0xff] %v13552_v30 }
 0x651   : > { %v13554_v34 = vpop.permute.xlu0 %5750 }
 0x652   : > { %17117 = vst [vmem:[#allocation117_spill] sm:$0xff] %v13554_v34  ;;  %6091 = vbcast.lane.b32.xlu0 %v17118_v37, 256  ;;  %6095 = vbcast.lane.b32.xlu1 %v17118_v37, 264  ;;  %v13558_v49 = vpop.permute.xlu1 %5743  ;;  %v17127_v37 = vld [vmem:[#allocation145_spill] sm:$0xff] }
 0x653   : > { %17119 = vst [vmem:[#allocation120_spill] sm:$0xff] %v13558_v49 }
 0x655   : > { %v13560_v21 = vpop.permute.xlu0 %5761 }
 0x656   : > { %17120 = vst [vmem:[#allocation123_spill] sm:$0xff] %v13560_v21  ;;  %6102 = vbcast.lane.b32.xlu0 %v17121_v6, 256  ;;  %6106 = vbcast.lane.b32.xlu1 %v17121_v6, 264  ;;  %v13564_v53 = vpop.permute.xlu1 %5754  ;;  %v17130_v6 = vld [vmem:[#allocation148_spill] sm:$0xff] }
 0x657   : > { %17122 = vst [vmem:[#allocation126_spill] sm:$0xff] %v13564_v53 }
 0x659   : > { %v13566_v48 = vpop.permute.xlu0 %5772 }
 0x65a   : > { %17123 = vst [vmem:[#allocation129_spill] sm:$0xff] %v13566_v48  ;;  %6113 = vbcast.lane.b32.xlu0 %v17124_v3, 256  ;;  %6117 = vbcast.lane.b32.xlu1 %v17124_v3, 264  ;;  %v13570_v34 = vpop.permute.xlu1 %5765  ;;  %v17133_v3 = vld [vmem:[#allocation151_spill] sm:$0xff] }
 0x65b   : > { %17125 = vst [vmem:[#allocation132_spill] sm:$0xff] %v13570_v34 }
 0x65d   : > { %v13572_v30 = vpop.permute.xlu0 %5783 }
 0x65e   : > { %17126 = vst [vmem:[#allocation18_spill] sm:$0xff] %v13572_v30  ;;  %6124 = vbcast.lane.b32.xlu0 %v17127_v37, 256  ;;  %6128 = vbcast.lane.b32.xlu1 %v17127_v37, 264  ;;  %v13576_v21 = vpop.permute.xlu1 %5776  ;;  %v17136_v37 = vld [vmem:[#allocation154_spill] sm:$0xff] }
 0x65f   : > { %17128 = vst [vmem:[#allocation19_spill] sm:$0xff] %v13576_v21 }
 0x661   : > { %v13578_v49 = vpop.permute.xlu0 %5794 }
 0x662   : > { %17129 = vst [vmem:[#allocation20_spill] sm:$0xff] %v13578_v49  ;;  %6135 = vbcast.lane.b32.xlu0 %v17130_v6, 256  ;;  %6139 = vbcast.lane.b32.xlu1 %v17130_v6, 264  ;;  %v13582_v48 = vpop.permute.xlu1 %5787  ;;  %v17139_v6 = vld [vmem:[#allocation157_spill] sm:$0xff] }
 0x663   : > { %17131 = vst [vmem:[#allocation21_spill] sm:$0xff] %v13582_v48 }
 0x665   : > { %v13584_v53 = vpop.permute.xlu0 %5805 }
 0x666   : > { %17132 = vst [vmem:[#allocation22_spill] sm:$0xff] %v13584_v53  ;;  %6146 = vbcast.lane.b32.xlu0 %v17133_v3, 256  ;;  %6150 = vbcast.lane.b32.xlu1 %v17133_v3, 264  ;;  %v13588_v30 = vpop.permute.xlu1 %5798  ;;  %v17142_v3 = vld [vmem:[#allocation160_spill] sm:$0xff] }
 0x667   : > { %17134 = vst [vmem:[#allocation23_spill] sm:$0xff] %v13588_v30 }
 0x669   : > { %v13590_v34 = vpop.permute.xlu0 %5816 }
 0x66a   : > { %17135 = vst [vmem:[#allocation24_spill] sm:$0xff] %v13590_v34  ;;  %6157 = vbcast.lane.b32.xlu0 %v17136_v37, 256  ;;  %6161 = vbcast.lane.b32.xlu1 %v17136_v37, 264  ;;  %v13594_v49 = vpop.permute.xlu1 %5809  ;;  %v17145_v37 = vld [vmem:[#allocation161_spill] sm:$0xff] }
 0x66b   : > { %17137 = vst [vmem:[#allocation135_spill] sm:$0xff] %v13594_v49 }
 0x66d   : > { %v13596_v21 = vpop.permute.xlu0 %5827 }
 0x66e   : > { %17138 = vst [vmem:[#allocation136_spill] sm:$0xff] %v13596_v21  ;;  %6168 = vbcast.lane.b32.xlu0 %v17139_v6, 256  ;;  %6172 = vbcast.lane.b32.xlu1 %v17139_v6, 264  ;;  %v13600_v53 = vpop.permute.xlu1 %5820  ;;  %v17148_v6 = vld [vmem:[#allocation167_spill] sm:$0xff] }
 0x66f   : > { %17140 = vst [vmem:[#allocation142_spill] sm:$0xff] %v13600_v53 }
 0x671   : > { %v13602_v48 = vpop.permute.xlu0 %5838 }
 0x672   : > { %17141 = vst [vmem:[#allocation145_spill] sm:$0xff] %v13602_v48  ;;  %6179 = vbcast.lane.b32.xlu0 %v17142_v3, 256  ;;  %6183 = vbcast.lane.b32.xlu1 %v17142_v3, 264  ;;  %v13606_v34 = vpop.permute.xlu1 %5831  ;;  %v17151_v3 = vld [vmem:[#allocation170_spill] sm:$0xff] }
 0x673   : > { %17143 = vst [vmem:[#allocation148_spill] sm:$0xff] %v13606_v34 }
 0x675   : > { %v13608_v30 = vpop.permute.xlu0 %5849 }
 0x676   : > { %17144 = vst [vmem:[#allocation151_spill] sm:$0xff] %v13608_v30  ;;  %6190 = vbcast.lane.b32.xlu0 %v17145_v37, 256  ;;  %6194 = vbcast.lane.b32.xlu1 %v17145_v37, 264  ;;  %v13612_v21 = vpop.permute.xlu1 %5842  ;;  %v17154_v37 = vld [vmem:[#allocation173_spill] sm:$0xff] }
 0x677   : > { %17146 = vst [vmem:[#allocation154_spill] sm:$0xff] %v13612_v21 }
 0x679   : > { %v13614_v49 = vpop.permute.xlu0 %5860 }
 0x67a   : > { %17147 = vst [vmem:[#allocation157_spill] sm:$0xff] %v13614_v49  ;;  %6201 = vbcast.lane.b32.xlu0 %v17148_v6, 256  ;;  %6205 = vbcast.lane.b32.xlu1 %v17148_v6, 264  ;;  %v13618_v48 = vpop.permute.xlu1 %5853  ;;  %v17157_v6 = vld [vmem:[#allocation176_spill] sm:$0xff] }
 0x67b   : > { %17149 = vst [vmem:[#allocation160_spill] sm:$0xff] %v13618_v48 }
 0x67d   : > { %v13620_v53 = vpop.permute.xlu0 %5871 }
 0x67e   : > { %17150 = vst [vmem:[#allocation161_spill] sm:$0xff] %v13620_v53  ;;  %6212 = vbcast.lane.b32.xlu0 %v17151_v3, 256  ;;  %6216 = vbcast.lane.b32.xlu1 %v17151_v3, 264  ;;  %v13624_v30 = vpop.permute.xlu1 %5864  ;;  %v17160_v3 = vld [vmem:[#allocation179_spill] sm:$0xff] }
 0x67f   : > { %17152 = vst [vmem:[#allocation167_spill] sm:$0xff] %v13624_v30 }
 0x681   : > { %v13626_v34 = vpop.permute.xlu0 %5882 }
 0x682   : > { %17153 = vst [vmem:[#allocation170_spill] sm:$0xff] %v13626_v34  ;;  %6223 = vbcast.lane.b32.xlu0 %v17154_v37, 256  ;;  %6227 = vbcast.lane.b32.xlu1 %v17154_v37, 264  ;;  %v13630_v49 = vpop.permute.xlu1 %5875  ;;  %v17163_v37 = vld [vmem:[#allocation182_spill] sm:$0xff] }
 0x683   : > { %17155 = vst [vmem:[#allocation173_spill] sm:$0xff] %v13630_v49 }
 0x685   : > { %v13632_v21 = vpop.permute.xlu0 %5893 }
 0x686   : > { %17156 = vst [vmem:[#allocation371_spill] sm:$0xff] %v13632_v21  ;;  %6234 = vbcast.lane.b32.xlu0 %v17157_v6, 256  ;;  %6238 = vbcast.lane.b32.xlu1 %v17157_v6, 264  ;;  %v13636_v53 = vpop.permute.xlu1 %5886  ;;  %v17166_v6 = vld [vmem:[#allocation185_spill] sm:$0xff] }
 0x687   : > { %17158 = vst [vmem:[#allocation176_spill] sm:$0xff] %v13636_v53 }
 0x689   : > { %v13638_v48 = vpop.permute.xlu0 %5904 }
 0x68a   : > { %17159 = vst [vmem:[#allocation372_spill] sm:$0xff] %v13638_v48  ;;  %6245 = vbcast.lane.b32.xlu0 %v17160_v3, 256  ;;  %6249 = vbcast.lane.b32.xlu1 %v17160_v3, 264  ;;  %v13642_v34 = vpop.permute.xlu1 %5897  ;;  %v17169_v3 = vld [vmem:[#allocation186_spill] sm:$0xff] }
 0x68b   : > { %17161 = vst [vmem:[#allocation179_spill] sm:$0xff] %v13642_v34 }
 0x68d   : > { %v13644_v30 = vpop.permute.xlu0 %5915 }
 0x68e   : > { %17162 = vst [vmem:[#allocation373_spill] sm:$0xff] %v13644_v30  ;;  %6256 = vbcast.lane.b32.xlu0 %v17163_v37, 256  ;;  %6260 = vbcast.lane.b32.xlu1 %v17163_v37, 264  ;;  %v13648_v21 = vpop.permute.xlu1 %5908  ;;  %v17172_v37 = vld [vmem:[#allocation191_spill] sm:$0xff] }
 0x68f   : > { %17164 = vst [vmem:[#allocation182_spill] sm:$0xff] %v13648_v21 }
 0x691   : > { %v13650_v49 = vpop.permute.xlu0 %5926 }
 0x692   : > { %17165 = vst [vmem:[#allocation374_spill] sm:$0xff] %v13650_v49  ;;  %6267 = vbcast.lane.b32.xlu0 %v17166_v6, 256  ;;  %6271 = vbcast.lane.b32.xlu1 %v17166_v6, 264  ;;  %v13654_v48 = vpop.permute.xlu1 %5919  ;;  %v17175_v6 = vld [vmem:[#allocation194_spill] sm:$0xff] }
 0x693   : > { %17167 = vst [vmem:[#allocation185_spill] sm:$0xff] %v13654_v48 }
 0x695   : > { %v13656_v53 = vpop.permute.xlu0 %5937 }
 0x696   : > { %17168 = vst [vmem:[#allocation375_spill] sm:$0xff] %v13656_v53  ;;  %6278 = vbcast.lane.b32.xlu0 %v17169_v3, 256  ;;  %6282 = vbcast.lane.b32.xlu1 %v17169_v3, 264  ;;  %v13660_v30 = vpop.permute.xlu1 %5930  ;;  %v17178_v3 = vld [vmem:[#allocation197_spill] sm:$0xff] }
 0x697   : > { %17170 = vst [vmem:[#allocation186_spill] sm:$0xff] %v13660_v30 }
 0x699   : > { %v13662_v34 = vpop.permute.xlu0 %5948 }
 0x69a   : > { %17171 = vst [vmem:[#allocation376_spill] sm:$0xff] %v13662_v34  ;;  %6289 = vbcast.lane.b32.xlu0 %v17172_v37, 256  ;;  %6293 = vbcast.lane.b32.xlu1 %v17172_v37, 264  ;;  %v13666_v49 = vpop.permute.xlu1 %5941  ;;  %v17181_v37 = vld [vmem:[#allocation200_spill] sm:$0xff] }
 0x69b   : > { %17173 = vst [vmem:[#allocation191_spill] sm:$0xff] %v13666_v49 }
 0x69d   : > { %v13668_v21 = vpop.permute.xlu0 %5959 }
 0x69e   : > { %17174 = vst [vmem:[#allocation377_spill] sm:$0xff] %v13668_v21  ;;  %6300 = vbcast.lane.b32.xlu0 %v17175_v6, 256  ;;  %6304 = vbcast.lane.b32.xlu1 %v17175_v6, 264  ;;  %v13672_v53 = vpop.permute.xlu1 %5952  ;;  %v17184_v6 = vld [vmem:[#allocation203_spill] sm:$0xff] }
 0x69f   : > { %17176 = vst [vmem:[#allocation194_spill] sm:$0xff] %v13672_v53 }
 0x6a1   : > { %v13674_v48 = vpop.permute.xlu0 %5970 }
 0x6a2   : > { %17177 = vst [vmem:[#allocation378_spill] sm:$0xff] %v13674_v48  ;;  %6311 = vbcast.lane.b32.xlu0 %v17178_v3, 256  ;;  %6315 = vbcast.lane.b32.xlu1 %v17178_v3, 264  ;;  %v13678_v34 = vpop.permute.xlu1 %5963  ;;  %v17187_v3 = vld [vmem:[#allocation206_spill] sm:$0xff] }
 0x6a3   : > { %17179 = vst [vmem:[#allocation197_spill] sm:$0xff] %v13678_v34 }
 0x6a5   : > { %v13680_v30 = vpop.permute.xlu0 %5981 }
 0x6a6   : > { %17180 = vst [vmem:[#allocation379_spill] sm:$0xff] %v13680_v30  ;;  %6322 = vbcast.lane.b32.xlu0 %v17181_v37, 256  ;;  %6326 = vbcast.lane.b32.xlu1 %v17181_v37, 264  ;;  %v13684_v21 = vpop.permute.xlu1 %5974  ;;  %v17190_v37 = vld [vmem:[#allocation208_spill] sm:$0xff] }
 0x6a7   : > { %17182 = vst [vmem:[#allocation200_spill] sm:$0xff] %v13684_v21  ;;  %v10190_v21 = vmov 0  }
 0x6a8   : > { %10179 = vset.pattern.permute.xlu1 %v10190_v21  ;;  %10178 = vset.pattern.permute.xlu0 %v10190_v21 }
 0x6a9   : > { %v13686_v49 = vpop.permute.xlu0 %5992 }
 0x6aa   : > { %17183 = vst [vmem:[#allocation380_spill] sm:$0xff] %v13686_v49  ;;  %6333 = vbcast.lane.b32.xlu0 %v17184_v6, 256  ;;  %6337 = vbcast.lane.b32.xlu1 %v17184_v6, 264  ;;  %v13690_v48 = vpop.permute.xlu1 %5985 }
 0x6ab   : > { %17185 = vst [vmem:[#allocation203_spill] sm:$0xff] %v13690_v48  ;;  %v17199_v48 = vld [vmem:[#allocation217_spill] sm:$0xff] }
 0x6ad   : > { %v13692_v53 = vpop.permute.xlu0 %6003 }
 0x6ae   : > { %17186 = vst [vmem:[#allocation381_spill] sm:$0xff] %v13692_v53  ;;  %6344 = vbcast.lane.b32.xlu0 %v17187_v3, 256  ;;  %6348 = vbcast.lane.b32.xlu1 %v17187_v3, 264  ;;  %v13696_v30 = vpop.permute.xlu1 %5996  ;;  %v17193_v53 = vld [vmem:[#allocation209_spill] sm:$0xff] }
 0x6af   : > { %17188 = vst [vmem:[#allocation206_spill] sm:$0xff] %v13696_v30 }
 0x6b1   : > { %v13698_v34 = vpop.permute.xlu0 %6014 }
 0x6b2   : > { %17189 = vst [vmem:[#allocation382_spill] sm:$0xff] %v13698_v34  ;;  %6355 = vbcast.lane.b32.xlu0 %v17190_v37, 256  ;;  %6359 = vbcast.lane.b32.xlu1 %v17190_v37, 264  ;;  %v13702_v49 = vpop.permute.xlu1 %6007  ;;  %v17196_v34 = vld [vmem:[#allocation214_spill] sm:$0xff] }
 0x6b3   : > { %17191 = vst [vmem:[#allocation208_spill] sm:$0xff] %v13702_v49 }
 0x6b5   : > { %v13704_v6 = vpop.permute.xlu0 %6025 }
 0x6b6   : > { %17192 = vst [vmem:[#allocation383_spill] sm:$0xff] %v13704_v6  ;;  %6366 = vbcast.lane.b32.xlu0 %v17193_v53, 256  ;;  %6370 = vbcast.lane.b32.xlu1 %v17193_v53, 264  ;;  %v13708_v3 = vpop.permute.xlu1 %6018  ;;  %v17202_v53 = vld [vmem:[#allocation220_spill] sm:$0xff] }
 0x6b7   : > { %17194 = vst [vmem:[#allocation209_spill] sm:$0xff] %v13708_v3 }
 0x6b9   : > { %v13710_v30 = vpop.permute.xlu0 %6036 }
 0x6ba   : > { %17195 = vst [vmem:[#allocation384_spill] sm:$0xff] %v13710_v30  ;;  %6377 = vbcast.lane.b32.xlu0 %v17196_v34, 256  ;;  %6381 = vbcast.lane.b32.xlu1 %v17196_v34, 264  ;;  %v13714_v37 = vpop.permute.xlu1 %6029  ;;  %v17205_v34 = vld [vmem:[#allocation223_spill] sm:$0xff] }
 0x6bb   : > { %17197 = vst [vmem:[#allocation214_spill] sm:$0xff] %v13714_v37 }
 0x6bd   : > { %v13716_v49 = vpop.permute.xlu0 %6047 }
 0x6be   : > { %17198 = vst [vmem:[#allocation385_spill] sm:$0xff] %v13716_v49  ;;  %6388 = vbcast.lane.b32.xlu0 %v17199_v48, 256  ;;  %6392 = vbcast.lane.b32.xlu1 %v17199_v48, 264  ;;  %v13720_v21 = vpop.permute.xlu1 %6040  ;;  %v17208_v48 = vld [vmem:[#allocation226_spill] sm:$0xff] }
 0x6bf   : > { %17200 = vst [vmem:[#allocation217_spill] sm:$0xff] %v13720_v21 }
 0x6c1   : > { %v13722_v6 = vpop.permute.xlu0 %6058 }
 0x6c2   : > { %17201 = vst [vmem:[#allocation386_spill] sm:$0xff] %v13722_v6  ;;  %6399 = vbcast.lane.b32.xlu0 %v17202_v53, 256  ;;  %6403 = vbcast.lane.b32.xlu1 %v17202_v53, 264  ;;  %v13726_v30 = vpop.permute.xlu1 %6051  ;;  %v17211_v53 = vld [vmem:[#allocation229_spill] sm:$0xff] }
 0x6c3   : > { %17203 = vst [vmem:[#allocation220_spill] sm:$0xff] %v13726_v30 }
 0x6c5   : > { %v13728_v3 = vpop.permute.xlu0 %6069 }
 0x6c6   : > { %17204 = vst [vmem:[#allocation387_spill] sm:$0xff] %v13728_v3  ;;  %6410 = vbcast.lane.b32.xlu0 %v17205_v34, 256  ;;  %6414 = vbcast.lane.b32.xlu1 %v17205_v34, 264  ;;  %v13732_v49 = vpop.permute.xlu1 %6062  ;;  %v17214_v34 = vld [vmem:[#allocation231_spill] sm:$0xff] }
 0x6c7   : > { %17206 = vst [vmem:[#allocation223_spill] sm:$0xff] %v13732_v49 }
 0x6c9   : > { %v13734_v37 = vpop.permute.xlu0 %6080 }
 0x6ca   : > { %17207 = vst [vmem:[#allocation388_spill] sm:$0xff] %v13734_v37  ;;  %6421 = vbcast.lane.b32.xlu0 %v17208_v48, 256  ;;  %6425 = vbcast.lane.b32.xlu1 %v17208_v48, 264  ;;  %v13738_v6 = vpop.permute.xlu1 %6073  ;;  %v17217_v48 = vld [vmem:[#allocation232_spill] sm:$0xff] }
 0x6cb   : > { %17209 = vst [vmem:[#allocation226_spill] sm:$0xff] %v13738_v6 }
 0x6cd   : > { %v13740_v21 = vpop.permute.xlu0 %6091 }
 0x6ce   : > { %17210 = vst [vmem:[#allocation389_spill] sm:$0xff] %v13740_v21  ;;  %6432 = vbcast.lane.b32.xlu0 %v17211_v53, 256  ;;  %6436 = vbcast.lane.b32.xlu1 %v17211_v53, 264  ;;  %v13744_v3 = vpop.permute.xlu1 %6084  ;;  %v17220_v53 = vld [vmem:[#allocation237_spill] sm:$0xff] }
 0x6cf   : > { %17212 = vst [vmem:[#allocation229_spill] sm:$0xff] %v13744_v3 }
 0x6d1   : > { %v13746_v30 = vpop.permute.xlu0 %6102 }
 0x6d2   : > { %17213 = vst [vmem:[#allocation390_spill] sm:$0xff] %v13746_v30  ;;  %6443 = vbcast.lane.b32.xlu0 %v17214_v34, 256  ;;  %6447 = vbcast.lane.b32.xlu1 %v17214_v34, 264  ;;  %v13750_v37 = vpop.permute.xlu1 %6095  ;;  %v17223_v34 = vld [vmem:[#allocation240_spill] sm:$0xff] }
 0x6d3   : > { %17215 = vst [vmem:[#allocation231_spill] sm:$0xff] %v13750_v37 }
 0x6d5   : > { %v13752_v49 = vpop.permute.xlu0 %6113 }
 0x6d6   : > { %17216 = vst [vmem:[#allocation391_spill] sm:$0xff] %v13752_v49  ;;  %6454 = vbcast.lane.b32.xlu0 %v17217_v48, 256  ;;  %6458 = vbcast.lane.b32.xlu1 %v17217_v48, 264  ;;  %v13756_v21 = vpop.permute.xlu1 %6106  ;;  %v17226_v48 = vld [vmem:[#allocation243_spill] sm:$0xff] }
 0x6d7   : > { %17218 = vst [vmem:[#allocation232_spill] sm:$0xff] %v13756_v21 }
 0x6d9   : > { %v13758_v6 = vpop.permute.xlu0 %6124 }
 0x6da   : > { %17219 = vst [vmem:[#allocation392_spill] sm:$0xff] %v13758_v6  ;;  %6465 = vbcast.lane.b32.xlu0 %v17220_v53, 256  ;;  %6469 = vbcast.lane.b32.xlu1 %v17220_v53, 264  ;;  %v13762_v30 = vpop.permute.xlu1 %6117  ;;  %v17229_v53 = vld [vmem:[#allocation246_spill] sm:$0xff] }
 0x6db   : > { %17221 = vst [vmem:[#allocation237_spill] sm:$0xff] %v13762_v30 }
 0x6dd   : > { %v13764_v3 = vpop.permute.xlu0 %6135 }
 0x6de   : > { %17222 = vst [vmem:[#allocation393_spill] sm:$0xff] %v13764_v3  ;;  %6476 = vbcast.lane.b32.xlu0 %v17223_v34, 256  ;;  %6480 = vbcast.lane.b32.xlu1 %v17223_v34, 264  ;;  %v13768_v49 = vpop.permute.xlu1 %6128  ;;  %v17232_v34 = vld [vmem:[#allocation249_spill] sm:$0xff] }
 0x6df   : > { %17224 = vst [vmem:[#allocation240_spill] sm:$0xff] %v13768_v49 }
 0x6e1   : > { %v13770_v37 = vpop.permute.xlu0 %6146 }
 0x6e2   : > { %17225 = vst [vmem:[#allocation394_spill] sm:$0xff] %v13770_v37  ;;  %6487 = vbcast.lane.b32.xlu0 %v17226_v48, 256  ;;  %6491 = vbcast.lane.b32.xlu1 %v17226_v48, 264  ;;  %v13774_v6 = vpop.permute.xlu1 %6139  ;;  %v17235_v48 = vld [vmem:[#allocation252_spill] sm:$0xff] }
 0x6e3   : > { %17227 = vst [vmem:[#allocation243_spill] sm:$0xff] %v13774_v6 }
 0x6e5   : > { %v13776_v21 = vpop.permute.xlu0 %6157 }
 0x6e6   : > { %17228 = vst [vmem:[#allocation395_spill] sm:$0xff] %v13776_v21  ;;  %6498 = vbcast.lane.b32.xlu0 %v17229_v53, 256  ;;  %6502 = vbcast.lane.b32.xlu1 %v17229_v53, 264  ;;  %v13780_v3 = vpop.permute.xlu1 %6150  ;;  %v17238_v53 = vld [vmem:[#allocation254_spill] sm:$0xff] }
 0x6e7   : > { %17230 = vst [vmem:[#allocation246_spill] sm:$0xff] %v13780_v3 }
 0x6e9   : > { %v13782_v30 = vpop.permute.xlu0 %6168 }
 0x6ea   : > { %17231 = vst [vmem:[#allocation396_spill] sm:$0xff] %v13782_v30  ;;  %6509 = vbcast.lane.b32.xlu0 %v17232_v34, 256  ;;  %6513 = vbcast.lane.b32.xlu1 %v17232_v34, 264  ;;  %v13786_v37 = vpop.permute.xlu1 %6161  ;;  %v17241_v34 = vld [vmem:[#allocation255_spill] sm:$0xff] }
 0x6eb   : > { %17233 = vst [vmem:[#allocation249_spill] sm:$0xff] %v13786_v37 }
 0x6ed   : > { %v13788_v49 = vpop.permute.xlu0 %6179 }
 0x6ee   : > { %17234 = vst [vmem:[#allocation397_spill] sm:$0xff] %v13788_v49  ;;  %6520 = vbcast.lane.b32.xlu0 %v17235_v48, 256  ;;  %6524 = vbcast.lane.b32.xlu1 %v17235_v48, 264  ;;  %v13792_v21 = vpop.permute.xlu1 %6172  ;;  %v17244_v48 = vld [vmem:[#allocation260_spill] sm:$0xff] }
 0x6ef   : > { %17236 = vst [vmem:[#allocation252_spill] sm:$0xff] %v13792_v21 }
 0x6f1   : > { %v13794_v6 = vpop.permute.xlu0 %6190 }
 0x6f2   : > { %17237 = vst [vmem:[#allocation398_spill] sm:$0xff] %v13794_v6  ;;  %6531 = vbcast.lane.b32.xlu0 %v17238_v53, 256  ;;  %6535 = vbcast.lane.b32.xlu1 %v17238_v53, 264  ;;  %v13798_v30 = vpop.permute.xlu1 %6183  ;;  %v17247_v53 = vld [vmem:[#allocation263_spill] sm:$0xff] }
 0x6f3   : > { %17239 = vst [vmem:[#allocation254_spill] sm:$0xff] %v13798_v30 }
 0x6f5   : > { %v13800_v3 = vpop.permute.xlu0 %6201 }
 0x6f6   : > { %17240 = vst [vmem:[#allocation399_spill] sm:$0xff] %v13800_v3  ;;  %6542 = vbcast.lane.b32.xlu0 %v17241_v34, 256  ;;  %6546 = vbcast.lane.b32.xlu1 %v17241_v34, 264  ;;  %v13804_v49 = vpop.permute.xlu1 %6194  ;;  %v17250_v34 = vld [vmem:[#allocation266_spill] sm:$0xff] }
 0x6f7   : > { %17242 = vst [vmem:[#allocation255_spill] sm:$0xff] %v13804_v49 }
 0x6f9   : > { %v13806_v37 = vpop.permute.xlu0 %6212 }
 0x6fa   : > { %17243 = vst [vmem:[#allocation400_spill] sm:$0xff] %v13806_v37  ;;  %6553 = vbcast.lane.b32.xlu0 %v17244_v48, 256  ;;  %6557 = vbcast.lane.b32.xlu1 %v17244_v48, 264  ;;  %v13810_v6 = vpop.permute.xlu1 %6205  ;;  %v17253_v48 = vld [vmem:[#allocation269_spill] sm:$0xff] }
 0x6fb   : > { %17245 = vst [vmem:[#allocation260_spill] sm:$0xff] %v13810_v6 }
 0x6fd   : > { %v13812_v21 = vpop.permute.xlu0 %6223 }
 0x6fe   : > { %17246 = vst [vmem:[#allocation401_spill] sm:$0xff] %v13812_v21  ;;  %6564 = vbcast.lane.b32.xlu0 %v17247_v53, 256  ;;  %6568 = vbcast.lane.b32.xlu1 %v17247_v53, 264  ;;  %v13816_v3 = vpop.permute.xlu1 %6216  ;;  %v17256_v53 = vld [vmem:[#allocation272_spill] sm:$0xff] }
 0x6ff   : > { %17248 = vst [vmem:[#allocation263_spill] sm:$0xff] %v13816_v3 }
 0x701   : > { %v13818_v30 = vpop.permute.xlu0 %6234 }
 0x702   : > { %17249 = vst [vmem:[#allocation402_spill] sm:$0xff] %v13818_v30  ;;  %6575 = vbcast.lane.b32.xlu0 %v17250_v34, 256  ;;  %6579 = vbcast.lane.b32.xlu1 %v17250_v34, 264  ;;  %v13822_v37 = vpop.permute.xlu1 %6227  ;;  %v17259_v34 = vld [vmem:[#allocation275_spill] sm:$0xff] }
 0x703   : > { %17251 = vst [vmem:[#allocation266_spill] sm:$0xff] %v13822_v37 }
 0x705   : > { %v13824_v49 = vpop.permute.xlu0 %6245 }
 0x706   : > { %17252 = vst [vmem:[#allocation403_spill] sm:$0xff] %v13824_v49  ;;  %6586 = vbcast.lane.b32.xlu0 %v17253_v48, 256  ;;  %6590 = vbcast.lane.b32.xlu1 %v17253_v48, 264  ;;  %v13828_v21 = vpop.permute.xlu1 %6238  ;;  %v17262_v48 = vld [vmem:[#allocation277_spill] sm:$0xff] }
 0x707   : > { %17254 = vst [vmem:[#allocation269_spill] sm:$0xff] %v13828_v21 }
 0x709   : > { %v13830_v6 = vpop.permute.xlu0 %6256 }
 0x70a   : > { %17255 = vst [vmem:[#allocation404_spill] sm:$0xff] %v13830_v6  ;;  %6597 = vbcast.lane.b32.xlu0 %v17256_v53, 256  ;;  %6601 = vbcast.lane.b32.xlu1 %v17256_v53, 264  ;;  %v13834_v30 = vpop.permute.xlu1 %6249  ;;  %v17265_v53 = vld [vmem:[#allocation278_spill] sm:$0xff] }
 0x70b   : > { %17257 = vst [vmem:[#allocation272_spill] sm:$0xff] %v13834_v30 }
 0x70d   : > { %v13836_v3 = vpop.permute.xlu0 %6267 }
 0x70e   : > { %17258 = vst [vmem:[#allocation405_spill] sm:$0xff] %v13836_v3  ;;  %6608 = vbcast.lane.b32.xlu0 %v17259_v34, 256  ;;  %6612 = vbcast.lane.b32.xlu1 %v17259_v34, 264  ;;  %v13840_v49 = vpop.permute.xlu1 %6260  ;;  %v17268_v34 = vld [vmem:[#allocation282_spill] sm:$0xff] }
 0x70f   : > { %17260 = vst [vmem:[#allocation275_spill] sm:$0xff] %v13840_v49 }
 0x711   : > { %v13842_v37 = vpop.permute.xlu0 %6278 }
 0x712   : > { %17261 = vst [vmem:[#allocation406_spill] sm:$0xff] %v13842_v37  ;;  %6619 = vbcast.lane.b32.xlu0 %v17262_v48, 256  ;;  %6623 = vbcast.lane.b32.xlu1 %v17262_v48, 264  ;;  %v13846_v6 = vpop.permute.xlu1 %6271  ;;  %v17271_v48 = vld [vmem:[#allocation284_spill] sm:$0xff] }
 0x713   : > { %17263 = vst [vmem:[#allocation277_spill] sm:$0xff] %v13846_v6 }
 0x715   : > { %v13848_v21 = vpop.permute.xlu0 %6289 }
 0x716   : > { %17264 = vst [vmem:[#allocation407_spill] sm:$0xff] %v13848_v21  ;;  %6630 = vbcast.lane.b32.xlu0 %v17265_v53, 256  ;;  %6634 = vbcast.lane.b32.xlu1 %v17265_v53, 264  ;;  %v13852_v3 = vpop.permute.xlu1 %6282  ;;  %v17274_v53 = vld [vmem:[#allocation286_spill] sm:$0xff] }
 0x717   : > { %17266 = vst [vmem:[#allocation278_spill] sm:$0xff] %v13852_v3 }
 0x719   : > { %v13854_v30 = vpop.permute.xlu0 %6300 }
 0x71a   : > { %17267 = vst [vmem:[#allocation408_spill] sm:$0xff] %v13854_v30  ;;  %6641 = vbcast.lane.b32.xlu0 %v17268_v34, 256  ;;  %6645 = vbcast.lane.b32.xlu1 %v17268_v34, 264  ;;  %v13858_v37 = vpop.permute.xlu1 %6293  ;;  %v17277_v34 = vld [vmem:[#allocation289_spill] sm:$0xff] }
 0x71b   : > { %17269 = vst [vmem:[#allocation282_spill] sm:$0xff] %v13858_v37 }
 0x71d   : > { %v13860_v49 = vpop.permute.xlu0 %6311 }
 0x71e   : > { %17270 = vst [vmem:[#allocation409_spill] sm:$0xff] %v13860_v49  ;;  %6652 = vbcast.lane.b32.xlu0 %v17271_v48, 256  ;;  %6656 = vbcast.lane.b32.xlu1 %v17271_v48, 264  ;;  %v13864_v21 = vpop.permute.xlu1 %6304  ;;  %v17280_v48 = vld [vmem:[#allocation292_spill] sm:$0xff] }
 0x71f   : > { %17272 = vst [vmem:[#allocation284_spill] sm:$0xff] %v13864_v21 }
 0x721   : > { %v13866_v6 = vpop.permute.xlu0 %6322 }
 0x722   : > { %17273 = vst [vmem:[#allocation410_spill] sm:$0xff] %v13866_v6  ;;  %6663 = vbcast.lane.b32.xlu0 %v17274_v53, 256  ;;  %6667 = vbcast.lane.b32.xlu1 %v17274_v53, 264  ;;  %v13870_v30 = vpop.permute.xlu1 %6315  ;;  %v17283_v53 = vld [vmem:[#allocation295_spill] sm:$0xff] }
 0x723   : > { %17275 = vst [vmem:[#allocation286_spill] sm:$0xff] %v13870_v30 }
 0x725   : > { %v13872_v3 = vpop.permute.xlu0 %6333 }
 0x726   : > { %17276 = vst [vmem:[#allocation411_spill] sm:$0xff] %v13872_v3  ;;  %6674 = vbcast.lane.b32.xlu0 %v17277_v34, 256  ;;  %6678 = vbcast.lane.b32.xlu1 %v17277_v34, 264  ;;  %v13876_v49 = vpop.permute.xlu1 %6326  ;;  %v17286_v34 = vld [vmem:[#allocation297_spill] sm:$0xff] }
 0x727   : > { %17278 = vst [vmem:[#allocation289_spill] sm:$0xff] %v13876_v49  ;;  %v17288_v49 = vld [vmem:[#allocation100_spill] sm:$0xff] }
 0x728   : > { %vm5049_vm2 = vcmp.lt.f32.partialorder %v17288_v49, 4.0 }
 0x729   : > { %v13878_v37 = vpop.permute.xlu0 %6344 }
 0x72a   : > { %17279 = vst [vmem:[#allocation412_spill] sm:$0xff] %v13878_v37  ;;  %6685 = vbcast.lane.b32.xlu0 %v17280_v48, 256  ;;  %6689 = vbcast.lane.b32.xlu1 %v17280_v48, 264  ;;  %v13882_v6 = vpop.permute.xlu1 %6337  ;;  %v17289_v48 = vld [vmem:[#allocation107_spill] sm:$0xff] }
 0x72b   : > { %17281 = vst [vmem:[#allocation292_spill] sm:$0xff] %v13882_v6  ;;  %vm5050_vm3 = vcmp.lt.f32.partialorder %v17289_v48, 4.0 }
 0x72c   : > { %v6970_v6 = vsel %vm5050_vm3, %v13320_v26, inf  ;;  %v17292_v26 = vld [vmem:[#allocation111_spill] sm:$0xff] }
 0x72d   : > { %v13884_v21 = vpop.permute.xlu0 %6355  ;;  %vm5053_vm6 = vcmp.lt.f32.partialorder %v17292_v26, 4.0 }
 0x72e   : > { %17282 = vst [vmem:[#allocation413_spill] sm:$0xff] %v13884_v21  ;;  %6696 = vbcast.lane.b32.xlu0 %v17283_v53, 256  ;;  %6700 = vbcast.lane.b32.xlu1 %v17283_v53, 264  ;;  %v13888_v3 = vpop.permute.xlu1 %6348  ;;  %v6969_v21 = vsel %vm5049_vm2, %v13318_v39, inf }
 0x72f   : > { %17284 = vst [vmem:[#allocation295_spill] sm:$0xff] %v13888_v3  ;;  %v17291_v3 = vld [vmem:[#allocation106_spill] sm:$0xff] }
 0x730   : > { %vm5052_vm5 = vcmp.lt.f32.partialorder %v17291_v3, 4.0  ;;  %v17295_v3 = vld [vmem:[#allocation116_spill] sm:$0xff] }
 0x731   : > { %v13890_v30 = vpop.permute.xlu0 %6366  ;;  %v6972_v49 = vsel %vm5052_vm5, %v13330_v15, inf  ;;  %v17294_v15 = vld [vmem:[#allocation113_spill] sm:$0xff]  ;;  %vm5056_vm9 = vcmp.lt.f32.partialorder %v17295_v3, 4.0  ;;  %v17299_v3 = vld [vmem:[#allocation122_spill] sm:$0xff] }
 0x732   : > { %17285 = vst [vmem:[#allocation414_spill] sm:$0xff] %v13890_v30  ;;  %6707 = vbcast.lane.b32.xlu0 %v17286_v34, 256  ;;  %6711 = vbcast.lane.b32.xlu1 %v17286_v34, 264  ;;  %v13894_v37 = vpop.permute.xlu1 %6359  ;;  %v17290_v30 = vld [vmem:[#allocation103_spill] sm:$0xff]  ;;  %vm5055_vm8 = vcmp.lt.f32.partialorder %v17294_v15, 4.0  ;;  %vm5060_vm13 = vcmp.lt.f32.partialorder %v17299_v3, 4.0 }
 0x733   : > { %17287 = vst [vmem:[#allocation297_spill] sm:$0xff] %v13894_v37  ;;  %vm5051_vm4 = vcmp.lt.f32.partialorder %v17290_v30, 4.0  ;;  %v17303_v3 = vld [vmem:[#allocation128_spill] sm:$0xff] }
 0x734   : > { %v6971_v34 = vsel %vm5051_vm4, %v13324_v29, inf  ;;  %vm5064_vm2 = vcmp.lt.f32.partialorder %v17303_v3, 4.0  ;;  %v17307_v3 = vld [vmem:[#allocation134_spill] sm:$0xff] }
 0x735   : > { %v13900_v16 = vpop.permute.xlu0 %6377 }
 0x736   : > { %7482 = vperm.xlu0 %10178, %v6969_v21   ;;  %7485 = vperm.xlu1 %10179, %v6970_v6   ;;  %v13902_v53 = vpop.permute.xlu1 %6370  ;;  %v17293_v21 = vld [vmem:[#allocation110_spill] sm:$0xff]  ;;  %v6973_v6 = vsel %vm5053_vm6, %v13326_v40, inf  ;;  %vm5068_vm6 = vcmp.lt.f32.partialorder %v17307_v3, 4.0 }
 0x737   : > { %vm5054_vm7 = vcmp.lt.f32.partialorder %v17293_v21, 4.0  ;;  %v17297_v21 = vld [vmem:[#allocation119_spill] sm:$0xff] }
 0x738   : > { %v6974_v30 = vsel %vm5054_vm7, %v13336_v13, inf  ;;  %v17296_v13 = vld [vmem:[#allocation115_spill] sm:$0xff]  ;;  %vm5058_vm11 = vcmp.lt.f32.partialorder %v17297_v21, 4.0  ;;  %v17301_v21 = vld [vmem:[#allocation125_spill] sm:$0xff] }
 0x739   : > { %v13908_v37 = vpop.permute.xlu0 %6388  ;;  %vm5057_vm10 = vcmp.lt.f32.partialorder %v17296_v13, 4.0  ;;  %vm5062_vm15 = vcmp.lt.f32.partialorder %v17301_v21, 4.0  ;;  %v17305_v21 = vld [vmem:[#allocation131_spill] sm:$0xff] }
 0x73a   : > { %7491 = vperm.xlu0 %10178, %v6972_v49   ;;  %7488 = vperm.xlu1 %10179, %v6971_v34   ;;  %v13910_v39 = vpop.permute.xlu1 %6381  ;;  %v6975_v34 = vsel %vm5055_vm8, %v13332_v60, inf  ;;  %v6976_v49 = vsel %vm5056_vm9, %v13342_v58, inf  ;;  %v17298_v58 = vld [vmem:[#allocation118_spill] sm:$0xff]  ;;  %vm5066_vm4 = vcmp.lt.f32.partialorder %v17305_v21, 4.0  ;;  %v17309_v21 = vld [vmem:[#allocation139_spill] sm:$0xff] }
 0x73b   : > { %vm5059_vm12 = vcmp.lt.f32.partialorder %v17298_v58, 4.0  ;;  %vm5070_vm8 = vcmp.lt.f32.partialorder %v17309_v21, 4.0 }
 0x73d   : > { %v13916_v48 = vpop.permute.xlu0 %6399 }
 0x73e   : > { %7497 = vperm.xlu0 %10178, %v6974_v30   ;;  %7494 = vperm.xlu1 %10179, %v6973_v6   ;;  %v13918_v29 = vpop.permute.xlu1 %6392  ;;  %v6977_v6 = vsel %vm5057_vm10, %v13338_v33, inf  ;;  %v6978_v30 = vsel %vm5058_vm11, %v13348_v12, inf  ;;  %v17300_v12 = vld [vmem:[#allocation121_spill] sm:$0xff]  ;;  %vm5072_vm10 = vcmp.lt.f32.partialorder %v12147_v43, 4.0 }
 0x73f   : > { %vm5061_vm14 = vcmp.lt.f32.partialorder %v17300_v12, 4.0 }
 0x741   : > { %v13924_v26 = vpop.permute.xlu0 %6410 }
 0x742   : > { %7503 = vperm.xlu0 %10178, %v6976_v49   ;;  %7500 = vperm.xlu1 %10179, %v6975_v34   ;;  %v13926_v40 = vpop.permute.xlu1 %6403  ;;  %v6979_v34 = vsel %vm5059_vm12, %v13344_v11, inf  ;;  %v6980_v49 = vsel %vm5060_vm13, %v13354_v36, inf  ;;  %v17302_v36 = vld [vmem:[#allocation124_spill] sm:$0xff] }
 0x743   : > { %vm5063_vm0 = vcmp.lt.f32.partialorder %v17302_v36, 4.0 }
 0x745   : > { %v13932_v15 = vpop.permute.xlu0 %6421 }
 0x746   : > { %7509 = vperm.xlu0 %10178, %v6978_v30   ;;  %7506 = vperm.xlu1 %10179, %v6977_v6   ;;  %v13934_v60 = vpop.permute.xlu1 %6414  ;;  %v6981_v6 = vsel %vm5061_vm14, %v13350_v19, inf  ;;  %v6982_v30 = vsel %vm5062_vm15, %v13360_v41, inf  ;;  %v17304_v41 = vld [vmem:[#allocation127_spill] sm:$0xff] }
 0x747   : > { %vm5065_vm3 = vcmp.lt.f32.partialorder %v17304_v41, 4.0 }
 0x749   : > { %v13940_v13 = vpop.permute.xlu0 %6432 }
 0x74a   : > { %7515 = vperm.xlu0 %10178, %v6980_v49   ;;  %7512 = vperm.xlu1 %10179, %v6979_v34   ;;  %v13942_v33 = vpop.permute.xlu1 %6425  ;;  %v6983_v34 = vsel %vm5063_vm0, %v13356_v8, inf  ;;  %v6984_v49 = vsel %vm5064_vm2, %v13366_v47, inf  ;;  %v17306_v47 = vld [vmem:[#allocation130_spill] sm:$0xff] }
 0x74b   : > { %vm5067_vm5 = vcmp.lt.f32.partialorder %v17306_v47, 4.0 }
 0x74d   : > { %v13948_v58 = vpop.permute.xlu0 %6443 }
 0x74e   : > { %7521 = vperm.xlu0 %10178, %v6982_v30   ;;  %7518 = vperm.xlu1 %10179, %v6981_v6   ;;  %v13950_v11 = vpop.permute.xlu1 %6436  ;;  %v6985_v6 = vsel %vm5065_vm3, %v13362_v2, inf  ;;  %v6986_v30 = vsel %vm5066_vm4, %v13372_v45, inf  ;;  %v17308_v45 = vld [vmem:[#allocation133_spill] sm:$0xff] }
 0x74f   : > { %vm5069_vm7 = vcmp.lt.f32.partialorder %v17308_v45, 4.0  ;;  %v17312_v45 = vld [vmem:[#allocation140_spill] sm:$0xff] }
 0x750   : > { %vm5074_vm12 = vcmp.lt.f32.partialorder %v17312_v45, 4.0 }
 0x751   : > { %v13956_v12 = vpop.permute.xlu0 %6454 }
 0x752   : > { %7527 = vperm.xlu0 %10178, %v6984_v49   ;;  %7524 = vperm.xlu1 %10179, %v6983_v34   ;;  %v13958_v19 = vpop.permute.xlu1 %6447  ;;  %v6987_v34 = vsel %vm5067_vm5, %v13368_v20, inf  ;;  %v6988_v49 = vsel %vm5068_vm6, %v13378_v10, inf  ;;  %v17310_v10 = vld [vmem:[#allocation138_spill] sm:$0xff] }
 0x753   : > { %vm5071_vm9 = vcmp.lt.f32.partialorder %v17310_v10, 4.0 }
 0x754   : > { %v6991_v3 = vsel %vm5071_vm9, %v13380_v22, inf  ;;  %v17314_v22 = vld [vmem:[#allocation143_spill] sm:$0xff] }
 0x755   : > { %v13964_v36 = vpop.permute.xlu0 %6465  ;;  %vm5076_vm14 = vcmp.lt.f32.partialorder %v17314_v22, 4.0 }
 0x756   : > { %7533 = vperm.xlu0 %10178, %v6986_v30   ;;  %7530 = vperm.xlu1 %10179, %v6985_v6   ;;  %v13966_v8 = vpop.permute.xlu1 %6458  ;;  %v6989_v6 = vsel %vm5069_vm7, %v13374_v57, inf  ;;  %v6990_v30 = vsel %vm5070_vm8, %v13384_v4, inf  ;;  %v17311_v4 = vld [vmem:[#allocation141_spill] sm:$0xff] }
 0x757   : > { %vm5073_vm11 = vcmp.lt.f32.partialorder %v17311_v4, 4.0  ;;  %v17316_v4 = vld [vmem:[#allocation146_spill] sm:$0xff] }
 0x758   : > { %v6993_v21 = vsel %vm5073_vm11, %v13386_v1, inf  ;;  %vm5078_vm0 = vcmp.lt.f32.partialorder %v17316_v4, 4.0  ;;  %vm5088_vm11 = vcmp.lt.f32.partialorder %v12244_v44, 4.0 }
 0x759   : > { %v13972_v41 = vpop.permute.xlu0 %6476 }
 0x75a   : > { %7539 = vperm.xlu0 %10178, %v6988_v49   ;;  %7536 = vperm.xlu1 %10179, %v6987_v34   ;;  %v13974_v2 = vpop.permute.xlu1 %6469  ;;  %v6992_v34 = vsel %vm5072_vm10, %v13390_v0, inf  ;;  %v17313_v0 = vld [vmem:[#allocation144_spill] sm:$0xff] }
 0x75b   : > { %vm5075_vm13 = vcmp.lt.f32.partialorder %v17313_v0, 4.0  ;;  %v17318_v0 = vld [vmem:[#allocation149_spill] sm:$0xff] }
 0x75c   : > { %v6995_v10 = vsel %vm5075_vm13, %v13392_v17, inf  ;;  %vm5080_vm3 = vcmp.lt.f32.partialorder %v17318_v0, 4.0 }
 0x75d   : > { %v13980_v47 = vpop.permute.xlu0 %6487 }
 0x75e   : > { %7545 = vperm.xlu0 %10178, %v6990_v30   ;;  %7542 = vperm.xlu1 %10179, %v6989_v6   ;;  %v13982_v20 = vpop.permute.xlu1 %6480  ;;  %v6994_v6 = vsel %vm5074_vm12, %v13396_v50, inf  ;;  %v17315_v50 = vld [vmem:[#allocation147_spill] sm:$0xff] }
 0x75f   : > { %vm5077_vm15 = vcmp.lt.f32.partialorder %v17315_v50, 4.0  ;;  %v17320_v50 = vld [vmem:[#allocation152_spill] sm:$0xff] }
 0x760   : > { %v6997_v45 = vsel %vm5077_vm15, %v13398_v62, inf  ;;  %vm5082_vm5 = vcmp.lt.f32.partialorder %v17320_v50, 4.0 }
 0x761   : > { %v13988_v49 = vpop.permute.xlu0 %6498 }
 0x762   : > { %7551 = vperm.xlu0 %10178, %v6992_v34   ;;  %7548 = vperm.xlu1 %10179, %v6991_v3   ;;  %v13990_v57 = vpop.permute.xlu1 %6491  ;;  %v6996_v3 = vsel %vm5076_vm14, %v13402_v61, inf  ;;  %v17317_v61 = vld [vmem:[#allocation150_spill] sm:$0xff] }
 0x763   : > { %vm5079_vm2 = vcmp.lt.f32.partialorder %v17317_v61, 4.0  ;;  %v17322_v61 = vld [vmem:[#allocation155_spill] sm:$0xff] }
 0x764   : > { %v6999_v22 = vsel %vm5079_vm2, %v13404_v27, inf  ;;  %vm5084_vm7 = vcmp.lt.f32.partialorder %v17322_v61, 4.0  ;;  %v7008_v61 = vsel %vm5088_vm11, %v13438_v63, inf  ;;  %v17330_v63 = vld [vmem:[#allocation165_spill] sm:$0xff] }
 0x765   : > { %v13996_v30 = vpop.permute.xlu0 %6509  ;;  %vm5091_vm14 = vcmp.lt.f32.partialorder %v17330_v63, 4.0 }
 0x766   : > { %7557 = vperm.xlu0 %10178, %v6994_v6   ;;  %7554 = vperm.xlu1 %10179, %v6993_v21   ;;  %v13998_v43 = vpop.permute.xlu1 %6502  ;;  %v6998_v21 = vsel %vm5078_vm0, %v13408_v59, inf  ;;  %v17319_v59 = vld [vmem:[#allocation153_spill] sm:$0xff] }
 0x767   : > { %vm5081_vm4 = vcmp.lt.f32.partialorder %v17319_v59, 4.0  ;;  %v17324_v59 = vld [vmem:[#allocation158_spill] sm:$0xff] }
 0x768   : > { %v7001_v4 = vsel %vm5081_vm4, %v13410_v18, inf  ;;  %vm5086_vm9 = vcmp.lt.f32.partialorder %v17324_v59, 4.0 }
 0x769   : > { %v14004_v34 = vpop.permute.xlu0 %6520 }
 0x76a   : > { %7563 = vperm.xlu0 %10178, %v6996_v3   ;;  %7560 = vperm.xlu1 %10179, %v6995_v10   ;;  %v14006_v1 = vpop.permute.xlu1 %6513  ;;  %v7000_v10 = vsel %vm5080_vm3, %v13414_v32, inf  ;;  %v17321_v32 = vld [vmem:[#allocation156_spill] sm:$0xff] }
 0x76b   : > { %vm5083_vm6 = vcmp.lt.f32.partialorder %v17321_v32, 4.0 }
 0x76c   : > { %v7003_v0 = vsel %vm5083_vm6, %v13416_v55, inf }
 0x76d   : > { %v14012_v6 = vpop.permute.xlu0 %6531 }
 0x76e   : > { %7569 = vperm.xlu0 %10178, %v6998_v21   ;;  %7566 = vperm.xlu1 %10179, %v6997_v45   ;;  %v14014_v17 = vpop.permute.xlu1 %6524  ;;  %v7002_v45 = vsel %vm5082_vm5, %v13420_v25, inf  ;;  %v17323_v25 = vld [vmem:[#allocation159_spill] sm:$0xff] }
 0x76f   : > { %vm5085_vm8 = vcmp.lt.f32.partialorder %v17323_v25, 4.0 }
 0x770   : > { %v7005_v50 = vsel %vm5085_vm8, %v13422_v31, inf }
 0x771   : > { %v14020_v3 = vpop.permute.xlu0 %6542 }
 0x772   : > { %7575 = vperm.xlu0 %10178, %v7000_v10   ;;  %7572 = vperm.xlu1 %10179, %v6999_v22   ;;  %v14022_v62 = vpop.permute.xlu1 %6535  ;;  %v7004_v22 = vsel %vm5084_vm7, %v13426_v7, inf  ;;  %v17325_v7 = vld [vmem:[#allocation164_spill] sm:$0xff] }
 0x773   : > { %vm5087_vm10 = vcmp.lt.f32.partialorder %v17325_v7, 4.0 }
 0x774   : > { %v7007_v32 = vsel %vm5087_vm10, %v13428_v54, inf  ;;  %v17331_v54 = vld [vmem:[#allocation169_spill] sm:$0xff] }
 0x775   : > { %v14028_v21 = vpop.permute.xlu0 %6553  ;;  %vm5092_vm15 = vcmp.lt.f32.partialorder %v17331_v54, 4.0 }
 0x776   : > { %7581 = vperm.xlu0 %10178, %v7002_v45   ;;  %7578 = vperm.xlu1 %10179, %v7001_v4   ;;  %v14030_v27 = vpop.permute.xlu1 %6546  ;;  %v7006_v4 = vsel %vm5086_vm9, %v13432_v5, inf  ;;  %v17326_v5 = vld [vmem:[#allocation163_spill] sm:$0xff]  ;;  %v7012_v7 = vsel %vm5092_vm15, %v13450_v9, inf }
 0x777   : > { %vm5089_vm12 = vcmp.lt.f32.partialorder %v17326_v5, 4.0  ;;  %v17338_v9 = vld [vmem:[#allocation171_spill] sm:$0xff] }
 0x778   : > { %v7009_v25 = vsel %vm5089_vm12, %v13434_v51, inf  ;;  %vm5095_vm3 = vcmp.lt.f32.partialorder %v17338_v9, 4.0 }
 0x779   : > { %v14036_v10 = vpop.permute.xlu0 %6564  ;;  %v7015_v63 = vsel %vm5095_vm3, %v13452_v35, inf }
 0x77a   : > { %7587 = vperm.xlu0 %10178, %v7004_v22   ;;  %7584 = vperm.xlu1 %10179, %v7003_v0   ;;  %v14038_v18 = vpop.permute.xlu1 %6557  ;;  %v17327_v22 = vld [vmem:[#allocation166_spill] sm:$0xff] }
 0x77b   : > { %vm5090_vm13 = vcmp.lt.f32.partialorder %v17327_v22, 4.0 }
 0x77c   : > { %v7010_v59 = vsel %vm5090_vm13, %v13444_v42, inf  ;;  %v17334_v42 = vld [vmem:[#allocation168_spill] sm:$0xff] }
 0x77d   : > { %v14044_v45 = vpop.permute.xlu0 %6575  ;;  %vm5093_vm0 = vcmp.lt.f32.partialorder %v17334_v42, 4.0 }
 0x77e   : > { %7593 = vperm.xlu0 %10178, %v7006_v4   ;;  %7590 = vperm.xlu1 %10179, %v7005_v50   ;;  %v14046_v55 = vpop.permute.xlu1 %6568  ;;  %v7011_v4 = vsel %vm5091_vm14, %v13440_v52, inf  ;;  %v7013_v5 = vsel %vm5093_vm0, %v13446_v38, inf }
 0x781   : > { %v14052_v0 = vpop.permute.xlu0 %6586 }
 0x782   : > { %7599 = vperm.xlu0 %10178, %v7008_v61   ;;  %7596 = vperm.xlu1 %10179, %v7007_v32   ;;  %v14054_v31 = vpop.permute.xlu1 %6579  ;;  %v17335_v61 = vld [vmem:[#allocation172_spill] sm:$0xff] }
 0x783   : > { %vm5094_vm2 = vcmp.lt.f32.partialorder %v17335_v61, 4.0 }
 0x784   : > { %v7014_v22 = vsel %vm5094_vm2, %v13456_v23, inf  ;;  %v17342_v23 = vld [vmem:[#allocation174_spill] sm:$0xff] }
 0x785   : > { %v14060_v50 = vpop.permute.xlu0 %6597  ;;  %vm5097_vm5 = vcmp.lt.f32.partialorder %v17342_v23, 4.0  ;;  %v17352_v23 = vld [vmem:[#allocation55_spill] sm:$0xff] }
 0x786   : > { %17328 = vst [vmem:[#allocation100_spill] sm:$0xff] %v14060_v50  ;;  %7605 = vperm.xlu0 %10178, %v7010_v59   ;;  %7602 = vperm.xlu1 %10179, %v7009_v25   ;;  %v14062_v44 = vpop.permute.xlu1 %6590  ;;  %v17339_v59 = vld [vmem:[#allocation175_spill] sm:$0xff]  ;;  %v7017_v42 = vsel %vm5097_vm5, %v13458_v14, inf }
 0x787   : > { %17329 = vst [vmem:[#allocation107_spill] sm:$0xff] %v14062_v44  ;;  %vm5096_vm4 = vcmp.lt.f32.partialorder %v17339_v59, 4.0  ;;  %v17414_v44 = vld [vmem:[#allocation114_spill] sm:$0xff] }
 0x788   : > { %v7016_v54 = vsel %vm5096_vm4, %v13462_v24, inf  ;;  %v17346_v24 = vld [vmem:[#allocation177_spill] sm:$0xff] }
 0x789   : > { %v14068_v32 = vpop.permute.xlu0 %6608  ;;  %vm5099_vm7 = vcmp.lt.f32.partialorder %v17346_v24, 4.0 }
 0x78a   : > { %17332 = vst [vmem:[#allocation103_spill] sm:$0xff] %v14068_v32  ;;  %7611 = vperm.xlu0 %10178, %v7012_v7   ;;  %7608 = vperm.xlu1 %10179, %v7011_v4   ;;  %v14070_v51 = vpop.permute.xlu1 %6601  ;;  %v17343_v7 = vld [vmem:[#allocation178_spill] sm:$0xff]  ;;  %v7019_v9 = vsel %vm5099_vm7, %v13464_v46, inf }
 0x78b   : > { %17333 = vst [vmem:[#allocation106_spill] sm:$0xff] %v14070_v51  ;;  %vm5098_vm6 = vcmp.lt.f32.partialorder %v17343_v7, 4.0  ;;  %v17408_v51 = vld [vmem:[#allocation108_spill] sm:$0xff] }
 0x78c   : > { %v7018_v61 = vsel %vm5098_vm6, %v13468_v56, inf  ;;  %v17350_v56 = vld [vmem:[#allocation180_spill] sm:$0xff] }
 0x78d   : > { %v14076_v25 = vpop.permute.xlu0 %6619  ;;  %vm5101_vm9 = vcmp.lt.f32.partialorder %v17350_v56, 4.0 }
 0x78e   : > { %17336 = vst [vmem:[#allocation111_spill] sm:$0xff] %v14076_v25  ;;  %7617 = vperm.xlu0 %10178, %v7014_v22   ;;  %7614 = vperm.xlu1 %10179, %v7013_v5   ;;  %v14078_v52 = vpop.permute.xlu1 %6612  ;;  %v17347_v22 = vld [vmem:[#allocation181_spill] sm:$0xff]  ;;  %v7021_v7 = vsel %vm5101_vm9, %v17352_v23, inf  ;;  %v17362_v23 = vld [vmem:[#allocation190_spill] sm:$0xff] }
 0x78f   : > { %17337 = vst [vmem:[#allocation110_spill] sm:$0xff] %v14078_v52  ;;  %vm5100_vm8 = vcmp.lt.f32.partialorder %v17347_v22, 4.0  ;;  %v17357_v22 = vld [vmem:[#allocation188_spill] sm:$0xff]  ;;  %vm5105_vm13 = vcmp.lt.f32.partialorder %v17362_v23, 4.0  ;;  %v17404_v52 = vld [vmem:[#allocation102_spill] sm:$0xff] }
 0x790   : > { %v7020_v59 = vsel %vm5100_vm8, %v13474_v28, inf  ;;  %v17356_v28 = vld [vmem:[#allocation183_spill] sm:$0xff]  ;;  %vm5104_vm12 = vcmp.lt.f32.partialorder %v17357_v22, 4.0 }
 0x791   : > { %v14084_v4 = vpop.permute.xlu0 %6630  ;;  %vm5103_vm11 = vcmp.lt.f32.partialorder %v17356_v28, 4.0 }
 0x792   : > { %17340 = vst [vmem:[#allocation113_spill] sm:$0xff] %v14084_v4  ;;  %7623 = vperm.xlu0 %10178, %v7016_v54   ;;  %7620 = vperm.xlu1 %10179, %v7015_v63   ;;  %v14086_v38 = vpop.permute.xlu1 %6623  ;;  %v17351_v54 = vld [vmem:[#allocation184_spill] sm:$0xff] }
 0x793   : > { %17341 = vst [vmem:[#allocation116_spill] sm:$0xff] %v14086_v38  ;;  %vm5102_vm10 = vcmp.lt.f32.partialorder %v17351_v54, 4.0  ;;  %v17400_v38 = vld [vmem:[#allocation96_spill] sm:$0xff] }
 0x795   : > { %v14092_v5 = vpop.permute.xlu0 %6641 }
 0x796   : > { %17344 = vst [vmem:[#allocation115_spill] sm:$0xff] %v14092_v5  ;;  %7629 = vperm.xlu0 %10178, %v7018_v61   ;;  %7626 = vperm.xlu1 %10179, %v7017_v42   ;;  %v14094_v35 = vpop.permute.xlu1 %6634  ;;  %v17353_v42 = vld [vmem:[#allocation62_spill] sm:$0xff] }
 0x797   : > { %17345 = vst [vmem:[#allocation119_spill] sm:$0xff] %v14094_v35  ;;  %v7022_v61 = vsel %vm5102_vm10, %v17353_v42, inf  ;;  %v17363_v42 = vld [vmem:[#allocation189_spill] sm:$0xff]  ;;  %v17396_v35 = vld [vmem:[#allocation90_spill] sm:$0xff] }
 0x798   : > { %vm5106_vm14 = vcmp.lt.f32.partialorder %v17363_v42, 4.0 }
 0x799   : > { %v14100_v63 = vpop.permute.xlu0 %6652 }
 0x79a   : > { %17348 = vst [vmem:[#allocation118_spill] sm:$0xff] %v14100_v63  ;;  %7635 = vperm.xlu0 %10178, %v7020_v59   ;;  %7632 = vperm.xlu1 %10179, %v7019_v9   ;;  %v14102_v14 = vpop.permute.xlu1 %6645  ;;  %v17358_v9 = vld [vmem:[#allocation56_spill] sm:$0xff] }
 0x79b   : > { %17349 = vst [vmem:[#allocation122_spill] sm:$0xff] %v14102_v14  ;;  %v7023_v59 = vsel %vm5103_vm11, %v17358_v9, inf  ;;  %v17359_v14 = vld [vmem:[#allocation68_spill] sm:$0xff] }
 0x79c   : > { %v7024_v56 = vsel %vm5104_vm12, %v17359_v14, inf  ;;  %v17368_v14 = vld [vmem:[#allocation193_spill] sm:$0xff]  ;;  %v17369_v9 = vld [vmem:[#allocation192_spill] sm:$0xff] }
 0x79d   : > { %v14108_v24 = vpop.permute.xlu0 %6663  ;;  %vm5107_vm15 = vcmp.lt.f32.partialorder %v17368_v14, 4.0  ;;  %vm5108_vm0 = vcmp.lt.f32.partialorder %v17369_v9, 4.0 }
 0x79e   : > { %17354 = vst [vmem:[#allocation121_spill] sm:$0xff] %v14108_v24  ;;  %7641 = vperm.xlu0 %10178, %v7022_v61   ;;  %7638 = vperm.xlu1 %10179, %v7021_v7   ;;  %v14110_v46 = vpop.permute.xlu1 %6656  ;;  %v17364_v7 = vld [vmem:[#allocation65_spill] sm:$0xff] }
 0x79f   : > { %17355 = vst [vmem:[#allocation125_spill] sm:$0xff] %v14110_v46  ;;  %v7025_v61 = vsel %vm5105_vm13, %v17364_v7, inf  ;;  %v17365_v46 = vld [vmem:[#allocation72_spill] sm:$0xff] }
 0x7a0   : > { %v7026_v28 = vsel %vm5106_vm14, %v17365_v46, inf  ;;  %v17374_v46 = vld [vmem:[#allocation196_spill] sm:$0xff] }
 0x7a1   : > { %v14116_v63 = vpop.permute.xlu0 %6674  ;;  %vm5109_vm2 = vcmp.lt.f32.partialorder %v17374_v46, 4.0 }
 0x7a2   : > { %17360 = vst [vmem:[#allocation124_spill] sm:$0xff] %v14116_v63  ;;  %7647 = vperm.xlu0 %10178, %v7024_v56   ;;  %7644 = vperm.xlu1 %10179, %v7023_v59   ;;  %v14118_v54 = vpop.permute.xlu1 %6667  ;;  %v17370_v59 = vld [vmem:[#allocation71_spill] sm:$0xff] }
 0x7a3   : > { %17361 = vst [vmem:[#allocation128_spill] sm:$0xff] %v14118_v54  ;;  %v7027_v56 = vsel %vm5107_vm15, %v17370_v59, inf  ;;  %v17371_v54 = vld [vmem:[#allocation74_spill] sm:$0xff]  ;;  %v17379_v59 = vld [vmem:[#allocation199_spill] sm:$0xff] }
 0x7a4   : > { %v7028_v23 = vsel %vm5108_vm0, %v17371_v54, inf  ;;  %vm5111_vm4 = vcmp.lt.f32.partialorder %v17379_v59, 4.0  ;;  %v17380_v54 = vld [vmem:[#allocation198_spill] sm:$0xff] }
 0x7a5   : > { %v14124_v24 = vpop.permute.xlu0 %6685  ;;  %vm5112_vm5 = vcmp.lt.f32.partialorder %v17380_v54, 4.0 }
 0x7a6   : > { %17366 = vst [vmem:[#allocation127_spill] sm:$0xff] %v14124_v24  ;;  %7653 = vperm.xlu0 %10178, %v7026_v28   ;;  %7650 = vperm.xlu1 %10179, %v7025_v61   ;;  %v14126_v22 = vpop.permute.xlu1 %6678  ;;  %v17375_v28 = vld [vmem:[#allocation195_spill] sm:$0xff]  ;;  %v17376_v61 = vld [vmem:[#allocation73_spill] sm:$0xff] }
 0x7a7   : > { %17367 = vst [vmem:[#allocation131_spill] sm:$0xff] %v14126_v22  ;;  %vm5110_vm3 = vcmp.lt.f32.partialorder %v17375_v28, 4.0  ;;  %v7029_v22 = vsel %vm5109_vm2, %v17376_v61, inf  ;;  %v17377_v24 = vld [vmem:[#allocation77_spill] sm:$0xff]  ;;  %v17385_v28 = vld [vmem:[#allocation202_spill] sm:$0xff] }
 0x7a8   : > { %v7030_v14 = vsel %vm5110_vm3, %v17377_v24, inf  ;;  %vm5113_vm6 = vcmp.lt.f32.partialorder %v17385_v28, 4.0  ;;  %v17386_v24 = vld [vmem:[#allocation201_spill] sm:$0xff] }
 0x7a9   : > { %v14134_v7 = vpop.permute.xlu0 %6696  ;;  %vm5114_vm7 = vcmp.lt.f32.partialorder %v17386_v24, 4.0 }
 0x7aa   : > { %7659 = vperm.xlu0 %10178, %v7028_v23   ;;  %7656 = vperm.xlu1 %10179, %v7027_v56   ;;  %v14132_v42 = vpop.permute.xlu1 %6689  ;;  %17373 = vst [vmem:[#allocation134_spill] sm:$0xff] %v14134_v7  ;;  %v17381_v56 = vld [vmem:[#allocation75_spill] sm:$0xff] }
 0x7ab   : > { %17372 = vst [vmem:[#allocation130_spill] sm:$0xff] %v14132_v42  ;;  %v7031_v23 = vsel %vm5111_vm4, %v17381_v56, inf  ;;  %v17382_v42 = vld [vmem:[#allocation79_spill] sm:$0xff]  ;;  %v17391_v56 = vld [vmem:[#allocation80_spill] sm:$0xff] }
 0x7ac   : > { %v7032_v7 = vsel %vm5112_vm5, %v17382_v42, inf  ;;  %v17389_v42 = vld [vmem:[#allocation205_spill] sm:$0xff] }
 0x7ad   : > { %v14146_v63 = vpop.permute.xlu0 %6707  ;;  %vm5115_vm8 = vcmp.lt.f32.partialorder %v17389_v42, 4.0 }
 0x7ae   : > { %7665 = vperm.xlu0 %10178, %v7030_v14   ;;  %7662 = vperm.xlu1 %10179, %v7029_v22   ;;  %v14140_v9 = vpop.permute.xlu1 %6700  ;;  %17383 = vst [vmem:[#allocation139_spill] sm:$0xff] %v14146_v63  ;;  %v17387_v22 = vld [vmem:[#allocation78_spill] sm:$0xff]  ;;  %v17388_v14 = vld [vmem:[#allocation81_spill] sm:$0xff] }
 0x7af   : > { %17378 = vst [vmem:[#allocation133_spill] sm:$0xff] %v14140_v9  ;;  %v7033_v61 = vsel %vm5113_vm6, %v17387_v22, inf  ;;  %v7034_v59 = vsel %vm5114_vm7, %v17388_v14, inf  ;;  %v17393_v22 = vld [vmem:[#allocation207_spill] sm:$0xff] }
 0x7b0   : > { %vm5117_vm10 = vcmp.lt.f32.partialorder %v17393_v22, 4.0  ;;  %v17394_v14 = vld [vmem:[#allocation211_spill] sm:$0xff] }
 0x7b1   : > { %vm5118_vm11 = vcmp.lt.f32.partialorder %v17394_v14, 4.0 }
 0x7b2   : > { %7671 = vperm.xlu0 %10178, %v7032_v7   ;;  %7668 = vperm.xlu1 %10179, %v7031_v23   ;;  %v14148_v46 = vpop.permute.xlu1 %6711  ;;  %v17390_v7 = vld [vmem:[#allocation204_spill] sm:$0xff]  ;;  %v7035_v23 = vsel %vm5115_vm8, %v17391_v56, inf  ;;  %v7038_v42 = vsel %vm5118_vm11, %v17396_v35, inf  ;;  %v17398_v56 = vld [vmem:[#allocation213_spill] sm:$0xff] }
 0x7b3   : > { %17384 = vst [vmem:[#allocation138_spill] sm:$0xff] %v14148_v46  ;;  %vm5116_vm9 = vcmp.lt.f32.partialorder %v17390_v7, 4.0  ;;  %v17392_v46 = vld [vmem:[#allocation83_spill] sm:$0xff]  ;;  %vm5120_vm13 = vcmp.lt.f32.partialorder %v17398_v56, 4.0  ;;  %v17401_v35 = vld [vmem:[#allocation212_spill] sm:$0xff] }
 0x7b4   : > { %v7036_v28 = vsel %vm5116_vm9, %v17392_v46, inf  ;;  %v17397_v46 = vld [vmem:[#allocation210_spill] sm:$0xff]  ;;  %v7040_v22 = vsel %vm5120_vm13, %v17400_v38, inf  ;;  %vm5121_vm14 = vcmp.lt.f32.partialorder %v17401_v35, 4.0  ;;  %v17405_v38 = vld [vmem:[#allocation215_spill] sm:$0xff] }
 0x7b5   : > { %v14154_v9 = vpop.permute.xlu0 %7482  ;;  %vm5119_vm12 = vcmp.lt.f32.partialorder %v17397_v46, 4.0  ;;  %vm5123_vm0 = vcmp.lt.f32.partialorder %v17405_v38, 4.0 }
 0x7b6   : > { %7677 = vperm.xlu0 %10178, %v7034_v59   ;;  %7674 = vperm.xlu1 %10179, %v7033_v61   ;;  %v14156_v54 = vpop.permute.xlu1 %7485  ;;  %v17395_v61 = vld [vmem:[#allocation82_spill] sm:$0xff] }
 0x7b7   : > { %v7037_v59 = vsel %vm5117_vm10, %v17395_v61, inf  ;;  %v17402_v61 = vld [vmem:[#allocation216_spill] sm:$0xff] }
 0x7b8   : > { %vm5122_vm15 = vcmp.lt.f32.partialorder %v17402_v61, 4.0 }
 0x7b9   : > { %v14162_v63 = vpop.permute.xlu0 %7491  ;;  %v7042_v46 = vsel %vm5122_vm15, %v17404_v52, inf  ;;  %v17411_v52 = vld [vmem:[#allocation218_spill] sm:$0xff] }
 0x7ba   : > { %7683 = vperm.xlu0 %10178, %v7036_v28   ;;  %7680 = vperm.xlu1 %10179, %v7035_v23   ;;  %v14164_v24 = vpop.permute.xlu1 %7488  ;;  %v17399_v23 = vld [vmem:[#allocation84_spill] sm:$0xff]  ;;  %vm5125_vm3 = vcmp.lt.f32.partialorder %v17411_v52, 4.0 }
 0x7bb   : > { %v7039_v28 = vsel %vm5119_vm12, %v17399_v23, inf  ;;  %v17406_v23 = vld [vmem:[#allocation219_spill] sm:$0xff] }
 0x7bc   : > { %vm5124_vm2 = vcmp.lt.f32.partialorder %v17406_v23, 4.0 }
 0x7bd   : > { %v14170_v5 = vpop.permute.xlu0 %7497  ;;  %v7044_v35 = vsel %vm5124_vm2, %v17408_v51, inf  ;;  %v17417_v51 = vld [vmem:[#allocation50_spill] sm:$0xff] }
 0x7be   : > { %7689 = vperm.xlu0 %10178, %v7038_v42   ;;  %7686 = vperm.xlu1 %10179, %v7037_v59   ;;  %v14172_v7 = vpop.permute.xlu1 %7494  ;;  %v17403_v59 = vld [vmem:[#allocation93_spill] sm:$0xff]  ;;  %vm5127_vm5 = vcmp.lt.f32.partialorder %v17417_v51, 4.0 }
 0x7bf   : > { %v7041_v42 = vsel %vm5121_vm14, %v17403_v59, inf  ;;  %v17412_v59 = vld [vmem:[#allocation51_spill] sm:$0xff] }
 0x7c0   : > { %vm5126_vm4 = vcmp.lt.f32.partialorder %v17412_v59, 4.0 }
 0x7c1   : > { %v14178_v4 = vpop.permute.xlu0 %7503  ;;  %v7046_v38 = vsel %vm5126_vm4, %v17414_v44, inf  ;;  %v17423_v44 = vld [vmem:[#allocation53_spill] sm:$0xff] }
 0x7c2   : > { %7695 = vperm.xlu0 %10178, %v7040_v22   ;;  %7692 = vperm.xlu1 %10179, %v7039_v28   ;;  %v14180_v14 = vpop.permute.xlu1 %7500  ;;  %v17407_v28 = vld [vmem:[#allocation99_spill] sm:$0xff]  ;;  %vm5129_vm7 = vcmp.lt.f32.partialorder %v17423_v44, 4.0 }
 0x7c3   : > { %v7043_v22 = vsel %vm5123_vm0, %v17407_v28, inf  ;;  %v17418_v28 = vld [vmem:[#allocation54_spill] sm:$0xff] }
 0x7c4   : > { %vm5128_vm6 = vcmp.lt.f32.partialorder %v17418_v28, 4.0 }
 0x7c5   : > { %v14186_v25 = vpop.permute.xlu0 %7509 }
 0x7c6   : > { %7701 = vperm.xlu0 %10178, %v7042_v46   ;;  %7698 = vperm.xlu1 %10179, %v7041_v42   ;;  %v14188_v56 = vpop.permute.xlu1 %7506  ;;  %v17413_v42 = vld [vmem:[#allocation105_spill] sm:$0xff] }
 0x7c7   : > { %v7045_v46 = vsel %vm5125_vm3, %v17413_v42, inf  ;;  %v17424_v42 = vld [vmem:[#allocation58_spill] sm:$0xff] }
 0x7c8   : > { %vm5130_vm8 = vcmp.lt.f32.partialorder %v17424_v42, 4.0 }
 0x7c9   : > { %v14194_v32 = vpop.permute.xlu0 %7515 }
 0x7ca   : > { %17409 = vst [vmem:[#allocation141_spill] sm:$0xff] %v14194_v32  ;;  %7707 = vperm.xlu0 %10178, %v7044_v35   ;;  %7704 = vperm.xlu1 %10179, %v7043_v22   ;;  %v14196_v61 = vpop.permute.xlu1 %7512  ;;  %v17419_v22 = vld [vmem:[#allocation109_spill] sm:$0xff] }
 0x7cb   : > { %17410 = vst [vmem:[#allocation140_spill] sm:$0xff] %v14196_v61  ;;  %v7047_v35 = vsel %vm5127_vm5, %v17419_v22, inf  ;;  %v17420_v61 = vld [vmem:[#allocation120_spill] sm:$0xff]  ;;  %v17430_v22 = vld [vmem:[#allocation61_spill] sm:$0xff] }
 0x7cc   : > { %v7048_v52 = vsel %vm5128_vm6, %v17420_v61, inf  ;;  %v17429_v61 = vld [vmem:[#allocation57_spill] sm:$0xff]  ;;  %vm5132_vm10 = vcmp.lt.f32.partialorder %v17430_v22, 4.0 }
 0x7cd   : > { %v14202_v50 = vpop.permute.xlu0 %7521  ;;  %vm5131_vm9 = vcmp.lt.f32.partialorder %v17429_v61, 4.0 }
 0x7ce   : > { %17415 = vst [vmem:[#allocation144_spill] sm:$0xff] %v14202_v50  ;;  %7713 = vperm.xlu0 %10178, %v7046_v38   ;;  %7710 = vperm.xlu1 %10179, %v7045_v46   ;;  %v14204_v23 = vpop.permute.xlu1 %7518  ;;  %v17425_v46 = vld [vmem:[#allocation117_spill] sm:$0xff] }
 0x7cf   : > { %17416 = vst [vmem:[#allocation143_spill] sm:$0xff] %v14204_v23  ;;  %v7049_v38 = vsel %vm5129_vm7, %v17425_v46, inf  ;;  %v17426_v23 = vld [vmem:[#allocation126_spill] sm:$0xff]  ;;  %v17436_v46 = vld [vmem:[#allocation64_spill] sm:$0xff] }
 0x7d0   : > { %v7050_v51 = vsel %vm5130_vm8, %v17426_v23, inf  ;;  %v17435_v23 = vld [vmem:[#allocation60_spill] sm:$0xff]  ;;  %vm5134_vm12 = vcmp.lt.f32.partialorder %v17436_v46, 4.0 }
 0x7d1   : > { %v14210_v32 = vpop.permute.xlu0 %7527  ;;  %vm5133_vm11 = vcmp.lt.f32.partialorder %v17435_v23, 4.0 }
 0x7d2   : > { %17421 = vst [vmem:[#allocation147_spill] sm:$0xff] %v14210_v32  ;;  %7719 = vperm.xlu0 %10178, %v7048_v52   ;;  %7716 = vperm.xlu1 %10179, %v7047_v35   ;;  %v14212_v59 = vpop.permute.xlu1 %7524  ;;  %v17431_v35 = vld [vmem:[#allocation123_spill] sm:$0xff] }
 0x7d3   : > { %17422 = vst [vmem:[#allocation146_spill] sm:$0xff] %v14212_v59  ;;  %v7051_v52 = vsel %vm5131_vm9, %v17431_v35, inf  ;;  %v17432_v59 = vld [vmem:[#allocation132_spill] sm:$0xff]  ;;  %v17442_v35 = vld [vmem:[#allocation67_spill] sm:$0xff] }
 0x7d4   : > { %v7052_v44 = vsel %vm5132_vm10, %v17432_v59, inf  ;;  %v17441_v59 = vld [vmem:[#allocation63_spill] sm:$0xff]  ;;  %vm5136_vm14 = vcmp.lt.f32.partialorder %v17442_v35, 4.0 }
 0x7d5   : > { %v14218_v50 = vpop.permute.xlu0 %7533  ;;  %vm5135_vm13 = vcmp.lt.f32.partialorder %v17441_v59, 4.0 }
 0x7d6   : > { %17427 = vst [vmem:[#allocation150_spill] sm:$0xff] %v14218_v50  ;;  %7725 = vperm.xlu0 %10178, %v7050_v51   ;;  %7722 = vperm.xlu1 %10179, %v7049_v38   ;;  %v14220_v28 = vpop.permute.xlu1 %7530  ;;  %v17437_v38 = vld [vmem:[#allocation129_spill] sm:$0xff] }
 0x7d7   : > { %17428 = vst [vmem:[#allocation149_spill] sm:$0xff] %v14220_v28  ;;  %v7053_v51 = vsel %vm5133_vm11, %v17437_v38, inf  ;;  %v17438_v28 = vld [vmem:[#allocation19_spill] sm:$0xff]  ;;  %v17448_v38 = vld [vmem:[#allocation70_spill] sm:$0xff] }
 0x7d8   : > { %v7054_v61 = vsel %vm5134_vm12, %v17438_v28, inf  ;;  %v17447_v28 = vld [vmem:[#allocation66_spill] sm:$0xff]  ;;  %vm5138_vm0 = vcmp.lt.f32.partialorder %v17448_v38, 4.0 }
 0x7d9   : > { %v14226_v32 = vpop.permute.xlu0 %7539  ;;  %vm5137_vm15 = vcmp.lt.f32.partialorder %v17447_v28, 4.0 }
 0x7da   : > { %17433 = vst [vmem:[#allocation153_spill] sm:$0xff] %v14226_v32  ;;  %7731 = vperm.xlu0 %10178, %v7052_v44   ;;  %7728 = vperm.xlu1 %10179, %v7051_v52   ;;  %v14228_v42 = vpop.permute.xlu1 %7536  ;;  %v17443_v52 = vld [vmem:[#allocation18_spill] sm:$0xff] }
 0x7db   : > { %17434 = vst [vmem:[#allocation152_spill] sm:$0xff] %v14228_v42  ;;  %v7055_v44 = vsel %vm5135_vm13, %v17443_v52, inf  ;;  %v17444_v42 = vld [vmem:[#allocation21_spill] sm:$0xff]  ;;  %v17454_v52 = vld [vmem:[#allocation222_spill] sm:$0xff] }
 0x7dc   : > { %v7056_v23 = vsel %vm5136_vm14, %v17444_v42, inf  ;;  %v17453_v42 = vld [vmem:[#allocation69_spill] sm:$0xff]  ;;  %vm5140_vm3 = vcmp.lt.f32.partialorder %v17454_v52, 4.0 }
 0x7dd   : > { %v14234_v50 = vpop.permute.xlu0 %7545  ;;  %vm5139_vm2 = vcmp.lt.f32.partialorder %v17453_v42, 4.0 }
 0x7de   : > { %17439 = vst [vmem:[#allocation156_spill] sm:$0xff] %v14234_v50  ;;  %7737 = vperm.xlu0 %10178, %v7054_v61   ;;  %7734 = vperm.xlu1 %10179, %v7053_v51   ;;  %v14236_v22 = vpop.permute.xlu1 %7542  ;;  %v17449_v51 = vld [vmem:[#allocation20_spill] sm:$0xff] }
 0x7df   : > { %17440 = vst [vmem:[#allocation155_spill] sm:$0xff] %v14236_v22  ;;  %v7057_v61 = vsel %vm5137_vm15, %v17449_v51, inf  ;;  %v17450_v22 = vld [vmem:[#allocation23_spill] sm:$0xff]  ;;  %v17460_v51 = vld [vmem:[#allocation225_spill] sm:$0xff] }
 0x7e0   : > { %v7058_v59 = vsel %vm5138_vm0, %v17450_v22, inf  ;;  %v17459_v22 = vld [vmem:[#allocation221_spill] sm:$0xff]  ;;  %vm5142_vm5 = vcmp.lt.f32.partialorder %v17460_v51, 4.0 }
 0x7e1   : > { %v14242_v32 = vpop.permute.xlu0 %7551  ;;  %vm5141_vm4 = vcmp.lt.f32.partialorder %v17459_v22, 4.0 }
 0x7e2   : > { %17445 = vst [vmem:[#allocation159_spill] sm:$0xff] %v14242_v32  ;;  %7743 = vperm.xlu0 %10178, %v7056_v23   ;;  %7740 = vperm.xlu1 %10179, %v7055_v44   ;;  %v14244_v46 = vpop.permute.xlu1 %7548  ;;  %v17455_v44 = vld [vmem:[#allocation22_spill] sm:$0xff] }
 0x7e3   : > { %17446 = vst [vmem:[#allocation158_spill] sm:$0xff] %v14244_v46  ;;  %v7059_v23 = vsel %vm5139_vm2, %v17455_v44, inf  ;;  %v17456_v46 = vld [vmem:[#allocation135_spill] sm:$0xff]  ;;  %v17466_v44 = vld [vmem:[#allocation228_spill] sm:$0xff] }
 0x7e4   : > { %v7060_v28 = vsel %vm5140_vm3, %v17456_v46, inf  ;;  %v17465_v46 = vld [vmem:[#allocation224_spill] sm:$0xff]  ;;  %vm5144_vm7 = vcmp.lt.f32.partialorder %v17466_v44, 4.0 }
 0x7e5   : > { %v14250_v50 = vpop.permute.xlu0 %7557  ;;  %vm5143_vm6 = vcmp.lt.f32.partialorder %v17465_v46, 4.0 }
 0x7e6   : > { %17451 = vst [vmem:[#allocation164_spill] sm:$0xff] %v14250_v50  ;;  %7749 = vperm.xlu0 %10178, %v7058_v59   ;;  %7746 = vperm.xlu1 %10179, %v7057_v61   ;;  %v14252_v35 = vpop.permute.xlu1 %7554  ;;  %v17461_v61 = vld [vmem:[#allocation24_spill] sm:$0xff] }
 0x7e7   : > { %17452 = vst [vmem:[#allocation163_spill] sm:$0xff] %v14252_v35  ;;  %v7061_v59 = vsel %vm5141_vm4, %v17461_v61, inf  ;;  %v17462_v35 = vld [vmem:[#allocation142_spill] sm:$0xff] }
 0x7e8   : > { %v7062_v42 = vsel %vm5142_vm5, %v17462_v35, inf  ;;  %v17471_v35 = vld [vmem:[#allocation227_spill] sm:$0xff]  ;;  %v17472_v61 = vld [vmem:[#allocation230_spill] sm:$0xff] }
 0x7e9   : > { %v14258_v32 = vpop.permute.xlu0 %7563  ;;  %vm5145_vm8 = vcmp.lt.f32.partialorder %v17471_v35, 4.0  ;;  %vm5146_vm9 = vcmp.lt.f32.partialorder %v17472_v61, 4.0 }
 0x7ea   : > { %17457 = vst [vmem:[#allocation166_spill] sm:$0xff] %v14258_v32  ;;  %7755 = vperm.xlu0 %10178, %v7060_v28   ;;  %7752 = vperm.xlu1 %10179, %v7059_v23   ;;  %v14260_v38 = vpop.permute.xlu1 %7560  ;;  %v17467_v23 = vld [vmem:[#allocation136_spill] sm:$0xff] }
 0x7eb   : > { %17458 = vst [vmem:[#allocation165_spill] sm:$0xff] %v14260_v38  ;;  %v7063_v28 = vsel %vm5143_vm6, %v17467_v23, inf  ;;  %v17468_v38 = vld [vmem:[#allocation148_spill] sm:$0xff]  ;;  %v17478_v23 = vld [vmem:[#allocation233_spill] sm:$0xff] }
 0x7ec   : > { %v7064_v22 = vsel %vm5144_vm7, %v17468_v38, inf  ;;  %v17477_v38 = vld [vmem:[#allocation234_spill] sm:$0xff]  ;;  %vm5148_vm11 = vcmp.lt.f32.partialorder %v17478_v23, 4.0 }
 0x7ed   : > { %v14266_v50 = vpop.permute.xlu0 %7569  ;;  %vm5147_vm10 = vcmp.lt.f32.partialorder %v17477_v38, 4.0 }
 0x7ee   : > { %17463 = vst [vmem:[#allocation169_spill] sm:$0xff] %v14266_v50  ;;  %7761 = vperm.xlu0 %10178, %v7062_v42   ;;  %7758 = vperm.xlu1 %10179, %v7061_v59   ;;  %v14268_v52 = vpop.permute.xlu1 %7566  ;;  %v17473_v59 = vld [vmem:[#allocation145_spill] sm:$0xff] }
 0x7ef   : > { %17464 = vst [vmem:[#allocation168_spill] sm:$0xff] %v14268_v52  ;;  %v7065_v42 = vsel %vm5145_vm8, %v17473_v59, inf  ;;  %v17474_v52 = vld [vmem:[#allocation154_spill] sm:$0xff]  ;;  %v17484_v59 = vld [vmem:[#allocation235_spill] sm:$0xff] }
 0x7f0   : > { %v7066_v46 = vsel %vm5146_vm9, %v17474_v52, inf  ;;  %v17483_v52 = vld [vmem:[#allocation236_spill] sm:$0xff]  ;;  %vm5150_vm13 = vcmp.lt.f32.partialorder %v17484_v59, 4.0 }
 0x7f1   : > { %v14274_v32 = vpop.permute.xlu0 %7575  ;;  %vm5149_vm12 = vcmp.lt.f32.partialorder %v17483_v52, 4.0 }
 0x7f2   : > { %17469 = vst [vmem:[#allocation172_spill] sm:$0xff] %v14274_v32  ;;  %7767 = vperm.xlu0 %10178, %v7064_v22   ;;  %7764 = vperm.xlu1 %10179, %v7063_v28   ;;  %v14276_v51 = vpop.permute.xlu1 %7572  ;;  %v17479_v28 = vld [vmem:[#allocation151_spill] sm:$0xff] }
 0x7f3   : > { %17470 = vst [vmem:[#allocation171_spill] sm:$0xff] %v14276_v51  ;;  %v7067_v22 = vsel %vm5147_vm10, %v17479_v28, inf  ;;  %v17480_v51 = vld [vmem:[#allocation160_spill] sm:$0xff]  ;;  %v17490_v28 = vld [vmem:[#allocation238_spill] sm:$0xff] }
 0x7f4   : > { %v7068_v35 = vsel %vm5148_vm11, %v17480_v51, inf  ;;  %v17489_v51 = vld [vmem:[#allocation239_spill] sm:$0xff]  ;;  %vm5152_vm15 = vcmp.lt.f32.partialorder %v17490_v28, 4.0 }
 0x7f5   : > { %v14282_v50 = vpop.permute.xlu0 %7581  ;;  %vm5151_vm14 = vcmp.lt.f32.partialorder %v17489_v51, 4.0 }
 0x7f6   : > { %17475 = vst [vmem:[#allocation175_spill] sm:$0xff] %v14282_v50  ;;  %7773 = vperm.xlu0 %10178, %v7066_v46   ;;  %7770 = vperm.xlu1 %10179, %v7065_v42   ;;  %v14284_v44 = vpop.permute.xlu1 %7578  ;;  %v17485_v42 = vld [vmem:[#allocation157_spill] sm:$0xff] }
 0x7f7   : > { %17476 = vst [vmem:[#allocation174_spill] sm:$0xff] %v14284_v44  ;;  %v7069_v46 = vsel %vm5149_vm12, %v17485_v42, inf  ;;  %v17486_v44 = vld [vmem:[#allocation167_spill] sm:$0xff]  ;;  %v17496_v42 = vld [vmem:[#allocation241_spill] sm:$0xff] }
 0x7f8   : > { %v7070_v38 = vsel %vm5150_vm13, %v17486_v44, inf  ;;  %v17495_v44 = vld [vmem:[#allocation242_spill] sm:$0xff]  ;;  %vm5154_vm2 = vcmp.lt.f32.partialorder %v17496_v42, 4.0 }
 0x7f9   : > { %v14290_v32 = vpop.permute.xlu0 %7587  ;;  %vm5153_vm0 = vcmp.lt.f32.partialorder %v17495_v44, 4.0 }
 0x7fa   : > { %17481 = vst [vmem:[#allocation178_spill] sm:$0xff] %v14290_v32  ;;  %7779 = vperm.xlu0 %10178, %v7068_v35   ;;  %7776 = vperm.xlu1 %10179, %v7067_v22   ;;  %v14292_v61 = vpop.permute.xlu1 %7584  ;;  %v17491_v22 = vld [vmem:[#allocation161_spill] sm:$0xff] }
 0x7fb   : > { %17482 = vst [vmem:[#allocation177_spill] sm:$0xff] %v14292_v61  ;;  %v7071_v35 = vsel %vm5151_vm14, %v17491_v22, inf  ;;  %v17492_v61 = vld [vmem:[#allocation173_spill] sm:$0xff]  ;;  %v17502_v22 = vld [vmem:[#allocation244_spill] sm:$0xff] }
 0x7fc   : > { %v7072_v52 = vsel %vm5152_vm15, %v17492_v61, inf  ;;  %v17501_v61 = vld [vmem:[#allocation245_spill] sm:$0xff]  ;;  %vm5156_vm4 = vcmp.lt.f32.partialorder %v17502_v22, 4.0 }
 0x7fd   : > { %v14298_v50 = vpop.permute.xlu0 %7593  ;;  %vm5155_vm3 = vcmp.lt.f32.partialorder %v17501_v61, 4.0 }
 0x7fe   : > { %17487 = vst [vmem:[#allocation181_spill] sm:$0xff] %v14298_v50  ;;  %7785 = vperm.xlu0 %10178, %v7070_v38   ;;  %7782 = vperm.xlu1 %10179, %v7069_v46   ;;  %v14300_v23 = vpop.permute.xlu1 %7590  ;;  %v17497_v46 = vld [vmem:[#allocation170_spill] sm:$0xff] }
 0x7ff   : > { %17488 = vst [vmem:[#allocation180_spill] sm:$0xff] %v14300_v23  ;;  %v7073_v38 = vsel %vm5153_vm0, %v17497_v46, inf  ;;  %v17498_v23 = vld [vmem:[#allocation176_spill] sm:$0xff]  ;;  %v17508_v46 = vld [vmem:[#allocation247_spill] sm:$0xff] }
 0x800   : > { %v7074_v51 = vsel %vm5154_vm2, %v17498_v23, inf  ;;  %v17507_v23 = vld [vmem:[#allocation248_spill] sm:$0xff]  ;;  %vm5158_vm6 = vcmp.lt.f32.partialorder %v17508_v46, 4.0 }
 0x801   : > { %v14306_v32 = vpop.permute.xlu0 %7599  ;;  %vm5157_vm5 = vcmp.lt.f32.partialorder %v17507_v23, 4.0 }
 0x802   : > { %17493 = vst [vmem:[#allocation184_spill] sm:$0xff] %v14306_v32  ;;  %7791 = vperm.xlu0 %10178, %v7072_v52   ;;  %7788 = vperm.xlu1 %10179, %v7071_v35   ;;  %v14308_v59 = vpop.permute.xlu1 %7596  ;;  %v17503_v35 = vld [vmem:[#allocation371_spill] sm:$0xff] }
 0x803   : > { %17494 = vst [vmem:[#allocation55_spill] sm:$0xff] %v14308_v59  ;;  %v7075_v52 = vsel %vm5155_vm3, %v17503_v35, inf  ;;  %v17504_v59 = vld [vmem:[#allocation179_spill] sm:$0xff]  ;;  %v17514_v35 = vld [vmem:[#allocation250_spill] sm:$0xff] }
 0x804   : > { %v7076_v44 = vsel %vm5156_vm4, %v17504_v59, inf  ;;  %v17513_v59 = vld [vmem:[#allocation251_spill] sm:$0xff]  ;;  %vm5160_vm8 = vcmp.lt.f32.partialorder %v17514_v35, 4.0 }
 0x805   : > { %v14314_v50 = vpop.permute.xlu0 %7605  ;;  %vm5159_vm7 = vcmp.lt.f32.partialorder %v17513_v59, 4.0 }
 0x806   : > { %17499 = vst [vmem:[#allocation62_spill] sm:$0xff] %v14314_v50  ;;  %7797 = vperm.xlu0 %10178, %v7074_v51   ;;  %7794 = vperm.xlu1 %10179, %v7073_v38   ;;  %v14316_v28 = vpop.permute.xlu1 %7602  ;;  %v17509_v38 = vld [vmem:[#allocation372_spill] sm:$0xff] }
 0x807   : > { %17500 = vst [vmem:[#allocation183_spill] sm:$0xff] %v14316_v28  ;;  %v7077_v51 = vsel %vm5157_vm5, %v17509_v38, inf  ;;  %v17510_v28 = vld [vmem:[#allocation182_spill] sm:$0xff]  ;;  %v17520_v38 = vld [vmem:[#allocation257_spill] sm:$0xff] }
 0x808   : > { %v7078_v61 = vsel %vm5158_vm6, %v17510_v28, inf  ;;  %v17519_v28 = vld [vmem:[#allocation253_spill] sm:$0xff]  ;;  %vm5162_vm10 = vcmp.lt.f32.partialorder %v17520_v38, 4.0 }
 0x809   : > { %v14322_v32 = vpop.permute.xlu0 %7611  ;;  %vm5161_vm9 = vcmp.lt.f32.partialorder %v17519_v28, 4.0 }
 0x80a   : > { %17505 = vst [vmem:[#allocation188_spill] sm:$0xff] %v14322_v32  ;;  %7803 = vperm.xlu0 %10178, %v7076_v44   ;;  %7800 = vperm.xlu1 %10179, %v7075_v52   ;;  %v14324_v42 = vpop.permute.xlu1 %7608  ;;  %v17515_v52 = vld [vmem:[#allocation373_spill] sm:$0xff] }
 0x80b   : > { %17506 = vst [vmem:[#allocation56_spill] sm:$0xff] %v14324_v42  ;;  %v7079_v44 = vsel %vm5159_vm7, %v17515_v52, inf  ;;  %v17516_v42 = vld [vmem:[#allocation185_spill] sm:$0xff]  ;;  %v17526_v52 = vld [vmem:[#allocation259_spill] sm:$0xff] }
 0x80c   : > { %v7080_v23 = vsel %vm5160_vm8, %v17516_v42, inf  ;;  %v17525_v42 = vld [vmem:[#allocation256_spill] sm:$0xff]  ;;  %vm5164_vm12 = vcmp.lt.f32.partialorder %v17526_v52, 4.0 }
 0x80d   : > { %v14330_v50 = vpop.permute.xlu0 %7617  ;;  %vm5163_vm11 = vcmp.lt.f32.partialorder %v17525_v42, 4.0 }
 0x80e   : > { %17511 = vst [vmem:[#allocation68_spill] sm:$0xff] %v14330_v50  ;;  %7809 = vperm.xlu0 %10178, %v7078_v61   ;;  %7806 = vperm.xlu1 %10179, %v7077_v51   ;;  %v14332_v22 = vpop.permute.xlu1 %7614  ;;  %v17521_v51 = vld [vmem:[#allocation374_spill] sm:$0xff] }
 0x80f   : > { %17512 = vst [vmem:[#allocation190_spill] sm:$0xff] %v14332_v22  ;;  %v7081_v61 = vsel %vm5161_vm9, %v17521_v51, inf  ;;  %v17522_v22 = vld [vmem:[#allocation186_spill] sm:$0xff] }
 0x810   : > { %v7082_v59 = vsel %vm5162_vm10, %v17522_v22, inf  ;;  %v17531_v22 = vld [vmem:[#allocation258_spill] sm:$0xff] }
 0x811   : > { %v14338_v32 = vpop.permute.xlu0 %7623  ;;  %vm5165_vm13 = vcmp.lt.f32.partialorder %v17531_v22, 4.0  ;;  %v17532_v51 = vld [vmem:[#allocation262_spill] sm:$0xff] }
 0x812   : > { %17517 = vst [vmem:[#allocation189_spill] sm:$0xff] %v14338_v32  ;;  %7815 = vperm.xlu0 %10178, %v7080_v23   ;;  %7812 = vperm.xlu1 %10179, %v7079_v44   ;;  %v14340_v46 = vpop.permute.xlu1 %7620  ;;  %v17527_v44 = vld [vmem:[#allocation375_spill] sm:$0xff]  ;;  %vm5166_vm14 = vcmp.lt.f32.partialorder %v17532_v51, 4.0 }
 0x813   : > { %17518 = vst [vmem:[#allocation65_spill] sm:$0xff] %v14340_v46  ;;  %v7083_v23 = vsel %vm5163_vm11, %v17527_v44, inf  ;;  %v17528_v46 = vld [vmem:[#allocation191_spill] sm:$0xff]  ;;  %v17538_v44 = vld [vmem:[#allocation265_spill] sm:$0xff] }
 0x814   : > { %v7084_v28 = vsel %vm5164_vm12, %v17528_v46, inf  ;;  %v17537_v46 = vld [vmem:[#allocation261_spill] sm:$0xff]  ;;  %vm5168_vm0 = vcmp.lt.f32.partialorder %v17538_v44, 4.0 }
 0x815   : > { %v14346_v50 = vpop.permute.xlu0 %7629  ;;  %vm5167_vm15 = vcmp.lt.f32.partialorder %v17537_v46, 4.0 }
 0x816   : > { %17523 = vst [vmem:[#allocation72_spill] sm:$0xff] %v14346_v50  ;;  %7821 = vperm.xlu0 %10178, %v7082_v59   ;;  %7818 = vperm.xlu1 %10179, %v7081_v61   ;;  %v14348_v35 = vpop.permute.xlu1 %7626  ;;  %v17533_v61 = vld [vmem:[#allocation376_spill] sm:$0xff] }
 0x817   : > { %17524 = vst [vmem:[#allocation193_spill] sm:$0xff] %v14348_v35  ;;  %v7085_v59 = vsel %vm5165_vm13, %v17533_v61, inf  ;;  %v17534_v35 = vld [vmem:[#allocation194_spill] sm:$0xff]  ;;  %v17544_v61 = vld [vmem:[#allocation268_spill] sm:$0xff] }
 0x818   : > { %v7086_v42 = vsel %vm5166_vm14, %v17534_v35, inf  ;;  %v17543_v35 = vld [vmem:[#allocation264_spill] sm:$0xff]  ;;  %vm5170_vm3 = vcmp.lt.f32.partialorder %v17544_v61, 4.0 }
 0x819   : > { %v14354_v32 = vpop.permute.xlu0 %7635  ;;  %vm5169_vm2 = vcmp.lt.f32.partialorder %v17543_v35, 4.0 }
 0x81a   : > { %17529 = vst [vmem:[#allocation192_spill] sm:$0xff] %v14354_v32  ;;  %7827 = vperm.xlu0 %10178, %v7084_v28   ;;  %7824 = vperm.xlu1 %10179, %v7083_v23   ;;  %v14356_v38 = vpop.permute.xlu1 %7632  ;;  %v17539_v23 = vld [vmem:[#allocation377_spill] sm:$0xff] }
 0x81b   : > { %17530 = vst [vmem:[#allocation71_spill] sm:$0xff] %v14356_v38  ;;  %v7087_v28 = vsel %vm5167_vm15, %v17539_v23, inf  ;;  %v17540_v38 = vld [vmem:[#allocation197_spill] sm:$0xff]  ;;  %v17550_v23 = vld [vmem:[#allocation271_spill] sm:$0xff] }
 0x81c   : > { %v7088_v22 = vsel %vm5168_vm0, %v17540_v38, inf  ;;  %v17549_v38 = vld [vmem:[#allocation267_spill] sm:$0xff]  ;;  %vm5172_vm5 = vcmp.lt.f32.partialorder %v17550_v23, 4.0 }
 0x81d   : > { %v14362_v50 = vpop.permute.xlu0 %7641  ;;  %vm5171_vm4 = vcmp.lt.f32.partialorder %v17549_v38, 4.0 }
 0x81e   : > { %17535 = vst [vmem:[#allocation74_spill] sm:$0xff] %v14362_v50  ;;  %7833 = vperm.xlu0 %10178, %v7086_v42   ;;  %7830 = vperm.xlu1 %10179, %v7085_v59   ;;  %v14364_v52 = vpop.permute.xlu1 %7638  ;;  %v17545_v59 = vld [vmem:[#allocation378_spill] sm:$0xff] }
 0x81f   : > { %17536 = vst [vmem:[#allocation196_spill] sm:$0xff] %v14364_v52  ;;  %v7089_v42 = vsel %vm5169_vm2, %v17545_v59, inf  ;;  %v17546_v52 = vld [vmem:[#allocation200_spill] sm:$0xff]  ;;  %v17556_v59 = vld [vmem:[#allocation274_spill] sm:$0xff] }
 0x820   : > { %v7090_v46 = vsel %vm5170_vm3, %v17546_v52, inf  ;;  %v17555_v52 = vld [vmem:[#allocation270_spill] sm:$0xff]  ;;  %vm5174_vm7 = vcmp.lt.f32.partialorder %v17556_v59, 4.0 }
 0x821   : > { %v14370_v32 = vpop.permute.xlu0 %7647  ;;  %vm5173_vm6 = vcmp.lt.f32.partialorder %v17555_v52, 4.0 }
 0x822   : > { %17541 = vst [vmem:[#allocation195_spill] sm:$0xff] %v14370_v32  ;;  %7839 = vperm.xlu0 %10178, %v7088_v22   ;;  %7836 = vperm.xlu1 %10179, %v7087_v28   ;;  %v14372_v51 = vpop.permute.xlu1 %7644  ;;  %v17551_v28 = vld [vmem:[#allocation379_spill] sm:$0xff] }
 0x823   : > { %17542 = vst [vmem:[#allocation73_spill] sm:$0xff] %v14372_v51  ;;  %v7091_v22 = vsel %vm5171_vm4, %v17551_v28, inf  ;;  %v17552_v51 = vld [vmem:[#allocation203_spill] sm:$0xff]  ;;  %v17562_v28 = vld [vmem:[#allocation276_spill] sm:$0xff] }
 0x824   : > { %v7092_v35 = vsel %vm5172_vm5, %v17552_v51, inf  ;;  %v17561_v51 = vld [vmem:[#allocation273_spill] sm:$0xff]  ;;  %vm5176_vm9 = vcmp.lt.f32.partialorder %v17562_v28, 4.0 }
 0x825   : > { %v14378_v50 = vpop.permute.xlu0 %7653  ;;  %vm5175_vm8 = vcmp.lt.f32.partialorder %v17561_v51, 4.0 }
 0x826   : > { %17547 = vst [vmem:[#allocation77_spill] sm:$0xff] %v14378_v50  ;;  %7845 = vperm.xlu0 %10178, %v7090_v46   ;;  %7842 = vperm.xlu1 %10179, %v7089_v42   ;;  %v14380_v44 = vpop.permute.xlu1 %7650  ;;  %v17557_v42 = vld [vmem:[#allocation380_spill] sm:$0xff] }
 0x827   : > { %17548 = vst [vmem:[#allocation199_spill] sm:$0xff] %v14380_v44  ;;  %v7093_v46 = vsel %vm5173_vm6, %v17557_v42, inf  ;;  %v17558_v44 = vld [vmem:[#allocation206_spill] sm:$0xff]  ;;  %v17568_v42 = vld [vmem:[#allocation279_spill] sm:$0xff] }
 0x828   : > { %v7094_v38 = vsel %vm5174_vm7, %v17558_v44, inf  ;;  %v17567_v44 = vld [vmem:[#allocation280_spill] sm:$0xff]  ;;  %vm5178_vm11 = vcmp.lt.f32.partialorder %v17568_v42, 4.0 }
 0x829   : > { %v14386_v32 = vpop.permute.xlu0 %7659  ;;  %vm5177_vm10 = vcmp.lt.f32.partialorder %v17567_v44, 4.0 }
 0x82a   : > { %17553 = vst [vmem:[#allocation198_spill] sm:$0xff] %v14386_v32  ;;  %7851 = vperm.xlu0 %10178, %v7092_v35   ;;  %7848 = vperm.xlu1 %10179, %v7091_v22   ;;  %v14388_v61 = vpop.permute.xlu1 %7656  ;;  %v17563_v22 = vld [vmem:[#allocation381_spill] sm:$0xff] }
 0x82b   : > { %17554 = vst [vmem:[#allocation75_spill] sm:$0xff] %v14388_v61  ;;  %v7095_v35 = vsel %vm5175_vm8, %v17563_v22, inf  ;;  %v17564_v61 = vld [vmem:[#allocation208_spill] sm:$0xff]  ;;  %v17574_v22 = vld [vmem:[#allocation283_spill] sm:$0xff] }
 0x82c   : > { %v7096_v52 = vsel %vm5176_vm9, %v17564_v61, inf  ;;  %v17573_v61 = vld [vmem:[#allocation281_spill] sm:$0xff]  ;;  %vm5180_vm13 = vcmp.lt.f32.partialorder %v17574_v22, 4.0 }
 0x82d   : > { %v14394_v50 = vpop.permute.xlu0 %7665  ;;  %vm5179_vm12 = vcmp.lt.f32.partialorder %v17573_v61, 4.0 }
 0x82e   : > { %17559 = vst [vmem:[#allocation79_spill] sm:$0xff] %v14394_v50  ;;  %7857 = vperm.xlu0 %10178, %v7094_v38   ;;  %7854 = vperm.xlu1 %10179, %v7093_v46   ;;  %v14396_v23 = vpop.permute.xlu1 %7662  ;;  %v17569_v46 = vld [vmem:[#allocation382_spill] sm:$0xff] }
 0x82f   : > { %17560 = vst [vmem:[#allocation202_spill] sm:$0xff] %v14396_v23  ;;  %v7097_v38 = vsel %vm5177_vm10, %v17569_v46, inf  ;;  %v17570_v23 = vld [vmem:[#allocation209_spill] sm:$0xff]  ;;  %v17580_v46 = vld [vmem:[#allocation288_spill] sm:$0xff] }
 0x830   : > { %v7098_v51 = vsel %vm5178_vm11, %v17570_v23, inf  ;;  %v17579_v23 = vld [vmem:[#allocation285_spill] sm:$0xff]  ;;  %vm5182_vm15 = vcmp.lt.f32.partialorder %v17580_v46, 4.0 }
 0x831   : > { %v14402_v32 = vpop.permute.xlu0 %7671  ;;  %vm5181_vm14 = vcmp.lt.f32.partialorder %v17579_v23, 4.0 }
 0x832   : > { %17565 = vst [vmem:[#allocation201_spill] sm:$0xff] %v14402_v32  ;;  %7863 = vperm.xlu0 %10178, %v7096_v52   ;;  %7860 = vperm.xlu1 %10179, %v7095_v35   ;;  %v14404_v59 = vpop.permute.xlu1 %7668  ;;  %v17575_v35 = vld [vmem:[#allocation383_spill] sm:$0xff] }
 0x833   : > { %17566 = vst [vmem:[#allocation78_spill] sm:$0xff] %v14404_v59  ;;  %v7099_v52 = vsel %vm5179_vm12, %v17575_v35, inf  ;;  %v17576_v59 = vld [vmem:[#allocation214_spill] sm:$0xff]  ;;  %v17586_v35 = vld [vmem:[#allocation291_spill] sm:$0xff] }
 0x834   : > { %v7100_v44 = vsel %vm5180_vm13, %v17576_v59, inf  ;;  %v17585_v59 = vld [vmem:[#allocation287_spill] sm:$0xff]  ;;  %vm5184_vm2 = vcmp.lt.f32.partialorder %v17586_v35, 4.0 }
 0x835   : > { %v14410_v50 = vpop.permute.xlu0 %7677  ;;  %vm5183_vm0 = vcmp.lt.f32.partialorder %v17585_v59, 4.0 }
 0x836   : > { %17571 = vst [vmem:[#allocation81_spill] sm:$0xff] %v14410_v50  ;;  %7869 = vperm.xlu0 %10178, %v7098_v51   ;;  %7866 = vperm.xlu1 %10179, %v7097_v38   ;;  %v14412_v28 = vpop.permute.xlu1 %7674  ;;  %v17581_v38 = vld [vmem:[#allocation384_spill] sm:$0xff] }
 0x837   : > { %17572 = vst [vmem:[#allocation205_spill] sm:$0xff] %v14412_v28  ;;  %v7101_v51 = vsel %vm5181_vm14, %v17581_v38, inf  ;;  %v17582_v28 = vld [vmem:[#allocation217_spill] sm:$0xff]  ;;  %v17592_v38 = vld [vmem:[#allocation294_spill] sm:$0xff] }
 0x838   : > { %v7102_v61 = vsel %vm5182_vm15, %v17582_v28, inf  ;;  %v17591_v28 = vld [vmem:[#allocation290_spill] sm:$0xff]  ;;  %vm5186_vm4 = vcmp.lt.f32.partialorder %v17592_v38, 4.0 }
 0x839   : > { %v14418_v32 = vpop.permute.xlu0 %7683  ;;  %vm5185_vm3 = vcmp.lt.f32.partialorder %v17591_v28, 4.0 }
 0x83a   : > { %17577 = vst [vmem:[#allocation204_spill] sm:$0xff] %v14418_v32  ;;  %7875 = vperm.xlu0 %10178, %v7100_v44   ;;  %7872 = vperm.xlu1 %10179, %v7099_v52   ;;  %v14420_v42 = vpop.permute.xlu1 %7680  ;;  %v17587_v52 = vld [vmem:[#allocation385_spill] sm:$0xff] }
 0x83b   : > { %17578 = vst [vmem:[#allocation80_spill] sm:$0xff] %v14420_v42  ;;  %v7103_v44 = vsel %vm5183_vm0, %v17587_v52, inf  ;;  %v17588_v42 = vld [vmem:[#allocation220_spill] sm:$0xff] }
 0x83c   : > { %v7104_v23 = vsel %vm5184_vm2, %v17588_v42, inf  ;;  %v17597_v42 = vld [vmem:[#allocation293_spill] sm:$0xff]  ;;  %v17598_v52 = vld [vmem:[#allocation296_spill] sm:$0xff] }
 0x83d   : > { %v14426_v50 = vpop.permute.xlu0 %7689  ;;  %vm5187_vm5 = vcmp.lt.f32.partialorder %v17597_v42, 4.0  ;;  %vm5188_vm6 = vcmp.lt.f32.partialorder %v17598_v52, 4.0 }
 0x83e   : > { %17583 = vst [vmem:[#allocation83_spill] sm:$0xff] %v14426_v50  ;;  %7881 = vperm.xlu0 %10178, %v7102_v61   ;;  %7878 = vperm.xlu1 %10179, %v7101_v51   ;;  %v14428_v22 = vpop.permute.xlu1 %7686  ;;  %v17593_v51 = vld [vmem:[#allocation386_spill] sm:$0xff] }
 0x83f   : > { %17584 = vst [vmem:[#allocation207_spill] sm:$0xff] %v14428_v22  ;;  %v7105_v61 = vsel %vm5185_vm3, %v17593_v51, inf  ;;  %v17594_v22 = vld [vmem:[#allocation223_spill] sm:$0xff] }
 0x840   : > { %v7106_v59 = vsel %vm5186_vm4, %v17594_v22, inf  ;;  %v17603_v22 = vld [vmem:[#allocation298_spill] sm:$0xff]  ;;  %v17604_v51 = vld [vmem:[#allocation299_spill] sm:$0xff] }
 0x841   : > { %v14434_v32 = vpop.permute.xlu0 %7695  ;;  %vm5189_vm7 = vcmp.lt.f32.partialorder %v17603_v22, 4.0  ;;  %vm5190_vm8 = vcmp.lt.f32.partialorder %v17604_v51, 4.0 }
 0x842   : > { %17589 = vst [vmem:[#allocation211_spill] sm:$0xff] %v14434_v32  ;;  %7887 = vperm.xlu0 %10178, %v7104_v23   ;;  %7884 = vperm.xlu1 %10179, %v7103_v44   ;;  %v14436_v46 = vpop.permute.xlu1 %7692  ;;  %v17599_v44 = vld [vmem:[#allocation387_spill] sm:$0xff] }
 0x843   : > { %17590 = vst [vmem:[#allocation82_spill] sm:$0xff] %v14436_v46  ;;  %v7107_v23 = vsel %vm5187_vm5, %v17599_v44, inf  ;;  %v17600_v46 = vld [vmem:[#allocation226_spill] sm:$0xff]  ;;  %v17610_v44 = vld [vmem:[#allocation301_spill] sm:$0xff] }
 0x844   : > { %v7108_v28 = vsel %vm5188_vm6, %v17600_v46, inf  ;;  %v17609_v46 = vld [vmem:[#allocation300_spill] sm:$0xff]  ;;  %vm5192_vm10 = vcmp.lt.f32.partialorder %v17610_v44, 4.0 }
 0x845   : > { %v14442_v50 = vpop.permute.xlu0 %7701  ;;  %vm5191_vm9 = vcmp.lt.f32.partialorder %v17609_v46, 4.0 }
 0x846   : > { %17595 = vst [vmem:[#allocation90_spill] sm:$0xff] %v14442_v50  ;;  %7893 = vperm.xlu0 %10178, %v7106_v59   ;;  %7890 = vperm.xlu1 %10179, %v7105_v61   ;;  %v14444_v35 = vpop.permute.xlu1 %7698  ;;  %v17605_v61 = vld [vmem:[#allocation388_spill] sm:$0xff] }
 0x847   : > { %17596 = vst [vmem:[#allocation210_spill] sm:$0xff] %v14444_v35  ;;  %v7109_v59 = vsel %vm5189_vm7, %v17605_v61, inf  ;;  %v17606_v35 = vld [vmem:[#allocation229_spill] sm:$0xff]  ;;  %v17616_v61 = vld [vmem:[#allocation303_spill] sm:$0xff] }
 0x848   : > { %v7110_v42 = vsel %vm5190_vm8, %v17606_v35, inf  ;;  %v17615_v35 = vld [vmem:[#allocation302_spill] sm:$0xff]  ;;  %vm5194_vm12 = vcmp.lt.f32.partialorder %v17616_v61, 4.0 }
 0x849   : > { %v14450_v32 = vpop.permute.xlu0 %7707  ;;  %vm5193_vm11 = vcmp.lt.f32.partialorder %v17615_v35, 4.0 }
 0x84a   : > { %17601 = vst [vmem:[#allocation213_spill] sm:$0xff] %v14450_v32  ;;  %7899 = vperm.xlu0 %10178, %v7108_v28   ;;  %7896 = vperm.xlu1 %10179, %v7107_v23   ;;  %v14452_v38 = vpop.permute.xlu1 %7704  ;;  %v17611_v23 = vld [vmem:[#allocation389_spill] sm:$0xff] }
 0x84b   : > { %17602 = vst [vmem:[#allocation84_spill] sm:$0xff] %v14452_v38  ;;  %v7111_v28 = vsel %vm5191_vm9, %v17611_v23, inf  ;;  %v17612_v38 = vld [vmem:[#allocation231_spill] sm:$0xff]  ;;  %v17622_v23 = vld [vmem:[#allocation305_spill] sm:$0xff] }
 0x84c   : > { %v7112_v22 = vsel %vm5192_vm10, %v17612_v38, inf  ;;  %v17621_v38 = vld [vmem:[#allocation304_spill] sm:$0xff]  ;;  %vm5196_vm14 = vcmp.lt.f32.partialorder %v17622_v23, 4.0 }
 0x84d   : > { %v14458_v50 = vpop.permute.xlu0 %7713  ;;  %vm5195_vm13 = vcmp.lt.f32.partialorder %v17621_v38, 4.0 }
 0x84e   : > { %17607 = vst [vmem:[#allocation96_spill] sm:$0xff] %v14458_v50  ;;  %7905 = vperm.xlu0 %10178, %v7110_v42   ;;  %7902 = vperm.xlu1 %10179, %v7109_v59   ;;  %v14460_v52 = vpop.permute.xlu1 %7710  ;;  %v17617_v59 = vld [vmem:[#allocation390_spill] sm:$0xff] }
 0x84f   : > { %17608 = vst [vmem:[#allocation212_spill] sm:$0xff] %v14460_v52  ;;  %v7113_v42 = vsel %vm5193_vm11, %v17617_v59, inf  ;;  %v17618_v52 = vld [vmem:[#allocation232_spill] sm:$0xff]  ;;  %v17628_v59 = vld [vmem:[#allocation307_spill] sm:$0xff] }
 0x850   : > { %v7114_v46 = vsel %vm5194_vm12, %v17618_v52, inf  ;;  %v17627_v52 = vld [vmem:[#allocation306_spill] sm:$0xff]  ;;  %vm5198_vm0 = vcmp.lt.f32.partialorder %v17628_v59, 4.0 }
 0x851   : > { %v14466_v32 = vpop.permute.xlu0 %7719  ;;  %vm5197_vm15 = vcmp.lt.f32.partialorder %v17627_v52, 4.0 }
 0x852   : > { %17613 = vst [vmem:[#allocation216_spill] sm:$0xff] %v14466_v32  ;;  %7911 = vperm.xlu0 %10178, %v7112_v22   ;;  %7908 = vperm.xlu1 %10179, %v7111_v28   ;;  %v14468_v51 = vpop.permute.xlu1 %7716  ;;  %v17623_v28 = vld [vmem:[#allocation391_spill] sm:$0xff] }
 0x853   : > { %17614 = vst [vmem:[#allocation93_spill] sm:$0xff] %v14468_v51  ;;  %v7115_v22 = vsel %vm5195_vm13, %v17623_v28, inf  ;;  %v17624_v51 = vld [vmem:[#allocation237_spill] sm:$0xff] }
 0x854   : > { %v7116_v35 = vsel %vm5196_vm14, %v17624_v51, inf  ;;  %v17633_v51 = vld [vmem:[#allocation308_spill] sm:$0xff]  ;;  %v17634_v28 = vld [vmem:[#allocation309_spill] sm:$0xff] }
 0x855   : > { %v14474_v50 = vpop.permute.xlu0 %7725  ;;  %vm5199_vm2 = vcmp.lt.f32.partialorder %v17633_v51, 4.0  ;;  %vm5200_vm3 = vcmp.lt.f32.partialorder %v17634_v28, 4.0 }
 0x856   : > { %17619 = vst [vmem:[#allocation102_spill] sm:$0xff] %v14474_v50  ;;  %7917 = vperm.xlu0 %10178, %v7114_v46   ;;  %7914 = vperm.xlu1 %10179, %v7113_v42   ;;  %v14476_v44 = vpop.permute.xlu1 %7722  ;;  %v17629_v42 = vld [vmem:[#allocation392_spill] sm:$0xff] }
 0x857   : > { %17620 = vst [vmem:[#allocation215_spill] sm:$0xff] %v14476_v44  ;;  %v7117_v46 = vsel %vm5197_vm15, %v17629_v42, inf  ;;  %v17630_v44 = vld [vmem:[#allocation240_spill] sm:$0xff]  ;;  %v17640_v42 = vld [vmem:[#allocation311_spill] sm:$0xff] }
 0x858   : > { %v7118_v38 = vsel %vm5198_vm0, %v17630_v44, inf  ;;  %v17639_v44 = vld [vmem:[#allocation310_spill] sm:$0xff]  ;;  %vm5202_vm5 = vcmp.lt.f32.partialorder %v17640_v42, 4.0 }
 0x859   : > { %v14482_v32 = vpop.permute.xlu0 %7731  ;;  %vm5201_vm4 = vcmp.lt.f32.partialorder %v17639_v44, 4.0 }
 0x85a   : > { %17625 = vst [vmem:[#allocation219_spill] sm:$0xff] %v14482_v32  ;;  %7923 = vperm.xlu0 %10178, %v7116_v35   ;;  %7920 = vperm.xlu1 %10179, %v7115_v22   ;;  %v14484_v61 = vpop.permute.xlu1 %7728  ;;  %v17635_v22 = vld [vmem:[#allocation393_spill] sm:$0xff] }
 0x85b   : > { %17626 = vst [vmem:[#allocation99_spill] sm:$0xff] %v14484_v61  ;;  %v7119_v35 = vsel %vm5199_vm2, %v17635_v22, inf  ;;  %v17636_v61 = vld [vmem:[#allocation243_spill] sm:$0xff]  ;;  %v17646_v22 = vld [vmem:[#allocation313_spill] sm:$0xff] }
 0x85c   : > { %v7120_v52 = vsel %vm5200_vm3, %v17636_v61, inf  ;;  %v17645_v61 = vld [vmem:[#allocation312_spill] sm:$0xff]  ;;  %vm5204_vm7 = vcmp.lt.f32.partialorder %v17646_v22, 4.0 }
 0x85d   : > { %v14490_v50 = vpop.permute.xlu0 %7737  ;;  %vm5203_vm6 = vcmp.lt.f32.partialorder %v17645_v61, 4.0 }
 0x85e   : > { %17631 = vst [vmem:[#allocation108_spill] sm:$0xff] %v14490_v50  ;;  %7929 = vperm.xlu0 %10178, %v7118_v38   ;;  %7926 = vperm.xlu1 %10179, %v7117_v46   ;;  %v14492_v23 = vpop.permute.xlu1 %7734  ;;  %v17641_v46 = vld [vmem:[#allocation394_spill] sm:$0xff] }
 0x85f   : > { %17632 = vst [vmem:[#allocation218_spill] sm:$0xff] %v14492_v23  ;;  %v7121_v38 = vsel %vm5201_vm4, %v17641_v46, inf  ;;  %v17642_v23 = vld [vmem:[#allocation246_spill] sm:$0xff]  ;;  %v17652_v46 = vld [vmem:[#allocation315_spill] sm:$0xff] }
 0x860   : > { %v7122_v51 = vsel %vm5202_vm5, %v17642_v23, inf  ;;  %v17651_v23 = vld [vmem:[#allocation314_spill] sm:$0xff]  ;;  %vm5206_vm9 = vcmp.lt.f32.partialorder %v17652_v46, 4.0 }
 0x861   : > { %v14498_v32 = vpop.permute.xlu0 %7743  ;;  %vm5205_vm8 = vcmp.lt.f32.partialorder %v17651_v23, 4.0 }
 0x862   : > { %17637 = vst [vmem:[#allocation51_spill] sm:$0xff] %v14498_v32  ;;  %7935 = vperm.xlu0 %10178, %v7120_v52   ;;  %7932 = vperm.xlu1 %10179, %v7119_v35   ;;  %v14500_v59 = vpop.permute.xlu1 %7740  ;;  %v17647_v35 = vld [vmem:[#allocation395_spill] sm:$0xff] }
 0x863   : > { %17638 = vst [vmem:[#allocation105_spill] sm:$0xff] %v14500_v59  ;;  %v7123_v52 = vsel %vm5203_vm6, %v17647_v35, inf  ;;  %v17648_v59 = vld [vmem:[#allocation249_spill] sm:$0xff] }
 0x864   : > { %v7124_v44 = vsel %vm5204_vm7, %v17648_v59, inf  ;;  %v17657_v59 = vld [vmem:[#allocation316_spill] sm:$0xff]  ;;  %v17658_v35 = vld [vmem:[#allocation317_spill] sm:$0xff] }
 0x865   : > { %v14506_v50 = vpop.permute.xlu0 %7749  ;;  %vm5207_vm10 = vcmp.lt.f32.partialorder %v17657_v59, 4.0  ;;  %vm5208_vm11 = vcmp.lt.f32.partialorder %v17658_v35, 4.0 }
 0x866   : > { %17643 = vst [vmem:[#allocation114_spill] sm:$0xff] %v14506_v50  ;;  %7941 = vperm.xlu0 %10178, %v7122_v51   ;;  %7938 = vperm.xlu1 %10179, %v7121_v38   ;;  %v14508_v28 = vpop.permute.xlu1 %7746  ;;  %v17653_v38 = vld [vmem:[#allocation396_spill] sm:$0xff] }
 0x867   : > { %17644 = vst [vmem:[#allocation50_spill] sm:$0xff] %v14508_v28  ;;  %v7125_v51 = vsel %vm5205_vm8, %v17653_v38, inf  ;;  %v17654_v28 = vld [vmem:[#allocation252_spill] sm:$0xff]  ;;  %v17664_v38 = vld [vmem:[#allocation319_spill] sm:$0xff] }
 0x868   : > { %v7126_v61 = vsel %vm5206_vm9, %v17654_v28, inf  ;;  %v17663_v28 = vld [vmem:[#allocation318_spill] sm:$0xff]  ;;  %vm5210_vm13 = vcmp.lt.f32.partialorder %v17664_v38, 4.0 }
 0x869   : > { %v14514_v32 = vpop.permute.xlu0 %7755  ;;  %vm5209_vm12 = vcmp.lt.f32.partialorder %v17663_v28, 4.0 }
 0x86a   : > { %17649 = vst [vmem:[#allocation54_spill] sm:$0xff] %v14514_v32  ;;  %7947 = vperm.xlu0 %10178, %v7124_v44   ;;  %7944 = vperm.xlu1 %10179, %v7123_v52   ;;  %v14516_v42 = vpop.permute.xlu1 %7752  ;;  %v17659_v52 = vld [vmem:[#allocation397_spill] sm:$0xff] }
 0x86b   : > { %17650 = vst [vmem:[#allocation109_spill] sm:$0xff] %v14516_v42  ;;  %v7127_v44 = vsel %vm5207_vm10, %v17659_v52, inf  ;;  %v17660_v42 = vld [vmem:[#allocation254_spill] sm:$0xff]  ;;  %v17670_v52 = vld [vmem:[#allocation321_spill] sm:$0xff] }
 0x86c   : > { %v7128_v23 = vsel %vm5208_vm11, %v17660_v42, inf  ;;  %v17669_v42 = vld [vmem:[#allocation320_spill] sm:$0xff]  ;;  %vm5212_vm15 = vcmp.lt.f32.partialorder %v17670_v52, 4.0 }
 0x86d   : > { %v14522_v50 = vpop.permute.xlu0 %7761  ;;  %vm5211_vm14 = vcmp.lt.f32.partialorder %v17669_v42, 4.0 }
 0x86e   : > { %17655 = vst [vmem:[#allocation120_spill] sm:$0xff] %v14522_v50  ;;  %7953 = vperm.xlu0 %10178, %v7126_v61   ;;  %7950 = vperm.xlu1 %10179, %v7125_v51   ;;  %v14524_v22 = vpop.permute.xlu1 %7758  ;;  %v17665_v51 = vld [vmem:[#allocation398_spill] sm:$0xff] }
 0x86f   : > { %17656 = vst [vmem:[#allocation53_spill] sm:$0xff] %v14524_v22  ;;  %v7129_v61 = vsel %vm5209_vm12, %v17665_v51, inf  ;;  %v17666_v22 = vld [vmem:[#allocation255_spill] sm:$0xff] }
 0x870   : > { %v7130_v59 = vsel %vm5210_vm13, %v17666_v22, inf  ;;  %v17675_v22 = vld [vmem:[#allocation322_spill] sm:$0xff]  ;;  %v17676_v51 = vld [vmem:[#allocation323_spill] sm:$0xff] }
 0x871   : > { %v14530_v32 = vpop.permute.xlu0 %7767  ;;  %vm5213_vm0 = vcmp.lt.f32.partialorder %v17675_v22, 4.0  ;;  %vm5214_vm2 = vcmp.lt.f32.partialorder %v17676_v51, 4.0 }
 0x872   : > { %17661 = vst [vmem:[#allocation58_spill] sm:$0xff] %v14530_v32  ;;  %7959 = vperm.xlu0 %10178, %v7128_v23   ;;  %7956 = vperm.xlu1 %10179, %v7127_v44   ;;  %v14532_v46 = vpop.permute.xlu1 %7764  ;;  %v17671_v44 = vld [vmem:[#allocation399_spill] sm:$0xff] }
 0x873   : > { %17662 = vst [vmem:[#allocation117_spill] sm:$0xff] %v14532_v46  ;;  %v7131_v23 = vsel %vm5211_vm14, %v17671_v44, inf  ;;  %v17672_v46 = vld [vmem:[#allocation260_spill] sm:$0xff]  ;;  %v17682_v44 = vld [vmem:[#allocation325_spill] sm:$0xff] }
 0x874   : > { %v7132_v28 = vsel %vm5212_vm15, %v17672_v46, inf  ;;  %v17681_v46 = vld [vmem:[#allocation324_spill] sm:$0xff]  ;;  %vm5216_vm4 = vcmp.lt.f32.partialorder %v17682_v44, 4.0 }
 0x875   : > { %v14538_v50 = vpop.permute.xlu0 %7773  ;;  %vm5215_vm3 = vcmp.lt.f32.partialorder %v17681_v46, 4.0 }
 0x876   : > { %17667 = vst [vmem:[#allocation126_spill] sm:$0xff] %v14538_v50  ;;  %7965 = vperm.xlu0 %10178, %v7130_v59   ;;  %7962 = vperm.xlu1 %10179, %v7129_v61   ;;  %v14540_v35 = vpop.permute.xlu1 %7770  ;;  %v17677_v61 = vld [vmem:[#allocation400_spill] sm:$0xff] }
 0x877   : > { %17668 = vst [vmem:[#allocation57_spill] sm:$0xff] %v14540_v35  ;;  %v7133_v59 = vsel %vm5213_vm0, %v17677_v61, inf  ;;  %v17678_v35 = vld [vmem:[#allocation263_spill] sm:$0xff] }
 0x878   : > { %v7134_v42 = vsel %vm5214_vm2, %v17678_v35, inf  ;;  %v17687_v35 = vld [vmem:[#allocation326_spill] sm:$0xff]  ;;  %v17688_v61 = vld [vmem:[#allocation327_spill] sm:$0xff] }
 0x879   : > { %v14546_v32 = vpop.permute.xlu0 %7779  ;;  %vm5217_vm5 = vcmp.lt.f32.partialorder %v17687_v35, 4.0  ;;  %vm5218_vm6 = vcmp.lt.f32.partialorder %v17688_v61, 4.0 }
 0x87a   : > { %17673 = vst [vmem:[#allocation61_spill] sm:$0xff] %v14546_v32  ;;  %7971 = vperm.xlu0 %10178, %v7132_v28   ;;  %7968 = vperm.xlu1 %10179, %v7131_v23   ;;  %v14548_v38 = vpop.permute.xlu1 %7776  ;;  %v17683_v23 = vld [vmem:[#allocation401_spill] sm:$0xff] }
 0x87b   : > { %17674 = vst [vmem:[#allocation123_spill] sm:$0xff] %v14548_v38  ;;  %v7135_v28 = vsel %vm5215_vm3, %v17683_v23, inf  ;;  %v17684_v38 = vld [vmem:[#allocation266_spill] sm:$0xff]  ;;  %v17694_v23 = vld [vmem:[#allocation85_spill] sm:$0xff] }
 0x87c   : > { %v7136_v22 = vsel %vm5216_vm4, %v17684_v38, inf  ;;  %v17693_v38 = vld [vmem:[#allocation86_spill] sm:$0xff]  ;;  %vm5220_vm8 = vcmp.lt.f32.partialorder %v17694_v23, 4.0 }
 0x87d   : > { %v14554_v50 = vpop.permute.xlu0 %7785  ;;  %vm5219_vm7 = vcmp.lt.f32.partialorder %v17693_v38, 4.0 }
 0x87e   : > { %17679 = vst [vmem:[#allocation132_spill] sm:$0xff] %v14554_v50  ;;  %7977 = vperm.xlu0 %10178, %v7134_v42   ;;  %7974 = vperm.xlu1 %10179, %v7133_v59   ;;  %v14556_v52 = vpop.permute.xlu1 %7782  ;;  %v17689_v59 = vld [vmem:[#allocation402_spill] sm:$0xff] }
 0x87f   : > { %17680 = vst [vmem:[#allocation60_spill] sm:$0xff] %v14556_v52  ;;  %v7137_v42 = vsel %vm5217_vm5, %v17689_v59, inf  ;;  %v17690_v52 = vld [vmem:[#allocation269_spill] sm:$0xff]  ;;  %v17700_v59 = vld [vmem:[#allocation88_spill] sm:$0xff] }
 0x880   : > { %v7138_v46 = vsel %vm5218_vm6, %v17690_v52, inf  ;;  %v17699_v52 = vld [vmem:[#allocation89_spill] sm:$0xff]  ;;  %vm5222_vm10 = vcmp.lt.f32.partialorder %v17700_v59, 4.0 }
 0x881   : > { %v14562_v32 = vpop.permute.xlu0 %7791  ;;  %vm5221_vm9 = vcmp.lt.f32.partialorder %v17699_v52, 4.0 }
 0x882   : > { %17685 = vst [vmem:[#allocation64_spill] sm:$0xff] %v14562_v32  ;;  %7983 = vperm.xlu0 %10178, %v7136_v22   ;;  %7980 = vperm.xlu1 %10179, %v7135_v28   ;;  %v14564_v51 = vpop.permute.xlu1 %7788  ;;  %v17695_v28 = vld [vmem:[#allocation403_spill] sm:$0xff] }
 0x883   : > { %17686 = vst [vmem:[#allocation129_spill] sm:$0xff] %v14564_v51  ;;  %v7139_v22 = vsel %vm5219_vm7, %v17695_v28, inf  ;;  %v17696_v51 = vld [vmem:[#allocation272_spill] sm:$0xff]  ;;  %v17706_v28 = vld [vmem:[#allocation91_spill] sm:$0xff] }
 0x884   : > { %v7140_v35 = vsel %vm5220_vm8, %v17696_v51, inf  ;;  %v17705_v51 = vld [vmem:[#allocation92_spill] sm:$0xff]  ;;  %vm5224_vm12 = vcmp.lt.f32.partialorder %v17706_v28, 4.0 }
 0x885   : > { %v14570_v50 = vpop.permute.xlu0 %7797  ;;  %vm5223_vm11 = vcmp.lt.f32.partialorder %v17705_v51, 4.0 }
 0x886   : > { %17691 = vst [vmem:[#allocation19_spill] sm:$0xff] %v14570_v50  ;;  %7989 = vperm.xlu0 %10178, %v7138_v46   ;;  %7986 = vperm.xlu1 %10179, %v7137_v42   ;;  %v14572_v44 = vpop.permute.xlu1 %7794  ;;  %v17701_v42 = vld [vmem:[#allocation404_spill] sm:$0xff] }
 0x887   : > { %17692 = vst [vmem:[#allocation63_spill] sm:$0xff] %v14572_v44  ;;  %v7141_v46 = vsel %vm5221_vm9, %v17701_v42, inf  ;;  %v17702_v44 = vld [vmem:[#allocation275_spill] sm:$0xff]  ;;  %v17712_v42 = vld [vmem:[#allocation94_spill] sm:$0xff] }
 0x888   : > { %v7142_v38 = vsel %vm5222_vm10, %v17702_v44, inf  ;;  %v17711_v44 = vld [vmem:[#allocation95_spill] sm:$0xff]  ;;  %vm5226_vm14 = vcmp.lt.f32.partialorder %v17712_v42, 4.0 }
 0x889   : > { %v14578_v32 = vpop.permute.xlu0 %7803  ;;  %vm5225_vm13 = vcmp.lt.f32.partialorder %v17711_v44, 4.0 }
 0x88a   : > { %17697 = vst [vmem:[#allocation67_spill] sm:$0xff] %v14578_v32  ;;  %7995 = vperm.xlu0 %10178, %v7140_v35   ;;  %7992 = vperm.xlu1 %10179, %v7139_v22   ;;  %v14580_v61 = vpop.permute.xlu1 %7800  ;;  %v17707_v22 = vld [vmem:[#allocation405_spill] sm:$0xff] }
 0x88b   : > { %17698 = vst [vmem:[#allocation18_spill] sm:$0xff] %v14580_v61  ;;  %v7143_v35 = vsel %vm5223_vm11, %v17707_v22, inf  ;;  %v17708_v61 = vld [vmem:[#allocation277_spill] sm:$0xff] }
 0x88c   : > { %v7144_v52 = vsel %vm5224_vm12, %v17708_v61, inf  ;;  %v17717_v61 = vld [vmem:[#allocation98_spill] sm:$0xff]  ;;  %v17718_v22 = vld [vmem:[#allocation97_spill] sm:$0xff] }
 0x88d   : > { %v14586_v50 = vpop.permute.xlu0 %7809  ;;  %vm5227_vm15 = vcmp.lt.f32.partialorder %v17717_v61, 4.0  ;;  %vm5228_vm0 = vcmp.lt.f32.partialorder %v17718_v22, 4.0 }
 0x88e   : > { %17703 = vst [vmem:[#allocation21_spill] sm:$0xff] %v14586_v50  ;;  %8001 = vperm.xlu0 %10178, %v7142_v38   ;;  %7998 = vperm.xlu1 %10179, %v7141_v46   ;;  %v14588_v23 = vpop.permute.xlu1 %7806  ;;  %v17713_v46 = vld [vmem:[#allocation406_spill] sm:$0xff] }
 0x88f   : > { %17704 = vst [vmem:[#allocation66_spill] sm:$0xff] %v14588_v23  ;;  %v7145_v38 = vsel %vm5225_vm13, %v17713_v46, inf  ;;  %v17714_v23 = vld [vmem:[#allocation278_spill] sm:$0xff]  ;;  %v17724_v46 = vld [vmem:[#allocation104_spill] sm:$0xff] }
 0x890   : > { %v7146_v51 = vsel %vm5226_vm14, %v17714_v23, inf  ;;  %v17723_v23 = vld [vmem:[#allocation101_spill] sm:$0xff]  ;;  %vm5230_vm3 = vcmp.lt.f32.partialorder %v17724_v46, 4.0 }
 0x891   : > { %v14594_v32 = vpop.permute.xlu0 %7815  ;;  %vm5229_vm2 = vcmp.lt.f32.partialorder %v17723_v23, 4.0 }
 0x892   : > { %17709 = vst [vmem:[#allocation70_spill] sm:$0xff] %v14594_v32  ;;  %8007 = vperm.xlu0 %10178, %v7144_v52   ;;  %8004 = vperm.xlu1 %10179, %v7143_v35   ;;  %v14596_v59 = vpop.permute.xlu1 %7812  ;;  %v17719_v35 = vld [vmem:[#allocation407_spill] sm:$0xff] }
 0x893   : > { %17710 = vst [vmem:[#allocation20_spill] sm:$0xff] %v14596_v59  ;;  %v7147_v52 = vsel %vm5227_vm15, %v17719_v35, inf  ;;  %v17720_v59 = vld [vmem:[#allocation282_spill] sm:$0xff]  ;;  %v17730_v35 = vld [vmem:[#allocation329_spill] sm:$0xff] }
 0x894   : > { %v7148_v44 = vsel %vm5228_vm0, %v17720_v59, inf  ;;  %v17729_v59 = vld [vmem:[#allocation328_spill] sm:$0xff]  ;;  %vm5232_vm5 = vcmp.lt.f32.partialorder %v17730_v35, 4.0 }
 0x895   : > { %v14602_v50 = vpop.permute.xlu0 %7821  ;;  %vm5231_vm4 = vcmp.lt.f32.partialorder %v17729_v59, 4.0 }
 0x896   : > { %17715 = vst [vmem:[#allocation23_spill] sm:$0xff] %v14602_v50  ;;  %8013 = vperm.xlu0 %10178, %v7146_v51   ;;  %8010 = vperm.xlu1 %10179, %v7145_v38   ;;  %v14604_v28 = vpop.permute.xlu1 %7818  ;;  %v17725_v38 = vld [vmem:[#allocation408_spill] sm:$0xff] }
 0x897   : > { %17716 = vst [vmem:[#allocation69_spill] sm:$0xff] %v14604_v28  ;;  %v7149_v51 = vsel %vm5229_vm2, %v17725_v38, inf  ;;  %v17726_v28 = vld [vmem:[#allocation284_spill] sm:$0xff]  ;;  %v17736_v38 = vld [vmem:[#allocation331_spill] sm:$0xff] }
 0x898   : > { %v7150_v61 = vsel %vm5230_vm3, %v17726_v28, inf  ;;  %v17735_v28 = vld [vmem:[#allocation330_spill] sm:$0xff]  ;;  %vm5234_vm7 = vcmp.lt.f32.partialorder %v17736_v38, 4.0 }
 0x899   : > { %v14610_v32 = vpop.permute.xlu0 %7827  ;;  %vm5233_vm6 = vcmp.lt.f32.partialorder %v17735_v28, 4.0 }
 0x89a   : > { %17721 = vst [vmem:[#allocation222_spill] sm:$0xff] %v14610_v32  ;;  %8019 = vperm.xlu0 %10178, %v7148_v44   ;;  %8016 = vperm.xlu1 %10179, %v7147_v52   ;;  %v14612_v42 = vpop.permute.xlu1 %7824  ;;  %v17731_v52 = vld [vmem:[#allocation409_spill] sm:$0xff] }
 0x89b   : > { %17722 = vst [vmem:[#allocation22_spill] sm:$0xff] %v14612_v42  ;;  %v7151_v44 = vsel %vm5231_vm4, %v17731_v52, inf  ;;  %v17732_v42 = vld [vmem:[#allocation286_spill] sm:$0xff]  ;;  %v17742_v52 = vld [vmem:[#allocation333_spill] sm:$0xff] }
 0x89c   : > { %v7152_v23 = vsel %vm5232_vm5, %v17732_v42, inf  ;;  %v17741_v42 = vld [vmem:[#allocation332_spill] sm:$0xff]  ;;  %vm5236_vm9 = vcmp.lt.f32.partialorder %v17742_v52, 4.0 }
 0x89d   : > { %v14618_v50 = vpop.permute.xlu0 %7833  ;;  %vm5235_vm8 = vcmp.lt.f32.partialorder %v17741_v42, 4.0 }
 0x89e   : > { %17727 = vst [vmem:[#allocation135_spill] sm:$0xff] %v14618_v50  ;;  %8025 = vperm.xlu0 %10178, %v7150_v61   ;;  %8022 = vperm.xlu1 %10179, %v7149_v51   ;;  %v14620_v22 = vpop.permute.xlu1 %7830  ;;  %v17737_v51 = vld [vmem:[#allocation410_spill] sm:$0xff] }
 0x89f   : > { %17728 = vst [vmem:[#allocation221_spill] sm:$0xff] %v14620_v22  ;;  %v7153_v61 = vsel %vm5233_vm6, %v17737_v51, inf  ;;  %v17738_v22 = vld [vmem:[#allocation289_spill] sm:$0xff]  ;;  %v17748_v51 = vld [vmem:[#allocation335_spill] sm:$0xff] }
 0x8a0   : > { %v7154_v59 = vsel %vm5234_vm7, %v17738_v22, inf  ;;  %v17747_v22 = vld [vmem:[#allocation334_spill] sm:$0xff]  ;;  %vm5238_vm11 = vcmp.lt.f32.partialorder %v17748_v51, 4.0 }
 0x8a1   : > { %v14626_v32 = vpop.permute.xlu0 %7839  ;;  %vm5237_vm10 = vcmp.lt.f32.partialorder %v17747_v22, 4.0 }
 0x8a2   : > { %17733 = vst [vmem:[#allocation225_spill] sm:$0xff] %v14626_v32  ;;  %8031 = vperm.xlu0 %10178, %v7152_v23   ;;  %8028 = vperm.xlu1 %10179, %v7151_v44   ;;  %v14628_v46 = vpop.permute.xlu1 %7836  ;;  %v17743_v44 = vld [vmem:[#allocation411_spill] sm:$0xff] }
 0x8a3   : > { %17734 = vst [vmem:[#allocation24_spill] sm:$0xff] %v14628_v46  ;;  %v7155_v23 = vsel %vm5235_vm8, %v17743_v44, inf  ;;  %v17744_v46 = vld [vmem:[#allocation292_spill] sm:$0xff]  ;;  %v17753_v44 = vld [vmem:[#allocation337_spill] sm:$0xff] }
 0x8a4   : > { %v7156_v28 = vsel %vm5236_vm9, %v17744_v46, inf  ;;  %v17752_v46 = vld [vmem:[#allocation336_spill] sm:$0xff]  ;;  %vm5240_vm13 = vcmp.lt.f32.partialorder %v17753_v44, 4.0 }
 0x8a5   : > { %v14634_v50 = vpop.permute.xlu0 %7845  ;;  %vm5239_vm12 = vcmp.lt.f32.partialorder %v17752_v46, 4.0 }
 0x8a6   : > { %17739 = vst [vmem:[#allocation142_spill] sm:$0xff] %v14634_v50  ;;  %8037 = vperm.xlu0 %10178, %v7154_v59   ;;  %8034 = vperm.xlu1 %10179, %v7153_v61   ;;  %v14636_v35 = vpop.permute.xlu1 %7842  ;;  %v17749_v61 = vld [vmem:[#allocation412_spill] sm:$0xff] }
 0x8a7   : > { %17740 = vst [vmem:[#allocation224_spill] sm:$0xff] %v14636_v35  ;;  %v7157_v59 = vsel %vm5237_vm10, %v17749_v61, inf  ;;  %v17750_v35 = vld [vmem:[#allocation295_spill] sm:$0xff]  ;;  %v17759_v61 = vld [vmem:[#allocation338_spill] sm:$0xff] }
 0x8a8   : > { %v7158_v42 = vsel %vm5238_vm11, %v17750_v35, inf  ;;  %v17758_v35 = vld [vmem:[#allocation7_spill] sm:$0xff]  ;;  %vm5242_vm15 = vcmp.lt.f32.partialorder %v17759_v61, 4.0 }
 0x8a9   : > { %v14642_v32 = vpop.permute.xlu0 %7851  ;;  %vm5241_vm14 = vcmp.lt.f32.partialorder %v17758_v35, 4.0  ;;  %v7162_v46 = vsel %vm5242_vm15, %v13902_v53, inf  ;;  %v17763_v53 = vld [vmem:[#allocation340_spill] sm:$0xff] }
 0x8aa   : > { %17745 = vst [vmem:[#allocation228_spill] sm:$0xff] %v14642_v32  ;;  %8043 = vperm.xlu0 %10178, %v7156_v28   ;;  %8040 = vperm.xlu1 %10179, %v7155_v23   ;;  %v14644_v38 = vpop.permute.xlu1 %7848  ;;  %v17754_v23 = vld [vmem:[#allocation413_spill] sm:$0xff]  ;;  %vm5245_vm3 = vcmp.lt.f32.partialorder %v17763_v53, 4.0 }
 0x8ab   : > { %17746 = vst [vmem:[#allocation136_spill] sm:$0xff] %v14644_v38  ;;  %v7159_v28 = vsel %vm5239_vm12, %v17754_v23, inf  ;;  %v17755_v38 = vld [vmem:[#allocation297_spill] sm:$0xff]  ;;  %v17762_v23 = vld [vmem:[#allocation339_spill] sm:$0xff] }
 0x8ac   : > { %v7160_v22 = vsel %vm5240_vm13, %v17755_v38, inf  ;;  %v17761_v38 = vld [vmem:[#allocation6_spill] sm:$0xff]  ;;  %vm5244_vm2 = vcmp.lt.f32.partialorder %v17762_v23, 4.0 }
 0x8ad   : > { %v14650_v50 = vpop.permute.xlu0 %7857  ;;  %vm5243_vm0 = vcmp.lt.f32.partialorder %v17761_v38, 4.0  ;;  %v17766_v23 = vld [vmem:[#allocation342_spill] sm:$0xff] }
 0x8ae   : > { %8049 = vperm.xlu0 %10178, %v7158_v42   ;;  %8046 = vperm.xlu1 %10179, %v7157_v59   ;;  %v14652_v52 = vpop.permute.xlu1 %7854  ;;  %v17760_v59 = vld [vmem:[#allocation414_spill] sm:$0xff]  ;;  %vm5248_vm6 = vcmp.lt.f32.partialorder %v17766_v23, 4.0  ;;  %v17770_v23 = vld [vmem:[#allocation344_spill] sm:$0xff] }
 0x8af   : > { %17751 = vst [vmem:[#allocation148_spill] sm:$0xff] %v14652_v52  ;;  %v7161_v42 = vsel %vm5241_vm14, %v17760_v59, inf  ;;  %v17764_v59 = vld [vmem:[#allocation341_spill] sm:$0xff]  ;;  %vm5252_vm10 = vcmp.lt.f32.partialorder %v17770_v23, 4.0  ;;  %v17776_v23 = vld [vmem:[#allocation346_spill] sm:$0xff] }
 0x8b0   : > { %vm5246_vm4 = vcmp.lt.f32.partialorder %v17764_v59, 4.0  ;;  %v17768_v59 = vld [vmem:[#allocation343_spill] sm:$0xff]  ;;  %vm5256_vm14 = vcmp.lt.f32.partialorder %v17776_v23, 4.0  ;;  %v17784_v23 = vld [vmem:[#allocation348_spill] sm:$0xff] }
 0x8b1   : > { %v14658_v32 = vpop.permute.xlu0 %7863  ;;  %vm5250_vm8 = vcmp.lt.f32.partialorder %v17768_v59, 4.0  ;;  %v17772_v59 = vld [vmem:[#allocation345_spill] sm:$0xff] }
 0x8b2   : > { %17756 = vst [vmem:[#allocation227_spill] sm:$0xff] %v14658_v32  ;;  %8055 = vperm.xlu0 %10178, %v7160_v22   ;;  %8052 = vperm.xlu1 %10179, %v7159_v28   ;;  %v14660_v51 = vpop.permute.xlu1 %7860  ;;  %v7163_v28 = vsel %vm5243_vm0, %v13900_v16, inf  ;;  %v7164_v22 = vsel %vm5244_vm2, %v13910_v39, inf  ;;  %v17765_v39 = vld [vmem:[#allocation10_spill] sm:$0xff]  ;;  %vm5254_vm12 = vcmp.lt.f32.partialorder %v17772_v59, 4.0  ;;  %v17780_v59 = vld [vmem:[#allocation347_spill] sm:$0xff] }
 0x8b3   : > { %17757 = vst [vmem:[#allocation230_spill] sm:$0xff] %v14660_v51  ;;  %vm5247_vm5 = vcmp.lt.f32.partialorder %v17765_v39, 4.0  ;;  %vm5258_vm0 = vcmp.lt.f32.partialorder %v17780_v59, 4.0  ;;  %v17787_v59 = vld [vmem:[#allocation349_spill] sm:$0xff] }
 0x8b5   : > { %v14666_v52 = vpop.permute.xlu0 %7869 }
 0x8b6   : > { %8061 = vperm.xlu0 %10178, %v7162_v46   ;;  %8058 = vperm.xlu1 %10179, %v7161_v42   ;;  %v14668_v44 = vpop.permute.xlu1 %7866  ;;  %v7165_v42 = vsel %vm5245_vm3, %v13908_v37, inf  ;;  %v7166_v46 = vsel %vm5246_vm4, %v13918_v29, inf  ;;  %v17767_v29 = vld [vmem:[#allocation12_spill] sm:$0xff]  ;;  %vm5260_vm3 = vcmp.lt.f32.partialorder %v17784_v23, 4.0  ;;  %v17791_v23 = vld [vmem:[#allocation350_spill] sm:$0xff] }
 0x8b7   : > { %vm5249_vm7 = vcmp.lt.f32.partialorder %v17767_v29, 4.0 }
 0x8b9   : > { %v14674_v35 = vpop.permute.xlu0 %7875 }
 0x8ba   : > { %8067 = vperm.xlu0 %10178, %v7164_v22   ;;  %8064 = vperm.xlu1 %10179, %v7163_v28   ;;  %v14676_v61 = vpop.permute.xlu1 %7872  ;;  %v7167_v28 = vsel %vm5247_vm5, %v13916_v48, inf  ;;  %v7168_v22 = vsel %vm5248_vm6, %v13926_v40, inf  ;;  %v17769_v40 = vld [vmem:[#allocation13_spill] sm:$0xff]  ;;  %vm5262_vm5 = vcmp.lt.f32.partialorder %v17787_v59, 4.0  ;;  %v17795_v59 = vld [vmem:[#allocation351_spill] sm:$0xff] }
 0x8bb   : > { %vm5251_vm9 = vcmp.lt.f32.partialorder %v17769_v40, 4.0 }
 0x8bd   : > { %v14682_v38 = vpop.permute.xlu0 %7881 }
 0x8be   : > { %8073 = vperm.xlu0 %10178, %v7166_v46   ;;  %8070 = vperm.xlu1 %10179, %v7165_v42   ;;  %v14684_v16 = vpop.permute.xlu1 %7878  ;;  %v7169_v42 = vsel %vm5249_vm7, %v13924_v26, inf  ;;  %v7170_v46 = vsel %vm5250_vm8, %v13934_v60, inf  ;;  %v17771_v60 = vld [vmem:[#allocation14_spill] sm:$0xff]  ;;  %vm5264_vm7 = vcmp.lt.f32.partialorder %v17791_v23, 4.0  ;;  %v17799_v23 = vld [vmem:[#allocation352_spill] sm:$0xff] }
 0x8bf   : > { %vm5253_vm11 = vcmp.lt.f32.partialorder %v17771_v60, 4.0 }
 0x8c1   : > { %v14690_v53 = vpop.permute.xlu0 %7887 }
 0x8c2   : > { %8079 = vperm.xlu0 %10178, %v7168_v22   ;;  %8076 = vperm.xlu1 %10179, %v7167_v28   ;;  %v14692_v37 = vpop.permute.xlu1 %7884  ;;  %v7171_v28 = vsel %vm5251_vm9, %v13932_v15, inf  ;;  %v7172_v22 = vsel %vm5252_vm10, %v13942_v33, inf  ;;  %v17775_v33 = vld [vmem:[#allocation15_spill] sm:$0xff]  ;;  %vm5266_vm9 = vcmp.lt.f32.partialorder %v17795_v59, 4.0  ;;  %v17803_v59 = vld [vmem:[#allocation353_spill] sm:$0xff] }
 0x8c3   : > { %vm5255_vm13 = vcmp.lt.f32.partialorder %v17775_v33, 4.0 }
 0x8c5   : > { %v14698_v39 = vpop.permute.xlu0 %7893 }
 0x8c6   : > { %8085 = vperm.xlu0 %10178, %v7170_v46   ;;  %8082 = vperm.xlu1 %10179, %v7169_v42   ;;  %v14700_v48 = vpop.permute.xlu1 %7890  ;;  %v7173_v42 = vsel %vm5253_vm11, %v13940_v13, inf  ;;  %v7174_v46 = vsel %vm5254_vm12, %v13950_v11, inf  ;;  %v17779_v11 = vld [vmem:[#allocation17_spill] sm:$0xff]  ;;  %vm5268_vm11 = vcmp.lt.f32.partialorder %v17799_v23, 4.0  ;;  %v17807_v23 = vld [vmem:[#allocation354_spill] sm:$0xff] }
 0x8c7   : > { %vm5257_vm15 = vcmp.lt.f32.partialorder %v17779_v11, 4.0 }
 0x8c9   : > { %v14706_v29 = vpop.permute.xlu0 %7899 }
 0x8ca   : > { %8091 = vperm.xlu0 %10178, %v7172_v22   ;;  %8088 = vperm.xlu1 %10179, %v7171_v28   ;;  %v14708_v26 = vpop.permute.xlu1 %7896  ;;  %v7175_v28 = vsel %vm5255_vm13, %v13948_v58, inf  ;;  %v7176_v22 = vsel %vm5256_vm14, %v13958_v19, inf  ;;  %v17783_v19 = vld [vmem:[#allocation26_spill] sm:$0xff]  ;;  %vm5270_vm13 = vcmp.lt.f32.partialorder %v17803_v59, 4.0 }
 0x8cb   : > { %vm5259_vm2 = vcmp.lt.f32.partialorder %v17783_v19, 4.0 }
 0x8cd   : > { %v14714_v40 = vpop.permute.xlu0 %7905 }
 0x8ce   : > { %17773 = vst [vmem:[#allocation145_spill] sm:$0xff] %v14714_v40  ;;  %8097 = vperm.xlu0 %10178, %v7174_v46   ;;  %8094 = vperm.xlu1 %10179, %v7173_v42   ;;  %v14716_v15 = vpop.permute.xlu1 %7902  ;;  %v7177_v42 = vsel %vm5257_vm15, %v13956_v12, inf  ;;  %v7178_v46 = vsel %vm5258_vm0, %v13966_v8, inf  ;;  %v17786_v8 = vld [vmem:[#allocation27_spill] sm:$0xff]  ;;  %vm5272_vm15 = vcmp.lt.f32.partialorder %v17807_v23, 4.0 }
 0x8cf   : > { %17774 = vst [vmem:[#allocation154_spill] sm:$0xff] %v14716_v15  ;;  %vm5261_vm4 = vcmp.lt.f32.partialorder %v17786_v8, 4.0  ;;  %v17831_v15 = vld [vmem:[#allocation2_spill] sm:$0xff] }
 0x8d0   : > { %v8265_v40 = vrot.slane %v14164_v24, %v17831_v15  ;;  %v8274_v24 = vrot.slane %v14172_v7, %v17831_v15  ;;  %v17836_v7 = vld [vmem:[#allocation46_spill] sm:$0xff] }
 0x8d1   : > { %v14722_v60 = vpop.permute.xlu0 %7911 }
 0x8d2   : > { %17777 = vst [vmem:[#allocation234_spill] sm:$0xff] %v14722_v60  ;;  %8103 = vperm.xlu0 %10178, %v7176_v22   ;;  %8100 = vperm.xlu1 %10179, %v7175_v28   ;;  %v14724_v13 = vpop.permute.xlu1 %7908  ;;  %v7179_v28 = vsel %vm5259_vm2, %v13964_v36, inf  ;;  %v7180_v22 = vsel %vm5260_vm3, %v13974_v2, inf  ;;  %v17790_v2 = vld [vmem:[#allocation28_spill] sm:$0xff]  ;;  %v17829_v60 = vld [vmem:[#allocation43_spill] sm:$0xff] }
 0x8d3   : > { %17778 = vst [vmem:[#allocation233_spill] sm:$0xff] %v14724_v13  ;;  %vm5263_vm6 = vcmp.lt.f32.partialorder %v17790_v2, 4.0  ;;  %v17828_v13 = vld [vmem:[#allocation363_spill] sm:$0xff] }
 0x8d5   : > { %v14730_v33 = vpop.permute.xlu0 %7917 }
 0x8d6   : > { %17781 = vst [vmem:[#allocation151_spill] sm:$0xff] %v14730_v33  ;;  %8109 = vperm.xlu0 %10178, %v7178_v46   ;;  %8106 = vperm.xlu1 %10179, %v7177_v42   ;;  %v14732_v58 = vpop.permute.xlu1 %7914  ;;  %v7181_v42 = vsel %vm5261_vm4, %v13972_v41, inf  ;;  %v7182_v46 = vsel %vm5262_vm5, %v13982_v20, inf  ;;  %v17794_v20 = vld [vmem:[#allocation29_spill] sm:$0xff] }
 0x8d7   : > { %17782 = vst [vmem:[#allocation160_spill] sm:$0xff] %v14732_v58  ;;  %vm5265_vm8 = vcmp.lt.f32.partialorder %v17794_v20, 4.0  ;;  %v17830_v58 = vld [vmem:[#allocation3_spill] sm:$0xff] }
 0x8d8   : > { %v8269_v33 = vrot.slane %v14162_v63, %v17830_v58  ;;  %v8278_v63 = vrot.slane %v14170_v5, %v17830_v58  ;;  %v17835_v5 = vld [vmem:[#allocation365_spill] sm:$0xff] }
 0x8d9   : > { %v14738_v11 = vpop.permute.xlu0 %7923 }
 0x8da   : > { %8115 = vperm.xlu0 %10178, %v7180_v22   ;;  %8112 = vperm.xlu1 %10179, %v7179_v28   ;;  %v14740_v12 = vpop.permute.xlu1 %7920  ;;  %v7183_v28 = vsel %vm5263_vm6, %v13980_v47, inf  ;;  %v7184_v22 = vsel %vm5264_vm7, %v13990_v57, inf  ;;  %v17798_v57 = vld [vmem:[#allocation30_spill] sm:$0xff] }
 0x8db   : > { %17785 = vst [vmem:[#allocation236_spill] sm:$0xff] %v14740_v12  ;;  %vm5267_vm10 = vcmp.lt.f32.partialorder %v17798_v57, 4.0 }
 0x8dd   : > { %v14746_v19 = vpop.permute.xlu0 %7929 }
 0x8de   : > { %17788 = vst [vmem:[#allocation235_spill] sm:$0xff] %v14746_v19  ;;  %8121 = vperm.xlu0 %10178, %v7182_v46   ;;  %8118 = vperm.xlu1 %10179, %v7181_v42   ;;  %v14748_v36 = vpop.permute.xlu1 %7926  ;;  %v7185_v42 = vsel %vm5265_vm8, %v13988_v49, inf  ;;  %v7186_v46 = vsel %vm5266_vm9, %v13998_v43, inf  ;;  %v17802_v43 = vld [vmem:[#allocation31_spill] sm:$0xff]  ;;  %v17897_v19 = vld [vmem:[#allocation174_spill] sm:$0xff] }
 0x8df   : > { %17789 = vst [vmem:[#allocation157_spill] sm:$0xff] %v14748_v36  ;;  %vm5269_vm12 = vcmp.lt.f32.partialorder %v17802_v43, 4.0  ;;  %v17810_v43 = vld [vmem:[#allocation35_spill] sm:$0xff] }
 0x8e0   : > { %vm5275_vm3 = vcmp.lt.f32.partialorder %v17810_v43, 4.0  ;;  %v8259_v43 = vrot.slane %v14156_v54, %v17830_v58  ;;  %v17896_v36 = vld [vmem:[#allocation175_spill] sm:$0xff] }
 0x8e1   : > { %v14754_v8 = vpop.permute.xlu0 %7935 }
 0x8e2   : > { %17792 = vst [vmem:[#allocation167_spill] sm:$0xff] %v14754_v8  ;;  %8127 = vperm.xlu0 %10178, %v7184_v22   ;;  %8124 = vperm.xlu1 %10179, %v7183_v28   ;;  %v14756_v41 = vpop.permute.xlu1 %7932  ;;  %v7187_v28 = vsel %vm5267_vm10, %v13996_v30, inf  ;;  %v7188_v22 = vsel %vm5268_vm11, %v14006_v1, inf  ;;  %v17806_v1 = vld [vmem:[#allocation32_spill] sm:$0xff]  ;;  %vm9407_vm10 = vcmask 1042434  }
 0x8e3   : > { %17793 = vst [vmem:[#allocation239_spill] sm:$0xff] %v14756_v41  ;;  %vm5271_vm14 = vcmp.lt.f32.partialorder %v17806_v1, 4.0  ;;  %v17815_v1 = vld [vmem:[#allocation37_spill] sm:$0xff] }
 0x8e5   : > { %v14762_v2 = vpop.permute.xlu0 %7941 }
 0x8e6   : > { %17796 = vst [vmem:[#allocation238_spill] sm:$0xff] %v14762_v2  ;;  %8133 = vperm.xlu0 %10178, %v7186_v46   ;;  %8130 = vperm.xlu1 %10179, %v7185_v42   ;;  %v14764_v47 = vpop.permute.xlu1 %7938  ;;  %v7189_v42 = vsel %vm5269_vm12, %v14004_v34, inf  ;;  %v7190_v46 = vsel %vm5270_vm13, %v14014_v17, inf  ;;  %v7191_v34 = vsel %vm5271_vm14, %v14012_v6, inf  ;;  %v7192_v17 = vsel %vm5272_vm15, %v14022_v62, inf  ;;  %v17819_v6 = vld [vmem:[#allocation359_spill] sm:$0xff] }
 0x8e7   : > { %17797 = vst [vmem:[#allocation161_spill] sm:$0xff] %v14764_v47  ;;  %v17820_v62 = vld [vmem:[#allocation39_spill] sm:$0xff]  ;;  %v17823_v47 = vld [vmem:[#allocation361_spill] sm:$0xff]  ;;  %vm9405_vm12 = vcmask 1041409   ;;  %vm5290_vm14 = vcmp.lt.f32.partialorder %v17828_v13, 4.0  ;;  %vm5291_vm15 = vcmp.lt.f32.partialorder %v17829_v60, 4.0 }
 0x8e8   : > { %vm5283_vm11 = vcmp.lt.f32.partialorder %v17820_v62, 4.0  ;;  %v17824_v2 = vld [vmem:[#allocation41_spill] sm:$0xff]  ;;  %v17867_v13 = vld [vmem:[#allocation118_spill] sm:$0xff] }
 0x8e9   : > { %v14770_v20 = vpop.permute.xlu0 %7947  ;;  %v17865_v60 = vld [vmem:[#allocation149_spill] sm:$0xff] }
 0x8ea   : > { %17800 = vst [vmem:[#allocation173_spill] sm:$0xff] %v14770_v20  ;;  %8139 = vperm.xlu0 %10178, %v7188_v22   ;;  %8136 = vperm.xlu1 %10179, %v7187_v28   ;;  %v14772_v49 = vpop.permute.xlu1 %7944  ;;  %v17808_v28 = vld [vmem:[#allocation33_spill] sm:$0xff]  ;;  %v17809_v22 = vld [vmem:[#allocation355_spill] sm:$0xff]  ;;  %v17822_v20 = vld [vmem:[#allocation40_spill] sm:$0xff] }
 0x8eb   : > { %17801 = vst [vmem:[#allocation242_spill] sm:$0xff] %v14772_v49  ;;  %vm5273_vm0 = vcmp.lt.f32.partialorder %v17808_v28, 4.0  ;;  %vm5274_vm2 = vcmp.lt.f32.partialorder %v17809_v22, 4.0  ;;  %v17818_v49 = vld [vmem:[#allocation38_spill] sm:$0xff]  ;;  %vm5285_vm13 = vcmp.lt.f32.partialorder %v17822_v20, 4.0  ;;  %v17833_v22 = vld [vmem:[#allocation45_spill] sm:$0xff] }
 0x8ec   : > { %vm5281_vm9 = vcmp.lt.f32.partialorder %v17818_v49, 4.0  ;;  %v7194_v41 = vsel %vm5274_vm2, %v14030_v27, inf  ;;  %v7195_v27 = vsel %vm5275_vm3, %v14028_v21, inf  ;;  %v8287_v21 = vrot.slane %v14178_v4, %v17830_v58 }
 0x8ed   : > { %v14778_v57 = vpop.permute.xlu0 %7953  ;;  %vm5295_vm2 = vcmp.lt.f32.partialorder %v17836_v7, 4.0  ;;  %v14859_v54 = vsel %vm5281_vm9, %v14052_v0, inf  ;;  %v17841_v0 = vld [vmem:[#allocation100_spill] sm:$0xff]  ;;  %vm17851_vm9 = vcmp.lt.f32.partialorder %v17824_v2, 4.0  ;;  %v17880_v7 = vld [vmem:[#allocation159_spill] sm:$0xff] }
 0x8ee   : > { %17804 = vst [vmem:[#allocation241_spill] sm:$0xff] %v14778_v57  ;;  %8145 = vperm.xlu0 %10178, %v7190_v46   ;;  %8142 = vperm.xlu1 %10179, %v7189_v42   ;;  %v14780_v30 = vpop.permute.xlu1 %7950  ;;  %v17812_v46 = vld [vmem:[#allocation356_spill] sm:$0xff]  ;;  %v17817_v57 = vld [vmem:[#allocation358_spill] sm:$0xff] }
 0x8ef   : > { %17805 = vst [vmem:[#allocation170_spill] sm:$0xff] %v14780_v30  ;;  %vm5276_vm4 = vcmp.lt.f32.partialorder %v17812_v46, 4.0  ;;  %v17813_v42 = vld [vmem:[#allocation36_spill] sm:$0xff]  ;;  %v17814_v30 = vld [vmem:[#allocation357_spill] sm:$0xff]  ;;  %vm5280_vm8 = vcmp.lt.f32.partialorder %v17817_v57, 4.0  ;;  %v8270_v46 = vsel %vm8260_vm1, %v8269_v33, %v8265_v40 }
 0x8f0   : > { %vm5277_vm5 = vcmp.lt.f32.partialorder %v17813_v42, 4.0  ;;  %v17834_v42 = vld [vmem:[#allocation364_spill] sm:$0xff]  ;;  %vm17838_vm6 = vcmp.lt.f32.partialorder %v17814_v30, 4.0  ;;  %v14878_v30 = vsel %vm5283_vm11, %v17841_v0, inf  ;;  %v17842_v57 = vld [vmem:[#allocation141_spill] sm:$0xff]  ;;  %v17848_v0 = vld [vmem:[#allocation106_spill] sm:$0xff] }
 0x8f1   : > { %v14789_v59 = vpop.permute.xlu0 %7959  ;;  %v7197_v28 = vsel %vm5277_vm5, %v14036_v10, inf  ;;  %v8283_v10 = vrot.slane %v14180_v14, %v17831_v15  ;;  %vm5292_vm3 = vcmp.lt.f32.partialorder %v17834_v42, 4.0  ;;  %vm5294_vm5 = vcmp.lt.f32.partialorder %v17835_v5, 4.0  ;;  %v17843_v33 = vld [vmem:[#allocation140_spill] sm:$0xff]  ;;  %v17879_v42 = vld [vmem:[#allocation155_spill] sm:$0xff] }
 0x8f2   : > { %17811 = vst [vmem:[#allocation176_spill] sm:$0xff] %v14789_v59  ;;  %8151 = vperm.xlu0 %10178, %v7192_v17   ;;  %8148 = vperm.xlu1 %10179, %v7191_v34   ;;  %v14795_v23 = vpop.permute.xlu1 %7956  ;;  %v17821_v59 = vld [vmem:[#allocation360_spill] sm:$0xff]  ;;  %v17825_v34 = vld [vmem:[#allocation362_spill] sm:$0xff]  ;;  %v7198_v4 = vsel %vm17838_vm6, %v14046_v55, inf  ;;  %v8292_v55 = vrot.slane %v14188_v56, %v17831_v15  ;;  %v8305_v40 = vrot.slane %v17842_v57, %v17830_v58  ;;  %vm17853_vm11 = vcmp.lt.f32.partialorder %v17823_v47, 4.0 }
 0x8f3   : > { %17816 = vst [vmem:[#allocation245_spill] sm:$0xff] %v14795_v23  ;;  %v17826_v17 = vld [vmem:[#allocation42_spill] sm:$0xff]  ;;  %v7193_v23 = vsel %vm5273_vm0, %v14020_v3, inf  ;;  %vm17837_vm0 = vcmp.lt.f32.partialorder %v17815_v1, 4.0  ;;  %v17844_v1 = vld [vmem:[#allocation107_spill] sm:$0xff] }
 0x8f4   : > { %vm5289_vm7 = vcmp.lt.f32.partialorder %v17826_v17, 4.0 }
 0x8f5   : > { %v14813_v8 = vpop.permute.xlu0 %7965 }
 0x8f6   : > { %17827 = vst [vmem:[#allocation244_spill] sm:$0xff] %v14813_v8  ;;  %8157 = vperm.xlu0 %10178, %v7194_v41   ;;  %8154 = vperm.xlu1 %10179, %v7193_v23   ;;  %v14821_v3 = vpop.permute.xlu1 %7962  ;;  %v8254_v41 = vrot.slane %v14154_v9, %v17831_v15  ;;  %v7196_v23 = vsel %vm5276_vm4, %v14038_v18, inf  ;;  %v14851_v9 = vsel %vm17837_vm0, %v14044_v45, inf  ;;  %v14866_v18 = vsel %vm5280_vm8, %v14054_v31, inf }
 0x8f7   : > { %17832 = vst [vmem:[#allocation371_spill] sm:$0xff] %v14821_v3  ;;  %v8296_v45 = vrot.slane %v14186_v25, %v17830_v58  ;;  %v8279_v31 = vsel %vm8260_vm1, %v8278_v63, %v8274_v24  ;;  %v8301_v25 = vrot.slane %v17843_v33, %v17831_v15  ;;  %vm17845_vm4 = vcmp.lt.f32.partialorder %v17819_v6, 4.0  ;;  %v17847_v24 = vld [vmem:[#allocation47_spill] sm:$0xff]  ;;  %v17881_v3 = vld [vmem:[#allocation158_spill] sm:$0xff] }
 0x8f8   : > { %v14888_v56 = vsel %vm17845_vm4, %v17844_v1, inf  ;;  %v8261_v62 = vsel %vm8260_vm1, %v8259_v43, %v8254_v41  ;;  %v8288_v63 = vsel %vm8260_vm1, %v8287_v21, %v8283_v10  ;;  %vm5297_vm6 = vcmp.lt.f32.partialorder %v17847_v24, 4.0  ;;  %v17850_v33 = vld [vmem:[#allocation111_spill] sm:$0xff]  ;;  %v17852_v1 = vld [vmem:[#allocation110_spill] sm:$0xff]  ;;  %v17855_v21 = vld [vmem:[#allocation113_spill] sm:$0xff] }
 0x8f9   : > { %v14861_v14 = vpop.permute.xlu0 %7971  ;;  %vm17849_vm8 = vcmp.lt.f32.partialorder %v17821_v59, 4.0  ;;  %v14906_v6 = vsel %vm17851_vm9, %v17850_v33, inf  ;;  %v14911_v20 = vsel %vm17853_vm11, %v17852_v1, inf  ;;  %v9406_v41 = vsel %vm9405_vm12, %v8270_v46, %v8261_v62  ;;  %v17856_v10 = vld [vmem:[#allocation116_spill] sm:$0xff]  ;;  %v17859_v46 = vld [vmem:[#allocation115_spill] sm:$0xff]  ;;  %v17894_v24 = vld [vmem:[#allocation181_spill] sm:$0xff] }
 0x8fa   : > { %17839 = vst [vmem:[#allocation179_spill] sm:$0xff] %v14861_v14  ;;  %8163 = vperm.xlu0 %10178, %v7196_v23   ;;  %8160 = vperm.xlu1 %10179, %v7195_v27   ;;  %v14873_v49 = vpop.permute.xlu1 %7968  ;;  %v17846_v27 = vld [vmem:[#allocation103_spill] sm:$0xff]  ;;  %v14901_v57 = vsel %vm17849_vm8, %v17848_v0, inf  ;;  %v7209_v59 = vsel %vm5289_vm7, %v17855_v21, inf  ;;  %v9408_v2 = vsel %vm9407_vm10, %v8279_v31, %v9406_v41  ;;  %v8297_v0 = vsel %vm8260_vm1, %v8296_v45, %v8292_v55  ;;  %v17862_v31 = vld [vmem:[#allocation144_spill] sm:$0xff]  ;;  %v17864_v45 = vld [vmem:[#allocation150_spill] sm:$0xff] }
 0x8fb   : > { %17840 = vst [vmem:[#allocation248_spill] sm:$0xff] %v14873_v49  ;;  %v14893_v23 = vsel %vm5285_vm13, %v17846_v27, inf  ;;  %vm17857_vm13 = vcmp.lt.f32.partialorder %v17825_v34, 4.0  ;;  %v7211_v62 = vsel %vm5291_vm15, %v17859_v46, inf  ;;  %v17860_v33 = vld [vmem:[#allocation119_spill] sm:$0xff]  ;;  %vm17861_vm7 = vcmask 1043459  }
 0x8fc   : > { %v14922_v27 = vsel %vm17857_vm13, %v17856_v10, inf  ;;  %v7210_v17 = vsel %vm5290_vm14, %v17860_v33, inf  ;;  %v9410_v34 = vsel %vm17861_vm7, %v8288_v63, %v9408_v2  ;;  %v8306_v1 = vsel %vm8260_vm1, %v8305_v40, %v8301_v25  ;;  %v17866_v10 = vld [vmem:[#allocation366_spill] sm:$0xff]  ;;  %v17870_v25 = vld [vmem:[#allocation153_spill] sm:$0xff]  ;;  %v17871_v46 = vld [vmem:[#allocation152_spill] sm:$0xff] }
 0x8fd   : > { %v14914_v43 = vpop.permute.xlu0 %7977  ;;  %v8314_v41 = vrot.slane %v17862_v31, %v17830_v58  ;;  %v8332_v55 = vrot.slane %v17864_v45, %v17830_v58  ;;  %v8328_v21 = vrot.slane %v17865_v60, %v17831_v15  ;;  %vm5296_vm15 = vcmp.lt.f32.partialorder %v17866_v10, 4.0  ;;  %v17874_v60 = vld [vmem:[#allocation121_spill] sm:$0xff]  ;;  %v17895_v14 = vld [vmem:[#allocation180_spill] sm:$0xff]  ;;  %v17906_v10 = vld [vmem:[#allocation183_spill] sm:$0xff] }
 0x8fe   : > { %17854 = vst [vmem:[#allocation247_spill] sm:$0xff] %v14914_v43  ;;  %8169 = vperm.xlu0 %10178, %v7198_v4   ;;  %8166 = vperm.xlu1 %10179, %v7197_v28   ;;  %v14926_v47 = vpop.permute.xlu1 %7974  ;;  %v17863_v4 = vld [vmem:[#allocation143_spill] sm:$0xff]  ;;  %vm17868_vm14 = vcmp.lt.f32.partialorder %v17833_v22, 4.0  ;;  %vm17869_vm0 = vcmask 1044484   ;;  %v8341_v2 = vrot.slane %v17870_v25, %v17830_v58  ;;  %v8337_v33 = vrot.slane %v17871_v46, %v17831_v15  ;;  %v17878_v46 = vld [vmem:[#allocation156_spill] sm:$0xff] }
 0x8ff   : > { %17858 = vst [vmem:[#allocation372_spill] sm:$0xff] %v14926_v47  ;;  %v8310_v28 = vrot.slane %v17863_v4, %v17831_v15  ;;  %v7213_v63 = vsel %vm17868_vm14, %v17867_v13, inf  ;;  %v9412_v40 = vsel %vm17869_vm0, %v8297_v0, %v9410_v34  ;;  %vm9415_vm4 = vcmask 1046534   ;;  %v17873_v4 = vld [vmem:[#allocation122_spill] sm:$0xff]  ;;  %v17875_v13 = vld [vmem:[#allocation125_spill] sm:$0xff]  ;;  %v17886_v47 = vld [vmem:[#allocation163_spill] sm:$0xff] }
 0x900   : > { %v7212_v45 = vsel %vm5292_vm3, %v17873_v4, inf  ;;  %v14961_v22 = vsel %vm5295_vm2, %v17874_v60, inf  ;;  %v7214_v0 = vsel %vm5294_vm5, %v17875_v13, inf  ;;  %vm17877_vm8 = vcmask 1045509   ;;  %v17883_v13 = vld [vmem:[#allocation146_spill] sm:$0xff]  ;;  %vm17904_vm5 = vmmov %vm17861_vm7 }
 0x901   : > { %v14953_v31 = vpop.permute.xlu0 %7983  ;;  %v9414_v25 = vsel %vm17877_vm8, %v8306_v1, %v9412_v40  ;;  %v8346_v4 = vrot.slane %v17879_v42, %v17831_v15  ;;  %v8359_v60 = vrot.slane %v17880_v7, %v17830_v58  ;;  %v8355_v8 = vrot.slane %v17881_v3, %v17831_v15  ;;  %vm17910_vm13 = vmmov %vm17877_vm8 }
 0x902   : > { %17872 = vst [vmem:[#allocation182_spill] sm:$0xff] %v14953_v31  ;;  %8205 = vperm.xlu0 %10178, %v7210_v17   ;;  %8202 = vperm.xlu1 %10179, %v7209_v59   ;;  %v14966_v34 = vpop.permute.xlu1 %7980  ;;  %v8350_v31 = vrot.slane %v17878_v46, %v17830_v58  ;;  %v8315_v5 = vsel %vm8260_vm1, %v8314_v41, %v8310_v28  ;;  %v17882_v59 = vld [vmem:[#allocation147_spill] sm:$0xff]  ;;  %v17884_v46 = vld [vmem:[#allocation48_spill] sm:$0xff]  ;;  %v17887_v41 = vld [vmem:[#allocation166_spill] sm:$0xff]  ;;  %vm9417_vm11 = vcmask 1047559  }
 0x903   : > { %17876 = vst [vmem:[#allocation251_spill] sm:$0xff] %v14966_v34  ;;  %v8323_v17 = vrot.slane %v17882_v59, %v17830_v58  ;;  %v8319_v1 = vrot.slane %v17883_v13, %v17831_v15  ;;  %v8333_v40 = vsel %vm8260_vm1, %v8332_v55, %v8328_v21  ;;  %vm5299_vm2 = vcmp.lt.f32.partialorder %v17884_v46, 4.0  ;;  %v17885_v34 = vld [vmem:[#allocation164_spill] sm:$0xff]  ;;  %v17890_v55 = vld [vmem:[#allocation165_spill] sm:$0xff]  ;;  %vm17915_vm7 = vmmov %vm17904_vm5 }
 0x904   : > { %v8342_v42 = vsel %vm8260_vm1, %v8341_v2, %v8337_v33  ;;  %v8368_v7 = vrot.slane %v17885_v34, %v17830_v58  ;;  %v8364_v3 = vrot.slane %v17886_v47, %v17831_v15  ;;  %v8377_v28 = vrot.slane %v17887_v41, %v17830_v58  ;;  %v17889_v59 = vld [vmem:[#allocation124_spill] sm:$0xff]  ;;  %v17891_v2 = vld [vmem:[#allocation178_spill] sm:$0xff]  ;;  %v17892_v34 = vld [vmem:[#allocation177_spill] sm:$0xff] }
 0x905   : > { %v14991_v43 = vpop.permute.xlu0 %7989  ;;  %v14996_v13 = vsel %vm5297_vm6, %v17889_v59, inf  ;;  %v8373_v21 = vrot.slane %v17890_v55, %v17831_v15  ;;  %v8413_v33 = vrot.slane %v17891_v2, %v17830_v58  ;;  %v8409_v49 = vrot.slane %v17892_v34, %v17831_v15  ;;  %vm17907_vm6 = vmmov %vm17869_vm0  ;;  %v17916_v46 = vld [vmem:[#allocation188_spill] sm:$0xff] }
 0x906   : > { %17888 = vst [vmem:[#allocation250_spill] sm:$0xff] %v14991_v43  ;;  %8211 = vperm.xlu0 %10178, %v7212_v45   ;;  %8208 = vperm.xlu1 %10179, %v7211_v62   ;;  %v15004_v47 = vpop.permute.xlu1 %7986  ;;  %v8351_v41 = vsel %vm8260_vm1, %v8350_v31, %v8346_v4  ;;  %v8360_v43 = vsel %vm8260_vm1, %v8359_v60, %v8355_v8  ;;  %v17898_v62 = vld [vmem:[#allocation184_spill] sm:$0xff]  ;;  %v17900_v4 = vld [vmem:[#allocation367_spill] sm:$0xff]  ;;  %vm17930_vm14 = vmmov %vm17869_vm0 }
 0x907   : > { %17893 = vst [vmem:[#allocation373_spill] sm:$0xff] %v15004_v47  ;;  %v8422_v59 = vrot.slane %v17894_v24, %v17830_v58  ;;  %v8418_v55 = vrot.slane %v17895_v14, %v17831_v15  ;;  %v8404_v2 = vrot.slane %v17896_v36, %v17830_v58  ;;  %v8400_v34 = vrot.slane %v17897_v19, %v17831_v15  ;;  %v17899_v47 = vld [vmem:[#allocation55_spill] sm:$0xff]  ;;  %v17901_v14 = vld [vmem:[#allocation169_spill] sm:$0xff]  ;;  %v17902_v36 = vld [vmem:[#allocation168_spill] sm:$0xff] }
 0x908   : > { %v8431_v45 = vrot.slane %v17898_v62, %v17830_v58  ;;  %v8427_v31 = vrot.slane %v17899_v47, %v17831_v15  ;;  %vm5298_vm3 = vcmp.lt.f32.partialorder %v17900_v4, 4.0  ;;  %v9419_v8 = vsel %vm9405_vm12, %v8342_v42, %v8333_v40  ;;  %v17903_v19 = vld [vmem:[#allocation128_spill] sm:$0xff] }
 0x909   : > { %v8369_v60 = vsel %vm8260_vm1, %v8368_v7, %v8364_v3  ;;  %v8386_v24 = vrot.slane %v17901_v14, %v17830_v58  ;;  %v8382_v51 = vrot.slane %v17902_v36, %v17831_v15  ;;  %v15027_v32 = vpop.permute.xlu0 %7995  ;;  %v7216_v62 = vsel %vm5296_vm15, %v17903_v19, inf  ;;  %v17905_v14 = vld [vmem:[#allocation62_spill] sm:$0xff] }
 0x90a   : > { %v9420_v47 = vsel %vm9407_vm10, %v8351_v41, %v9419_v8  ;;  %v8378_v12 = vsel %vm8260_vm1, %v8377_v28, %v8373_v21  ;;  %v8414_v40 = vsel %vm8260_vm1, %v8413_v33, %v8409_v49  ;;  %8217 = vperm.xlu0 %10178, %v7214_v0   ;;  %8214 = vperm.xlu1 %10179, %v7213_v63   ;;  %v15035_v42 = vpop.permute.xlu1 %7992  ;;  %v17908_v0 = vld [vmem:[#allocation49_spill] sm:$0xff]  ;;  %v17911_v8 = vld [vmem:[#allocation127_spill] sm:$0xff] }
 0x90b   : > { %v9421_v7 = vsel %vm17904_vm5, %v8360_v43, %v9420_v47  ;;  %v8423_v3 = vsel %vm8260_vm1, %v8422_v59, %v8418_v55  ;;  %v8440_v36 = vrot.slane %v17905_v14, %v17830_v58  ;;  %v8436_v19 = vrot.slane %v17906_v10, %v17831_v15  ;;  %v17918_v47 = vld [vmem:[#allocation68_spill] sm:$0xff]  ;;  %v17921_v14 = vld [vmem:[#allocation71_spill] sm:$0xff] }
 0x90c   : > { %v9422_v41 = vsel %vm17907_vm6, %v8369_v60, %v9421_v7  ;;  %v8405_v28 = vsel %vm8260_vm1, %v8404_v2, %v8400_v34  ;;  %v8432_v49 = vsel %vm8260_vm1, %v8431_v45, %v8427_v31  ;;  %v15047_v63 = vsel %vm9415_vm4, %v8315_v5, %v9414_v25  ;;  %v17912_v25 = vld [vmem:[#allocation172_spill] sm:$0xff]  ;;  %v17913_v34 = vld [vmem:[#allocation171_spill] sm:$0xff]  ;;  %v17919_v7 = vld [vmem:[#allocation190_spill] sm:$0xff] }
 0x90d   : > { %vm5301_vm9 = vcmp.lt.f32.partialorder %v17908_v0, 4.0  ;;  %v8387_v43 = vsel %vm8260_vm1, %v8386_v24, %v8382_v51  ;;  %v9426_v21 = vsel %vm9405_vm12, %v8414_v40, %v8405_v28  ;;  %v15052_v33 = vpop.permute.xlu0 %8001  ;;  %v9423_v59 = vsel %vm17910_vm13, %v8378_v12, %v9422_v41  ;;  %v17917_v60 = vld [vmem:[#allocation56_spill] sm:$0xff]  ;;  %v17924_v28 = vld [vmem:[#allocation193_spill] sm:$0xff]  ;;  %vm17975_vm13 = vmmov %vm17877_vm8 }
 0x90e   : > { %17909 = vst [vmem:[#allocation185_spill] sm:$0xff] %v15052_v33  ;;  %v8324_v55 = vsel %vm8260_vm1, %v8323_v17, %v8319_v1  ;;  %v15059_v2 = vsel %vm5299_vm2, %v17911_v8, inf  ;;  %v8395_v5 = vrot.slane %v17912_v25, %v17830_v58  ;;  %v8391_v51 = vrot.slane %v17913_v34, %v17831_v15  ;;  %8175 = vperm.xlu0 %10178, %v14866_v18   ;;  %v15068_v12 = vpop.permute.xlu1 %7998  ;;  %v17922_v41 = vld [vmem:[#allocation368_spill] sm:$0xff] }
 0x90f   : > { %v9427_v45 = vsel %vm9407_vm10, %v8423_v3, %v9426_v21  ;;  %8172 = vperm.xlu1 %10179, %v14851_v9   ;;  %17914 = vst [vmem:[#allocation253_spill] sm:$0xff] %v15068_v12  ;;  %v8441_v1 = vsel %vm8260_vm1, %v8440_v36, %v8436_v19  ;;  %v8449_v31 = vrot.slane %v17916_v46, %v17830_v58  ;;  %v17920_v9 = vld [vmem:[#allocation192_spill] sm:$0xff]  ;;  %vm5300_vm15 = vcmp.lt.f32.partialorder %v17922_v41, 4.0  ;;  %v17925_v21 = vld [vmem:[#allocation74_spill] sm:$0xff]  ;;  %v17927_v46 = vld [vmem:[#allocation131_spill] sm:$0xff] }
 0x910   : > { %v9428_v17 = vsel %vm17915_vm7, %v8432_v49, %v9427_v45  ;;  %v8445_v24 = vrot.slane %v17917_v60, %v17831_v15  ;;  %v8458_v40 = vrot.slane %v17918_v47, %v17830_v58  ;;  %v8454_v18 = vrot.slane %v17919_v7, %v17831_v15  ;;  %v17923_v36 = vld [vmem:[#allocation72_spill] sm:$0xff]  ;;  %v17928_v47 = vld [vmem:[#allocation195_spill] sm:$0xff]  ;;  %vm17976_vm7 = vmmov %vm17907_vm6 }
 0x911   : > { %v8485_v3 = vrot.slane %v17920_v9, %v17830_v58  ;;  %v8481_v10 = vrot.slane %v17921_v14, %v17831_v15  ;;  %v8476_v19 = vrot.slane %v17923_v36, %v17830_v58  ;;  %v8472_v49 = vrot.slane %v17924_v28, %v17831_v15  ;;  %v17926_v25 = vld [vmem:[#allocation196_spill] sm:$0xff]  ;;  %v8008_v45 = vpop.permute.xlu0 %8007  ;;  %v17929_v9 = vld [vmem:[#allocation73_spill] sm:$0xff]  ;;  %v17945_v41 = vld [vmem:[#allocation207_spill] sm:$0xff] }
 0x912   : > { %v8494_v8 = vrot.slane %v17925_v21, %v17830_v58  ;;  %v8490_v34 = vrot.slane %v17926_v25, %v17831_v15  ;;  %v7218_v60 = vsel %vm5298_vm3, %v17927_v46, inf  ;;  %v8503_v7 = vrot.slane %v17928_v47, %v17830_v58  ;;  %8223 = vperm.xlu0 %10178, %v7216_v62   ;;  %v8005_v28 = vpop.permute.xlu1 %8004  ;;  %v17931_v47 = vld [vmem:[#allocation189_spill] sm:$0xff]  ;;  %vm17939_vm3 = vmmov %vm17904_vm5 }
 0x913   : > { %v8499_v14 = vrot.slane %v17929_v9, %v17831_v15  ;;  %v9043_v36 = vrot.slane %v8008_v45, %v17830_v58  ;;  %8220 = vperm.xlu1 %10179, %v14961_v22   ;;  %v9429_v21 = vsel %vm17930_vm14, %v8441_v1, %v9428_v17  ;;  %v8450_v25 = vsel %vm8260_vm1, %v8449_v31, %v8445_v24  ;;  %v17932_v9 = vld [vmem:[#allocation65_spill] sm:$0xff]  ;;  %v17933_v22 = vld [vmem:[#allocation52_spill] sm:$0xff]  ;;  %v17935_v24 = vld [vmem:[#allocation199_spill] sm:$0xff] }
 0x914   : > { %v9039_v12 = vrot.slane %v8005_v28, %v17831_v15  ;;  %v8396_v4 = vsel %vm8260_vm1, %v8395_v5, %v8391_v51  ;;  %v8459_v46 = vsel %vm8260_vm1, %v8458_v40, %v8454_v18  ;;  %v8467_v33 = vrot.slane %v17931_v47, %v17830_v58  ;;  %v17934_v1 = vld [vmem:[#allocation77_spill] sm:$0xff]  ;;  %v17937_v18 = vld [vmem:[#allocation134_spill] sm:$0xff] }
 0x915   : > { %v8463_v45 = vrot.slane %v17932_v9, %v17831_v15  ;;  %v8486_v62 = vsel %vm8260_vm1, %v8485_v3, %v8481_v10  ;;  %vm5303_vm0 = vcmp.lt.f32.partialorder %v17933_v22, 4.0  ;;  %v8495_v17 = vsel %vm8260_vm1, %v8494_v8, %v8490_v34  ;;  %v8014_v51 = vpop.permute.xlu0 %8013  ;;  %v17956_v22 = vld [vmem:[#allocation82_spill] sm:$0xff] }
 0x916   : > { %v8512_v31 = vrot.slane %v17934_v1, %v17830_v58  ;;  %v8508_v5 = vrot.slane %v17935_v24, %v17831_v15  ;;  %v15119_v40 = vsel %vm8260_vm1, %v9043_v36, %v9039_v12  ;;  %v15124_v28 = vsel %vm5301_vm9, %v17937_v18, inf  ;;  %8181 = vperm.xlu0 %10178, %v14888_v56   ;;  %v8011_v34 = vpop.permute.xlu1 %8010  ;;  %v17938_v56 = vld [vmem:[#allocation369_spill] sm:$0xff]  ;;  %v17946_v18 = vld [vmem:[#allocation75_spill] sm:$0xff]  ;;  %vm17974_vm9 = vmmov %vm17939_vm3 }
 0x917   : > { %17936 = vst [vmem:[#allocation257_spill] sm:$0xff] %v15119_v40  ;;  %v8477_v3 = vsel %vm8260_vm1, %v8476_v19, %v8472_v49  ;;  %v8504_v10 = vsel %vm8260_vm1, %v8503_v7, %v8499_v14  ;;  %v9052_v8 = vrot.slane %v8014_v51, %v17830_v58  ;;  %8178 = vperm.xlu1 %10179, %v14859_v54   ;;  %vm5302_vm2 = vcmp.lt.f32.partialorder %v17938_v56, 4.0  ;;  %v17964_v56 = vld [vmem:[#allocation99_spill] sm:$0xff] }
 0x918   : > { %v9433_v47 = vsel %vm9405_vm12, %v8486_v62, %v8477_v3  ;;  %v9048_v12 = vrot.slane %v8011_v34, %v17831_v15  ;;  %v9424_v36 = vsel %vm9415_vm4, %v8387_v43, %v9423_v59  ;;  %v9430_v0 = vsel %vm17877_vm8, %v8450_v25, %v9429_v21  ;;  %v17940_v25 = vld [vmem:[#allocation130_spill] sm:$0xff]  ;;  %v17949_v34 = vld [vmem:[#allocation201_spill] sm:$0xff] }
 0x919   : > { %v9434_v9 = vsel %vm9407_vm10, %v8495_v17, %v9433_v47  ;;  %v15137_v19 = vsel %vm9417_vm11, %v8396_v4, %v9424_v36  ;;  %v15140_v49 = vsel %vm9415_vm4, %v8459_v46, %v9430_v0  ;;  %v15144_v54 = vsel %vm9417_vm11, %v8324_v55, %v15047_v63  ;;  %v8020_v14 = vpop.permute.xlu0 %8019  ;;  %v17941_v46 = vld [vmem:[#allocation204_spill] sm:$0xff]  ;;  %v17951_v36 = vld [vmem:[#allocation78_spill] sm:$0xff] }
 0x91a   : > { %v9435_v7 = vsel %vm17939_vm3, %v8504_v10, %v9434_v9  ;;  %v8513_v43 = vsel %vm8260_vm1, %v8512_v31, %v8508_v5  ;;  %v9053_v59 = vsel %vm8260_vm1, %v9052_v8, %v9048_v12  ;;  %v15151_v21 = vsel %vm8260_vm1, %v8467_v33, %v8463_v45  ;;  %v17942_v55 = vld [vmem:[#allocation80_spill] sm:$0xff]  ;;  %8229 = vperm.xlu0 %10178, %v7218_v60   ;;  %v8017_v1 = vpop.permute.xlu1 %8016  ;;  %v17943_v31 = vld [vmem:[#allocation198_spill] sm:$0xff]  ;;  %v17944_v45 = vld [vmem:[#allocation83_spill] sm:$0xff] }
 0x91b   : > { %v7220_v4 = vsel %vm5300_vm15, %v17940_v25, inf  ;;  %v8557_v63 = vrot.slane %v17941_v46, %v17830_v58  ;;  %v8553_v62 = vrot.slane %v17942_v55, %v17831_v15  ;;  %v9061_v17 = vrot.slane %v8020_v14, %v17830_v58  ;;  %8226 = vperm.xlu1 %10179, %v14996_v13   ;;  %v17947_v10 = vld [vmem:[#allocation79_spill] sm:$0xff]  ;;  %v17948_v13 = vld [vmem:[#allocation202_spill] sm:$0xff]  ;;  %v17952_v9 = vld [vmem:[#allocation81_spill] sm:$0xff] }
 0x91c   : > { %v8521_v33 = vrot.slane %v17943_v31, %v17830_v58  ;;  %v8566_v24 = vrot.slane %v17944_v45, %v17830_v58  ;;  %v8562_v5 = vrot.slane %v17945_v41, %v17831_v15  ;;  %v9057_v51 = vrot.slane %v8017_v1, %v17831_v15  ;;  %v17950_v12 = vld [vmem:[#allocation370_spill] sm:$0xff]  ;;  %v17953_v25 = vld [vmem:[#allocation205_spill] sm:$0xff]  ;;  %v17954_v31 = vld [vmem:[#allocation139_spill] sm:$0xff] }
 0x91d   : > { %v8517_v3 = vrot.slane %v17946_v18, %v17831_v15  ;;  %v8530_v60 = vrot.slane %v17947_v10, %v17830_v58  ;;  %v8526_v8 = vrot.slane %v17948_v13, %v17831_v15  ;;  %v8539_v47 = vrot.slane %v17949_v34, %v17830_v58  ;;  %v8026_v1 = vpop.permute.xlu0 %8025  ;;  %vm17979_vm15 = vmmov %vm17877_vm8 }
 0x91e   : > { %vm5304_vm5 = vcmp.lt.f32.partialorder %v17950_v12, 4.0  ;;  %v8535_v0 = vrot.slane %v17951_v36, %v17831_v15  ;;  %v8548_v14 = vrot.slane %v17952_v9, %v17830_v58  ;;  %v8544_v46 = vrot.slane %v17953_v25, %v17831_v15  ;;  %8187 = vperm.xlu0 %10178, %v14901_v57   ;;  %v8023_v13 = vpop.permute.xlu1 %8022  ;;  %v17959_v57 = vld [vmem:[#allocation213_spill] sm:$0xff] }
 0x91f   : > { %v9062_v55 = vsel %vm8260_vm1, %v9061_v17, %v9057_v51  ;;  %v15188_v45 = vsel %vm5303_vm0, %v17954_v31, inf  ;;  %v8558_v41 = vsel %vm8260_vm1, %v8557_v63, %v8553_v62  ;;  %v9070_v10 = vrot.slane %v8026_v1, %v17830_v58  ;;  %8184 = vperm.xlu1 %10179, %v14878_v30   ;;  %v17955_v17 = vld [vmem:[#allocation211_spill] sm:$0xff]  ;;  %v17957_v63 = vld [vmem:[#allocation90_spill] sm:$0xff]  ;;  %vm17994_vm0 = vmmov %vm17939_vm3 }
 0x920   : > { %v9489_v18 = vsel %vm9405_vm12, %v9062_v55, %v9053_v59  ;;  %v8567_v34 = vsel %vm8260_vm1, %v8566_v24, %v8562_v5  ;;  %v8575_v51 = vrot.slane %v17955_v17, %v17830_v58  ;;  %v8571_v36 = vrot.slane %v17956_v22, %v17831_v15  ;;  %v17958_v62 = vld [vmem:[#allocation210_spill] sm:$0xff]  ;;  %v17960_v55 = vld [vmem:[#allocation84_spill] sm:$0xff]  ;;  %v17961_v22 = vld [vmem:[#allocation133_spill] sm:$0xff] }
 0x921   : > { %v9066_v9 = vrot.slane %v8023_v13, %v17831_v15  ;;  %v8584_v59 = vrot.slane %v17957_v63, %v17830_v58  ;;  %v8580_v25 = vrot.slane %v17958_v62, %v17831_v15  ;;  %v8593_v30 = vrot.slane %v17959_v57, %v17830_v58  ;;  %v15213_v17 = vpop.permute.xlu0 %8031 }
 0x922   : > { %v8589_v24 = vrot.slane %v17960_v55, %v17831_v15  ;;  %v9436_v5 = vsel %vm17907_vm6, %v8513_v43, %v9435_v7  ;;  %v8522_v1 = vsel %vm8260_vm1, %v8521_v33, %v8517_v3  ;;  %v8549_v31 = vsel %vm8260_vm1, %v8548_v14, %v8544_v46  ;;  %8235 = vperm.xlu0 %10178, %v7220_v4   ;;  %v15224_v7 = vpop.permute.xlu1 %8028  ;;  %v17963_v33 = vld [vmem:[#allocation219_spill] sm:$0xff] }
 0x923   : > { %v9071_v13 = vsel %vm8260_vm1, %v9070_v10, %v9066_v9  ;;  %v7222_v63 = vsel %vm5302_vm2, %v17961_v22, inf  ;;  %v8531_v62 = vsel %vm8260_vm1, %v8530_v60, %v8526_v8  ;;  %v9440_v57 = vsel %vm9405_vm12, %v8558_v41, %v8549_v31  ;;  %8232 = vperm.xlu1 %10179, %v15059_v2   ;;  %v17965_v2 = vld [vmem:[#allocation96_spill] sm:$0xff]  ;;  %vm17998_vm2 = vmmov %vm17907_vm6 }
 0x924   : > { %v15221_v55 = vsel %vm9407_vm10, %v9071_v13, %v9489_v18  ;;  %v9441_v43 = vsel %vm9407_vm10, %v8567_v34, %v9440_v57  ;;  %v8629_v3 = vrot.slane %v17963_v33, %v17830_v58  ;;  %v8625_v14 = vrot.slane %v17964_v56, %v17831_v15  ;;  %v17966_v18 = vld [vmem:[#allocation102_spill] sm:$0xff]  ;;  %v17967_v34 = vld [vmem:[#allocation215_spill] sm:$0xff]  ;;  %v17968_v31 = vld [vmem:[#allocation108_spill] sm:$0xff] }
 0x925   : > { %17962 = vst [vmem:[#allocation374_spill] sm:$0xff] %v15221_v55  ;;  %v8540_v60 = vsel %vm8260_vm1, %v8539_v47, %v8535_v0  ;;  %v8576_v8 = vsel %vm8260_vm1, %v8575_v51, %v8571_v36  ;;  %v8585_v46 = vsel %vm8260_vm1, %v8584_v59, %v8580_v25  ;;  %v8594_v4 = vsel %vm8260_vm1, %v8593_v30, %v8589_v24  ;;  %v17969_v47 = vld [vmem:[#allocation218_spill] sm:$0xff]  ;;  %v15245_v51 = vpop.permute.xlu0 %8037  ;;  %v17971_v25 = vld [vmem:[#allocation212_spill] sm:$0xff]  ;;  %v17972_v24 = vld [vmem:[#allocation51_spill] sm:$0xff] }
 0x926   : > { %v8602_v41 = vrot.slane %v17965_v2, %v17830_v58  ;;  %v8620_v10 = vrot.slane %v17966_v18, %v17830_v58  ;;  %v8616_v9 = vrot.slane %v17967_v34, %v17831_v15  ;;  %v8638_v13 = vrot.slane %v17968_v31, %v17830_v58  ;;  %v17970_v36 = vld [vmem:[#allocation138_spill] sm:$0xff]  ;;  %v17973_v57 = vld [vmem:[#allocation105_spill] sm:$0xff]  ;;  %8193 = vperm.xlu0 %10178, %v14911_v20   ;;  %v15260_v56 = vpop.permute.xlu1 %8034  ;;  %vm18025_vm6 = vmmov %vm17998_vm2 }
 0x927   : > { %v8634_v0 = vrot.slane %v17969_v47, %v17831_v15  ;;  %v15250_v59 = vsel %vm5304_vm5, %v17970_v36, inf  ;;  %v8598_v30 = vrot.slane %v17971_v25, %v17831_v15  ;;  %v8647_v22 = vrot.slane %v17972_v24, %v17830_v58  ;;  %8190 = vperm.xlu1 %10179, %v14893_v23   ;;  %v17977_v47 = vld [vmem:[#allocation114_spill] sm:$0xff]  ;;  %v17986_v24 = vld [vmem:[#allocation132_spill] sm:$0xff]  ;;  %vm18012_vm5 = vmmov %vm17994_vm0 }
 0x928   : > { %v8643_v33 = vrot.slane %v17973_v57, %v17831_v15  ;;  %v9442_v2 = vsel %vm17974_vm9, %v8576_v8, %v9441_v43  ;;  %v8630_v12 = vsel %vm8260_vm1, %v8629_v3, %v8625_v14  ;;  %v9432_v18 = vsel %vm9417_vm11, %v15151_v21, %v15140_v49  ;;  %v17978_v20 = vld [vmem:[#allocation50_spill] sm:$0xff]  ;;  %vm18026_vm9 = vmmov %vm17975_vm13 }
 0x929   : > { %v9437_v34 = vsel %vm17975_vm13, %v8522_v1, %v9436_v5  ;;  %v9443_v31 = vsel %vm17976_vm7, %v8585_v46, %v9442_v2  ;;  %v8656_v36 = vrot.slane %v17977_v47, %v17830_v58  ;;  %v8652_v23 = vrot.slane %v17978_v20, %v17831_v15  ;;  %v15276_v14 = vpop.permute.xlu0 %8043  ;;  %v17991_v20 = vld [vmem:[#allocation129_spill] sm:$0xff]  ;;  %vm18027_vm13 = vmmov %vm18026_vm9 }
 0x92a   : > { %v9438_v25 = vsel %vm9415_vm4, %v8531_v62, %v9437_v34  ;;  %v8621_v43 = vsel %vm8260_vm1, %v8620_v10, %v8616_v9  ;;  %v8639_v3 = vsel %vm8260_vm1, %v8638_v13, %v8634_v0  ;;  %v9444_v49 = vsel %vm17979_vm15, %v8594_v4, %v9443_v31  ;;  %8241 = vperm.xlu0 %10178, %v7222_v63   ;;  %v15286_v62 = vpop.permute.xlu1 %8040  ;;  %v17982_v4 = vld [vmem:[#allocation54_spill] sm:$0xff]  ;;  %v17985_v0 = vld [vmem:[#allocation123_spill] sm:$0xff]  ;;  %v17990_v31 = vld [vmem:[#allocation64_spill] sm:$0xff] }
 0x92b   : > { %v15280_v21 = vsel %vm9417_vm11, %v8540_v60, %v9438_v25  ;;  %v8603_v5 = vsel %vm8260_vm1, %v8602_v41, %v8598_v30  ;;  %v9447_v1 = vsel %vm9405_vm12, %v8630_v12, %v8621_v43  ;;  %v8648_v8 = vsel %vm8260_vm1, %v8647_v22, %v8643_v33  ;;  %8238 = vperm.xlu1 %10179, %v15124_v28   ;;  %v17983_v60 = vld [vmem:[#allocation109_spill] sm:$0xff]  ;;  %v17987_v22 = vld [vmem:[#allocation60_spill] sm:$0xff]  ;;  %v17988_v33 = vld [vmem:[#allocation126_spill] sm:$0xff] }
 0x92c   : > { %17980 = vst [vmem:[#allocation186_spill] sm:$0xff] %v15286_v62  ;;  %vm17981_vm14 = vcmask 130048   ;;  %v8665_v10 = vrot.slane %v17982_v4, %v17830_v58  ;;  %v8661_v9 = vrot.slane %v17983_v60, %v17831_v15  ;;  %v17984_v41 = vld [vmem:[#allocation61_spill] sm:$0xff]  ;;  %v8697_v63 = vrot.slane %v17985_v0, %v17831_v15  ;;  %vm18030_vm7 = vmmov %vm17994_vm0 }
 0x92d   : > { %v15290_v46 = vsel %vm17981_vm14, %v15144_v54, inf  ;;  %v8701_v13 = vrot.slane %v17984_v41, %v17830_v58  ;;  %v9448_v28 = vsel %vm9407_vm10, %v8639_v3, %v9447_v1  ;;  %v8657_v30 = vsel %vm8260_vm1, %v8656_v36, %v8652_v23  ;;  %v17989_v12 = vld [vmem:[#allocation57_spill] sm:$0xff]  ;;  %v15314_v43 = vpop.permute.xlu0 %8049  ;;  %v17993_v36 = vld [vmem:[#allocation216_spill] sm:$0xff]  ;;  %vm17996_vm8 = vmmov %vm17981_vm14 }
 0x92e   : > { %v8710_v54 = vrot.slane %v17986_v24, %v17830_v58  ;;  %v8706_v57 = vrot.slane %v17987_v22, %v17831_v15  ;;  %v8692_v2 = vrot.slane %v17988_v33, %v17830_v58  ;;  %v8688_v34 = vrot.slane %v17989_v12, %v17831_v15  ;;  %17992 = vst [vmem:[#allocation256_spill] sm:$0xff] %v15314_v43  ;;  %v15321_v1 = vpop.permute.xlu1 %8046  ;;  %v17997_v41 = vld [vmem:[#allocation93_spill] sm:$0xff]  ;;  %vm18008_vm3 = vmmov %vm17996_vm8 }
 0x92f   : > { %v8719_v47 = vrot.slane %v17990_v31, %v17830_v58  ;;  %v8715_v25 = vrot.slane %v17991_v20, %v17831_v15  ;;  %v8611_v23 = vrot.slane %v17993_v36, %v17830_v58  ;;  %v9449_v3 = vsel %vm17994_vm0, %v8648_v8, %v9448_v28  ;;  %8199 = vperm.xlu0 %10178, %v14922_v27   ;;  %v18006_v36 = vld [vmem:[#allocation22_spill] sm:$0xff]  ;;  %vm18031_vm15 = vmmov %vm17998_vm2 }
 0x930   : > { %8196 = vperm.xlu1 %10179, %v14906_v6   ;;  %17995 = vst [vmem:[#allocation259_spill] sm:$0xff] %v15321_v1  ;;  %v15325_v4 = vsel %vm17996_vm8, %v15137_v19, inf  ;;  %v15328_v60 = vsel %vm9415_vm4, %v8603_v5, %v9444_v49  ;;  %v8607_v0 = vrot.slane %v17997_v41, %v17831_v15  ;;  %v9450_v24 = vsel %vm17998_vm2, %v8657_v30, %v9449_v3  ;;  %v17999_v6 = vld [vmem:[#allocation120_spill] sm:$0xff]  ;;  %v18000_v19 = vld [vmem:[#allocation19_spill] sm:$0xff]  ;;  %v18010_v41 = vld [vmem:[#allocation58_spill] sm:$0xff] }
 0x931   : > { %v8666_v8 = vsel %vm8260_vm1, %v8665_v10, %v8661_v9  ;;  %v8702_v27 = vsel %vm8260_vm1, %v8701_v13, %v8697_v63  ;;  %v8674_v28 = vrot.slane %v17999_v6, %v17830_v58  ;;  %v8711_v22 = vsel %vm8260_vm1, %v8710_v54, %v8706_v57  ;;  %v18001_v49 = vld [vmem:[#allocation63_spill] sm:$0xff]  ;;  %v18003_v9 = vld [vmem:[#allocation18_spill] sm:$0xff]  ;;  %v15348_v63 = vpop.permute.xlu0 %8055  ;;  %v18011_v6 = vld [vmem:[#allocation117_spill] sm:$0xff] }
 0x932   : > { %v8728_v33 = vrot.slane %v18000_v19, %v17830_v58  ;;  %v8724_v5 = vrot.slane %v18001_v49, %v17831_v15  ;;  %v8693_v12 = vsel %vm8260_vm1, %v8692_v2, %v8688_v34  ;;  %v8720_v31 = vsel %vm8260_vm1, %v8719_v47, %v8715_v25  ;;  %v18002_v30 = vld [vmem:[#allocation67_spill] sm:$0xff]  ;;  %18004 = vst [vmem:[#allocation375_spill] sm:$0xff] %v15348_v63  ;;  %v18005_v57 = vld [vmem:[#allocation222_spill] sm:$0xff]  ;;  %v15357_v2 = vpop.permute.xlu1 %8052  ;;  %v18009_v47 = vld [vmem:[#allocation53_spill] sm:$0xff] }
 0x933   : > { %v8737_v10 = vrot.slane %v18002_v30, %v17830_v58  ;;  %v8733_v13 = vrot.slane %v18003_v9, %v17831_v15  ;;  %v9454_v54 = vsel %vm9405_vm12, %v8702_v27, %v8693_v12  ;;  %v8773_v20 = vrot.slane %v18005_v57, %v17830_v58  ;;  %8247 = vperm.xlu0 %10178, %v15250_v59   ;;  %v18013_v12 = vld [vmem:[#allocation135_spill] sm:$0xff]  ;;  %vm18036_vm14 = vmmov %vm17994_vm0 }
 0x934   : > { %v8769_v3 = vrot.slane %v18006_v36, %v17831_v15  ;;  %8244 = vperm.xlu1 %10179, %v15188_v45   ;;  %18007 = vst [vmem:[#allocation191_spill] sm:$0xff] %v15357_v2  ;;  %v15360_v34 = vsel %vm18008_vm3, %v9432_v18, inf  ;;  %v8670_v25 = vrot.slane %v18009_v47, %v17831_v15  ;;  %v8683_v27 = vrot.slane %v18010_v41, %v17830_v58  ;;  %v18014_v18 = vld [vmem:[#allocation221_spill] sm:$0xff]  ;;  %v18016_v41 = vld [vmem:[#allocation23_spill] sm:$0xff]  ;;  %v18023_v2 = vld [vmem:[#allocation142_spill] sm:$0xff] }
 0x935   : > { %v8679_v19 = vrot.slane %v18011_v6, %v17831_v15  ;;  %v9455_v49 = vsel %vm9407_vm10, %v8711_v22, %v9454_v54  ;;  %v8729_v45 = vsel %vm8260_vm1, %v8728_v33, %v8724_v5  ;;  %v8782_v30 = vrot.slane %v18013_v12, %v17830_v58  ;;  %v18015_v36 = vld [vmem:[#allocation21_spill] sm:$0xff]  ;;  %v18018_v33 = vld [vmem:[#allocation66_spill] sm:$0xff]  ;;  %vm18049_vm0 = vmmov %vm17998_vm2 }
 0x936   : > { %v9456_v59 = vsel %vm18012_vm5, %v8720_v31, %v9455_v49  ;;  %v8778_v9 = vrot.slane %v18014_v18, %v17831_v15  ;;  %v8738_v57 = vsel %vm8260_vm1, %v8737_v10, %v8733_v13  ;;  %v8746_v47 = vrot.slane %v18015_v36, %v17830_v58  ;;  %v18017_v22 = vld [vmem:[#allocation69_spill] sm:$0xff]  ;;  %v15382_v31 = vpop.permute.xlu0 %8061  ;;  %v18019_v49 = vld [vmem:[#allocation70_spill] sm:$0xff]  ;;  %v18020_v18 = vld [vmem:[#allocation20_spill] sm:$0xff]  ;;  %v15391_v36 = vpop.permute.xlu1 %8058 }
 0x937   : > { %v8764_v6 = vrot.slane %v18016_v41, %v17830_v58  ;;  %v8760_v54 = vrot.slane %v18017_v22, %v17831_v15  ;;  %v8742_v5 = vrot.slane %v18018_v33, %v17831_v15  ;;  %v8755_v12 = vrot.slane %v18019_v49, %v17830_v58  ;;  %v18021_v41 = vld [vmem:[#allocation225_spill] sm:$0xff]  ;;  %v18022_v22 = vld [vmem:[#allocation24_spill] sm:$0xff]  ;;  %vm18050_vm8 = vmmov %vm18026_vm9 }
 0x938   : > { %v8751_v10 = vrot.slane %v18020_v18, %v17831_v15  ;;  %v8774_v13 = vsel %vm8260_vm1, %v8773_v20, %v8769_v3  ;;  %v8791_v55 = vrot.slane %v18021_v41, %v17830_v58  ;;  %v8787_v40 = vrot.slane %v18022_v22, %v17831_v15  ;;  %v18024_v33 = vld [vmem:[#allocation224_spill] sm:$0xff]  ;;  %vm18051_vm2 = vmmov %vm18050_vm8 }
 0x939   : > { %v8800_v63 = vrot.slane %v18023_v2, %v17830_v58  ;;  %v8796_v1 = vrot.slane %v18024_v33, %v17831_v15  ;;  %v9457_v49 = vsel %vm18025_vm6, %v8729_v45, %v9456_v59  ;;  %v8783_v18 = vsel %vm8260_vm1, %v8782_v30, %v8778_v9  ;;  %v18028_v30 = vld [vmem:[#allocation228_spill] sm:$0xff]  ;;  %vm18068_vm3 = vmmov %vm18012_vm5 }
 0x93a   : > { %v8612_v20 = vsel %vm8260_vm1, %v8611_v23, %v8607_v0  ;;  %v9451_v3 = vsel %vm18026_vm9, %v8666_v8, %v9450_v24  ;;  %v8675_v43 = vsel %vm8260_vm1, %v8674_v28, %v8670_v25  ;;  %v8765_v41 = vsel %vm8260_vm1, %v8764_v6, %v8760_v54  ;;  %v15407_v62 = vpop.permute.xlu0 %8067  ;;  %v15417_v0 = vpop.permute.xlu1 %8064  ;;  %vm18069_vm5 = vmmov %vm18049_vm0 }
 0x93b   : > { %v9458_v22 = vsel %vm18027_vm13, %v8738_v57, %v9457_v49  ;;  %v8684_v2 = vsel %vm8260_vm1, %v8683_v27, %v8679_v19  ;;  %v8747_v33 = vsel %vm8260_vm1, %v8746_v47, %v8742_v5  ;;  %v9461_v59 = vsel %vm9405_vm12, %v8774_v13, %v8765_v41  ;;  %v18032_v41 = vld [vmem:[#allocation236_spill] sm:$0xff]  ;;  %vm18072_vm6 = vmmov %vm18068_vm3 }
 0x93c   : > { %v8845_v45 = vrot.slane %v14674_v35, %v17830_v58  ;;  %v8841_v23 = vrot.slane %v14676_v61, %v17831_v15  ;;  %v9462_v24 = vsel %vm9407_vm10, %v8783_v18, %v9461_v59  ;;  %v8792_v8 = vsel %vm8260_vm1, %v8791_v55, %v8787_v40  ;;  %v18029_v40 = vld [vmem:[#allocation136_spill] sm:$0xff]  ;;  %v18034_v59 = vld [vmem:[#allocation227_spill] sm:$0xff] }
 0x93d   : > { %v8801_v28 = vsel %vm8260_vm1, %v8800_v63, %v8796_v1  ;;  %v8756_v25 = vsel %vm8260_vm1, %v8755_v12, %v8751_v10  ;;  %v8836_v27 = vrot.slane %v14666_v52, %v17830_v58  ;;  %v8832_v19 = vrot.slane %v14668_v44, %v17831_v15 }
 0x93e   : > { %v8854_v35 = vrot.slane %v14682_v38, %v17830_v58  ;;  %v8850_v61 = vrot.slane %v14684_v16, %v17831_v15  ;;  %v8809_v9 = vrot.slane %v18028_v30, %v17830_v58  ;;  %v8805_v55 = vrot.slane %v18029_v40, %v17831_v15  ;;  %v15439_v63 = vpop.permute.xlu0 %8073  ;;  %v15443_v57 = vpop.permute.xlu1 %8070 }
 0x93f   : > { %v8863_v1 = vrot.slane %v14690_v53, %v17830_v58  ;;  %v8859_v52 = vrot.slane %v14692_v37, %v17831_v15  ;;  %v9463_v44 = vsel %vm18030_vm7, %v8792_v8, %v9462_v24  ;;  %v8846_v38 = vsel %vm8260_vm1, %v8845_v45, %v8841_v23  ;;  %v18035_v23 = vld [vmem:[#allocation230_spill] sm:$0xff]  ;;  %v18037_v8 = vld [vmem:[#allocation235_spill] sm:$0xff]  ;;  %vm18075_vm7 = vmmov %vm18051_vm2 }
 0x940   : > { %v9459_v16 = vsel %vm9415_vm4, %v8747_v33, %v9458_v22  ;;  %v9452_v47 = vsel %vm9415_vm4, %v8675_v43, %v9451_v3  ;;  %v9464_v6 = vsel %vm18031_vm15, %v8801_v28, %v9463_v44  ;;  %v15450_v53 = vsel %vm9417_vm11, %v8612_v20, %v15328_v60  ;;  %vm18076_vm15 = vmmov %vm18049_vm0 }
 0x941   : > { %v15453_v37 = vsel %vm9417_vm11, %v8756_v25, %v9459_v16  ;;  %v15456_v54 = vsel %vm9417_vm11, %v8684_v2, %v9452_v47  ;;  %v8837_v5 = vsel %vm8260_vm1, %v8836_v27, %v8832_v19  ;;  %v8855_v12 = vsel %vm8260_vm1, %v8854_v35, %v8850_v61  ;;  %v18038_v25 = vld [vmem:[#allocation157_spill] sm:$0xff]  ;;  %v18040_v61 = vld [vmem:[#allocation154_spill] sm:$0xff] }
 0x942   : > { %v8872_v10 = vrot.slane %v14698_v39, %v17830_v58  ;;  %v8868_v43 = vrot.slane %v14700_v48, %v17831_v15  ;;  %v8810_v13 = vsel %vm8260_vm1, %v8809_v9, %v8805_v55  ;;  %v8818_v60 = vrot.slane %v14650_v50, %v17830_v58  ;;  %v15469_v20 = vpop.permute.xlu0 %8079  ;;  %v15479_v2 = vpop.permute.xlu1 %8076  ;;  %v18033_v50 = vld [vmem:[#allocation148_spill] sm:$0xff]  ;;  %v18039_v19 = vld [vmem:[#allocation145_spill] sm:$0xff]  ;;  %v18041_v9 = vld [vmem:[#allocation151_spill] sm:$0xff] }
 0x943   : > { %v9468_v49 = vsel %vm9405_vm12, %v8846_v38, %v8837_v5  ;;  %v8864_v18 = vsel %vm8260_vm1, %v8863_v1, %v8859_v52  ;;  %v8881_v3 = vrot.slane %v14706_v29, %v17830_v58  ;;  %v8877_v39 = vrot.slane %v14708_v26, %v17831_v15  ;;  %v18042_v55 = vld [vmem:[#allocation160_spill] sm:$0xff]  ;;  %v18043_v38 = vld [vmem:[#allocation234_spill] sm:$0xff]  ;;  %v18044_v47 = vld [vmem:[#allocation233_spill] sm:$0xff] }
 0x944   : > { %v8917_v48 = vrot.slane %v14738_v11, %v17830_v58  ;;  %v8913_v22 = vrot.slane %v18032_v41, %v17831_v15  ;;  %v8814_v33 = vrot.slane %v18033_v50, %v17831_v15  ;;  %v8827_v45 = vrot.slane %v18034_v59, %v17830_v58  ;;  %v18047_v50 = vld [vmem:[#allocation238_spill] sm:$0xff] }
 0x945   : > { %v8823_v29 = vrot.slane %v18035_v23, %v17831_v15  ;;  %v9469_v24 = vsel %vm9407_vm10, %v8855_v12, %v9468_v49  ;;  %v8873_v11 = vsel %vm8260_vm1, %v8872_v10, %v8868_v43  ;;  %v8926_v28 = vrot.slane %v18037_v8, %v17830_v58  ;;  %v18045_v43 = vld [vmem:[#allocation167_spill] sm:$0xff] }
 0x946   : > { %v9470_v26 = vsel %vm18036_vm14, %v8864_v18, %v9469_v24  ;;  %v8922_v27 = vrot.slane %v18038_v25, %v17831_v15  ;;  %v8890_v35 = vrot.slane %v18039_v19, %v17830_v58  ;;  %v8886_v30 = vrot.slane %v18040_v61, %v17831_v15  ;;  %v15502_v52 = vpop.permute.xlu0 %8085  ;;  %v15510_v10 = vpop.permute.xlu1 %8082  ;;  %v18046_v18 = vld [vmem:[#allocation239_spill] sm:$0xff] }
 0x947   : > { %v8908_v40 = vrot.slane %v18041_v9, %v17830_v58  ;;  %v8904_v1 = vrot.slane %v18042_v55, %v17831_v15  ;;  %v8882_v44 = vsel %vm8260_vm1, %v8881_v3, %v8877_v39  ;;  %v8899_v16 = vrot.slane %v18043_v38, %v17830_v58  ;;  %v18048_v3 = vld [vmem:[#allocation161_spill] sm:$0xff]  ;;  %v18057_v38 = vld [vmem:[#allocation247_spill] sm:$0xff] }
 0x948   : > { %v8895_v5 = vrot.slane %v18044_v47, %v17831_v15  ;;  %v8918_v12 = vsel %vm8260_vm1, %v8917_v48, %v8913_v22  ;;  %v8935_v49 = vrot.slane %v18045_v43, %v17830_v58  ;;  %v8931_v41 = vrot.slane %v18046_v18, %v17831_v15 }
 0x949   : > { %v8944_v59 = vrot.slane %v18047_v50, %v17830_v58  ;;  %v8940_v39 = vrot.slane %v18048_v3, %v17831_v15  ;;  %v8819_v23 = vsel %vm8260_vm1, %v8818_v60, %v8814_v33  ;;  %v9471_v24 = vsel %vm18049_vm0, %v8873_v11, %v9470_v26  ;;  %v18052_v60 = vld [vmem:[#allocation179_spill] sm:$0xff]  ;;  %v18053_v26 = vld [vmem:[#allocation248_spill] sm:$0xff] }
 0x94a   : > { %v8927_v48 = vsel %vm8260_vm1, %v8926_v28, %v8922_v27  ;;  %v9465_v22 = vsel %vm18050_vm8, %v8810_v13, %v9464_v6  ;;  %v8891_v8 = vsel %vm8260_vm1, %v8890_v35, %v8886_v30  ;;  %v8909_v25 = vsel %vm8260_vm1, %v8908_v40, %v8904_v1  ;;  %v15526_v19 = vpop.permute.xlu0 %8091  ;;  %v15535_v28 = vpop.permute.xlu1 %8088  ;;  %v18055_v30 = vld [vmem:[#allocation242_spill] sm:$0xff]  ;;  %v18056_v1 = vld [vmem:[#allocation241_spill] sm:$0xff] }
 0x94b   : > { %v9472_v61 = vsel %vm18051_vm2, %v8882_v44, %v9471_v24  ;;  %v8828_v9 = vsel %vm8260_vm1, %v8827_v45, %v8823_v29  ;;  %v9475_v55 = vsel %vm9405_vm12, %v8918_v12, %v8909_v25  ;;  %v8989_v33 = vrot.slane %v18052_v60, %v17830_v58  ;;  %v18054_v45 = vld [vmem:[#allocation173_spill] sm:$0xff]  ;;  %v18059_v12 = vld [vmem:[#allocation170_spill] sm:$0xff] }
 0x94c   : > { %v8985_v11 = vrot.slane %v18053_v26, %v17831_v15  ;;  %v8900_v6 = vsel %vm8260_vm1, %v8899_v16, %v8895_v5  ;;  %v9476_v13 = vsel %vm9407_vm10, %v8927_v48, %v9475_v55  ;;  %v8936_v27 = vsel %vm8260_vm1, %v8935_v49, %v8931_v41  ;;  %v18058_v16 = vld [vmem:[#allocation372_spill] sm:$0xff]  ;;  %v18063_v24 = vld [vmem:[#allocation245_spill] sm:$0xff]  ;;  %v18064_v55 = vld [vmem:[#allocation182_spill] sm:$0xff] }
 0x94d   : > { %v8945_v35 = vsel %vm8260_vm1, %v8944_v59, %v8940_v39  ;;  %v8953_v29 = vrot.slane %v18054_v45, %v17830_v58  ;;  %v8949_v40 = vrot.slane %v18055_v30, %v17831_v15  ;;  %v8962_v44 = vrot.slane %v18056_v1, %v17830_v58  ;;  %v18060_v49 = vld [vmem:[#allocation176_spill] sm:$0xff]  ;;  %v18062_v59 = vld [vmem:[#allocation371_spill] sm:$0xff]  ;;  %v18066_v1 = vld [vmem:[#allocation250_spill] sm:$0xff] }
 0x94e   : > { %v8998_v47 = vrot.slane %v18057_v38, %v17830_v58  ;;  %v8994_v5 = vrot.slane %v18058_v16, %v17831_v15  ;;  %v8958_v43 = vrot.slane %v18059_v12, %v17831_v15  ;;  %v8971_v18 = vrot.slane %v18060_v49, %v17830_v58  ;;  %v18061_v41 = vld [vmem:[#allocation244_spill] sm:$0xff]  ;;  %v15559_v39 = vpop.permute.xlu0 %8097  ;;  %v18065_v26 = vld [vmem:[#allocation251_spill] sm:$0xff]  ;;  %v15568_v30 = vpop.permute.xlu1 %8094  ;;  %v18067_v16 = vld [vmem:[#allocation373_spill] sm:$0xff] }
 0x94f   : > { %v8980_v50 = vrot.slane %v18061_v41, %v17830_v58  ;;  %v8976_v3 = vrot.slane %v18062_v59, %v17831_v15  ;;  %v8967_v48 = vrot.slane %v18063_v24, %v17831_v15  ;;  %v8990_v25 = vsel %vm8260_vm1, %v8989_v33, %v8985_v11 }
 0x950   : > { %v9007_v60 = vrot.slane %v18064_v55, %v17830_v58  ;;  %v9003_v45 = vrot.slane %v18065_v26, %v17831_v15  ;;  %v9016_v38 = vrot.slane %v18066_v1, %v17830_v58  ;;  %v9012_v12 = vrot.slane %v18067_v16, %v17831_v15 }
 0x951   : > { %v9025_v49 = vrot.slane %v15027_v32, %v17830_v58  ;;  %v9021_v33 = vrot.slane %v15035_v42, %v17831_v15  ;;  %v9477_v11 = vsel %vm18068_vm3, %v8936_v27, %v9476_v13  ;;  %v8999_v41 = vsel %vm8260_vm1, %v8998_v47, %v8994_v5  ;;  %vm18081_vm3 = vmmov %vm18075_vm7 }
 0x952   : > { %v9473_v59 = vsel %vm9415_vm4, %v8891_v8, %v9472_v61  ;;  %v9466_v24 = vsel %vm9415_vm4, %v8819_v23, %v9465_v22  ;;  %v9478_v55 = vsel %vm18069_vm5, %v8945_v35, %v9477_v11  ;;  %v8981_v26 = vsel %vm8260_vm1, %v8980_v50, %v8976_v3  ;;  %v15584_v1 = vpop.permute.xlu0 %8103  ;;  %9544 = vmin.xlane.f32.xlu0 %v15325_v4  ;;  %v15593_v22 = vpop.permute.xlu1 %8100  ;;  %vm18087_vm5 = vmmov %vm18072_vm6 }
 0x953   : > { %v9474_v32 = vsel %vm9417_vm11, %v8900_v6, %v9473_v59  ;;  %v9467_v42 = vsel %vm9417_vm11, %v8828_v9, %v9466_v24  ;;  %v8954_v13 = vsel %vm8260_vm1, %v8953_v29, %v8949_v40  ;;  %v8963_v27 = vsel %vm8260_vm1, %v8962_v44, %v8958_v43  ;;  %v18070_v9 = vld [vmem:[#allocation185_spill] sm:$0xff]  ;;  %v18082_v59 = vld [vmem:[#allocation186_spill] sm:$0xff] }
 0x954   : > { %v9482_v8 = vsel %vm9405_vm12, %v8990_v25, %v8981_v26  ;;  %v9008_v23 = vsel %vm8260_vm1, %v9007_v60, %v9003_v45  ;;  %v9017_v35 = vsel %vm8260_vm1, %v9016_v38, %v9012_v12  ;;  %v9026_v4 = vsel %vm8260_vm1, %v9025_v49, %v9021_v33  ;;  %v18071_v29 = vld [vmem:[#allocation253_spill] sm:$0xff] }
 0x955   : > { %v9483_v61 = vsel %vm9407_vm10, %v8999_v41, %v9482_v8  ;;  %v8972_v6 = vsel %vm8260_vm1, %v8971_v18, %v8967_v48  ;;  %v9034_v47 = vrot.slane %v18070_v9, %v17830_v58  ;;  %v9030_v40 = vrot.slane %v18071_v29, %v17831_v15 }
 0x956   : > { %v9079_v44 = vrot.slane %v15213_v17, %v17830_v58  ;;  %v9075_v5 = vrot.slane %v15224_v7, %v17831_v15  ;;  %v9484_v43 = vsel %vm18072_vm6, %v9008_v23, %v9483_v61  ;;  %v15608_v50 = vpop.permute.xlu0 %8109  ;;  %9547 = vmin.xlane.f32.xlu0 %v15360_v34  ;;  %vm18073_vm9 = vcmask 130048   ;;  %v15618_v17 = vpop.permute.xlu1 %8106  ;;  %vm18090_vm6 = vmmov %vm18087_vm5 }
 0x957   : > { %v9552_v18 = vsel %vm18073_vm9, %v15450_v53, inf  ;;  %vm18074_vm13 = vmmov %vm18073_vm9  ;;  %v9479_v48 = vsel %vm18075_vm7, %v8954_v13, %v9478_v55  ;;  %v9485_v25 = vsel %vm18076_vm15, %v9017_v35, %v9484_v43  ;;  %v9088_v12 = vrot.slane %v15245_v51, %v17830_v58 }
 0x958   : > { %v9549_v3 = vsel %vm18074_vm13, %v15280_v21, inf  ;;  %9541 = vmin.xlane.f32.xlu1 %v15290_v46  ;;  %vm18077_vm14 = vmmov %vm18073_vm9  ;;  %v9480_v60 = vsel %vm9415_vm4, %v8963_v27, %v9479_v48  ;;  %v9486_v45 = vsel %vm18081_vm3, %v9026_v4, %v9485_v25  ;;  %v9035_v46 = vsel %vm8260_vm1, %v9034_v47, %v9030_v40  ;;  %v18089_v48 = vld [vmem:[#allocation374_spill] sm:$0xff] }
 0x959   : > { %v9558_v7 = vsel %vm18077_vm14, %v15453_v37, inf  ;;  %vm18078_vm0 = vmmov %vm18073_vm9  ;;  %v15629_v38 = vsel %vm9417_vm11, %v8972_v6, %v9480_v60  ;;  %v9080_v16 = vsel %vm8260_vm1, %v9079_v44, %v9075_v5  ;;  %v9133_v37 = vrot.slane %v15407_v62, %v17830_v58 }
 0x95a   : > { %v9555_v34 = vsel %vm18078_vm0, %v15456_v54, inf  ;;  %vm18079_vm8 = vmmov %vm18078_vm0  ;;  %v9129_v54 = vrot.slane %v15417_v0, %v17831_v15  ;;  %v9084_v49 = vrot.slane %v15260_v56, %v17831_v15  ;;  %v9142_v33 = vrot.slane %v15439_v63, %v17830_v58  ;;  %v15645_v41 = vpop.permute.xlu0 %8115  ;;  %9553 = vmin.xlane.f32.xlu0 %v9552_v18  ;;  %v15655_v63 = vpop.permute.xlu1 %8112  ;;  %v18088_v18 = vld [vmem:[#allocation257_spill] sm:$0xff] }
 0x95b   : > { %v9564_v53 = vsel %vm18079_vm8, %v9474_v32, inf  ;;  %vm18080_vm2 = vmmov %vm18078_vm0  ;;  %v9138_v11 = vrot.slane %v15443_v57, %v17831_v15  ;;  %v9124_v62 = vrot.slane %v15382_v31, %v17830_v58  ;;  %v9120_v0 = vrot.slane %v15391_v36, %v17831_v15  ;;  %v18084_v32 = vld [vmem:[#allocation259_spill] sm:$0xff] }
 0x95c   : > { %v9561_v21 = vsel %vm18080_vm2, %v9467_v42, inf  ;;  %v9151_v51 = vrot.slane %v15469_v20, %v17830_v58  ;;  %v9147_v56 = vrot.slane %v15479_v2, %v17831_v15  ;;  %9550 = vmin.xlane.f32.xlu1 %v9549_v3  ;;  %v9097_v57 = vrot.slane %v15276_v14, %v17830_v58  ;;  %v18083_v20 = vld [vmem:[#allocation256_spill] sm:$0xff]  ;;  %vm18091_vm9 = vmmov %vm18076_vm15 }
 0x95d   : > { %v9093_v24 = vrot.slane %v18082_v59, %v17831_v15  ;;  %v9160_v31 = vrot.slane %v15502_v52, %v17830_v58  ;;  %v9156_v36 = vrot.slane %v15510_v10, %v17831_v15  ;;  %v9106_v55 = vrot.slane %v18083_v20, %v17830_v58  ;;  %vm18092_vm13 = vmmov %vm18091_vm9 }
 0x95e   : > { %v9134_v2 = vsel %vm8260_vm1, %v9133_v37, %v9129_v54  ;;  %v9169_v26 = vrot.slane %v15526_v19, %v17830_v58  ;;  %v9165_v14 = vrot.slane %v15535_v28, %v17831_v15  ;;  %v9102_v42 = vrot.slane %v18084_v32, %v17831_v15  ;;  %v15679_v27 = vpop.permute.xlu0 %8121  ;;  %9559 = vmin.xlane.f32.xlu0 %v9558_v7  ;;  %v8119_v61 = vpop.permute.xlu1 %8118  ;;  %vm18093_vm7 = vmmov %vm18081_vm3 }
 0x95f   : > { %v9143_v13 = vsel %vm8260_vm1, %v9142_v33, %v9138_v11  ;;  %v9178_v52 = vrot.slane %v15559_v39, %v17830_v58  ;;  %v9174_v10 = vrot.slane %v15568_v30, %v17831_v15  ;;  %v9125_v8 = vsel %vm8260_vm1, %v9124_v62, %v9120_v0  ;;  %v18085_v39 = vld [vmem:[#allocation375_spill] sm:$0xff]  ;;  %vm18094_vm15 = vmmov %vm18078_vm0 }
 0x960   : > { %v9152_v19 = vsel %vm8260_vm1, %v9151_v51, %v9147_v56  ;;  %v9187_v28 = vrot.slane %v15584_v1, %v17830_v58  ;;  %v9183_v23 = vrot.slane %v15593_v22, %v17831_v15  ;;  %9556 = vmin.xlane.f32.xlu1 %v9555_v34  ;;  %v9115_v35 = vrot.slane %v18085_v39, %v17830_v58  ;;  %v18086_v30 = vld [vmem:[#allocation191_spill] sm:$0xff]  ;;  %vm18095_vm14 = vmmov %vm18081_vm3 }
 0x961   : > { %v9111_v4 = vrot.slane %v18086_v30, %v17831_v15  ;;  %v9496_v6 = vsel %vm9405_vm12, %v9134_v2, %v9125_v8  ;;  %v9161_v9 = vsel %vm8260_vm1, %v9160_v31, %v9156_v36  ;;  %v9089_v47 = vsel %vm8260_vm1, %v9088_v12, %v9084_v49  ;;  %vm18096_vm8 = vmmov %vm18078_vm0 }
 0x962   : > { %v9497_v29 = vsel %vm9407_vm10, %v9143_v13, %v9496_v6  ;;  %v9170_v1 = vsel %vm8260_vm1, %v9169_v26, %v9165_v14  ;;  %v9487_v22 = vsel %vm9415_vm4, %v9035_v46, %v9486_v45  ;;  %v9098_v40 = vsel %vm8260_vm1, %v9097_v57, %v9093_v24  ;;  %v8128_v43 = vpop.permute.xlu0 %8127  ;;  %9565 = vmin.xlane.f32.xlu0 %v9564_v53  ;;  %v8125_v60 = vpop.permute.xlu1 %8124  ;;  %vm18097_vm2 = vmmov %vm18078_vm0 }
 0x963   : > { %v9498_v44 = vsel %vm18087_vm5, %v9152_v19, %v9497_v29  ;;  %v9179_v5 = vsel %vm8260_vm1, %v9178_v52, %v9174_v10  ;;  %v9488_v3 = vsel %vm9417_vm11, %v18088_v18, %v9487_v22  ;;  %v9491_v25 = vsel %vm18090_vm6, %v9080_v16, %v18089_v48  ;;  %vm18098_vm3 = vmmov %vm18087_vm5 }
 0x964   : > { %v9107_v7 = vsel %vm8260_vm1, %v9106_v55, %v9102_v42  ;;  %v9499_v34 = vsel %vm18091_vm9, %v9161_v9, %v9498_v44  ;;  %9562 = vmin.xlane.f32.xlu1 %v9561_v21  ;;  %v9188_v45 = vsel %vm8260_vm1, %v9187_v28, %v9183_v23  ;;  %v9492_v46 = vsel %vm18092_vm13, %v9089_v47, %v9491_v25  ;;  %vm18099_vm5 = vmmov %vm18091_vm9 }
 0x965   : > { %v9500_v37 = vsel %vm18093_vm7, %v9170_v1, %v9499_v34  ;;  %v9116_v53 = vsel %vm8260_vm1, %v9115_v35, %v9111_v4  ;;  %v9570_v54 = vsel %vm18094_vm15, %v9488_v3, inf  ;;  %v9493_v16 = vsel %vm18095_vm14, %v9098_v40, %v9492_v46  ;;  %vm18100_vm6 = vmmov %vm18093_vm7 }
 0x966   : > { %v9501_v12 = vsel %vm9415_vm4, %v9179_v5, %v9500_v37  ;;  %v8134_v49 = vpop.permute.xlu0 %8133  ;;  %9571 = vmin.xlane.f32.xlu0 %v9570_v54  ;;  %v9567_v21 = vsel %vm18078_vm0, %v15629_v38, inf  ;;  %v9494_v11 = vsel %vm9415_vm4, %v9107_v7, %v9493_v16  ;;  %v8131_v62 = vpop.permute.xlu1 %8130  ;;  %v9205_v56 = vrot.slane %v15645_v41, %v17830_v58  ;;  %vm18101_vm9 = vmmov %vm18078_vm0 }
 0x967   : > { %v9502_v33 = vsel %vm9417_vm11, %v9188_v45, %v9501_v12  ;;  %v9495_v0 = vsel %vm9417_vm11, %v9116_v53, %v9494_v11  ;;  %v9201_v57 = vrot.slane %v15655_v63, %v17831_v15  ;;  %v9214_v24 = vrot.slane %v15679_v27, %v17830_v58  ;;  %vm18102_vm13 = vmmov %vm18098_vm3 }
 0x968   : > { %9568 = vmin.xlane.f32.xlu1 %v9567_v21  ;;  %v9576_v51 = vsel %vm18096_vm8, %v9502_v33, inf  ;;  %v9573_v38 = vsel %vm18097_vm2, %v9495_v0, inf  ;;  %v9210_v31 = vrot.slane %v8119_v61, %v17831_v15  ;;  %v9196_v20 = vrot.slane %v15608_v50, %v17830_v58  ;;  %vm18103_vm7 = vmmov %vm18099_vm5 }
 0x969   : > { %v9192_v41 = vrot.slane %v15618_v17, %v17831_v15  ;;  %v9223_v55 = vrot.slane %v8128_v43, %v17830_v58  ;;  %v9219_v63 = vrot.slane %v8125_v60, %v17831_v15  ;;  %v9232_v2 = vrot.slane %v8134_v49, %v17830_v58  ;;  %vm18104_vm15 = vmmov %vm18100_vm6 }
 0x96a   : > { %v8140_v59 = vpop.permute.xlu0 %8139  ;;  %9577 = vmin.xlane.f32.xlu0 %v9576_v51  ;;  %v8137_v36 = vpop.permute.xlu1 %8136  ;;  %v9228_v26 = vrot.slane %v8131_v62, %v17831_v15  ;;  %v9206_v14 = vsel %vm8260_vm1, %v9205_v56, %v9201_v57  ;;  %v9215_v50 = vsel %vm8260_vm1, %v9214_v24, %v9210_v31  ;;  %vm18105_vm14 = vmmov %vm18098_vm3 }
 0x96b   : > { %v9241_v32 = vrot.slane %v8140_v59, %v17830_v58  ;;  %v9237_v42 = vrot.slane %v8137_v36, %v17831_v15  ;;  %v9197_v10 = vsel %vm8260_vm1, %v9196_v20, %v9192_v41  ;;  %v9224_v27 = vsel %vm8260_vm1, %v9223_v55, %v9219_v63  ;;  %vm18109_vm8 = vmmov %vm18097_vm2 }
 0x96c   : > { %9574 = vmin.xlane.f32.xlu1 %v9573_v38  ;;  %v9503_v19 = vsel %vm9405_vm12, %v9206_v14, %v9197_v10  ;;  %v9233_v28 = vsel %vm8260_vm1, %v9232_v2, %v9228_v26 }
 0x96d   : > { %v9504_v23 = vsel %vm9407_vm10, %v9215_v50, %v9503_v19  ;;  %v9242_v61 = vsel %vm8260_vm1, %v9241_v32, %v9237_v42 }
 0x96e   : > { %v8146_v13 = vpop.permute.xlu0 %8145  ;;  %v8143_v17 = vpop.permute.xlu1 %8142  ;;  %v9505_v35 = vsel %vm18098_vm3, %v9224_v27, %v9504_v23 }
 0x96f   : > { %v9250_v52 = vrot.slane %v8146_v13, %v17830_v58  ;;  %v9246_v8 = vrot.slane %v8143_v17, %v17831_v15  ;;  %v9506_v9 = vsel %vm18099_vm5, %v9233_v28, %v9505_v35 }
 0x970   : > { %v9507_v29 = vsel %vm18100_vm6, %v9242_v61, %v9506_v9 }
 0x971   : > { %v9251_v30 = vsel %vm8260_vm1, %v9250_v52, %v9246_v8 }
 0x972   : > { %v8152_v39 = vpop.permute.xlu0 %8151  ;;  %v8149_v6 = vpop.permute.xlu1 %8148  ;;  %v9508_v40 = vsel %vm9415_vm4, %v9251_v30, %v9507_v29 }
 0x973   : > { %v9259_v4 = vrot.slane %v8152_v39, %v17830_v58  ;;  %v9255_v47 = vrot.slane %v8149_v6, %v17831_v15 }
 0x975   : > { %v9260_v22 = vsel %vm8260_vm1, %v9259_v4, %v9255_v47 }
 0x976   : > { %v8158_v1 = vpop.permute.xlu0 %8157  ;;  %v8155_v44 = vpop.permute.xlu1 %8154  ;;  %v9509_v5 = vsel %vm9417_vm11, %v9260_v22, %v9508_v40 }
 0x977   : > { %v9579_v43 = vsel %vm18101_vm9, %v9509_v5, inf  ;;  %v9268_v59 = vrot.slane %v8158_v1, %v17830_v58  ;;  %v9264_v38 = vrot.slane %v8155_v44, %v17831_v15 }
 0x978   : > { %9580 = vmin.xlane.f32.xlu1 %v9579_v43 }
 0x979   : > { %v9269_v55 = vsel %vm8260_vm1, %v9268_v59, %v9264_v38 }
 0x97a   : > { %v8164_v18 = vpop.permute.xlu0 %8163  ;;  %v8161_v3 = vpop.permute.xlu1 %8160 }
 0x97b   : > { %v9277_v51 = vrot.slane %v8164_v18, %v17830_v58  ;;  %v9273_v56 = vrot.slane %v8161_v3, %v17831_v15 }
 0x97d   : > { %v9278_v20 = vsel %vm8260_vm1, %v9277_v51, %v9273_v56 }
 0x97e   : > { %v8170_v48 = vpop.permute.xlu0 %8169  ;;  %v8167_v25 = vpop.permute.xlu1 %8166  ;;  %v9510_v32 = vsel %vm9405_vm12, %v9278_v20, %v9269_v55 }
 0x97f   : > { %v9286_v24 = vrot.slane %v8170_v48, %v17830_v58  ;;  %v9282_v31 = vrot.slane %v8167_v25, %v17831_v15 }
 0x981   : > { %v9287_v63 = vsel %vm8260_vm1, %v9286_v24, %v9282_v31 }
 0x982   : > { %v15757_v7 = vpop.permute.xlu0 %8205  ;;  %v15759_v34 = vpop.permute.xlu1 %8202  ;;  %v9511_v27 = vsel %vm9407_vm10, %v9287_v63, %v9510_v32  ;;  %v9637_v63 = vld [vmem:[%s15831_s9 + $0x8] sm:$0xff] }
 0x983   : > { %v9340_v23 = vrot.slane %v15757_v7, %v17830_v58  ;;  %v9336_v4 = vrot.slane %v15759_v34, %v17831_v15 }
 0x986   : > { %v8212_v60 = vpop.permute.xlu0 %8211  ;;  %v8209_v45 = vpop.permute.xlu1 %8208 }
 0x987   : > { %v9349_v42 = vrot.slane %v8212_v60, %v17830_v58  ;;  %v9345_v13 = vrot.slane %v8209_v45, %v17831_v15  ;;  %v9341_v45 = vsel %vm8260_vm1, %v9340_v23, %v9336_v4 }
 0x989   : > { %v9350_v6 = vsel %vm8260_vm1, %v9349_v42, %v9345_v13  ;;  %v9638_v13 = vld [vmem:[%s15831_s9 + $0x10] sm:$0xff] }
 0x98a   : > { %v8218_v46 = vpop.permute.xlu0 %8217  ;;  %v8215_v37 = vpop.permute.xlu1 %8214 }
 0x98b   : > { %v9358_v50 = vrot.slane %v8218_v46, %v17830_v58  ;;  %v9354_v52 = vrot.slane %v8215_v37, %v17831_v15 }
 0x98d   : > { %v9359_v29 = vsel %vm8260_vm1, %v9358_v50, %v9354_v52  ;;  %v18113_v50 = vld [vmem:[#allocation9_spill] sm:$0xff] }
 0x98e   : > { %v8176_v53 = vpop.permute.xlu0 %8175  ;;  %v8173_v54 = vpop.permute.xlu1 %8172 }
 0x98f   : > { %v9295_v2 = vrot.slane %v8176_v53, %v17830_v58  ;;  %v9291_v26 = vrot.slane %v8173_v54, %v17831_v15  ;;  %v9517_v54 = vsel %vm9405_vm12, %v9350_v6, %v9341_v45  ;;  %vm18106_vm12 = vmmov %vm18099_vm5  ;;  %v18118_v6 = vld [vmem:[#allocation11_spill] sm:$0xff] }
 0x991   : > { %v9296_v61 = vsel %vm8260_vm1, %v9295_v2, %v9291_v26  ;;  %v18110_v2 = vld [vmem:[#allocation8_spill] sm:$0xff]  ;;  %v18111_v26 = vmov 0.0  }
 0x992   : > { %v8224_v12 = vpop.permute.xlu0 %8223  ;;  %v8221_v16 = vpop.permute.xlu1 %8220  ;;  %v9512_v44 = vsel %vm18102_vm13, %v9296_v61, %v9511_v27  ;;  %v18114_v27 = vld [vmem:[#allocation4_spill] sm:$0xff]  ;;  %v9640_v61 = vld [vmem:[%s15831_s9 + $0x20] sm:$0xff] }
 0x993   : > { %v9367_v9 = vrot.slane %v8224_v12, %v17830_v58  ;;  %v9363_v47 = vrot.slane %v8221_v16, %v17831_v15 }
 0x995   : > { %v9368_v46 = vsel %vm8260_vm1, %v9367_v9, %v9363_v47 }
 0x996   : > { %v8182_v49 = vpop.permute.xlu0 %8181  ;;  %v8179_v21 = vpop.permute.xlu1 %8178 }
 0x997   : > { %v9304_v17 = vrot.slane %v8182_v49, %v17830_v58  ;;  %v9300_v10 = vrot.slane %v8179_v21, %v17831_v15  ;;  %v9518_v49 = vsel %vm9407_vm10, %v9359_v29, %v9517_v54  ;;  %vm18107_vm10 = vmmov %vm18078_vm0 }
 0x998   : > { %vm18108_vm0 = vmmov %vm18100_vm6 }
 0x999   : > { %v9305_v1 = vsel %vm8260_vm1, %v9304_v17, %v9300_v10  ;;  %v9636_v17 = vld [vmem:[%s15831_s9] sm:$0xff] }
 0x99a   : > { %v8230_v33 = vpop.permute.xlu0 %8229  ;;  %v8227_v11 = vpop.permute.xlu1 %8226  ;;  %v9513_v37 = vsel %vm18103_vm7, %v9305_v1, %v9512_v44 }
 0x99b   : > { %v9376_v22 = vrot.slane %v8230_v33, %v17830_v58  ;;  %v9372_v40 = vrot.slane %v8227_v11, %v17831_v15 }
 0x99d   : > { %v9377_v12 = vsel %vm8260_vm1, %v9376_v22, %v9372_v40  ;;  %v9642_v22 = vld [vmem:[%s15831_s9 + $0x30] sm:$0xff]  ;;  %v18120_v40 = vld [vmem:[#allocation34_spill] sm:$0xff] }
 0x99e   : > { %v8188_v62 = vpop.permute.xlu0 %8187  ;;  %v8185_v0 = vpop.permute.xlu1 %8184 }
 0x99f   : > { %v9313_v8 = vrot.slane %v8188_v62, %v17830_v58  ;;  %v9309_v19 = vrot.slane %v8185_v0, %v17831_v15  ;;  %v9519_v0 = vsel %vm18105_vm14, %v9368_v46, %v9518_v49  ;;  %v9643_v46 = vld [vmem:[%s15831_s9 + $0x38] sm:$0xff] }
 0x9a0   : > { %v9520_v38 = vsel %vm18106_vm12, %v9377_v12, %v9519_v0 }
 0x9a1   : > { %v9314_v5 = vsel %vm8260_vm1, %v9313_v8, %v9309_v19 }
 0x9a2   : > { %v8236_v57 = vpop.permute.xlu0 %8235  ;;  %v8233_v36 = vpop.permute.xlu1 %8232  ;;  %v9514_v16 = vsel %vm18104_vm15, %v9314_v5, %v9513_v37  ;;  %v9641_v5 = vld [vmem:[%s15831_s9 + $0x28] sm:$0xff] }
 0x9a3   : > { %v9385_v43 = vrot.slane %v8236_v57, %v17830_v58  ;;  %v9381_v18 = vrot.slane %v8233_v36, %v17831_v15 }
 0x9a5   : > { %v9386_v21 = vsel %vm8260_vm1, %v9385_v43, %v9381_v18  ;;  %v18122_v18 = vld [vmem:[#allocation25_spill] sm:$0xff] }
 0x9a6   : > { %v8194_v41 = vpop.permute.xlu0 %8193  ;;  %v8191_v14 = vpop.permute.xlu1 %8190  ;;  %v9521_v36 = vsel %vm18108_vm0, %v9386_v21, %v9520_v38  ;;  %v9646_v21 = vld [vmem:[%s15831_s9 + $0x50] sm:$0xff] }
 0x9a7   : > { %v9322_v39 = vrot.slane %v8194_v41, %v17830_v58  ;;  %v9318_v35 = vrot.slane %v8191_v14, %v17831_v15 }
 0x9a9   : > { %v9323_v48 = vsel %vm8260_vm1, %v9322_v39, %v9318_v35  ;;  %v18116_v39 = vld [vmem:[#allocation16_spill] sm:$0xff] }
 0x9aa   : > { %v8242_v28 = vpop.permute.xlu0 %8241  ;;  %v8239_v30 = vpop.permute.xlu1 %8238  ;;  %v9515_v62 = vsel %vm9415_vm4, %v9323_v48, %v9514_v16 }
 0x9ab   : > { %v9394_v25 = vrot.slane %v8242_v28, %v17830_v58  ;;  %v9390_v7 = vrot.slane %v8239_v30, %v17831_v15  ;;  %v9639_v30 = vld [vmem:[%s15831_s9 + $0x18] sm:$0xff] }
 0x9ad   : > { %v9395_v51 = vsel %vm8260_vm1, %v9394_v25, %v9390_v7 }
 0x9ae   : > { %v8200_v3 = vpop.permute.xlu0 %8199  ;;  %v9522_v41 = vsel %vm9415_vm4, %v9395_v51, %v9521_v36  ;;  %vm18112_vm4 = vmmov %vm18097_vm2  ;;  %v18130_v51 = vld [vmem:[#allocation59_spill] sm:$0xff] }
 0x9af   : > { %v9331_v34 = vrot.slane %v8200_v3, %v17830_v58  ;;  %v8197_v60 = vpop.permute.xlu1 %8196  ;;  %vm18115_vm3 = vmmov %vm18112_vm4 }
 0x9b0   : > { %v9327_v53 = vrot.slane %v8197_v60, %v17831_v15  ;;  %vm18117_vm6 = vmmov %vm18115_vm3  ;;  %v18124_v60 = vld [vmem:[#allocation5_spill] sm:$0xff] }
 0x9b1   : > { %vm18119_vm13 = vmmov %vm18115_vm3 }
 0x9b2   : > { %v8248_v33 = vpop.permute.xlu0 %8247  ;;  %v9332_v11 = vsel %vm8260_vm1, %v9331_v34, %v9327_v53  ;;  %vm18121_vm15 = vmmov %vm18115_vm3  ;;  %v9644_v34 = vld [vmem:[%s15831_s9 + $0x40] sm:$0xff]  ;;  %v18126_v53 = vld [vmem:[#allocation44_spill] sm:$0xff] }
 0x9b3   : > { %v9403_v56 = vrot.slane %v8248_v33, %v17830_v58  ;;  %v8245_v57 = vpop.permute.xlu1 %8244  ;;  %v9516_v59 = vsel %vm9417_vm11, %v9332_v11, %v9515_v62  ;;  %vm18123_vm12 = vmmov %vm18115_vm3  ;;  %v18128_v33 = vld [vmem:[#allocation76_spill] sm:$0xff]  ;;  %v9645_v62 = vld [vmem:[%s15831_s9 + $0x48] sm:$0xff] }
 0x9b4   : > { %v9399_v24 = vrot.slane %v8245_v57, %v17831_v15  ;;  %v9582_v31 = vsel %vm18107_vm10, %v9516_v59, inf  ;;  %vm18125_vm0 = vmmov %vm18115_vm3 }
 0x9b5   : > { %9583 = vmin.xlane.f32.xlu0 %v9582_v31  ;;  %v18132_v31 = vld [vmem:[#allocation112_spill] sm:$0xff] }
 0x9b6   : > { %v9404_v20 = vsel %vm8260_vm1, %v9403_v56, %v9399_v24  ;;  %v9648_v24 = vld [vmem:[%s15831_s9 + $0x60] sm:$0xff] }
 0x9b7   : > { %v9523_v55 = vsel %vm9417_vm11, %v9404_v20, %v9522_v41  ;;  %v9647_v20 = vld [vmem:[%s15831_s9 + $0x58] sm:$0xff] }
 0x9b8   : > { %v9585_v58 = vsel %vm18109_vm8, %v9523_v55, inf  ;;  %v18134_v55 = vld [vmem:[#allocation87_spill] sm:$0xff] }
 0x9b9   : > { %9586 = vmin.xlane.f32.xlu1 %v9585_v58 }
 0x9df   : > { %v9545_v15 = vpop.xlane.xlu0 %9544 }
 0x9e0   : > { %vm9589_vm1 = vcmp.ge.f32.partialorder %v18110_v2, %v9545_v15 }
 0x9e1   : > { %v10021_v14 = vsel %vm9589_vm1, 1.0, %v18111_v26  ;;  %vm18127_vm1 = vmmov %vm18125_vm0 }
 0x9e2   : > { %v9653_v32 = vmul.f32 %v10021_v14, %v9637_v63  ;;  %v9649_v14 = vld [vmem:[%s15831_s9 + $0x68] sm:$0xff] }
 0x9e3   : > { %v9548_v42 = vpop.xlane.xlu0 %9547 }
 0x9e4   : > { %9669 = vst.msk [vmem:[%s15838_s13 + $0x8] sm:$0xff] %vm18112_vm4, %v9653_v32  ;;  %vm9590_vm11 = vcmp.ge.f32.partialorder %v18113_v50, %v9548_v42  ;;  %v18137_v32 = vld [vmem:[#allocation137_spill] sm:$0xff] }
 0x9e5   : > { %v9542_v52 = vpop.xlane.xlu1 %9541  ;;  %v10022_v10 = vsel %vm9590_vm11, 1.0, %v18111_v26  ;;  %vm18129_vm11 = vmmov %vm18125_vm0 }
 0x9e6   : > { %vm9588_vm2 = vcmp.ge.f32.partialorder %v18114_v27, %v9542_v52  ;;  %v9654_v8 = vmul.f32 %v10022_v10, %v9638_v13  ;;  %v9650_v52 = vld [vmem:[%s15831_s9 + $0x70] sm:$0xff] }
 0x9e7   : > { %v10020_v19 = vsel %vm9588_vm2, 1.0, %v18111_v26  ;;  %v9554_v23 = vpop.xlane.xlu0 %9553 }
 0x9e8   : > { %v9652_v28 = vmul.f32 %v10020_v19, %v9636_v17  ;;  %9670 = vst.msk [vmem:[%s15838_s13 + $0x10] sm:$0xff] %vm18115_vm3, %v9654_v8  ;;  %vm9592_vm5 = vcmp.ge.f32.partialorder %v18116_v39, %v9554_v23  ;;  %vm18131_vm3 = vmmov %vm18125_vm0  ;;  %v18139_v17 = vld [vmem:[#allocation162_spill] sm:$0xff]  ;;  %v9651_v19 = vld [vmem:[%s15831_s9 + $0x78] sm:$0xff] }
 0x9e9   : > { %v9551_v35 = vpop.xlane.xlu1 %9550  ;;  %v10024_v4 = vsel %vm9592_vm5, 1.0, %v18111_v26 }
 0x9ea   : > { %9668 = vst.msk [vmem:[%s15838_s13] sm:$0xff] %vm18117_vm6, %v9652_v28  ;;  %vm9591_vm9 = vcmp.ge.f32.partialorder %v18118_v6, %v9551_v35  ;;  %v9656_v9 = vmul.f32 %v10024_v4, %v9640_v61  ;;  %vm18133_vm6 = vmmov %vm18125_vm0  ;;  %v18141_v28 = vld [vmem:[#allocation187_spill] sm:$0xff] }
 0x9eb   : > { %v10023_v47 = vsel %vm9591_vm9, 1.0, %v18111_v26  ;;  %v9560_v1 = vpop.xlane.xlu0 %9559 }
 0x9ec   : > { %v9655_v29 = vmul.f32 %v10023_v47, %v9639_v30  ;;  %9672 = vst.msk [vmem:[%s15838_s13 + $0x20] sm:$0xff] %vm18119_vm13, %v9656_v9  ;;  %vm9594_vm7 = vcmp.ge.f32.partialorder %v18120_v40, %v9560_v1  ;;  %vm18135_vm13 = vmmov %vm18125_vm0 }
 0x9ed   : > { %v9557_v44 = vpop.xlane.xlu1 %9556  ;;  %v10026_v43 = vsel %vm9594_vm7, 1.0, %v18111_v26  ;;  %vm18136_vm7 = vmmov %vm18125_vm0 }
 0x9ee   : > { %9671 = vst.msk [vmem:[%s15838_s13 + $0x18] sm:$0xff] %vm18121_vm15, %v9655_v29  ;;  %vm9593_vm14 = vcmp.ge.f32.partialorder %v18122_v18, %v9557_v44  ;;  %v9658_v3 = vmul.f32 %v10026_v43, %v9642_v22 }
 0x9ef   : > { %v10025_v48 = vsel %vm9593_vm14, 1.0, %v18111_v26  ;;  %v9566_v7 = vpop.xlane.xlu0 %9565  ;;  %vm18138_vm14 = vmmov %vm18125_vm0 }
 0x9f0   : > { %v9657_v25 = vmul.f32 %v10025_v48, %v9641_v5  ;;  %9674 = vst.msk [vmem:[%s15838_s13 + $0x30] sm:$0xff] %vm18123_vm12, %v9658_v3  ;;  %vm9596_vm10 = vcmp.ge.f32.partialorder %v18124_v60, %v9566_v7 }
 0x9f1   : > { %v9563_v45 = vpop.xlane.xlu1 %9562  ;;  %v10028_v37 = vsel %vm9596_vm10, 1.0, %v18111_v26  ;;  %vm18140_vm10 = vmmov %vm18125_vm0 }
 0x9f2   : > { %9673 = vst.msk [vmem:[%s15838_s13 + $0x28] sm:$0xff] %vm18125_vm0, %v9657_v25  ;;  %vm9595_vm8 = vcmp.ge.f32.partialorder %v18126_v53, %v9563_v45  ;;  %v9660_v54 = vmul.f32 %v10028_v37, %v9644_v34 }
 0x9f3   : > { %v10027_v12 = vsel %vm9595_vm8, 1.0, %v18111_v26  ;;  %v9572_v49 = vpop.xlane.xlu0 %9571  ;;  %vm18142_vm8 = vmmov %vm18127_vm1 }
 0x9f4   : > { %v9659_v16 = vmul.f32 %v10027_v12, %v9643_v46  ;;  %9676 = vst.msk [vmem:[%s15838_s13 + $0x40] sm:$0xff] %vm18127_vm1, %v9660_v54  ;;  %vm9598_vm4 = vcmp.ge.f32.partialorder %v18128_v33, %v9572_v49 }
 0x9f5   : > { %v9569_v11 = vpop.xlane.xlu1 %9568  ;;  %v10030_v0 = vsel %vm9598_vm4, 1.0, %v18111_v26 }
 0x9f6   : > { %9675 = vst.msk [vmem:[%s15838_s13 + $0x38] sm:$0xff] %vm18129_vm11, %v9659_v16  ;;  %vm9597_vm2 = vcmp.ge.f32.partialorder %v18130_v51, %v9569_v11  ;;  %v9662_v56 = vmul.f32 %v10030_v0, %v9646_v21 }
 0x9f7   : > { %v10029_v57 = vsel %vm9597_vm2, 1.0, %v18111_v26  ;;  %v9578_v38 = vpop.xlane.xlu0 %9577 }
 0x9f8   : > { %v9661_v59 = vmul.f32 %v10029_v57, %v9645_v62  ;;  %9678 = vst.msk [vmem:[%s15838_s13 + $0x50] sm:$0xff] %vm18131_vm3, %v9662_v56  ;;  %vm9600_vm5 = vcmp.ge.f32.partialorder %v18132_v31, %v9578_v38 }
 0x9f9   : > { %v9575_v36 = vpop.xlane.xlu1 %9574  ;;  %v10032_v41 = vsel %vm9600_vm5, 1.0, %v18111_v26 }
 0x9fa   : > { %9677 = vst.msk [vmem:[%s15838_s13 + $0x48] sm:$0xff] %vm18133_vm6, %v9661_v59  ;;  %vm9599_vm9 = vcmp.ge.f32.partialorder %v18134_v55, %v9575_v36  ;;  %v9664_v58 = vmul.f32 %v10032_v41, %v9648_v24 }
 0x9fb   : > { %v10031_v15 = vsel %vm9599_vm9, 1.0, %v18111_v26 }
 0x9fc   : > { %v9663_v63 = vmul.f32 %v10031_v15, %v9647_v20  ;;  %9680 = vst.msk [vmem:[%s15838_s13 + $0x60] sm:$0xff] %vm18135_vm13, %v9664_v58 }
 0x9fe   : > { %9679 = vst.msk [vmem:[%s15838_s13 + $0x58] sm:$0xff] %vm18136_vm7, %v9663_v63 }
 0xa05   : > { %v9581_v2 = vpop.xlane.xlu1 %9580 }
 0xa06   : > { %vm9601_vm15 = vcmp.ge.f32.partialorder %v18137_v32, %v9581_v2 }
 0xa07   : > { %v10033_v42 = vsel %vm9601_vm15, 1.0, %v18111_v26 }
 0xa08   : > { %v9665_v13 = vmul.f32 %v10033_v42, %v9649_v14 }
 0xa0a   : > { %9681 = vst.msk [vmem:[%s15838_s13 + $0x68] sm:$0xff] %vm18138_vm14, %v9665_v13 }
 0xa42   : > { %v9584_v50 = vpop.xlane.xlu0 %9583 }
 0xa43   : > { %vm9602_vm12 = vcmp.ge.f32.partialorder %v18139_v17, %v9584_v50 }
 0xa44   : > { %v10034_v10 = vsel %vm9602_vm12, 1.0, %v18111_v26 }
 0xa45   : > { %v9666_v27 = vmul.f32 %v10034_v10, %v9650_v52 }
 0xa46   : > { %v9587_v8 = vpop.xlane.xlu1 %9586 }
 0xa47   : > { %9682 = vst.msk [vmem:[%s15838_s13 + $0x70] sm:$0xff] %vm18140_vm10, %v9666_v27  ;;  %vm9603_vm0 = vcmp.ge.f32.partialorder %v18141_v28, %v9587_v8 }
 0xa48   : > { %v10035_v23 = vsel %vm9603_vm0, 1.0, %v18111_v26 }
 0xa49   : > { %v9667_v61 = vmul.f32 %v10035_v23, %v9651_v19 }
 0xa4b   : > { %9683 = vst.msk [vmem:[%s15838_s13 + $0x78] sm:$0xff] %vm18142_vm8, %v9667_v61 }
 0xa4c PF: > { %s13_s12 = sadd.s32 1, %s10186_s12  }
 0xa4d   : > { %p10_p4 = scmp.ge.s32.totalorder %s13_s12, 4  }
 0xa4f   :  { %12 = sbr.rel (!%p10_p4) target bundleno = 1 (0x1), region = 65 }

</bundles_post_ra>
